<compile_context>
chip_gen: v5e
topology: v5e:2x2
jax: 0.10.0
libtpu: 0.0.40
codegen_flags: <defaults>
</compile_context>

<pallas_src>
import functools

import jax
import jax.numpy as jnp
import numpy as np
from jax.experimental import pallas as pl
from jax.experimental.pallas import tpu as pltpu

EPS = 1e-5
# bf16 MXU inputs with f32 accumulation (v6e/v7x recommendation).  Set to
# jnp.float32 for bit-strict f32 convolutions (slower, especially on v5e).
MATMUL_DTYPE = jnp.bfloat16


def _round_up(x, m):
    return ((x + m - 1) // m) * m


# --------------------------------------------------------------------------
# Kernel A: per-channel (sum, sum of squares) of an NHWC tensor.
# --------------------------------------------------------------------------
def _bn_sums_kernel(x_ref, sums_ref, *, rows, tr, need_mask):
    i = pl.program_id(0)

    @pl.when(i == 0)
    def _init():
        sums_ref[...] = jnp.zeros_like(sums_ref)

    x = x_ref[...].astype(jnp.float32)                        # (tr, W, C)
    if need_mask:
        # Masked tail: jnp.where (not multiply) so OOB garbage in the partial
        # last block cannot poison the sums.
        ridx = jax.lax.broadcasted_iota(jnp.int32, (x.shape[0], 1, 1), 0)
        x = jnp.where(ridx + i * tr < rows, x, 0.0)
    x2d = x.reshape(x.shape[0] * x.shape[1], x.shape[2])
    s = jnp.sum(x2d, axis=0, keepdims=True)
    ss = jnp.sum(x2d * x2d, axis=0, keepdims=True)
    sums_ref[...] += jnp.concatenate([s, ss], axis=0)         # one stacked (2,C) RMW


def bn_sums(x_nhwc):
    N, H, W, C = x_nhwc.shape
    rows = N * H
    x2 = x_nhwc.reshape(rows, W, C)
    # Row tile from a ~2 MiB/block byte budget (not a divisor of N*H).
    row_bytes = W * C * jnp.dtype(x_nhwc.dtype).itemsize
    budget_rows = max(8, ((2 << 20) // max(row_bytes, 1)) // 8 * 8)
    tr = min(_round_up(rows, 8), budget_rows)
    grid = pl.cdiv(rows, tr)
    need_mask = (rows % tr) != 0

    est = 2 * tr * W * C * 4 + 8 * C * 4
    vmem_limit = int(min(64 << 20, max(32 << 20, 2 * est)))

    kernel = functools.partial(_bn_sums_kernel, rows=rows, tr=tr, need_mask=need_mask)
    return pl.pallas_call(
        kernel,
        out_shape=jax.ShapeDtypeStruct((2, C), jnp.float32),
        grid_spec=pltpu.PrefetchScalarGridSpec(
            num_scalar_prefetch=0,
            grid=(grid,),
            in_specs=[pl.BlockSpec((tr, W, C), lambda i: (i, 0, 0))],
            out_specs=pl.BlockSpec((2, C), lambda i: (0, 0))),
        # Global reduction axis: must be sequential so stats are whole-batch.
        compiler_params=pltpu.CompilerParams(
            dimension_semantics=("arbitrary",),
            vmem_limit_bytes=vmem_limit),
    )(x2)


def _scale_shift_from_sums(sums, gamma, beta, count):
    # Tiny (2, C) finalize done in XLA so the conv kernel can emit raw partial
    # sums and the separate BN2 stats pass over h is deleted.
    inv_n = 1.0 / float(count)
    mean = sums[0] * inv_n
    # E[x^2]-E[x]^2 in f32; clamp tiny negatives from cancellation.
    # TODO(synk): switch to two-pass / Welford if large-count cancellation matters.
    var = jnp.maximum(sums[1] * inv_n - mean * mean, 0.0)
    scale = gamma.astype(jnp.float32) * jax.lax.rsqrt(var + EPS)
    shift = beta.astype(jnp.float32) - mean * scale
    return scale.reshape(1, -1), shift.reshape(1, -1)


# --------------------------------------------------------------------------
# Kernel B: fused BN-affine + ReLU + zero-pad + KxK conv + bias (+ residual)
#           (+ optional per-sample (sum, sum-sq) of the conv output for BN2)
# --------------------------------------------------------------------------
def _make_conv_kernel(*, padding, H, W, Wp8, C, Co, KH, KW, chunks, mode,
                      has_res, emit_stats):
    p = padding
    Hp = H + 2 * p
    total_rows = (Hp + 1) * Wp8      # extra row slab: margin for the flat-view
                                     # tap reads of the discarded lane columns

    def kernel(*refs):
        scale_ref, shift_ref, x_ref, w_ref, b_ref = refs[:5]
        nxt = 5
        if has_res:
            res_ref = refs[nxt]; nxt += 1
        else:
            res_ref = None
        o_ref = refs[nxt]; nxt += 1
        if emit_stats:
            stats_ref = refs[nxt]; nxt += 1
        else:
            stats_ref = None
        pad_ref = refs[nxt]

        # Zero only the top/bottom halo slabs of the padded scratch.  The
        # per-chunk interior store below rewrites every other row (including
        # the horizontal padding columns), so no full-buffer memset is needed.
        # Done every grid step (not @pl.when(step == 0)) so it is also correct
        # when the "parallel" batch axis is megacore-sharded and a core never
        # executes program_id == 0.
        if p > 0:
            pad_ref[0:p * Wp8, :] = jnp.zeros((p * Wp8, C), pad_ref.dtype)
        bot = (p + H) * Wp8
        pad_ref[bot:total_rows, :] = jnp.zeros((total_rows - bot, C), pad_ref.dtype)

        scale = scale_ref[...]                        # (1, C)  f32
        shift = shift_ref[...]
        bias = b_ref[...]                             # (1, Co) f32

        # ---- pass 1: BN affine + ReLU + horizontal zero-pad -> padded scratch
        for h0, ch in chunks:
            xs = x_ref[0, h0:h0 + ch, :, :].astype(jnp.float32)      # (ch, W, C)
            y = jnp.maximum(xs * scale + shift, 0.0).astype(pad_ref.dtype)
            pieces = []
            if p > 0:
                pieces.append(jnp.zeros((ch, p, C), pad_ref.dtype))
            pieces.append(y)
            if Wp8 - W - p > 0:
                pieces.append(jnp.zeros((ch, Wp8 - W - p, C), pad_ref.dtype))
            yp = jnp.concatenate(pieces, axis=1) if len(pieces) > 1 else y
            pad_ref[(p + h0) * Wp8:(p + h0 + ch) * Wp8, :] = yp.reshape(ch * Wp8, C)

        # Hoist grid-invariant weight loads out of the chunk loop.
        if mode == "full":
            w_full = w_ref[...]                       # (KH*KW*C, Co)
        elif mode == "kw":
            w_rows = [w_ref[kh] for kh in range(KH)]  # each (KW*C, Co)

        if emit_stats:
            s_acc = jnp.zeros((1, Co), jnp.float32)
            ss_acc = jnp.zeros((1, Co), jnp.float32)

        # ---- pass 2: conv as tap matmuls on ref-sliced views of the scratch
        for h0, ch in chunks:
            Mc = ch * Wp8

            def tap(kh, kw, _h0=h0, _Mc=Mc):
                off = (_h0 + kh) * Wp8 + kw           # static offset
                return pad_ref[off:off + _Mc, :]      # (Mc, C) ref-sliced load

            if mode == "full":
                # Pack all taps into the contraction: one dot with K = KH*KW*C.
                patch = jnp.concatenate(
                    [tap(kh, kw) for kh in range(KH) for kw in range(KW)], axis=1)
                acc = jnp.dot(patch, w_full, preferred_element_type=jnp.float32)
            elif mode == "kw":
                # Pack the KW taps of each kernel row: KH dots with K = KW*C.
                acc = None
                for kh in range(KH):
                    patch = jnp.concatenate([tap(kh, kw) for kw in range(KW)], axis=1)
                    d = jnp.dot(patch, w_rows[kh], preferred_element_type=jnp.float32)
                    acc = d if acc is None else acc + d
            else:
                # Per-tap dots (K = C already fills a 128-deep MXU when C >= 128),
                # accumulated in a value (no acc_ref round trips).
                acc = None
                for kh in range(KH):
                    for kw in range(KW):
                        d = jnp.dot(tap(kh, kw), w_ref[kh, kw],
                                    preferred_element_type=jnp.float32)
                        acc = d if acc is None else acc + d

            out = acc.reshape(ch, Wp8, Co)[:, :W, :] + bias           # (ch, W, Co)
            if has_res:
                out = out + res_ref[0, h0:h0 + ch, :, :].astype(jnp.float32)
            if emit_stats:
                o2d = out.reshape(ch * W, Co)
                s_acc = s_acc + jnp.sum(o2d, axis=0, keepdims=True)
                ss_acc = ss_acc + jnp.sum(o2d * o2d, axis=0, keepdims=True)
            o_ref[0, h0:h0 + ch, :, :] = out.astype(o_ref.dtype)

        if emit_stats:
            stats_ref[0] = jnp.concatenate([s_acc, ss_acc], axis=0)   # (2, Co)

    return kernel


def fused_bn_relu_conv(x_nhwc, scale, shift, w_hwio, bias, padding,
                       residual=None, emit_stats=False):
    N, H, W, C = x_nhwc.shape
    KH, KW, Cin, Co = w_hwio.shape
    assert Cin == C
    assert KH == 2 * padding + 1 and KW == 2 * padding + 1, (
        "ResBlock2d residual requires a 'same' conv (kernel_size == 2*padding + 1)")
    if residual is not None:
        assert residual.shape == (N, H, W, Co)
    has_res = residual is not None
    Hp = H + 2 * padding
    Wp8 = _round_up(W + 2 * padding, 8)               # sublane-friendly padded width
    total_rows = (Hp + 1) * Wp8

    # Tap packing mode: pack KxK taps into the contraction so the 256-deep
    # v6e/v7x MXU sees K ~ 9C / 3C instead of K = C for small channel counts.
    if KH * KW * C <= 512:
        mode, w_arg = "full", w_hwio.reshape(KH * KW * C, Co)
    elif KW * C <= 512:
        mode, w_arg = "kw", w_hwio.reshape(KH, KW * C, Co)
    else:
        mode, w_arg = "tap", w_hwio
    w_arg = w_arg.astype(MATMUL_DTYPE)
    k_eff = {"full": KH * KW * C, "kw": KW * C, "tap": C}[mode]

    # In-kernel row chunking bounds live im2col/accumulator values (~2 MiB).
    per_row_bytes = Wp8 * (k_eff * 2 + Co * 4) + W * C * 4
    rows_per_chunk = max(1, min(H, (2 << 20) // max(per_row_bytes, 1)))
    chunks, h0 = [], 0
    while h0 < H:
        ch = min(rows_per_chunk, H - h0)
        chunks.append((h0, ch))
        h0 += ch

    in_specs = [
        pl.BlockSpec((1, C), lambda n: (0, 0)),                   # scale (resident)
        pl.BlockSpec((1, C), lambda n: (0, 0)),                   # shift (resident)
        pl.BlockSpec((1, H, W, C), lambda n: (n, 0, 0, 0)),       # one sample / step
        pl.BlockSpec(w_arg.shape, lambda n: tuple(0 for _ in w_arg.shape)),
        pl.BlockSpec((1, Co), lambda n: (0, 0)),                  # bias (resident)
    ]
    args = [scale, shift, x_nhwc, w_arg, bias.reshape(1, Co).astype(jnp.float32)]
    if has_res:
        in_specs.append(pl.BlockSpec((1, H, W, Co), lambda n: (n, 0, 0, 0)))
        args.append(residual)

    out_spec_main = pl.BlockSpec((1, H, W, Co), lambda n: (n, 0, 0, 0))
    if emit_stats:
        out_shape = (jax.ShapeDtypeStruct((N, H, W, Co), x_nhwc.dtype),
                     jax.ShapeDtypeStruct((N, 2, Co), jnp.float32))
        out_specs = (out_spec_main, pl.BlockSpec((1, 2, Co), lambda n: (n, 0, 0)))
    else:
        out_shape = jax.ShapeDtypeStruct((N, H, W, Co), x_nhwc.dtype)
        out_specs = out_spec_main

    # Explicit VMEM budget from actual buffer bytes (+2x headroom), capped at
    # 64 MiB so it is valid on v7x as well as v5e/v6e.
    xb = jnp.dtype(x_nhwc.dtype).itemsize
    est = (2 * H * W * C * xb                       # x block (double-buffered)
           + (2 * H * W * Co * xb if has_res else 0)
           + 2 * H * W * Co * xb                    # output block
           + 2 * w_arg.size * 2                     # weights (bf16)
           + total_rows * C * 2                     # padded scratch
           + 16 * (C + Co) * 4)                     # scale/shift/bias/stats
    vmem_limit = int(min(64 << 20, max(32 << 20, 2 * est)))

    kernel = _make_conv_kernel(
        padding=padding, H=H, W=W, Wp8=Wp8, C=C, Co=Co, KH=KH, KW=KW,
        chunks=tuple(chunks), mode=mode, has_res=has_res, emit_stats=emit_stats)

    return pl.pallas_call(
        kernel,
        out_shape=out_shape,
        grid_spec=pltpu.PrefetchScalarGridSpec(
            num_scalar_prefetch=0,
            grid=(N,),
            in_specs=in_specs,
            out_specs=out_specs,
            scratch_shapes=[pltpu.VMEM((total_rows, C), MATMUL_DTYPE)]),
        # Samples are independent (stats are per-sample partials reduced in
        # XLA), so the batch axis stays "parallel" for v7x megacore sharding.
        compiler_params=pltpu.CompilerParams(
            dimension_semantics=("parallel",),
            vmem_limit_bytes=vmem_limit),
    )(*args)


# --------------------------------------------------------------------------
# ResBlock2d forward
# --------------------------------------------------------------------------
def resblock2d_nhwc(x_nhwc, params, padding):
    """ResBlock2d forward on an NHWC tensor (no layout transposes)."""
    N, H, W, C = x_nhwc.shape
    count = N * H * W
    sums1 = bn_sums(x_nhwc)
    s1, t1 = _scale_shift_from_sums(sums1, params["gamma1"], params["beta1"], count)
    # conv1 also emits BN2's per-sample (sum, sum-sq), so there is no extra
    # full HBM pass over h for the second BatchNorm's statistics.
    h, stats2 = fused_bn_relu_conv(x_nhwc, s1, t1, params["w1"], params["b1"],
                                   padding, emit_stats=True)
    sums2 = jnp.sum(stats2, axis=0)                  # (2, C) tiny XLA reduce
    s2, t2 = _scale_shift_from_sums(sums2, params["gamma2"], params["beta2"], count)
    out = fused_bn_relu_conv(h, s2, t2, params["w2"], params["b2"], padding,
                             residual=x_nhwc)        # fused "+ x"
    return out


def resblock2d(x_nchw, params, padding):
    """PyTorch-parity NCHW entry point.  NHWC-native callers should call
    resblock2d_nhwc directly and skip the two full-tensor transposes."""
    x = jnp.transpose(x_nchw, (0, 2, 3, 1))          # NCHW -> NHWC
    out = resblock2d_nhwc(x, params, padding)
    return jnp.transpose(out, (0, 3, 1, 2))          # NHWC -> NCHW


# --------------------------------------------------------------------------
# Deterministic parameter init (shapes per nn.Conv2d / BatchNorm2d of ResBlock2d)
# --------------------------------------------------------------------------
def init_params(key, in_features, kernel_size):
    ks = jax.random.split(key, 8)
    fan_in = in_features * kernel_size * kernel_size
    bound = 1.0 / np.sqrt(fan_in)
    shape_w = (kernel_size, kernel_size, in_features, in_features)  # HWIO
    return {
        "w1": jax.random.uniform(ks[0], shape_w, jnp.float32, -bound, bound),
        "b1": jax.random.uniform(ks[1], (in_features,), jnp.float32, -bound, bound),
        "w2": jax.random.uniform(ks[2], shape_w, jnp.float32, -bound, bound),
        "b2": jax.random.uniform(ks[3], (in_features,), jnp.float32, -bound, bound),
        "gamma1": 1.0 + 0.1 * jax.random.normal(ks[4], (in_features,), jnp.float32),
        "beta1": 0.1 * jax.random.normal(ks[5], (in_features,), jnp.float32),
        "gamma2": 1.0 + 0.1 * jax.random.normal(ks[6], (in_features,), jnp.float32),
        "beta2": 0.1 * jax.random.normal(ks[7], (in_features,), jnp.float32),
    }


# --------------------------------------------------------------------------
# Pure-JAX reference (for correctness check)
# --------------------------------------------------------------------------
def _ref_bn_relu(x, gamma, beta):
    mean = jnp.mean(x, axis=(0, 2, 3), keepdims=True)
    var = jnp.mean(jnp.square(x - mean), axis=(0, 2, 3), keepdims=True)
    y = (x - mean) * jax.lax.rsqrt(var + EPS)
    y = y * gamma[None, :, None, None] + beta[None, :, None, None]
    return jnp.maximum(y, 0.0)


def _ref_conv(x, w_hwio, b, padding):
    w_oihw = jnp.transpose(w_hwio, (3, 2, 0, 1))
    y = jax.lax.conv_general_dilated(
        x, w_oihw, window_strides=(1, 1),
        padding=[(padding, padding), (padding, padding)],
        dimension_numbers=("NCHW", "OIHW", "NCHW"))
    return y + b[None, :, None, None]


def resblock2d_ref(x, p, padding):
    y = _ref_bn_relu(x, p["gamma1"], p["beta1"])
    y = _ref_conv(y, p["w1"], p["b1"], padding)
    y = _ref_bn_relu(y, p["gamma2"], p["beta2"])
    y = _ref_conv(y, p["w2"], p["b2"], padding)
    return y + x


if __name__ == "__main__":
    N, C, H, W = 2, 4, 16, 16
    kernel_size, padding = 3, 1

    key = jax.random.PRNGKey(0)
    k_x, k_p = jax.random.split(key)
    x = jax.random.normal(k_x, (N, C, H, W), jnp.float32)
    params = init_params(k_p, C, kernel_size)

    fwd = jax.jit(resblock2d, static_argnums=2)
    out = jax.block_until_ready(fwd(x, params, padding))

    ref = jax.block_until_ready(resblock2d_ref(x, params, padding))
    # bf16 MXU inputs (f32 accumulation) -> tolerance looser than pure-f32.
    np.testing.assert_allclose(np.asarray(out), np.asarray(ref), atol=5e-2, rtol=5e-2)

    print("KERNEL_OK")
</pallas_src>

<mosaic_0001>
module attributes {stable_mosaic.version = 11 : i64} {
  func.func @_bn_sums_kernel(%arg0: i32, %arg1: memref<32x16x4xf32, #tpu.memory_space<vmem>>, %arg2: memref<2x4xf32, #tpu.memory_space<vmem>>) attributes {dimension_semantics = [#tpu.dimension_semantics<arbitrary>], iteration_bounds = array<i64: 1>, scalar_prefetch = 0 : i64, scratch_operands = 0 : i64, tpu.core_type = #tpu.core_type<tc>, window_params = [{transform_indices = @transform_0, window_bounds = array<i64: 32, 16, 4>}, {pipeline_mode = #tpu.pipeline_mode<synchronous>, transform_indices = @transform_1, window_bounds = array<i64: 2, 4>}]} {
    %c0_i32 = arith.constant 0 : i32
    %0 = arith.cmpi eq, %arg0, %c0_i32 : i32
    %1 = arith.extui %0 : i1 to i32
    %c0_i32_0 = arith.constant 0 : i32
    %2 = arith.cmpi ne, %1, %c0_i32_0 : i32
    scf.if %2 {
      %cst_8 = arith.constant 0.000000e+00 : f32
      %14 = vector.broadcast %cst_8 : f32 to vector<2x4xf32>
      %c0_9 = arith.constant 0 : index
      %c0_10 = arith.constant 0 : index
      %15 = vector.load %arg2[%c0_9, %c0_10] : memref<2x4xf32, #tpu.memory_space<vmem>>, vector<2x4xf32>
      tpu.vector_store %arg2[%c0_9, %c0_10], %14 {strides = array<i32>} : memref<2x4xf32, #tpu.memory_space<vmem>>, vector<2x4xf32>,
    } else {
    }
    %c0 = arith.constant 0 : index
    %c0_1 = arith.constant 0 : index
    %c0_2 = arith.constant 0 : index
    %3 = vector.load %arg1[%c0, %c0_1, %c0_2] : memref<32x16x4xf32, #tpu.memory_space<vmem>>, vector<32x16x4xf32>
    %4 = vector.shape_cast %3 : vector<32x16x4xf32> to vector<512x4xf32>
    %cst = arith.constant dense<0.000000e+00> : vector<4xf32>
    %5 = vector.multi_reduction <add>, %4, %cst [0] : vector<512x4xf32> to vector<4xf32>
    %6 = vector.shape_cast %5 : vector<4xf32> to vector<1x4xf32>
    %7 = arith.mulf %4, %4 : vector<512x4xf32>
    %cst_3 = arith.constant dense<0.000000e+00> : vector<4xf32>
    %8 = vector.multi_reduction <add>, %7, %cst_3 [0] : vector<512x4xf32> to vector<4xf32>
    %9 = vector.shape_cast %8 : vector<4xf32> to vector<1x4xf32>
    %c0_4 = arith.constant 0 : index
    %c0_5 = arith.constant 0 : index
    %10 = vector.load %arg2[%c0_4, %c0_5] : memref<2x4xf32, #tpu.memory_space<vmem>>, vector<2x4xf32>
    %11 = tpu.concatenate %6, %9 in 0 : vector<1x4xf32>, vector<1x4xf32> -> vector<2x4xf32>
    %12 = arith.addf %10, %11 : vector<2x4xf32>
    %c0_6 = arith.constant 0 : index
    %c0_7 = arith.constant 0 : index
    %13 = vector.load %arg2[%c0_6, %c0_7] : memref<2x4xf32, #tpu.memory_space<vmem>>, vector<2x4xf32>
    tpu.vector_store %arg2[%c0_6, %c0_7], %12 {strides = array<i32>} : memref<2x4xf32, #tpu.memory_space<vmem>>, vector<2x4xf32>,
    return
  }
  func.func @transform_0(%arg0: i32) -> (i32, i32, i32) {
    %c0_i32 = arith.constant 0 : i32
    %c0_i32_0 = arith.constant 0 : i32
    %c0_i32_1 = arith.constant 0 : i32
    return %arg0, %c0_i32, %c0_i32_0 : i32, i32, i32
  }
  func.func @transform_1(%arg0: i32) -> (i32, i32) {
    %c0_i32 = arith.constant 0 : i32
    %c0_i32_0 = arith.constant 0 : i32
    %c0_i32_1 = arith.constant 0 : i32
    return %c0_i32, %c0_i32_0 : i32, i32
  }
}

module attributes {stable_mosaic.version = 11 : i64} {
  func.func @kernel(%arg0: i32, %arg1: memref<1x4xf32, #tpu.memory_space<vmem>>, %arg2: memref<1x4xf32, #tpu.memory_space<vmem>>, %arg3: memref<1x16x16x4xf32, #tpu.memory_space<vmem>>, %arg4: memref<36x4xbf16, #tpu.memory_space<vmem>>, %arg5: memref<1x4xf32, #tpu.memory_space<vmem>>, %arg6: memref<1x16x16x4xf32, #tpu.memory_space<vmem>>, %arg7: memref<1x2x4xf32, #tpu.memory_space<vmem>>, %arg8: memref<456x4xbf16, #tpu.memory_space<vmem>>) attributes {dimension_semantics = [#tpu.dimension_semantics<parallel>], iteration_bounds = array<i64: 2>, scalar_prefetch = 0 : i64, scratch_operands = 1 : i64, tpu.core_type = #tpu.core_type<tc>, window_params = [{pipeline_mode = #tpu.pipeline_mode<synchronous>, transform_indices = @transform_0, window_bounds = array<i64: 1, 4>}, {pipeline_mode = #tpu.pipeline_mode<synchronous>, transform_indices = @transform_1, window_bounds = array<i64: 1, 4>}, {transform_indices = @transform_2, window_bounds = array<i64: 1, 16, 16, 4>}, {pipeline_mode = #tpu.pipeline_mode<synchronous>, transform_indices = @transform_3, window_bounds = array<i64: 36, 4>}, {pipeline_mode = #tpu.pipeline_mode<synchronous>, transform_indices = @transform_4, window_bounds = array<i64: 1, 4>}, {transform_indices = @transform_5, window_bounds = array<i64: 1, 16, 16, 4>}, {transform_indices = @transform_6, window_bounds = array<i64: 1, 2, 4>}]} {
    %cst = arith.constant 0.000000e+00 : bf16
    %0 = vector.broadcast %cst : bf16 to vector<24x4xbf16>
    %c0 = arith.constant 0 : index
    %c0_0 = arith.constant 0 : index
    %1 = vector.load %arg8[%c0, %c0_0] : memref<456x4xbf16, #tpu.memory_space<vmem>>, vector<24x4xbf16>
    tpu.vector_store %arg8[%c0, %c0_0], %0 {strides = array<i32>} : memref<456x4xbf16, #tpu.memory_space<vmem>>, vector<24x4xbf16>,
    %cst_1 = arith.constant 0.000000e+00 : bf16
    %2 = vector.broadcast %cst_1 : bf16 to vector<48x4xbf16>
    %c408 = arith.constant 408 : index
    %c0_2 = arith.constant 0 : index
    %3 = vector.load %arg8[%c408, %c0_2] : memref<456x4xbf16, #tpu.memory_space<vmem>>, vector<48x4xbf16>
    tpu.vector_store %arg8[%c408, %c0_2], %2 {strides = array<i32>} : memref<456x4xbf16, #tpu.memory_space<vmem>>, vector<48x4xbf16>,
    %c0_3 = arith.constant 0 : index
    %c0_4 = arith.constant 0 : index
    %4 = vector.load %arg1[%c0_3, %c0_4] : memref<1x4xf32, #tpu.memory_space<vmem>>, vector<1x4xf32>
    %c0_5 = arith.constant 0 : index
    %c0_6 = arith.constant 0 : index
    %5 = vector.load %arg2[%c0_5, %c0_6] : memref<1x4xf32, #tpu.memory_space<vmem>>, vector<1x4xf32>
    %c0_7 = arith.constant 0 : index
    %c0_8 = arith.constant 0 : index
    %6 = vector.load %arg5[%c0_7, %c0_8] : memref<1x4xf32, #tpu.memory_space<vmem>>, vector<1x4xf32>
    %c0_9 = arith.constant 0 : index
    %c0_10 = arith.constant 0 : index
    %c0_11 = arith.constant 0 : index
    %c0_12 = arith.constant 0 : index
    %7 = vector.load %arg3[%c0_9, %c0_10, %c0_11, %c0_12] : memref<1x16x16x4xf32, #tpu.memory_space<vmem>>, vector<1x16x16x4xf32>
    %8 = vector.shape_cast %7 : vector<1x16x16x4xf32> to vector<16x16x4xf32>
    %9 = vector.shape_cast %4 : vector<1x4xf32> to vector<1x1x4xf32>
    %10 = vector.broadcast %9 : vector<1x1x4xf32> to vector<16x16x4xf32>
    %11 = arith.mulf %8, %10 : vector<16x16x4xf32>
    %12 = vector.shape_cast %5 : vector<1x4xf32> to vector<1x1x4xf32>
    %13 = vector.broadcast %12 : vector<1x1x4xf32> to vector<16x16x4xf32>
    %14 = arith.addf %11, %13 : vector<16x16x4xf32>
    %cst_13 = arith.constant 0.000000e+00 : f32
    %15 = vector.broadcast %cst_13 : f32 to vector<16x16x4xf32>
    %16 = arith.maximumf %14, %15 : vector<16x16x4xf32>
    %17 = arith.truncf %16 : vector<16x16x4xf32> to vector<16x16x4xbf16>
    %cst_14 = arith.constant 0.000000e+00 : bf16
    %18 = vector.broadcast %cst_14 : bf16 to vector<16x1x4xbf16>
    %cst_15 = arith.constant 0.000000e+00 : bf16
    %19 = vector.broadcast %cst_15 : bf16 to vector<16x7x4xbf16>
    %20 = tpu.concatenate %18, %17, %19 in 1 : vector<16x1x4xbf16>, vector<16x16x4xbf16>, vector<16x7x4xbf16> -> vector<16x24x4xbf16>
    %21 = vector.shape_cast %20 : vector<16x24x4xbf16> to vector<384x4xbf16>
    %c24 = arith.constant 24 : index
    %c0_16 = arith.constant 0 : index
    %22 = vector.load %arg8[%c24, %c0_16] : memref<456x4xbf16, #tpu.memory_space<vmem>>, vector<384x4xbf16>
    tpu.vector_store %arg8[%c24, %c0_16], %21 {strides = array<i32>} : memref<456x4xbf16, #tpu.memory_space<vmem>>, vector<384x4xbf16>,
    %c0_17 = arith.constant 0 : index
    %c0_18 = arith.constant 0 : index
    %23 = vector.load %arg4[%c0_17, %c0_18] : memref<36x4xbf16, #tpu.memory_space<vmem>>, vector<36x4xbf16>
    %cst_19 = arith.constant 0.000000e+00 : f32
    %24 = vector.broadcast %cst_19 : f32 to vector<1x4xf32>
    %cst_20 = arith.constant 0.000000e+00 : f32
    %25 = vector.broadcast %cst_20 : f32 to vector<1x4xf32>
    %c0_21 = arith.constant 0 : index
    %c0_22 = arith.constant 0 : index
    %26 = vector.load %arg8[%c0_21, %c0_22] : memref<456x4xbf16, #tpu.memory_space<vmem>>, vector<384x4xbf16>
    %c1 = arith.constant 1 : index
    %c0_23 = arith.constant 0 : index
    %27 = vector.load %arg8[%c1, %c0_23] : memref<456x4xbf16, #tpu.memory_space<vmem>>, vector<384x4xbf16>
    %c2 = arith.constant 2 : index
    %c0_24 = arith.constant 0 : index
    %28 = vector.load %arg8[%c2, %c0_24] : memref<456x4xbf16, #tpu.memory_space<vmem>>, vector<384x4xbf16>
    %c24_25 = arith.constant 24 : index
    %c0_26 = arith.constant 0 : index
    %29 = vector.load %arg8[%c24_25, %c0_26] : memref<456x4xbf16, #tpu.memory_space<vmem>>, vector<384x4xbf16>
    %c25 = arith.constant 25 : index
    %c0_27 = arith.constant 0 : index
    %30 = vector.load %arg8[%c25, %c0_27] : memref<456x4xbf16, #tpu.memory_space<vmem>>, vector<384x4xbf16>
    %c26 = arith.constant 26 : index
    %c0_28 = arith.constant 0 : index
    %31 = vector.load %arg8[%c26, %c0_28] : memref<456x4xbf16, #tpu.memory_space<vmem>>, vector<384x4xbf16>
    %c48 = arith.constant 48 : index
    %c0_29 = arith.constant 0 : index
    %32 = vector.load %arg8[%c48, %c0_29] : memref<456x4xbf16, #tpu.memory_space<vmem>>, vector<384x4xbf16>
    %c49 = arith.constant 49 : index
    %c0_30 = arith.constant 0 : index
    %33 = vector.load %arg8[%c49, %c0_30] : memref<456x4xbf16, #tpu.memory_space<vmem>>, vector<384x4xbf16>
    %c50 = arith.constant 50 : index
    %c0_31 = arith.constant 0 : index
    %34 = vector.load %arg8[%c50, %c0_31] : memref<456x4xbf16, #tpu.memory_space<vmem>>, vector<384x4xbf16>
    %35 = tpu.concatenate %26, %27, %28, %29, %30, %31, %32, %33, %34 in 1 : vector<384x4xbf16>, vector<384x4xbf16>, vector<384x4xbf16>, vector<384x4xbf16>, vector<384x4xbf16>, vector<384x4xbf16>, vector<384x4xbf16>, vector<384x4xbf16>, vector<384x4xbf16> -> vector<384x36xbf16>
    %cst_32 = arith.constant dense<0.000000e+00> : vector<384x4xf32>
    %36 = tpu.matmul %35, %23, %cst_32 {dimension_numbers = #tpu.dot_dimension_numbers<[1], [0], [0], [1], [0, 0, 1, 1], [], []>} : vector<384x36xbf16>, vector<36x4xbf16>, vector<384x4xf32> -> vector<384x4xf32>
    %37 = vector.shape_cast %36 : vector<384x4xf32> to vector<16x24x4xf32>
    %38 = vector.extract_strided_slice %37 {offsets = [0, 0, 0], sizes = [16, 16, 4], strides = [1, 1, 1]} : vector<16x24x4xf32> to vector<16x16x4xf32>
    %39 = vector.shape_cast %6 : vector<1x4xf32> to vector<1x1x4xf32>
    %40 = vector.broadcast %39 : vector<1x1x4xf32> to vector<16x16x4xf32>
    %41 = arith.addf %38, %40 : vector<16x16x4xf32>
    %42 = vector.shape_cast %41 : vector<16x16x4xf32> to vector<256x4xf32>
    %cst_33 = arith.constant dense<0.000000e+00> : vector<4xf32>
    %43 = vector.multi_reduction <add>, %42, %cst_33 [0] : vector<256x4xf32> to vector<4xf32>
    %44 = vector.shape_cast %43 : vector<4xf32> to vector<1x4xf32>
    %45 = arith.addf %24, %44 : vector<1x4xf32>
    %46 = arith.mulf %42, %42 : vector<256x4xf32>
    %cst_34 = arith.constant dense<0.000000e+00> : vector<4xf32>
    %47 = vector.multi_reduction <add>, %46, %cst_34 [0] : vector<256x4xf32> to vector<4xf32>
    %48 = vector.shape_cast %47 : vector<4xf32> to vector<1x4xf32>
    %49 = arith.addf %25, %48 : vector<1x4xf32>
    %c0_35 = arith.constant 0 : index
    %c0_36 = arith.constant 0 : index
    %c0_37 = arith.constant 0 : index
    %c0_38 = arith.constant 0 : index
    %50 = vector.load %arg6[%c0_35, %c0_36, %c0_37, %c0_38] : memref<1x16x16x4xf32, #tpu.memory_space<vmem>>, vector<1x16x16x4xf32>
    %51 = vector.shape_cast %50 : vector<1x16x16x4xf32> to vector<16x16x4xf32>
    %52 = vector.shape_cast %41 : vector<16x16x4xf32> to vector<1x16x16x4xf32>
    tpu.vector_store %arg6[%c0_35, %c0_36, %c0_37, %c0_38], %52 {strides = array<i32>} : memref<1x16x16x4xf32, #tpu.memory_space<vmem>>, vector<1x16x16x4xf32>,
    %53 = tpu.concatenate %45, %49 in 0 : vector<1x4xf32>, vector<1x4xf32> -> vector<2x4xf32>
    %c0_39 = arith.constant 0 : index
    %c0_40 = arith.constant 0 : index
    %c0_41 = arith.constant 0 : index
    %54 = vector.load %arg7[%c0_39, %c0_40, %c0_41] : memref<1x2x4xf32, #tpu.memory_space<vmem>>, vector<1x2x4xf32>
    %55 = vector.shape_cast %54 : vector<1x2x4xf32> to vector<2x4xf32>
    %56 = vector.shape_cast %53 : vector<2x4xf32> to vector<1x2x4xf32>
    tpu.vector_store %arg7[%c0_39, %c0_40, %c0_41], %56 {strides = array<i32>} : memref<1x2x4xf32, #tpu.memory_space<vmem>>, vector<1x2x4xf32>,
    return
  }
  func.func @transform_0(%arg0: i32) -> (i32, i32) {
    %c0_i32 = arith.constant 0 : i32
    %c0_i32_0 = arith.constant 0 : i32
    %c0_i32_1 = arith.constant 0 : i32
    return %c0_i32, %c0_i32_0 : i32, i32
  }
  func.func @transform_1(%arg0: i32) -> (i32, i32) {
    %c0_i32 = arith.constant 0 : i32
    %c0_i32_0 = arith.constant 0 : i32
    %c0_i32_1 = arith.constant 0 : i32
    return %c0_i32, %c0_i32_0 : i32, i32
  }
  func.func @transform_2(%arg0: i32) -> (i32, i32, i32, i32) {
    %c0_i32 = arith.constant 0 : i32
    %c0_i32_0 = arith.constant 0 : i32
    %c0_i32_1 = arith.constant 0 : i32
    %c0_i32_2 = arith.constant 0 : i32
    return %arg0, %c0_i32, %c0_i32_0, %c0_i32_1 : i32, i32, i32, i32
  }
  func.func @transform_3(%arg0: i32) -> (i32, i32) {
    %c0_i32 = arith.constant 0 : i32
    %c0_i32_0 = arith.constant 0 : i32
    %c0_i32_1 = arith.constant 0 : i32
    return %c0_i32, %c0_i32_0 : i32, i32
  }
  func.func @transform_4(%arg0: i32) -> (i32, i32) {
    %c0_i32 = arith.constant 0 : i32
    %c0_i32_0 = arith.constant 0 : i32
    %c0_i32_1 = arith.constant 0 : i32
    return %c0_i32, %c0_i32_0 : i32, i32
  }
  func.func @transform_5(%arg0: i32) -> (i32, i32, i32, i32) {
    %c0_i32 = arith.constant 0 : i32
    %c0_i32_0 = arith.constant 0 : i32
    %c0_i32_1 = arith.constant 0 : i32
    %c0_i32_2 = arith.constant 0 : i32
    return %arg0, %c0_i32, %c0_i32_0, %c0_i32_1 : i32, i32, i32, i32
  }
  func.func @transform_6(%arg0: i32) -> (i32, i32, i32) {
    %c0_i32 = arith.constant 0 : i32
    %c0_i32_0 = arith.constant 0 : i32
    %c0_i32_1 = arith.constant 0 : i32
    return %arg0, %c0_i32, %c0_i32_0 : i32, i32, i32
  }
}

module attributes {stable_mosaic.version = 11 : i64} {
  func.func @kernel(%arg0: i32, %arg1: memref<1x4xf32, #tpu.memory_space<vmem>>, %arg2: memref<1x4xf32, #tpu.memory_space<vmem>>, %arg3: memref<1x16x16x4xf32, #tpu.memory_space<vmem>>, %arg4: memref<36x4xbf16, #tpu.memory_space<vmem>>, %arg5: memref<1x4xf32, #tpu.memory_space<vmem>>, %arg6: memref<1x16x16x4xf32, #tpu.memory_space<vmem>>, %arg7: memref<1x16x16x4xf32, #tpu.memory_space<vmem>>, %arg8: memref<456x4xbf16, #tpu.memory_space<vmem>>) attributes {dimension_semantics = [#tpu.dimension_semantics<parallel>], iteration_bounds = array<i64: 2>, scalar_prefetch = 0 : i64, scratch_operands = 1 : i64, tpu.core_type = #tpu.core_type<tc>, window_params = [{pipeline_mode = #tpu.pipeline_mode<synchronous>, transform_indices = @transform_0, window_bounds = array<i64: 1, 4>}, {pipeline_mode = #tpu.pipeline_mode<synchronous>, transform_indices = @transform_1, window_bounds = array<i64: 1, 4>}, {transform_indices = @transform_2, window_bounds = array<i64: 1, 16, 16, 4>}, {pipeline_mode = #tpu.pipeline_mode<synchronous>, transform_indices = @transform_3, window_bounds = array<i64: 36, 4>}, {pipeline_mode = #tpu.pipeline_mode<synchronous>, transform_indices = @transform_4, window_bounds = array<i64: 1, 4>}, {transform_indices = @transform_5, window_bounds = array<i64: 1, 16, 16, 4>}, {transform_indices = @transform_6, window_bounds = array<i64: 1, 16, 16, 4>}]} {
    %cst = arith.constant 0.000000e+00 : bf16
    %0 = vector.broadcast %cst : bf16 to vector<24x4xbf16>
    %c0 = arith.constant 0 : index
    %c0_0 = arith.constant 0 : index
    %1 = vector.load %arg8[%c0, %c0_0] : memref<456x4xbf16, #tpu.memory_space<vmem>>, vector<24x4xbf16>
    tpu.vector_store %arg8[%c0, %c0_0], %0 {strides = array<i32>} : memref<456x4xbf16, #tpu.memory_space<vmem>>, vector<24x4xbf16>,
    %cst_1 = arith.constant 0.000000e+00 : bf16
    %2 = vector.broadcast %cst_1 : bf16 to vector<48x4xbf16>
    %c408 = arith.constant 408 : index
    %c0_2 = arith.constant 0 : index
    %3 = vector.load %arg8[%c408, %c0_2] : memref<456x4xbf16, #tpu.memory_space<vmem>>, vector<48x4xbf16>
    tpu.vector_store %arg8[%c408, %c0_2], %2 {strides = array<i32>} : memref<456x4xbf16, #tpu.memory_space<vmem>>, vector<48x4xbf16>,
    %c0_3 = arith.constant 0 : index
    %c0_4 = arith.constant 0 : index
    %4 = vector.load %arg1[%c0_3, %c0_4] : memref<1x4xf32, #tpu.memory_space<vmem>>, vector<1x4xf32>
    %c0_5 = arith.constant 0 : index
    %c0_6 = arith.constant 0 : index
    %5 = vector.load %arg2[%c0_5, %c0_6] : memref<1x4xf32, #tpu.memory_space<vmem>>, vector<1x4xf32>
    %c0_7 = arith.constant 0 : index
    %c0_8 = arith.constant 0 : index
    %6 = vector.load %arg5[%c0_7, %c0_8] : memref<1x4xf32, #tpu.memory_space<vmem>>, vector<1x4xf32>
    %c0_9 = arith.constant 0 : index
    %c0_10 = arith.constant 0 : index
    %c0_11 = arith.constant 0 : index
    %c0_12 = arith.constant 0 : index
    %7 = vector.load %arg3[%c0_9, %c0_10, %c0_11, %c0_12] : memref<1x16x16x4xf32, #tpu.memory_space<vmem>>, vector<1x16x16x4xf32>
    %8 = vector.shape_cast %7 : vector<1x16x16x4xf32> to vector<16x16x4xf32>
    %9 = vector.shape_cast %4 : vector<1x4xf32> to vector<1x1x4xf32>
    %10 = vector.broadcast %9 : vector<1x1x4xf32> to vector<16x16x4xf32>
    %11 = arith.mulf %8, %10 : vector<16x16x4xf32>
    %12 = vector.shape_cast %5 : vector<1x4xf32> to vector<1x1x4xf32>
    %13 = vector.broadcast %12 : vector<1x1x4xf32> to vector<16x16x4xf32>
    %14 = arith.addf %11, %13 : vector<16x16x4xf32>
    %cst_13 = arith.constant 0.000000e+00 : f32
    %15 = vector.broadcast %cst_13 : f32 to vector<16x16x4xf32>
    %16 = arith.maximumf %14, %15 : vector<16x16x4xf32>
    %17 = arith.truncf %16 : vector<16x16x4xf32> to vector<16x16x4xbf16>
    %cst_14 = arith.constant 0.000000e+00 : bf16
    %18 = vector.broadcast %cst_14 : bf16 to vector<16x1x4xbf16>
    %cst_15 = arith.constant 0.000000e+00 : bf16
    %19 = vector.broadcast %cst_15 : bf16 to vector<16x7x4xbf16>
    %20 = tpu.concatenate %18, %17, %19 in 1 : vector<16x1x4xbf16>, vector<16x16x4xbf16>, vector<16x7x4xbf16> -> vector<16x24x4xbf16>
    %21 = vector.shape_cast %20 : vector<16x24x4xbf16> to vector<384x4xbf16>
    %c24 = arith.constant 24 : index
    %c0_16 = arith.constant 0 : index
    %22 = vector.load %arg8[%c24, %c0_16] : memref<456x4xbf16, #tpu.memory_space<vmem>>, vector<384x4xbf16>
    tpu.vector_store %arg8[%c24, %c0_16], %21 {strides = array<i32>} : memref<456x4xbf16, #tpu.memory_space<vmem>>, vector<384x4xbf16>,
    %c0_17 = arith.constant 0 : index
    %c0_18 = arith.constant 0 : index
    %23 = vector.load %arg4[%c0_17, %c0_18] : memref<36x4xbf16, #tpu.memory_space<vmem>>, vector<36x4xbf16>
    %c0_19 = arith.constant 0 : index
    %c0_20 = arith.constant 0 : index
    %24 = vector.load %arg8[%c0_19, %c0_20] : memref<456x4xbf16, #tpu.memory_space<vmem>>, vector<384x4xbf16>
    %c1 = arith.constant 1 : index
    %c0_21 = arith.constant 0 : index
    %25 = vector.load %arg8[%c1, %c0_21] : memref<456x4xbf16, #tpu.memory_space<vmem>>, vector<384x4xbf16>
    %c2 = arith.constant 2 : index
    %c0_22 = arith.constant 0 : index
    %26 = vector.load %arg8[%c2, %c0_22] : memref<456x4xbf16, #tpu.memory_space<vmem>>, vector<384x4xbf16>
    %c24_23 = arith.constant 24 : index
    %c0_24 = arith.constant 0 : index
    %27 = vector.load %arg8[%c24_23, %c0_24] : memref<456x4xbf16, #tpu.memory_space<vmem>>, vector<384x4xbf16>
    %c25 = arith.constant 25 : index
    %c0_25 = arith.constant 0 : index
    %28 = vector.load %arg8[%c25, %c0_25] : memref<456x4xbf16, #tpu.memory_space<vmem>>, vector<384x4xbf16>
    %c26 = arith.constant 26 : index
    %c0_26 = arith.constant 0 : index
    %29 = vector.load %arg8[%c26, %c0_26] : memref<456x4xbf16, #tpu.memory_space<vmem>>, vector<384x4xbf16>
    %c48 = arith.constant 48 : index
    %c0_27 = arith.constant 0 : index
    %30 = vector.load %arg8[%c48, %c0_27] : memref<456x4xbf16, #tpu.memory_space<vmem>>, vector<384x4xbf16>
    %c49 = arith.constant 49 : index
    %c0_28 = arith.constant 0 : index
    %31 = vector.load %arg8[%c49, %c0_28] : memref<456x4xbf16, #tpu.memory_space<vmem>>, vector<384x4xbf16>
    %c50 = arith.constant 50 : index
    %c0_29 = arith.constant 0 : index
    %32 = vector.load %arg8[%c50, %c0_29] : memref<456x4xbf16, #tpu.memory_space<vmem>>, vector<384x4xbf16>
    %33 = tpu.concatenate %24, %25, %26, %27, %28, %29, %30, %31, %32 in 1 : vector<384x4xbf16>, vector<384x4xbf16>, vector<384x4xbf16>, vector<384x4xbf16>, vector<384x4xbf16>, vector<384x4xbf16>, vector<384x4xbf16>, vector<384x4xbf16>, vector<384x4xbf16> -> vector<384x36xbf16>
    %cst_30 = arith.constant dense<0.000000e+00> : vector<384x4xf32>
    %34 = tpu.matmul %33, %23, %cst_30 {dimension_numbers = #tpu.dot_dimension_numbers<[1], [0], [0], [1], [0, 0, 1, 1], [], []>} : vector<384x36xbf16>, vector<36x4xbf16>, vector<384x4xf32> -> vector<384x4xf32>
    %35 = vector.shape_cast %34 : vector<384x4xf32> to vector<16x24x4xf32>
    %36 = vector.extract_strided_slice %35 {offsets = [0, 0, 0], sizes = [16, 16, 4], strides = [1, 1, 1]} : vector<16x24x4xf32> to vector<16x16x4xf32>
    %37 = vector.shape_cast %6 : vector<1x4xf32> to vector<1x1x4xf32>
    %38 = vector.broadcast %37 : vector<1x1x4xf32> to vector<16x16x4xf32>
    %39 = arith.addf %36, %38 : vector<16x16x4xf32>
    %c0_31 = arith.constant 0 : index
    %c0_32 = arith.constant 0 : index
    %c0_33 = arith.constant 0 : index
    %c0_34 = arith.constant 0 : index
    %40 = vector.load %arg6[%c0_31, %c0_32, %c0_33, %c0_34] : memref<1x16x16x4xf32, #tpu.memory_space<vmem>>, vector<1x16x16x4xf32>
    %41 = vector.shape_cast %40 : vector<1x16x16x4xf32> to vector<16x16x4xf32>
    %42 = arith.addf %39, %41 : vector<16x16x4xf32>
    %c0_35 = arith.constant 0 : index
    %c0_36 = arith.constant 0 : index
    %c0_37 = arith.constant 0 : index
    %c0_38 = arith.constant 0 : index
    %43 = vector.load %arg7[%c0_35, %c0_36, %c0_37, %c0_38] : memref<1x16x16x4xf32, #tpu.memory_space<vmem>>, vector<1x16x16x4xf32>
    %44 = vector.shape_cast %43 : vector<1x16x16x4xf32> to vector<16x16x4xf32>
    %45 = vector.shape_cast %42 : vector<16x16x4xf32> to vector<1x16x16x4xf32>
    tpu.vector_store %arg7[%c0_35, %c0_36, %c0_37, %c0_38], %45 {strides = array<i32>} : memref<1x16x16x4xf32, #tpu.memory_space<vmem>>, vector<1x16x16x4xf32>,
    return
  }
  func.func @transform_0(%arg0: i32) -> (i32, i32) {
    %c0_i32 = arith.constant 0 : i32
    %c0_i32_0 = arith.constant 0 : i32
    %c0_i32_1 = arith.constant 0 : i32
    return %c0_i32, %c0_i32_0 : i32, i32
  }
  func.func @transform_1(%arg0: i32) -> (i32, i32) {
    %c0_i32 = arith.constant 0 : i32
    %c0_i32_0 = arith.constant 0 : i32
    %c0_i32_1 = arith.constant 0 : i32
    return %c0_i32, %c0_i32_0 : i32, i32
  }
  func.func @transform_2(%arg0: i32) -> (i32, i32, i32, i32) {
    %c0_i32 = arith.constant 0 : i32
    %c0_i32_0 = arith.constant 0 : i32
    %c0_i32_1 = arith.constant 0 : i32
    %c0_i32_2 = arith.constant 0 : i32
    return %arg0, %c0_i32, %c0_i32_0, %c0_i32_1 : i32, i32, i32, i32
  }
  func.func @transform_3(%arg0: i32) -> (i32, i32) {
    %c0_i32 = arith.constant 0 : i32
    %c0_i32_0 = arith.constant 0 : i32
    %c0_i32_1 = arith.constant 0 : i32
    return %c0_i32, %c0_i32_0 : i32, i32
  }
  func.func @transform_4(%arg0: i32) -> (i32, i32) {
    %c0_i32 = arith.constant 0 : i32
    %c0_i32_0 = arith.constant 0 : i32
    %c0_i32_1 = arith.constant 0 : i32
    return %c0_i32, %c0_i32_0 : i32, i32
  }
  func.func @transform_5(%arg0: i32) -> (i32, i32, i32, i32) {
    %c0_i32 = arith.constant 0 : i32
    %c0_i32_0 = arith.constant 0 : i32
    %c0_i32_1 = arith.constant 0 : i32
    %c0_i32_2 = arith.constant 0 : i32
    return %arg0, %c0_i32, %c0_i32_0, %c0_i32_1 : i32, i32, i32, i32
  }
  func.func @transform_6(%arg0: i32) -> (i32, i32, i32, i32) {
    %c0_i32 = arith.constant 0 : i32
    %c0_i32_0 = arith.constant 0 : i32
    %c0_i32_1 = arith.constant 0 : i32
    %c0_i32_2 = arith.constant 0 : i32
    return %arg0, %c0_i32, %c0_i32_0, %c0_i32_1 : i32, i32, i32, i32
  }
}

</mosaic_0001>

<bundles_post_ra>
// kernel: resblock2d.3
= control target key start
LH: loop header
LB: loop body
LE: loop exit
PB: predicated region body
PF: predicated region fallthrough
CT: control target
= control target key end

     0   :  { %vm12_vm0 = vcmask 25600   ;;  %vm78_vm1 = vcmask 31744   ;;  %v420_v0 = vmov 0.0   ;;  %vm410_vm2 = vcmask 1040384   ;;  %s762_s0 = inlined_call_operand.vmem [shape: f32[32,16,4], index: 0, kind: input, shape index: {}]   ;;  %s763_s1 = inlined_call_operand.vmem [shape: f32[2,4], index: 1, kind: output, shape index: {}]  }
   0x1   :  { %13 = vst.msk [vmem:[%s763_s1] sm:$0x3] %vm12_vm0, %v420_v0  ;;  %v14_v1 = vld [vmem:[%s762_s0] sm:$0xff]  ;;  %v15_v2 = vld [vmem:[%s762_s0 + $0x8] sm:$0xff]  ;;  %v16_v3 = vld [vmem:[%s762_s0 + $0x10] sm:$0xff] }
   0x2   :  { %v79_v4 = vsel %vm78_vm1, %v14_v1, 0.0  ;;  %v80_v5 = vsel %vm78_vm1, %v15_v2, 0.0  ;;  %v82_v6 = vsel %vm78_vm1, %v16_v3, 0.0  ;;  %v17_v7 = vld [vmem:[%s762_s0 + $0x18] sm:$0xff]  ;;  %v18_v10 = vld [vmem:[%s762_s0 + $0x20] sm:$0xff]  ;;  %v19_v13 = vld [vmem:[%s762_s0 + $0x28] sm:$0xff]  ;;  %v212_v21 = vmul.f32 %v14_v1, %v14_v1 }
   0x3   :  { %v81_v8 = vadd.f32 %v80_v5, %v79_v4  ;;  %v84_v9 = vsel %vm78_vm1, %v17_v7, 0.0  ;;  %v86_v12 = vsel %vm78_vm1, %v18_v10, 0.0  ;;  %v88_v15 = vsel %vm78_vm1, %v19_v13, 0.0  ;;  %v20_v16 = vld [vmem:[%s762_s0 + $0x30] sm:$0xff]  ;;  %v21_v19 = vld [vmem:[%s762_s0 + $0x38] sm:$0xff]  ;;  %v22_v25 = vld [vmem:[%s762_s0 + $0x40] sm:$0xff] }
   0x4   :  { %v90_v18 = vsel %vm78_vm1, %v20_v16, 0.0  ;;  %v92_v22 = vsel %vm78_vm1, %v21_v19, 0.0  ;;  %v213_v23 = vmul.f32 %v15_v2, %v15_v2  ;;  %v214_v24 = vmul.f32 %v16_v3, %v16_v3  ;;  %v23_v29 = vld [vmem:[%s762_s0 + $0x48] sm:$0xff]  ;;  %v24_v36 = vld [vmem:[%s762_s0 + $0x50] sm:$0xff]  ;;  %v25_v42 = vld [vmem:[%s762_s0 + $0x58] sm:$0xff] }
   0x5   :  { %v83_v11 = vadd.f32 %v82_v6, %v81_v8  ;;  %v94_v27 = vsel %vm78_vm1, %v22_v25, 0.0  ;;  %v215_v28 = vmul.f32 %v17_v7, %v17_v7  ;;  %v276_v31 = vsel %vm78_vm1, %v212_v21, 0.0  ;;  %v26_v48 = vld [vmem:[%s762_s0 + $0x60] sm:$0xff]  ;;  %v27_v54 = vld [vmem:[%s762_s0 + $0x68] sm:$0xff]  ;;  %v28_v60 = vld [vmem:[%s762_s0 + $0x70] sm:$0xff] }
   0x6   :  { %v96_v32 = vsel %vm78_vm1, %v23_v29, 0.0  ;;  %v216_v33 = vmul.f32 %v18_v10, %v18_v10  ;;  %v277_v34 = vsel %vm78_vm1, %v213_v23, 0.0  ;;  %v279_v35 = vsel %vm78_vm1, %v214_v24, 0.0  ;;  %v29_v2 = vld [vmem:[%s762_s0 + $0x78] sm:$0xff]  ;;  %v30_v8 = vld [vmem:[%s762_s0 + $0x80] sm:$0xff] }
   0x7   :  { %v85_v14 = vadd.f32 %v84_v9, %v83_v11  ;;  %v278_v38 = vadd.f32 %v277_v34, %v276_v31  ;;  %v98_v39 = vsel %vm78_vm1, %v24_v36, 0.0  ;;  %v217_v40 = vmul.f32 %v19_v13, %v19_v13 }
   0x8   :  { %v281_v41 = vsel %vm78_vm1, %v215_v28, 0.0  ;;  %v100_v45 = vsel %vm78_vm1, %v25_v42, 0.0  ;;  %v218_v46 = vmul.f32 %v20_v16, %v20_v16  ;;  %v283_v47 = vsel %vm78_vm1, %v216_v33, 0.0 }
   0x9   :  { %v87_v17 = vadd.f32 %v86_v12, %v85_v14  ;;  %v280_v44 = vadd.f32 %v279_v35, %v278_v38  ;;  %v102_v51 = vsel %vm78_vm1, %v26_v48, 0.0  ;;  %v219_v52 = vmul.f32 %v21_v19, %v21_v19  ;;  %v31_v14 = vld [vmem:[%s762_s0 + $0x88] sm:$0xff] }
   0xa   :  { %v285_v53 = vsel %vm78_vm1, %v217_v40, 0.0  ;;  %v104_v57 = vsel %vm78_vm1, %v27_v54, 0.0  ;;  %v220_v58 = vmul.f32 %v22_v25, %v22_v25  ;;  %v287_v59 = vsel %vm78_vm1, %v218_v46, 0.0  ;;  %v35_v38 = vld [vmem:[%s762_s0 + $0xa8] sm:$0xff] }
   0xb   :  { %v89_v20 = vadd.f32 %v88_v15, %v87_v17  ;;  %v282_v50 = vadd.f32 %v281_v41, %v280_v44  ;;  %v106_v63 = vsel %vm78_vm1, %v28_v60, 0.0  ;;  %v221_v0 = vmul.f32 %v23_v29, %v23_v29  ;;  %v36_v44 = vld [vmem:[%s762_s0 + $0xb0] sm:$0xff] }
   0xc   :  { %v289_v1 = vsel %vm78_vm1, %v219_v52, 0.0  ;;  %v108_v5 = vsel %vm78_vm1, %v29_v2, 0.0  ;;  %v222_v6 = vmul.f32 %v24_v36, %v24_v36  ;;  %v291_v7 = vsel %vm78_vm1, %v220_v58, 0.0 }
   0xd   :  { %v91_v26 = vadd.f32 %v90_v18, %v89_v20  ;;  %v284_v56 = vadd.f32 %v283_v47, %v282_v50  ;;  %v110_v11 = vsel %vm78_vm1, %v30_v8, 0.0  ;;  %v223_v12 = vmul.f32 %v25_v42, %v25_v42  ;;  %v32_v20 = vld [vmem:[%s762_s0 + $0x90] sm:$0xff]  ;;  %v37_v50 = vld [vmem:[%s762_s0 + $0xb8] sm:$0xff] }
   0xe   :  { %v293_v13 = vsel %vm78_vm1, %v221_v0, 0.0  ;;  %v112_v17 = vsel %vm78_vm1, %v31_v14, 0.0  ;;  %v224_v18 = vmul.f32 %v26_v48, %v26_v48  ;;  %v295_v19 = vsel %vm78_vm1, %v222_v6, 0.0 }
   0xf   :  { %v93_v30 = vadd.f32 %v92_v22, %v91_v26  ;;  %v286_v62 = vadd.f32 %v285_v53, %v284_v56  ;;  %v114_v23 = vsel %vm78_vm1, %v32_v20, 0.0  ;;  %v225_v24 = vmul.f32 %v27_v54, %v27_v54  ;;  %v33_v26 = vld [vmem:[%s762_s0 + $0x98] sm:$0xff]  ;;  %v38_v56 = vld [vmem:[%s762_s0 + $0xc0] sm:$0xff] }
  0x10   :  { %v297_v25 = vsel %vm78_vm1, %v223_v12, 0.0  ;;  %v116_v29 = vsel %vm78_vm1, %v33_v26, 0.0  ;;  %v299_v31 = vsel %vm78_vm1, %v224_v18, 0.0  ;;  %v227_v36 = vmul.f32 %v29_v2, %v29_v2 }
  0x11   :  { %v95_v37 = vadd.f32 %v94_v27, %v93_v30  ;;  %v288_v4 = vadd.f32 %v287_v59, %v286_v62  ;;  %v226_v30 = vmul.f32 %v28_v60, %v28_v60  ;;  %v120_v41 = vsel %vm78_vm1, %v35_v38, 0.0  ;;  %v39_v62 = vld [vmem:[%s762_s0 + $0xc8] sm:$0xff] }
  0x12   :  { %v228_v42 = vmul.f32 %v30_v8, %v30_v8  ;;  %v122_v47 = vsel %vm78_vm1, %v36_v44, 0.0  ;;  %v229_v48 = vmul.f32 %v31_v14, %v31_v14  ;;  %v124_v53 = vsel %vm78_vm1, %v37_v50, 0.0 }
  0x13   :  { %v97_v43 = vadd.f32 %v96_v32, %v95_v37  ;;  %v290_v10 = vadd.f32 %v289_v1, %v288_v4  ;;  %v34_v32 = vld [vmem:[%s762_s0 + $0xa0] sm:$0xff]  ;;  %v301_v37 = vsel %vm78_vm1, %v225_v24, 0.0  ;;  %v230_v54 = vmul.f32 %v32_v20, %v32_v20  ;;  %v40_v4 = vld [vmem:[%s762_s0 + $0xd0] sm:$0xff] }
  0x14   :  { %v118_v35 = vsel %vm78_vm1, %v34_v32, 0.0  ;;  %v126_v59 = vsel %vm78_vm1, %v38_v56, 0.0  ;;  %v231_v60 = vmul.f32 %v33_v26, %v33_v26  ;;  %v128_v1 = vsel %vm78_vm1, %v39_v62, 0.0 }
  0x15   :  { %v99_v49 = vadd.f32 %v98_v39, %v97_v43  ;;  %v292_v16 = vadd.f32 %v291_v7, %v290_v10  ;;  %v303_v43 = vsel %vm78_vm1, %v226_v30, 0.0  ;;  %v232_v2 = vmul.f32 %v34_v32, %v34_v32  ;;  %v41_v10 = vld [vmem:[%s762_s0 + $0xd8] sm:$0xff] }
  0x16   :  { %v130_v7 = vsel %vm78_vm1, %v40_v4, 0.0  ;;  %v233_v8 = vmul.f32 %v35_v38, %v35_v38  ;;  %v234_v14 = vmul.f32 %v36_v44, %v36_v44  ;;  %v235_v20 = vmul.f32 %v37_v50, %v37_v50 }
  0x17   :  { %v101_v55 = vadd.f32 %v100_v45, %v99_v49  ;;  %v294_v22 = vadd.f32 %v293_v13, %v292_v16  ;;  %v305_v49 = vsel %vm78_vm1, %v227_v36, 0.0  ;;  %v132_v13 = vsel %vm78_vm1, %v41_v10, 0.0  ;;  %v42_v16 = vld [vmem:[%s762_s0 + $0xe0] sm:$0xff] }
  0x18   :  { %v236_v26 = vmul.f32 %v38_v56, %v38_v56  ;;  %v237_v32 = vmul.f32 %v39_v62, %v39_v62  ;;  %v238_v38 = vmul.f32 %v40_v4, %v40_v4  ;;  %v239_v44 = vmul.f32 %v41_v10, %v41_v10 }
  0x19   :  { %v103_v61 = vadd.f32 %v102_v51, %v101_v55  ;;  %v296_v28 = vadd.f32 %v295_v19, %v294_v22  ;;  %v307_v55 = vsel %vm78_vm1, %v228_v42, 0.0  ;;  %v134_v19 = vsel %vm78_vm1, %v42_v16, 0.0  ;;  %v43_v22 = vld [vmem:[%s762_s0 + $0xe8] sm:$0xff] }
  0x1a   :  { %v240_v50 = vmul.f32 %v42_v16, %v42_v16  ;;  %v241_v56 = vmul.f32 %v43_v22, %v43_v22 }
  0x1b   :  { %v105_v3 = vadd.f32 %v104_v57, %v103_v61  ;;  %v298_v34 = vadd.f32 %v297_v25, %v296_v28  ;;  %v309_v61 = vsel %vm78_vm1, %v229_v48, 0.0  ;;  %v136_v25 = vsel %vm78_vm1, %v43_v22, 0.0  ;;  %v44_v28 = vld [vmem:[%s762_s0 + $0xf0] sm:$0xff] }
  0x1c   :  { %v242_v62 = vmul.f32 %v44_v28, %v44_v28 }
  0x1d   :  { %v107_v9 = vadd.f32 %v106_v63, %v105_v3  ;;  %v300_v40 = vadd.f32 %v299_v31, %v298_v34  ;;  %v311_v3 = vsel %vm78_vm1, %v230_v54, 0.0  ;;  %v138_v31 = vsel %vm78_vm1, %v44_v28, 0.0  ;;  %v45_v34 = vld [vmem:[%s762_s0 + $0xf8] sm:$0xff] }
  0x1e   :  { %v243_v4 = vmul.f32 %v45_v34, %v45_v34 }
  0x1f   :  { %v109_v15 = vadd.f32 %v108_v5, %v107_v9  ;;  %v302_v46 = vadd.f32 %v301_v37, %v300_v40  ;;  %v313_v9 = vsel %vm78_vm1, %v231_v60, 0.0  ;;  %v140_v37 = vsel %vm78_vm1, %v45_v34, 0.0  ;;  %v46_v40 = vld [vmem:[%s762_s0 + $0x100] sm:$0xff] }
  0x20   :  { %v244_v10 = vmul.f32 %v46_v40, %v46_v40 }
  0x21   :  { %v111_v21 = vadd.f32 %v110_v11, %v109_v15  ;;  %v304_v52 = vadd.f32 %v303_v43, %v302_v46  ;;  %v315_v15 = vsel %vm78_vm1, %v232_v2, 0.0  ;;  %v142_v43 = vsel %vm78_vm1, %v46_v40, 0.0  ;;  %v47_v46 = vld [vmem:[%s762_s0 + $0x108] sm:$0xff] }
  0x22   :  { %v245_v16 = vmul.f32 %v47_v46, %v47_v46 }
  0x23   :  { %v113_v27 = vadd.f32 %v112_v17, %v111_v21  ;;  %v306_v58 = vadd.f32 %v305_v49, %v304_v52  ;;  %v317_v21 = vsel %vm78_vm1, %v233_v8, 0.0  ;;  %v144_v49 = vsel %vm78_vm1, %v47_v46, 0.0  ;;  %v48_v52 = vld [vmem:[%s762_s0 + $0x110] sm:$0xff] }
  0x24   :  { %v246_v22 = vmul.f32 %v48_v52, %v48_v52 }
  0x25   :  { %v115_v33 = vadd.f32 %v114_v23, %v113_v27  ;;  %v308_v0 = vadd.f32 %v307_v55, %v306_v58  ;;  %v319_v27 = vsel %vm78_vm1, %v234_v14, 0.0  ;;  %v146_v55 = vsel %vm78_vm1, %v48_v52, 0.0  ;;  %v49_v58 = vld [vmem:[%s762_s0 + $0x118] sm:$0xff] }
  0x26   :  { %v247_v28 = vmul.f32 %v49_v58, %v49_v58 }
  0x27   :  { %v117_v39 = vadd.f32 %v116_v29, %v115_v33  ;;  %v310_v6 = vadd.f32 %v309_v61, %v308_v0  ;;  %v321_v33 = vsel %vm78_vm1, %v235_v20, 0.0  ;;  %v148_v61 = vsel %vm78_vm1, %v49_v58, 0.0  ;;  %v50_v0 = vld [vmem:[%s762_s0 + $0x120] sm:$0xff] }
  0x28   :  { %v248_v34 = vmul.f32 %v50_v0, %v50_v0 }
  0x29   :  { %v119_v45 = vadd.f32 %v118_v35, %v117_v39  ;;  %v312_v12 = vadd.f32 %v311_v3, %v310_v6  ;;  %v323_v39 = vsel %vm78_vm1, %v236_v26, 0.0  ;;  %v150_v3 = vsel %vm78_vm1, %v50_v0, 0.0  ;;  %v51_v6 = vld [vmem:[%s762_s0 + $0x128] sm:$0xff] }
  0x2a   :  { %v249_v40 = vmul.f32 %v51_v6, %v51_v6 }
  0x2b   :  { %v121_v51 = vadd.f32 %v120_v41, %v119_v45  ;;  %v314_v18 = vadd.f32 %v313_v9, %v312_v12  ;;  %v325_v45 = vsel %vm78_vm1, %v237_v32, 0.0  ;;  %v152_v9 = vsel %vm78_vm1, %v51_v6, 0.0  ;;  %v52_v12 = vld [vmem:[%s762_s0 + $0x130] sm:$0xff] }
  0x2c   :  { %v250_v46 = vmul.f32 %v52_v12, %v52_v12 }
  0x2d   :  { %v123_v57 = vadd.f32 %v122_v47, %v121_v51  ;;  %v316_v24 = vadd.f32 %v315_v15, %v314_v18  ;;  %v327_v51 = vsel %vm78_vm1, %v238_v38, 0.0  ;;  %v154_v15 = vsel %vm78_vm1, %v52_v12, 0.0  ;;  %v53_v18 = vld [vmem:[%s762_s0 + $0x138] sm:$0xff] }
  0x2e   :  { %v251_v52 = vmul.f32 %v53_v18, %v53_v18 }
  0x2f   :  { %v125_v63 = vadd.f32 %v124_v53, %v123_v57  ;;  %v318_v30 = vadd.f32 %v317_v21, %v316_v24  ;;  %v329_v57 = vsel %vm78_vm1, %v239_v44, 0.0  ;;  %v156_v21 = vsel %vm78_vm1, %v53_v18, 0.0  ;;  %v54_v24 = vld [vmem:[%s762_s0 + $0x140] sm:$0xff] }
  0x30   :  { %v252_v58 = vmul.f32 %v54_v24, %v54_v24 }
  0x31   :  { %v127_v5 = vadd.f32 %v126_v59, %v125_v63  ;;  %v320_v36 = vadd.f32 %v319_v27, %v318_v30  ;;  %v331_v63 = vsel %vm78_vm1, %v240_v50, 0.0  ;;  %v158_v27 = vsel %vm78_vm1, %v54_v24, 0.0  ;;  %v55_v30 = vld [vmem:[%s762_s0 + $0x148] sm:$0xff] }
  0x32   :  { %v253_v0 = vmul.f32 %v55_v30, %v55_v30 }
  0x33   :  { %v129_v11 = vadd.f32 %v128_v1, %v127_v5  ;;  %v322_v42 = vadd.f32 %v321_v33, %v320_v36  ;;  %v333_v5 = vsel %vm78_vm1, %v241_v56, 0.0  ;;  %v160_v33 = vsel %vm78_vm1, %v55_v30, 0.0  ;;  %v56_v36 = vld [vmem:[%s762_s0 + $0x150] sm:$0xff] }
  0x34   :  { %v254_v6 = vmul.f32 %v56_v36, %v56_v36 }
  0x35   :  { %v131_v17 = vadd.f32 %v130_v7, %v129_v11  ;;  %v324_v48 = vadd.f32 %v323_v39, %v322_v42  ;;  %v335_v11 = vsel %vm78_vm1, %v242_v62, 0.0  ;;  %v162_v39 = vsel %vm78_vm1, %v56_v36, 0.0  ;;  %v57_v42 = vld [vmem:[%s762_s0 + $0x158] sm:$0xff] }
  0x36   :  { %v255_v12 = vmul.f32 %v57_v42, %v57_v42 }
  0x37   :  { %v133_v23 = vadd.f32 %v132_v13, %v131_v17  ;;  %v326_v54 = vadd.f32 %v325_v45, %v324_v48  ;;  %v337_v17 = vsel %vm78_vm1, %v243_v4, 0.0  ;;  %v164_v45 = vsel %vm78_vm1, %v57_v42, 0.0  ;;  %v58_v48 = vld [vmem:[%s762_s0 + $0x160] sm:$0xff] }
  0x38   :  { %v256_v18 = vmul.f32 %v58_v48, %v58_v48 }
  0x39   :  { %v135_v29 = vadd.f32 %v134_v19, %v133_v23  ;;  %v328_v60 = vadd.f32 %v327_v51, %v326_v54  ;;  %v339_v23 = vsel %vm78_vm1, %v244_v10, 0.0  ;;  %v166_v51 = vsel %vm78_vm1, %v58_v48, 0.0  ;;  %v59_v54 = vld [vmem:[%s762_s0 + $0x168] sm:$0xff] }
  0x3a   :  { %v257_v24 = vmul.f32 %v59_v54, %v59_v54 }
  0x3b   :  { %v137_v35 = vadd.f32 %v136_v25, %v135_v29  ;;  %v330_v2 = vadd.f32 %v329_v57, %v328_v60  ;;  %v341_v29 = vsel %vm78_vm1, %v245_v16, 0.0  ;;  %v168_v57 = vsel %vm78_vm1, %v59_v54, 0.0  ;;  %v60_v60 = vld [vmem:[%s762_s0 + $0x170] sm:$0xff] }
  0x3c   :  { %v258_v30 = vmul.f32 %v60_v60, %v60_v60 }
  0x3d   :  { %v139_v41 = vadd.f32 %v138_v31, %v137_v35  ;;  %v332_v8 = vadd.f32 %v331_v63, %v330_v2  ;;  %v343_v35 = vsel %vm78_vm1, %v246_v22, 0.0  ;;  %v170_v63 = vsel %vm78_vm1, %v60_v60, 0.0  ;;  %v61_v2 = vld [vmem:[%s762_s0 + $0x178] sm:$0xff] }
  0x3e   :  { %v259_v36 = vmul.f32 %v61_v2, %v61_v2 }
  0x3f   :  { %v141_v47 = vadd.f32 %v140_v37, %v139_v41  ;;  %v334_v14 = vadd.f32 %v333_v5, %v332_v8  ;;  %v345_v41 = vsel %vm78_vm1, %v247_v28, 0.0  ;;  %v172_v5 = vsel %vm78_vm1, %v61_v2, 0.0  ;;  %v62_v8 = vld [vmem:[%s762_s0 + $0x180] sm:$0xff] }
  0x40   :  { %v260_v42 = vmul.f32 %v62_v8, %v62_v8 }
  0x41   :  { %v143_v53 = vadd.f32 %v142_v43, %v141_v47  ;;  %v336_v20 = vadd.f32 %v335_v11, %v334_v14  ;;  %v347_v47 = vsel %vm78_vm1, %v248_v34, 0.0  ;;  %v174_v11 = vsel %vm78_vm1, %v62_v8, 0.0  ;;  %v63_v14 = vld [vmem:[%s762_s0 + $0x188] sm:$0xff] }
  0x42   :  { %v261_v48 = vmul.f32 %v63_v14, %v63_v14 }
  0x43   :  { %v145_v59 = vadd.f32 %v144_v49, %v143_v53  ;;  %v338_v26 = vadd.f32 %v337_v17, %v336_v20  ;;  %v349_v53 = vsel %vm78_vm1, %v249_v40, 0.0  ;;  %v176_v17 = vsel %vm78_vm1, %v63_v14, 0.0  ;;  %v64_v20 = vld [vmem:[%s762_s0 + $0x190] sm:$0xff] }
  0x44   :  { %v262_v54 = vmul.f32 %v64_v20, %v64_v20 }
  0x45   :  { %v147_v1 = vadd.f32 %v146_v55, %v145_v59  ;;  %v340_v32 = vadd.f32 %v339_v23, %v338_v26  ;;  %v351_v59 = vsel %vm78_vm1, %v250_v46, 0.0  ;;  %v178_v23 = vsel %vm78_vm1, %v64_v20, 0.0  ;;  %v65_v26 = vld [vmem:[%s762_s0 + $0x198] sm:$0xff] }
  0x46   :  { %v263_v60 = vmul.f32 %v65_v26, %v65_v26 }
  0x47   :  { %v149_v7 = vadd.f32 %v148_v61, %v147_v1  ;;  %v342_v38 = vadd.f32 %v341_v29, %v340_v32  ;;  %v353_v1 = vsel %vm78_vm1, %v251_v52, 0.0  ;;  %v180_v29 = vsel %vm78_vm1, %v65_v26, 0.0  ;;  %v66_v32 = vld [vmem:[%s762_s0 + $0x1a0] sm:$0xff] }
  0x48   :  { %v264_v2 = vmul.f32 %v66_v32, %v66_v32 }
  0x49   :  { %v151_v13 = vadd.f32 %v150_v3, %v149_v7  ;;  %v344_v44 = vadd.f32 %v343_v35, %v342_v38  ;;  %v355_v7 = vsel %vm78_vm1, %v252_v58, 0.0  ;;  %v182_v35 = vsel %vm78_vm1, %v66_v32, 0.0  ;;  %v67_v38 = vld [vmem:[%s762_s0 + $0x1a8] sm:$0xff] }
  0x4a   :  { %v265_v8 = vmul.f32 %v67_v38, %v67_v38 }
  0x4b   :  { %v153_v19 = vadd.f32 %v152_v9, %v151_v13  ;;  %v346_v50 = vadd.f32 %v345_v41, %v344_v44  ;;  %v357_v13 = vsel %vm78_vm1, %v253_v0, 0.0  ;;  %v184_v41 = vsel %vm78_vm1, %v67_v38, 0.0  ;;  %v68_v44 = vld [vmem:[%s762_s0 + $0x1b0] sm:$0xff] }
  0x4c   :  { %v266_v14 = vmul.f32 %v68_v44, %v68_v44 }
  0x4d   :  { %v155_v25 = vadd.f32 %v154_v15, %v153_v19  ;;  %v348_v56 = vadd.f32 %v347_v47, %v346_v50  ;;  %v359_v19 = vsel %vm78_vm1, %v254_v6, 0.0  ;;  %v186_v47 = vsel %vm78_vm1, %v68_v44, 0.0  ;;  %v69_v50 = vld [vmem:[%s762_s0 + $0x1b8] sm:$0xff] }
  0x4e   :  { %v267_v20 = vmul.f32 %v69_v50, %v69_v50 }
  0x4f   :  { %v157_v31 = vadd.f32 %v156_v21, %v155_v25  ;;  %v350_v62 = vadd.f32 %v349_v53, %v348_v56  ;;  %v361_v25 = vsel %vm78_vm1, %v255_v12, 0.0  ;;  %v188_v53 = vsel %vm78_vm1, %v69_v50, 0.0  ;;  %v70_v56 = vld [vmem:[%s762_s0 + $0x1c0] sm:$0xff] }
  0x50   :  { %v268_v26 = vmul.f32 %v70_v56, %v70_v56 }
  0x51   :  { %v159_v37 = vadd.f32 %v158_v27, %v157_v31  ;;  %v352_v4 = vadd.f32 %v351_v59, %v350_v62  ;;  %v363_v31 = vsel %vm78_vm1, %v256_v18, 0.0  ;;  %v190_v59 = vsel %vm78_vm1, %v70_v56, 0.0  ;;  %v71_v62 = vld [vmem:[%s762_s0 + $0x1c8] sm:$0xff] }
  0x52   :  { %v269_v32 = vmul.f32 %v71_v62, %v71_v62 }
  0x53   :  { %v161_v43 = vadd.f32 %v160_v33, %v159_v37  ;;  %v354_v10 = vadd.f32 %v353_v1, %v352_v4  ;;  %v365_v37 = vsel %vm78_vm1, %v257_v24, 0.0  ;;  %v192_v1 = vsel %vm78_vm1, %v71_v62, 0.0  ;;  %v72_v4 = vld [vmem:[%s762_s0 + $0x1d0] sm:$0xff] }
  0x54   :  { %v270_v38 = vmul.f32 %v72_v4, %v72_v4 }
  0x55   :  { %v163_v49 = vadd.f32 %v162_v39, %v161_v43  ;;  %v356_v16 = vadd.f32 %v355_v7, %v354_v10  ;;  %v367_v43 = vsel %vm78_vm1, %v258_v30, 0.0  ;;  %v194_v7 = vsel %vm78_vm1, %v72_v4, 0.0  ;;  %v73_v10 = vld [vmem:[%s762_s0 + $0x1d8] sm:$0xff] }
  0x57   :  { %v165_v55 = vadd.f32 %v164_v45, %v163_v49  ;;  %v358_v22 = vadd.f32 %v357_v13, %v356_v16  ;;  %v369_v49 = vsel %vm78_vm1, %v259_v36, 0.0  ;;  %v196_v13 = vsel %vm78_vm1, %v73_v10, 0.0  ;;  %v74_v16 = vld [vmem:[%s762_s0 + $0x1e0] sm:$0xff] }
  0x59   :  { %v167_v61 = vadd.f32 %v166_v51, %v165_v55  ;;  %v360_v28 = vadd.f32 %v359_v19, %v358_v22  ;;  %v371_v55 = vsel %vm78_vm1, %v260_v42, 0.0  ;;  %v198_v19 = vsel %vm78_vm1, %v74_v16, 0.0  ;;  %v75_v22 = vld [vmem:[%s762_s0 + $0x1e8] sm:$0xff] }
  0x5a   :  { %v271_v42 = vmul.f32 %v73_v10, %v73_v10 }
  0x5b   :  { %v169_v3 = vadd.f32 %v168_v57, %v167_v61  ;;  %v362_v34 = vadd.f32 %v361_v25, %v360_v28  ;;  %v373_v61 = vsel %vm78_vm1, %v261_v48, 0.0  ;;  %v200_v25 = vsel %vm78_vm1, %v75_v22, 0.0  ;;  %v76_v28 = vld [vmem:[%s762_s0 + $0x1f0] sm:$0xff] }
  0x5c   :  { %v393_v50 = vsel %vm78_vm1, %v271_v42, 0.0 }
  0x5d   :  { %v171_v9 = vadd.f32 %v170_v63, %v169_v3  ;;  %v364_v40 = vadd.f32 %v363_v31, %v362_v34  ;;  %v375_v3 = vsel %vm78_vm1, %v262_v54, 0.0  ;;  %v202_v31 = vsel %vm78_vm1, %v76_v28, 0.0  ;;  %v77_v34 = vld [vmem:[%s762_s0 + $0x1f8] sm:$0xff] }
  0x5e   :  { %v275_v56 = vmul.f32 %v77_v34, %v77_v34 }
  0x5f   :  { %v173_v15 = vadd.f32 %v172_v5, %v171_v9  ;;  %v366_v46 = vadd.f32 %v365_v37, %v364_v40  ;;  %v377_v9 = vsel %vm78_vm1, %v263_v60, 0.0  ;;  %v204_v37 = vsel %vm78_vm1, %v77_v34, 0.0 }
  0x60   :  { %v401_v62 = vsel %vm78_vm1, %v275_v56, 0.0 }
  0x61   :  { %v175_v21 = vadd.f32 %v174_v11, %v173_v15  ;;  %v368_v52 = vadd.f32 %v367_v43, %v366_v46  ;;  %v379_v15 = vsel %vm78_vm1, %v264_v2, 0.0  ;;  %v389_v43 = vsel %vm78_vm1, %v269_v32, 0.0 }
  0x62   :  { %v272_v46 = vmul.f32 %v74_v16, %v74_v16 }
  0x63   :  { %v177_v27 = vadd.f32 %v176_v17, %v175_v21  ;;  %v370_v58 = vadd.f32 %v369_v49, %v368_v52  ;;  %v381_v21 = vsel %vm78_vm1, %v265_v8, 0.0  ;;  %v273_v49 = vmul.f32 %v75_v22, %v75_v22 }
  0x64   :  { %v395_v54 = vsel %vm78_vm1, %v272_v46, 0.0 }
  0x65   :  { %v179_v33 = vadd.f32 %v178_v23, %v177_v27  ;;  %v372_v0 = vadd.f32 %v371_v55, %v370_v58  ;;  %v383_v27 = vsel %vm78_vm1, %v266_v14, 0.0 }
  0x67   :  { %v181_v39 = vadd.f32 %v180_v29, %v179_v33  ;;  %v374_v6 = vadd.f32 %v373_v61, %v372_v0  ;;  %v385_v33 = vsel %vm78_vm1, %v267_v20, 0.0 }
  0x69   :  { %v183_v45 = vadd.f32 %v182_v35, %v181_v39  ;;  %v376_v12 = vadd.f32 %v375_v3, %v374_v6  ;;  %v387_v39 = vsel %vm78_vm1, %v268_v26, 0.0 }
  0x6b   :  { %v185_v51 = vadd.f32 %v184_v41, %v183_v45  ;;  %v378_v18 = vadd.f32 %v377_v9, %v376_v12 }
  0x6d   :  { %v187_v57 = vadd.f32 %v186_v47, %v185_v51  ;;  %v380_v24 = vadd.f32 %v379_v15, %v378_v18  ;;  %v391_v47 = vsel %vm78_vm1, %v270_v38, 0.0 }
  0x6f   :  { %v189_v63 = vadd.f32 %v188_v53, %v187_v57  ;;  %v382_v30 = vadd.f32 %v381_v21, %v380_v24  ;;  %v274_v53 = vmul.f32 %v76_v28, %v76_v28  ;;  %v397_v57 = vsel %vm78_vm1, %v273_v49, 0.0 }
  0x71   :  { %v191_v5 = vadd.f32 %v190_v59, %v189_v63  ;;  %v384_v36 = vadd.f32 %v383_v27, %v382_v30  ;;  %v399_v60 = vsel %vm78_vm1, %v274_v53, 0.0 }
  0x73   :  { %v193_v11 = vadd.f32 %v192_v1, %v191_v5  ;;  %v386_v41 = vadd.f32 %v385_v33, %v384_v36 }
  0x75   :  { %v195_v17 = vadd.f32 %v194_v7, %v193_v11  ;;  %v388_v45 = vadd.f32 %v387_v39, %v386_v41  ;;  %v409_v11 = vld [vmem:[%s763_s1] sm:$0x3] }
  0x77   :  { %v197_v23 = vadd.f32 %v196_v13, %v195_v17  ;;  %v390_v48 = vadd.f32 %v389_v43, %v388_v45 }
  0x79   :  { %v199_v29 = vadd.f32 %v198_v19, %v197_v23  ;;  %v392_v52 = vadd.f32 %v391_v47, %v390_v48 }
  0x7b   :  { %v201_v35 = vadd.f32 %v200_v25, %v199_v29  ;;  %v394_v55 = vadd.f32 %v393_v50, %v392_v52 }
  0x7d   :  { %v203_v40 = vadd.f32 %v202_v31, %v201_v35  ;;  %v396_v59 = vadd.f32 %v395_v54, %v394_v55 }
  0x7f   :  { %v205_v44 = vadd.f32 %v204_v37, %v203_v40  ;;  %v398_v61 = vadd.f32 %v397_v57, %v396_v59 }
  0x81   :  { %v206_v51 = vrot.slane %v205_v44, 4  ;;  %v400_v0 = vadd.f32 %v399_v60, %v398_v61 }
  0x83   :  { %v207_v58 = vadd.f32 %v206_v51, %v205_v44  ;;  %v402_v1 = vadd.f32 %v401_v62, %v400_v0 }
  0x85   :  { %v208_v63 = vrot.slane %v207_v58, 2  ;;  %v403_v3 = vrot.slane %v402_v1, 4 }
  0x87   :  { %v209_v2 = vadd.f32 %v208_v63, %v207_v58  ;;  %v404_v4 = vadd.f32 %v403_v3, %v402_v1 }
  0x89   :  { %v210_v5 = vrot.slane %v209_v2, 1  ;;  %v405_v6 = vrot.slane %v404_v4, 2 }
  0x8b   :  { %v406_v7 = vadd.f32 %v405_v6, %v404_v4  ;;  %v211_v8 = vadd.f32 %v210_v5, %v209_v2 }
  0x8d   :  { %v407_v9 = vrot.slane %v406_v7, 1 }
  0x8f   :  { %v408_v10 = vadd.f32 %v407_v9, %v406_v7 }
  0x91   :  { %v411_v12 = vsel %vm410_vm2, %v211_v8, %v408_v10 }
  0x92   :  { %v412_v13 = vadd.f32 %v411_v12, %v409_v11 }
  0x94   :  { %414 = vst.msk [vmem:[%s763_s1] sm:$0x3] %vm12_vm0, %v412_v13 }

// kernel: resblock2d.5
= control target key start
LH: loop header
LB: loop body
LE: loop exit
PB: predicated region body
PF: predicated region fallthrough
CT: control target
= control target key end

     0   :  { %s3313_s21 = smov 0   ;;  %s5197_s0 = inlined_call_operand.vmem [shape: f32[1,4], index: 0, kind: input, shape index: {}]   ;;  %s5198_s1 = inlined_call_operand.vmem [shape: f32[1,4], index: 1, kind: input, shape index: {}]   ;;  %s5199_s2 = inlined_call_operand.vmem [shape: f32[2,16,16,4], index: 2, kind: input, shape index: {}]   ;;  %s5200_s3 = inlined_call_operand.vmem [shape: bf16[36,4], index: 3, kind: input, shape index: {}]   ;;  %s5201_s4 = inlined_call_operand.vmem [shape: f32[1,4], index: 4, kind: input, shape index: {}]   ;;  %s5202_s5 = inlined_call_operand.vmem [shape: f32[2,16,16,4], index: 5, kind: input, shape index: {}]   ;;  %s5203_s6 = inlined_call_operand.vmem [shape: f32[2,16,16,4], index: 6, kind: output, shape index: {}]  }
   0x1 LB: > { %s2863_s22 = sadd.s32 4294967295, %s3267_s21   ;;  %p2867_p0 = scmp.ge.s32.totalorder %s3267_s21, 1  ;;  %s3267_s21 = sphi %s3313_s21, %s16_s21  }
   0x2   : > { %p222_p1 = scmp.lt.s32.totalorder %s3267_s21, 3 }
   0x4   : > { %p223_p2 = pnand %p2867_p0, %p222_p1 }
   0x6   : > { %226 = sbr.rel (%p223_p2) target bundleno = 851 (0x353), region = 44 }
   0xb   : > { %p257_p3 = scmp.lt.s32.totalorder %s2863_s22, 1  ;;  %vm273_vm0 = vcmask 27648   ;;  %v3269_v0 = vmov 0   ;;  %v3327_v1 = vld [vmem:[%s5197_s0] ss:$0 sm:$0xff]  ;;  %vm676_vm1 = vcmask 1040384  }
   0xc   : > { %274 = vst.msk [vmem:[#allocation2] sm:$0xf] %vm273_vm0, %v3269_v0  ;;  %v3340_v2 = vld [vmem:[%s5198_s1] ss:$0 sm:$0xff]  ;;  %vm677_vm2 = vsmask.f32 256 }
   0xd   : > { %s5427_s22 = smov (!%p257_p3, %s2863_s22), 1  ;;  %275 = vst.msk [vmem:[#allocation2 + $0x4] sm:$0xf] %vm273_vm0, %v3269_v0  ;;  %vm3382_vm3 = vmand %vm676_vm1, %vm677_vm2  ;;  %vm1123_vm4 = vsmask.f32 7424  ;;  %s3270_s7 = smov 4  }
   0xe   : > { %276 = vst.msk [vmem:[#allocation2 + $0x8] sm:$0xf] %vm273_vm0, %v3269_v0  ;;  %s3329_s25 = sshll.u32 %s5427_s22, 8  ;;  %vm1371_vm5 = vcmask 1046528   ;;  %s3271_s12 = smov 8   ;;  %vm2092_vm6 = vcmask 31744  }
   0xf   : > { %s3335_s28 = scalar_lea.vmem %s5199_s2, %s3329_s25  ;;  %277 = vst.msk [vmem:[#allocation2 + $0xcc] sm:$0xf] %vm273_vm0, %v3269_v0  ;;  %s3272_s13 = smov 12   ;;  %vm2141_vm7 = vcmask 64512   ;;  %vm2190_vm8 = vcmask 97280   ;;  %vm2239_vm9 = vcmask 130048  }
  0x10   : > { %v286_v3 = vld [vmem:[%s3335_s28] sm:$0xff]  ;;  %v287_v4 = vld [vmem:[%s3335_s28 + $0x8] sm:$0xff]  ;;  %v288_v5 = vld [vmem:[%s3335_s28 + $0x10] sm:$0xff]  ;;  %278 = vst.msk [vmem:[#allocation2 + $0xd0] sm:$0xf] %vm273_vm0, %v3269_v0  ;;  %s3273_s14 = smov 16   ;;  %s5003_s29 = scalar_lea.vmem %s5202_s5, %s3329_s25 }
  0x11   : > { %v321_v6 = vmul.f32 %v3327_v1, %v286_v3  ;;  %v322_v7 = vmul.f32 %v3327_v1, %v287_v4  ;;  %v289_v8 = vld [vmem:[%s3335_s28 + $0x18] sm:$0xff]  ;;  %v290_v9 = vld [vmem:[%s3335_s28 + $0x20] sm:$0xff]  ;;  %v291_v10 = vld [vmem:[%s3335_s28 + $0x28] sm:$0xff]  ;;  %v323_v11 = vmul.f32 %v3327_v1, %v288_v5  ;;  %279 = vst.msk [vmem:[#allocation2 + $0xd4] sm:$0xf] %vm273_vm0, %v3269_v0  ;;  %s3274_s15 = smov 20   ;;  %s5019_s10 = scalar_lea.vmem %s5203_s6, %s3329_s25 }
  0x12   : > { %v324_v12 = vmul.f32 %v3327_v1, %v289_v8  ;;  %v325_v13 = vmul.f32 %v3327_v1, %v290_v9  ;;  %v326_v14 = vmul.f32 %v3327_v1, %v291_v10  ;;  %v292_v15 = vld [vmem:[%s3335_s28 + $0x30] sm:$0xff]  ;;  %280 = vst.msk [vmem:[#allocation2 + $0xd8] sm:$0xf] %vm273_vm0, %v3269_v0  ;;  %v293_v20 = vld [vmem:[%s3335_s28 + $0x38] sm:$0xff]  ;;  %v294_v42 = vld [vmem:[%s3335_s28 + $0x40] sm:$0xff]  ;;  %s3275_s16 = smov 24  }
  0x13   : > { %v356_v16 = vadd.f32 %v3340_v2, %v321_v6  ;;  %v357_v17 = vadd.f32 %v3340_v2, %v322_v7  ;;  %v358_v19 = vadd.f32 %v3340_v2, %v323_v11  ;;  %v327_v21 = vmul.f32 %v3327_v1, %v292_v15  ;;  %v295_v43 = vld [vmem:[%s3335_s28 + $0x48] sm:$0xff]  ;;  %v296_v48 = vld [vmem:[%s3335_s28 + $0x50] sm:$0xff]  ;;  %v297_v3 = vld [vmem:[%s3335_s28 + $0x58] sm:$0xff]  ;;  %s3276_s17 = smov 28   ;;  %s3277_s18 = smov 32  }
  0x14   : > { %v2919_v18 = vld [vmem:[#allocation2] sm:$0xff]   ;;  %v359_v24 = vadd.f32 %v3340_v2, %v324_v12  ;;  %v360_v25 = vadd.f32 %v3340_v2, %v325_v13  ;;  %v361_v28 = vadd.f32 %v3340_v2, %v326_v14  ;;  %v328_v33 = vmul.f32 %v3327_v1, %v293_v20 }
  0x15   : > { %v1125_v22 = vshrl.u32 %v2919_v18, 16  ;;  %v1127_v23 = vshll.u32 %v2919_v18, 16  ;;  %v388_v26 = vmax.f32 %v356_v16, 0.0  ;;  %v389_v27 = vmax.f32 %v357_v17, 0.0 }
  0x16   : > { %v390_v29 = vmax.f32 %v358_v19, 0.0  ;;  %v391_v31 = vmax.f32 %v359_v24, 0.0  ;;  %v392_v32 = vmax.f32 %v360_v25, 0.0  ;;  %v393_v36 = vmax.f32 %v361_v28, 0.0 }
  0x17   : > { %v1129_v30 = vrot.slane %v1127_v23, 1  ;;  %v420_v34 = vpack.c.bf16 %v388_v26, %v388_v26  ;;  %v421_v35 = vpack.c.bf16 %v389_v27, %v389_v27  ;;  %v362_v41 = vadd.f32 %v3340_v2, %v327_v21 }
  0x18   : > { %v422_v37 = vpack.c.bf16 %v390_v29, %v390_v29  ;;  %v423_v39 = vpack.c.bf16 %v391_v31, %v391_v31  ;;  %v424_v40 = vpack.c.bf16 %v392_v32, %v392_v32  ;;  %v425_v46 = vpack.c.bf16 %v393_v36, %v393_v36 }
  0x19   : > { %v3368_v38 = vor.u32 %v1129_v30, %v1125_v22  ;;  %v484_v44 = vunpack.c.l.b16 %v420_v34  ;;  %v485_v45 = vunpack.c.l.b16 %v421_v35  ;;  %v363_v51 = vadd.f32 %v3340_v2, %v328_v33 }
  0x1a   : > { %v486_v47 = vunpack.c.l.b16 %v422_v37  ;;  %v487_v49 = vunpack.c.l.b16 %v423_v39  ;;  %v488_v50 = vunpack.c.l.b16 %v424_v40  ;;  %v394_v52 = vmax.f32 %v362_v41, 0.0 }
  0x1b   : > { %v516_v53 = vpack.c.b16 %v485_v45, %v484_v44  ;;  %v489_v54 = vunpack.c.l.b16 %v425_v46  ;;  %v329_v55 = vmul.f32 %v3327_v1, %v294_v42  ;;  %v330_v56 = vmul.f32 %v3327_v1, %v295_v43  ;;  %v298_v46 = vld [vmem:[%s3335_s28 + $0x60] sm:$0xff] }
  0x1c   : > { %v517_v57 = vpack.c.b16 %v487_v49, %v486_v47  ;;  %v395_v58 = vmax.f32 %v363_v51, 0.0  ;;  %v426_v59 = vpack.c.bf16 %v394_v52, %v394_v52  ;;  %v331_v60 = vmul.f32 %v3327_v1, %v296_v48  ;;  %v299_v47 = vld [vmem:[%s3335_s28 + $0x68] sm:$0xff]  ;;  %v300_v48 = vld [vmem:[%s3335_s28 + $0x70] sm:$0xff] }
  0x1d   : > { %v533_v61 = vshrl.u32 %v516_v53, 16  ;;  %v536_v62 = vshll.u32 %v516_v53, 16  ;;  %v518_v63 = vpack.c.b16 %v489_v54, %v488_v50  ;;  %v364_v0 = vadd.f32 %v3340_v2, %v329_v55 }
  0x1e   : > { %v540_v5 = vshrl.u32 %v517_v57, 16  ;;  %v543_v6 = vshll.u32 %v517_v57, 16  ;;  %v427_v7 = vpack.c.bf16 %v395_v58, %v395_v58  ;;  %v490_v8 = vunpack.c.l.b16 %v426_v59 }
  0x1f   : > { %v535_v9 = vrot.slane %v533_v61, 7  ;;  %v547_v10 = vshrl.u32 %v518_v63, 16  ;;  %v550_v11 = vshll.u32 %v518_v63, 16  ;;  %v365_v12 = vadd.f32 %v3340_v2, %v330_v56 }
  0x20   : > { %v542_v13 = vrot.slane %v540_v5, 7  ;;  %v491_v14 = vunpack.c.l.b16 %v427_v7  ;;  %v396_v15 = vmax.f32 %v364_v0, 0.0  ;;  %v332_v16 = vmul.f32 %v3327_v1, %v297_v3  ;;  %v301_v5 = vld [vmem:[%s3335_s28 + $0x78] sm:$0xff] }
  0x21   : > { %v538_v17 = vor.u32 %v536_v62, %v535_v9  ;;  %v549_v18 = vrot.slane %v547_v10, 7  ;;  %v695_v19 = vsel %vm3382_vm3, %v535_v9, 0  ;;  %v397_v20 = vmax.f32 %v365_v12, 0.0 }
  0x22   : > { %v696_v21 = vsel %vm3382_vm3, %v542_v13, 0  ;;  %v545_v22 = vor.u32 %v543_v6, %v542_v13  ;;  %v745_v23 = vunpack.c.l.b16 %v695_v19  ;;  %v519_v24 = vpack.c.b16 %v491_v14, %v490_v8 }
  0x23   : > { %v679_v25 = vsel %vm3382_vm3, 0, %v538_v17  ;;  %v552_v26 = vor.u32 %v550_v11, %v549_v18  ;;  %v697_v27 = vsel %vm3382_vm3, %v549_v18, 0  ;;  %v748_v28 = vunpack.c.l.b16 %v696_v21 }
  0x24   : > { %v743_v29 = vunpack.c.l.b16 %v679_v25  ;;  %v751_v30 = vunpack.c.l.b16 %v697_v27  ;;  %v680_v31 = vsel %vm3382_vm3, 0, %v545_v22  ;;  %v744_v32 = vunpack.c.h.b16 %v679_v25 }
  0x25   : > { %v681_v33 = vsel %vm3382_vm3, 0, %v552_v26  ;;  %v796_v34 = vpack.c.b16 %v748_v28, %v748_v28  ;;  %v746_v35 = vunpack.c.l.b16 %v680_v31  ;;  %v747_v36 = vunpack.c.h.b16 %v680_v31 }
  0x26   : > { %v791_v37 = vpack.c.b16 %v743_v29, %v743_v29  ;;  %v749_v39 = vunpack.c.l.b16 %v681_v33  ;;  %v750_v40 = vunpack.c.h.b16 %v681_v33  ;;  %v799_v41 = vpack.c.b16 %v751_v30, %v751_v30 }
  0x27   : > { %892 = vst.msk [vmem:[#allocation2 + $0x20] sm:$0xf] %vm273_vm0, %v796_v34  ;;  %v792_v42 = vpack.c.b16 %v744_v32, %v744_v32  ;;  %v793_v43 = vpack.c.b16 %v745_v23, %v745_v23  ;;  %v794_v44 = vpack.c.b16 %v746_v35, %v746_v35  ;;  %v795_v45 = vpack.c.b16 %v747_v36, %v747_v36 }
  0x28   : > { %887 = vst.msk [vmem:[#allocation2 + $0xc] sm:$0xf] %vm273_vm0, %v791_v37  ;;  %v797_v49 = vpack.c.b16 %v749_v39, %v749_v39  ;;  %v798_v50 = vpack.c.b16 %v750_v40, %v750_v40  ;;  %v554_v51 = vshrl.u32 %v519_v24, 16  ;;  %v557_v52 = vshll.u32 %v519_v24, 16 }
  0x29   : > { %895 = vst.msk [vmem:[#allocation2 + $0x2c] sm:$0xf] %vm273_vm0, %v799_v41  ;;  %v428_v53 = vpack.c.bf16 %v396_v15, %v396_v15  ;;  %v429_v54 = vpack.c.bf16 %v397_v20, %v397_v20  ;;  %v366_v55 = vadd.f32 %v3340_v2, %v331_v60  ;;  %v367_v56 = vadd.f32 %v3340_v2, %v332_v16 }
  0x2a   : > { %893 = vst.msk [vmem:[#allocation2 + $0x24] sm:$0xf] %vm273_vm0, %v797_v49  ;;  %v556_v57 = vrot.slane %v554_v51, 7  ;;  %v333_v58 = vmul.f32 %v3327_v1, %v298_v46  ;;  %v334_v59 = vmul.f32 %v3327_v1, %v299_v47  ;;  %v3412_v61 = vmul.f32 %v3327_v1, %v300_v48 }
  0x2b   : > { %894 = vst.msk [vmem:[#allocation2 + $0x28] sm:$0xf] %vm273_vm0, %v798_v50  ;;  %v492_v62 = vunpack.c.l.b16 %v428_v53  ;;  %v493_v63 = vunpack.c.l.b16 %v429_v54  ;;  %v398_v0 = vmax.f32 %v366_v55, 0.0  ;;  %v399_v3 = vmax.f32 %v367_v56, 0.0 }
  0x2c   : > { %888 = vst.msk [vmem:[#allocation2 + $0x10] sm:$0xf] %vm273_vm0, %v792_v42  ;;  %v559_v60 = vor.u32 %v557_v52, %v556_v57  ;;  %v698_v6 = vsel %vm3382_vm3, %v556_v57, 0  ;;  %v368_v7 = vadd.f32 %v3340_v2, %v333_v58  ;;  %v3421_v8 = vadd.f32 %v3340_v2, %v334_v59 }
  0x2d   : > { %889 = vst.msk [vmem:[#allocation2 + $0x14] sm:$0xf] %vm273_vm0, %v793_v43  ;;  %v520_v9 = vpack.c.b16 %v493_v63, %v492_v62  ;;  %v754_v10 = vunpack.c.l.b16 %v698_v6  ;;  %v430_v11 = vpack.c.bf16 %v398_v0, %v398_v0  ;;  %v431_v12 = vpack.c.bf16 %v399_v3, %v399_v3 }
  0x2e   : > { %890 = vst.msk [vmem:[#allocation2 + $0x18] sm:$0xf] %vm273_vm0, %v794_v44  ;;  %v682_v13 = vsel %vm3382_vm3, 0, %v559_v60  ;;  %v400_v14 = vmax.f32 %v368_v7, 0.0  ;;  %v401_v15 = vmax.f32 %v3421_v8, 0.0  ;;  %v3429_v16 = vmul.f32 %v3327_v1, %v301_v5 }
  0x2f   : > { %v3431_v17 = vld [vmem:[#allocation2 + $0x8] sm:$0xff]   ;;  %891 = vst.msk [vmem:[#allocation2 + $0x1c] sm:$0xf] %vm273_vm0, %v795_v45  ;;  %v752_v18 = vunpack.c.l.b16 %v682_v13  ;;  %v753_v19 = vunpack.c.h.b16 %v682_v13  ;;  %v561_v20 = vshrl.u32 %v520_v9, 16  ;;  %v564_v21 = vshll.u32 %v520_v9, 16 }
  0x30   : > { %v1132_v22 = vshll.u32 %v3431_v17, 16  ;;  %v1136_v23 = vshrl.u32 %v3431_v17, 16  ;;  %v802_v24 = vpack.c.b16 %v754_v10, %v754_v10  ;;  %v494_v25 = vunpack.c.l.b16 %v430_v11 }
  0x31   : > { %v3436_v26 = vld [vmem:[#allocation2 + $0x20] sm:$0xff]   ;;  %v800_v27 = vpack.c.b16 %v752_v18, %v752_v18  ;;  %v801_v28 = vpack.c.b16 %v753_v19, %v753_v19  ;;  %v563_v29 = vrot.slane %v561_v20, 7  ;;  %v495_v30 = vunpack.c.l.b16 %v431_v12 }
  0x32   : > { %v1134_v31 = vrot.slane %v1132_v22, 1  ;;  %v3438_v32 = vld [vmem:[#allocation2 + $0x28] sm:$0xff]   ;;  %v1156_v33 = vshll.u32 %v3436_v26, 16  ;;  %v1160_v34 = vshrl.u32 %v3436_v26, 16  ;;  %898 = vst.msk [vmem:[#allocation2 + $0x38] sm:$0xf] %vm273_vm0, %v802_v24  ;;  %v432_v35 = vpack.c.bf16 %v400_v14, %v400_v14 }
  0x33   : > { %v1164_v36 = vshll.u32 %v3438_v32, 16  ;;  %896 = vst.msk [vmem:[#allocation2 + $0x30] sm:$0xf] %vm273_vm0, %v800_v27  ;;  %v1168_v37 = vshrl.u32 %v3438_v32, 16  ;;  %v566_v39 = vor.u32 %v564_v21, %v563_v29  ;;  %v521_v40 = vpack.c.b16 %v495_v30, %v494_v25  ;;  %v302_v21 = vld [vmem:[%s3335_s28 + $0x80] sm:$0xff] }
  0x34   : > { %v1135_v41 = vsel %vm1123_vm4, %v3368_v38, %v1134_v31  ;;  %v1158_v42 = vrot.slane %v1156_v33, 1  ;;  %v3448_v43 = vld [vmem:[#allocation2 + $0x10] sm:$0xff]   ;;  %v1138_v44 = vor.u32 %v1136_v23, %v1134_v31  ;;  %897 = vst.msk [vmem:[#allocation2 + $0x34] sm:$0xf] %vm273_vm0, %v801_v28  ;;  %v699_v45 = vsel %vm3382_vm3, %v563_v29, 0  ;;  %v303_v31 = vld [vmem:[%s3335_s28 + $0x88] sm:$0xff] }
  0x35   : > { %1320 = vrot.lane.b32.xlu0 %v1135_v41, %s3270_s7  ;;  %v1166_v46 = vrot.slane %v1164_v36, 1  ;;  %v1140_v47 = vshll.u32 %v3448_v43, 16  ;;  %v1144_v48 = vshrl.u32 %v3448_v43, 16  ;;  %v683_v38 = vsel %vm3382_vm3, 0, %v566_v39 }
  0x36   : > { %v1162_v49 = vor.u32 %v1160_v34, %v1158_v42  ;;  %v3458_v50 = vld [vmem:[#allocation2 + $0x18] sm:$0xff]   ;;  %v755_v51 = vunpack.c.l.b16 %v683_v38  ;;  %v568_v52 = vshrl.u32 %v521_v40, 16  ;;  %v571_v53 = vshll.u32 %v521_v40, 16 }
  0x37   : > { %v1142_v54 = vrot.slane %v1140_v47, 1  ;;  %v1148_v55 = vshll.u32 %v3458_v50, 16  ;;  %v1170_v56 = vor.u32 %v1168_v37, %v1166_v46  ;;  %v1152_v57 = vshrl.u32 %v3458_v50, 16  ;;  %v304_v37 = vld [vmem:[%s3335_s28 + $0x90] sm:$0xff]  ;;  %v305_v47 = vld [vmem:[%s3335_s28 + $0x98] sm:$0xff] }
  0x38   : > { %v3463_v58 = vsel %vm1123_vm4, %v1162_v49, %v1166_v46  ;;  %v803_v59 = vpack.c.b16 %v755_v51, %v755_v51  ;;  %v570_v62 = vrot.slane %v568_v52, 7  ;;  %v756_v63 = vunpack.c.h.b16 %v683_v38 }
  0x39   : > { %5262 = vst [vmem:[#allocation3_spill] sm:$0xff] %v3463_v58  ;;  %1328 = vrot.lane.b32.xlu2 %v3463_v58, %s3270_s7  ;;  %v1146_v0 = vor.u32 %v1144_v48, %v1142_v54  ;;  %v1150_v3 = vrot.slane %v1148_v55, 1  ;;  %v1143_v5 = vsel %vm1123_vm4, %v1138_v44, %v1142_v54  ;;  %v757_v60 = vunpack.c.l.b16 %v699_v45 }
  0x3a   : > { %899 = vst.msk [vmem:[#allocation2 + $0x3c] sm:$0xf] %vm273_vm0, %v803_v59  ;;  %v573_v6 = vor.u32 %v571_v53, %v570_v62  ;;  %v804_v7 = vpack.c.b16 %v756_v63, %v756_v63  ;;  %v433_v8 = vpack.c.bf16 %v401_v15, %v401_v15  ;;  %v496_v9 = vunpack.c.l.b16 %v432_v35 }
  0x3b   : > { %v1151_v10 = vsel %vm1123_vm4, %v1146_v0, %v1150_v3  ;;  %v3470_v11 = vld [vmem:[#allocation2 + $0x30] sm:$0xff]   ;;  %v1154_v12 = vor.u32 %v1152_v57, %v1150_v3  ;;  %v805_v13 = vpack.c.b16 %v757_v60, %v757_v60  ;;  %v700_v14 = vsel %vm3382_vm3, %v570_v62, 0 }
  0x3c   : > { %1324 = vrot.lane.b32.xlu1 %v1151_v10, %s3270_s7  ;;  %v1172_v18 = vshll.u32 %v3470_v11, 16  ;;  %v1176_v19 = vshrl.u32 %v3470_v11, 16  ;;  %v684_v15 = vsel %vm3382_vm3, 0, %v573_v6  ;;  %900 = vst.msk [vmem:[#allocation2 + $0x40] sm:$0xf] %vm273_vm0, %v804_v7  ;;  %v497_v20 = vunpack.c.l.b16 %v433_v8 }
  0x3d   : > { %1322 = vrot.lane.b32.xlu0 %v1143_v5, %s3270_s7  ;;  %v3483_v22 = vsel %vm1123_vm4, %v1154_v12, %v1158_v42  ;;  %v758_v23 = vunpack.c.l.b16 %v684_v15  ;;  %v759_v24 = vunpack.c.h.b16 %v684_v15  ;;  %901 = vst.msk [vmem:[#allocation2 + $0x44] sm:$0xf] %vm273_vm0, %v805_v13  ;;  %v760_v25 = vunpack.c.l.b16 %v700_v14 }
  0x3e   : > { %5263 = vst [vmem:[#allocation4_spill] sm:$0xff] %v3483_v22  ;;  %v1174_v27 = vrot.slane %v1172_v18, 1  ;;  %v522_v28 = vpack.c.b16 %v497_v20, %v496_v9  ;;  %v370_v29 = vadd.f32 %v3340_v2, %v3412_v61  ;;  %v371_v30 = vadd.f32 %v3340_v2, %v3429_v16 }
  0x3f   : > { %v806_v33 = vpack.c.b16 %v758_v23, %v758_v23  ;;  %v807_v34 = vpack.c.b16 %v759_v24, %v759_v24  ;;  %v808_v35 = vpack.c.b16 %v760_v25, %v760_v25  ;;  %v337_v36 = vmul.f32 %v3327_v1, %v302_v21 }
  0x40   : > { %v3494_v39 = vsel %vm1123_vm4, %v1170_v56, %v1174_v27  ;;  %v1178_v40 = vor.u32 %v1176_v19, %v1174_v27  ;;  %v575_v41 = vshrl.u32 %v522_v28, 16  ;;  %v578_v42 = vshll.u32 %v522_v28, 16  ;;  %v306_v28 = vld [vmem:[%s3335_s28 + $0xa0] sm:$0xff] }
  0x41   : > { %5264 = vst [vmem:[#allocation5_spill] sm:$0xff] %v3494_v39  ;;  %1330 = vrot.lane.b32.xlu2 %v3494_v39, %s3270_s7  ;;  %v3498_v61 = vld [vmem:[#allocation2 + $0x38] sm:$0xff]   ;;  %v402_v16 = vmax.f32 %v370_v29, 0.0  ;;  %v403_v44 = vmax.f32 %v371_v30, 0.0  ;;  %v338_v45 = vmul.f32 %v3327_v1, %v303_v31  ;;  %v372_v46 = vadd.f32 %v3340_v2, %v337_v36  ;;  %v307_v29 = vld [vmem:[%s3335_s28 + $0xa8] sm:$0xff] }
  0x42   : > { %902 = vst.msk [vmem:[#allocation2 + $0x48] sm:$0xf] %vm273_vm0, %v806_v33  ;;  %v1180_v48 = vshll.u32 %v3498_v61, 16  ;;  %v1184_v38 = vshrl.u32 %v3498_v61, 16  ;;  %v577_v49 = vrot.slane %v575_v41, 7  ;;  %v339_v51 = vmul.f32 %v3327_v1, %v304_v37 }
  0x43   : > { %903 = vst.msk [vmem:[#allocation2 + $0x4c] sm:$0xf] %vm273_vm0, %v807_v34  ;;  %v434_v52 = vpack.c.bf16 %v402_v16, %v402_v16  ;;  %v435_v53 = vpack.c.bf16 %v403_v44, %v403_v44  ;;  %v373_v54 = vadd.f32 %v3340_v2, %v338_v45  ;;  %v404_v55 = vmax.f32 %v372_v46, 0.0 }
  0x44   : > { %904 = vst.msk [vmem:[#allocation2 + $0x50] sm:$0xf] %vm273_vm0, %v808_v35  ;;  %1326 = vrot.lane.b32.xlu1 %v3483_v22, %s3270_s7  ;;  %v1182_v56 = vrot.slane %v1180_v48, 1  ;;  %v3512_v57 = vld [vmem:[#allocation2 + $0x40] sm:$0xff]   ;;  %v580_v59 = vor.u32 %v578_v42, %v577_v49  ;;  %v701_v62 = vsel %vm3382_vm3, %v577_v49, 0  ;;  %v340_v63 = vmul.f32 %v3327_v1, %v305_v47 }
  0x45   : > { %v1188_v0 = vshll.u32 %v3512_v57, 16  ;;  %v1192_v3 = vshrl.u32 %v3512_v57, 16  ;;  %v498_v5 = vunpack.c.l.b16 %v434_v52  ;;  %v499_v60 = vunpack.c.l.b16 %v435_v53 }
  0x46   : > { %v3520_v6 = vsel %vm1123_vm4, %v1178_v40, %v1182_v56  ;;  %v1186_v7 = vor.u32 %v1184_v38, %v1182_v56  ;;  %v685_v8 = vsel %vm3382_vm3, 0, %v580_v59  ;;  %v763_v9 = vunpack.c.l.b16 %v701_v62  ;;  %v308_v59 = vld [vmem:[%s3335_s28 + $0xb0] sm:$0xff] }
  0x47   : > { %5265 = vst [vmem:[#allocation6_spill] sm:$0xff] %v3520_v6  ;;  %1332 = vrot.lane.b32.xlu0 %v3520_v6, %s3270_s7  ;;  %v1190_v10 = vrot.slane %v1188_v0, 1  ;;  %v761_v12 = vunpack.c.l.b16 %v685_v8  ;;  %v523_v13 = vpack.c.b16 %v499_v60, %v498_v5  ;;  %v762_v14 = vunpack.c.h.b16 %v685_v8 }
  0x48   : > { %v811_v18 = vpack.c.b16 %v763_v9, %v763_v9  ;;  %v405_v19 = vmax.f32 %v373_v54, 0.0  ;;  %v436_v15 = vpack.c.bf16 %v404_v55, %v404_v55  ;;  %v374_v20 = vadd.f32 %v3340_v2, %v339_v51 }
  0x49   : > { %v1194_v23 = vor.u32 %v1192_v3, %v1190_v10  ;;  %v3530_v24 = vsel %vm1123_vm4, %v1186_v7, %v1190_v10  ;;  %v809_v25 = vpack.c.b16 %v761_v12, %v761_v12  ;;  %v582_v27 = vshrl.u32 %v523_v13, 16 }
  0x4a   : > { %v3527_v21 = vld [vmem:[#allocation2 + $0x48] sm:$0xff]   ;;  %5266 = vst [vmem:[#allocation7_spill] sm:$0xff] %v3530_v24  ;;  %v585_v33 = vshll.u32 %v523_v13, 16  ;;  %v810_v34 = vpack.c.b16 %v762_v14, %v762_v14  ;;  %v437_v36 = vpack.c.bf16 %v405_v19, %v405_v19  ;;  %v500_v37 = vunpack.c.l.b16 %v436_v15 }
  0x4b   : > { %v1196_v30 = vshll.u32 %v3527_v21, 16  ;;  %v1200_v31 = vshrl.u32 %v3527_v21, 16  ;;  %907 = vst.msk [vmem:[#allocation2 + $0x5c] sm:$0xf] %vm273_vm0, %v811_v18  ;;  %v584_v35 = vrot.slane %v582_v27, 7  ;;  %v375_v40 = vadd.f32 %v3340_v2, %v340_v63 }
  0x4c   : > { %905 = vst.msk [vmem:[#allocation2 + $0x54] sm:$0xf] %vm273_vm0, %v809_v25  ;;  %1334 = vrot.lane.b32.xlu1 %v3530_v24, %s3270_s7  ;;  %v406_v42 = vmax.f32 %v374_v20, 0.0  ;;  %v341_v16 = vmul.f32 %v3327_v1, %v306_v28  ;;  %v342_v44 = vmul.f32 %v3327_v1, %v307_v29  ;;  %v501_v46 = vunpack.c.l.b16 %v437_v36 }
  0x4d   : > { %v1198_v41 = vrot.slane %v1196_v30, 1  ;;  %906 = vst.msk [vmem:[#allocation2 + $0x58] sm:$0xf] %vm273_vm0, %v810_v34  ;;  %v587_v45 = vor.u32 %v585_v33, %v584_v35  ;;  %v702_v47 = vsel %vm3382_vm3, %v584_v35, 0  ;;  %v407_v48 = vmax.f32 %v375_v40, 0.0 }
  0x4e   : > { %v766_v51 = vunpack.c.l.b16 %v702_v47  ;;  %v438_v52 = vpack.c.bf16 %v406_v42, %v406_v42  ;;  %v524_v54 = vpack.c.b16 %v501_v46, %v500_v37  ;;  %v376_v56 = vadd.f32 %v3340_v2, %v341_v16 }
  0x4f   : > { %v3547_v38 = vsel %vm1123_vm4, %v1194_v23, %v1198_v41  ;;  %v1202_v49 = vor.u32 %v1200_v31, %v1198_v41  ;;  %v686_v53 = vsel %vm3382_vm3, 0, %v587_v45  ;;  %v439_v55 = vpack.c.bf16 %v407_v48, %v407_v48 }
  0x50   : > { %5267 = vst [vmem:[#allocation8_spill] sm:$0xff] %v3547_v38  ;;  %1336 = vrot.lane.b32.xlu2 %v3547_v38, %s3270_s7  ;;  %v764_v62 = vunpack.c.l.b16 %v686_v53  ;;  %v765_v63 = vunpack.c.h.b16 %v686_v53  ;;  %v814_v0 = vpack.c.b16 %v766_v51, %v766_v51  ;;  %v502_v3 = vunpack.c.l.b16 %v438_v52  ;;  %v309_v51 = vld [vmem:[%s3335_s28 + $0xb8] sm:$0xff] }
  0x51   : > { %v589_v5 = vshrl.u32 %v524_v54, 16  ;;  %v592_v60 = vshll.u32 %v524_v54, 16  ;;  %v503_v7 = vunpack.c.l.b16 %v439_v55  ;;  %v377_v8 = vadd.f32 %v3340_v2, %v342_v44  ;;  %v310_v55 = vld [vmem:[%s3335_s28 + $0xc0] sm:$0xff] }
  0x52   : > { %v812_v10 = vpack.c.b16 %v764_v62, %v764_v62  ;;  %v813_v12 = vpack.c.b16 %v765_v63, %v765_v63  ;;  %910 = vst.msk [vmem:[#allocation2 + $0x68] sm:$0xf] %vm273_vm0, %v814_v0  ;;  %v408_v13 = vmax.f32 %v376_v56, 0.0  ;;  %v343_v14 = vmul.f32 %v3327_v1, %v308_v59 }
  0x53   : > { %v3556_v9 = vld [vmem:[#allocation2 + $0x50] sm:$0xff]   ;;  %v591_v20 = vrot.slane %v589_v5, 7  ;;  %v525_v23 = vpack.c.b16 %v503_v7, %v502_v3  ;;  %v409_v28 = vmax.f32 %v377_v8, 0.0  ;;  %v344_v5 = vmul.f32 %v3327_v1, %v309_v51  ;;  %v311_v7 = vld [vmem:[%s3335_s28 + $0xc8] sm:$0xff] }
  0x54   : > { %v1204_v18 = vshll.u32 %v3556_v9, 16  ;;  %v3561_v19 = vld [vmem:[#allocation2 + $0x58] sm:$0xff]   ;;  %v1208_v15 = vshrl.u32 %v3556_v9, 16  ;;  %908 = vst.msk [vmem:[#allocation2 + $0x60] sm:$0xf] %vm273_vm0, %v812_v10  ;;  %v440_v29 = vpack.c.bf16 %v408_v13, %v408_v13  ;;  %vm2288_vm10 = vcmask 162816  }
  0x55   : > { %v1212_v25 = vshll.u32 %v3561_v19, 16  ;;  %v1216_v27 = vshrl.u32 %v3561_v19, 16  ;;  %909 = vst.msk [vmem:[#allocation2 + $0x64] sm:$0xf] %vm273_vm0, %v813_v12  ;;  %v594_v31 = vor.u32 %v592_v60, %v591_v20  ;;  %v596_v33 = vshrl.u32 %v525_v23, 16 }
  0x56   : > { %v1206_v30 = vrot.slane %v1204_v18, 1  ;;  %v599_v34 = vshll.u32 %v525_v23, 16  ;;  %v703_v36 = vsel %vm3382_vm3, %v591_v20, 0  ;;  %v441_v37 = vpack.c.bf16 %v409_v28, %v409_v28  ;;  %v313_v20 = vld [vmem:[%s3335_s28 + $0xd8] sm:$0xff] }
  0x57   : > { %v1214_v35 = vrot.slane %v1212_v25, 1  ;;  %v504_v40 = vunpack.c.l.b16 %v440_v29  ;;  %v687_v16 = vsel %vm3382_vm3, 0, %v594_v31  ;;  %v598_v44 = vrot.slane %v596_v33, 7 }
  0x58   : > { %v3571_v41 = vsel %vm1123_vm4, %v1202_v49, %v1206_v30  ;;  %v1210_v42 = vor.u32 %v1208_v15, %v1206_v30  ;;  %v767_v46 = vunpack.c.l.b16 %v687_v16  ;;  %v768_v47 = vunpack.c.h.b16 %v687_v16  ;;  %v312_v15 = vld [vmem:[%s3335_s28 + $0xd0] sm:$0xff] }
  0x59   : > { %5268 = vst [vmem:[#allocation9_spill] sm:$0xff] %v3571_v41  ;;  %1338 = vrot.lane.b32.xlu0 %v3571_v41, %s3270_s7  ;;  %v1218_v45 = vor.u32 %v1216_v27, %v1214_v35  ;;  %v769_v48 = vunpack.c.l.b16 %v703_v36  ;;  %v601_v53 = vor.u32 %v599_v34, %v598_v44  ;;  %v505_v49 = vunpack.c.l.b16 %v441_v37 }
  0x5a   : > { %v3579_v52 = vsel %vm1123_vm4, %v1210_v42, %v1214_v35  ;;  %v704_v54 = vsel %vm3382_vm3, %v598_v44, 0  ;;  %v815_v56 = vpack.c.b16 %v767_v46, %v767_v46  ;;  %v816_v59 = vpack.c.b16 %v768_v47, %v768_v47 }
  0x5b   : > { %5269 = vst [vmem:[#allocation10_spill] sm:$0xff] %v3579_v52  ;;  %1340 = vrot.lane.b32.xlu1 %v3579_v52, %s3270_s7  ;;  %v817_v62 = vpack.c.b16 %v769_v48, %v769_v48  ;;  %v772_v63 = vunpack.c.l.b16 %v704_v54  ;;  %v688_v0 = vsel %vm3382_vm3, 0, %v601_v53  ;;  %v526_v3 = vpack.c.b16 %v505_v49, %v504_v40 }
  0x5c   : > { %v378_v60 = vadd.f32 %v3340_v2, %v343_v14  ;;  %v3591_v8 = vld [vmem:[#allocation2 + $0x60] sm:$0xff]   ;;  %911 = vst.msk [vmem:[#allocation2 + $0x6c] sm:$0xf] %vm273_vm0, %v815_v56  ;;  %v770_v10 = vunpack.c.l.b16 %v688_v0  ;;  %v771_v12 = vunpack.c.h.b16 %v688_v0  ;;  %v345_v18 = vmul.f32 %v3327_v1, %v310_v55 }
  0x5d   : > { %v820_v13 = vpack.c.b16 %v772_v63, %v772_v63  ;;  %v1220_v23 = vshll.u32 %v3591_v8, 16  ;;  %v1224_v25 = vshrl.u32 %v3591_v8, 16  ;;  %912 = vst.msk [vmem:[#allocation2 + $0x70] sm:$0xf] %vm273_vm0, %v816_v59  ;;  %v603_v27 = vshrl.u32 %v526_v3, 16 }
  0x5e   : > { %v606_v14 = vshll.u32 %v526_v3, 16  ;;  %v818_v28 = vpack.c.b16 %v770_v10, %v770_v10  ;;  %v819_v29 = vpack.c.b16 %v771_v12, %v771_v12  ;;  %913 = vst.msk [vmem:[#allocation2 + $0x74] sm:$0xf] %vm273_vm0, %v817_v62  ;;  %v379_v30 = vadd.f32 %v3340_v2, %v344_v5 }
  0x5f   : > { %v410_v31 = vmax.f32 %v378_v60, 0.0  ;;  %v1222_v33 = vrot.slane %v1220_v23, 1  ;;  %v605_v34 = vrot.slane %v603_v27, 7  ;;  %916 = vst.msk [vmem:[#allocation2 + $0x80] sm:$0xf] %vm273_vm0, %v820_v13  ;;  %v346_v35 = vmul.f32 %v3327_v1, %v311_v7 }
  0x60   : > { %v380_v36 = vadd.f32 %v3340_v2, %v345_v18  ;;  %914 = vst.msk [vmem:[#allocation2 + $0x78] sm:$0xf] %vm273_vm0, %v818_v28  ;;  %v411_v37 = vmax.f32 %v379_v30, 0.0  ;;  %v347_v42 = vmul.f32 %v3327_v1, %v312_v15  ;;  %v348_v16 = vmul.f32 %v3327_v1, %v313_v20 }
  0x61   : > { %v442_v40 = vpack.c.bf16 %v410_v31, %v410_v31  ;;  %v3609_v44 = vsel %vm1123_vm4, %v1218_v45, %v1222_v33  ;;  %v1226_v46 = vor.u32 %v1224_v25, %v1222_v33  ;;  %915 = vst.msk [vmem:[#allocation2 + $0x7c] sm:$0xf] %vm273_vm0, %v819_v29  ;;  %v608_v47 = vor.u32 %v606_v14, %v605_v34  ;;  %v314_v29 = vld [vmem:[%s3335_s28 + $0xe0] sm:$0xff] }
  0x62   : > { %5270 = vst [vmem:[#allocation11_spill] sm:$0xff] %v3609_v44  ;;  %v705_v48 = vsel %vm3382_vm3, %v605_v34, 0  ;;  %1342 = vrot.lane.b32.xlu2 %v3609_v44, %s3270_s7  ;;  %v443_v51 = vpack.c.bf16 %v411_v37, %v411_v37  ;;  %v381_v54 = vadd.f32 %v3340_v2, %v346_v35  ;;  %v412_v56 = vmax.f32 %v380_v36, 0.0  ;;  %v315_v36 = vld [vmem:[%s3335_s28 + $0xe8] sm:$0xff] }
  0x63   : > { %v506_v53 = vunpack.c.l.b16 %v442_v40  ;;  %v775_v49 = vunpack.c.l.b16 %v705_v48  ;;  %v3617_v55 = vld [vmem:[#allocation2 + $0x68] sm:$0xff]   ;;  %v689_v45 = vsel %vm3382_vm3, 0, %v608_v47  ;;  %v382_v59 = vadd.f32 %v3340_v2, %v347_v42 }
  0x64   : > { %v383_v62 = vadd.f32 %v3340_v2, %v348_v16  ;;  %v1228_v63 = vshll.u32 %v3617_v55, 16  ;;  %v1232_v0 = vshrl.u32 %v3617_v55, 16  ;;  %v773_v3 = vunpack.c.l.b16 %v689_v45 }
  0x65   : > { %v507_v5 = vunpack.c.l.b16 %v443_v51  ;;  %v3625_v60 = vld [vmem:[#allocation2 + $0x70] sm:$0xff]   ;;  %v774_v7 = vunpack.c.h.b16 %v689_v45  ;;  %v823_v10 = vpack.c.b16 %v775_v49, %v775_v49  ;;  %v413_v12 = vmax.f32 %v381_v54, 0.0 }
  0x66   : > { %v444_v13 = vpack.c.bf16 %v412_v56, %v412_v56  ;;  %v1230_v18 = vrot.slane %v1228_v63, 1  ;;  %v1236_v15 = vshll.u32 %v3625_v60, 16  ;;  %v1240_v20 = vshrl.u32 %v3625_v60, 16 }
  0x67   : > { %v821_v23 = vpack.c.b16 %v773_v3, %v773_v3  ;;  %v527_v25 = vpack.c.b16 %v507_v5, %v506_v53  ;;  %v822_v27 = vpack.c.b16 %v774_v7, %v774_v7  ;;  %919 = vst.msk [vmem:[#allocation2 + $0x8c] sm:$0xf] %vm273_vm0, %v823_v10  ;;  %v445_v14 = vpack.c.bf16 %v413_v12, %v413_v12  ;;  %v316_v53 = vld [vmem:[%s3335_s28 + $0xf0] sm:$0xff] }
  0x68   : > { %v508_v28 = vunpack.c.l.b16 %v444_v13  ;;  %v3632_v30 = vsel %vm1123_vm4, %v1226_v46, %v1230_v18  ;;  %v3634_v31 = vld [vmem:[#allocation2 + $0x78] sm:$0xff]   ;;  %v1238_v33 = vrot.slane %v1236_v15, 1  ;;  %v1234_v34 = vor.u32 %v1232_v0, %v1230_v18 }
  0x69   : > { %5271 = vst [vmem:[#allocation12_spill] sm:$0xff] %v3632_v30  ;;  %v414_v35 = vmax.f32 %v382_v59, 0.0  ;;  %1344 = vrot.lane.b32.xlu0 %v3632_v30, %s3270_s7  ;;  %v1244_v37 = vshll.u32 %v3634_v31, 16  ;;  %v1248_v40 = vshrl.u32 %v3634_v31, 16  ;;  %v610_v42 = vshrl.u32 %v527_v25, 16 }
  0x6a   : > { %917 = vst.msk [vmem:[#allocation2 + $0x84] sm:$0xf] %vm273_vm0, %v821_v23  ;;  %v613_v16 = vshll.u32 %v527_v25, 16  ;;  %v1242_v46 = vor.u32 %v1240_v20, %v1238_v33  ;;  %v3644_v47 = vsel %vm1123_vm4, %v1234_v34, %v1238_v33  ;;  %v509_v48 = vunpack.c.l.b16 %v445_v14 }
  0x6b   : > { %918 = vst.msk [vmem:[#allocation2 + $0x88] sm:$0xf] %vm273_vm0, %v822_v27  ;;  %v415_v51 = vmax.f32 %v383_v62, 0.0  ;;  %v1246_v49 = vrot.slane %v1244_v37, 1  ;;  %1346 = vrot.lane.b32.xlu1 %v3644_v47, %s3270_s7  ;;  %v612_v54 = vrot.slane %v610_v42, 7  ;;  %v446_v45 = vpack.c.bf16 %v414_v35, %v414_v35 }
  0x6c   : > { %5272 = vst [vmem:[#allocation13_spill] sm:$0xff] %v3644_v47  ;;  %v349_v56 = vmul.f32 %v3327_v1, %v314_v29  ;;  %v528_v59 = vpack.c.b16 %v509_v48, %v508_v28  ;;  %v350_v0 = vmul.f32 %v3327_v1, %v315_v36  ;;  %v351_v7 = vmul.f32 %v3327_v1, %v316_v53  ;;  %v3984_v47 = vld [vmem:[#allocation2 + $0x3c] sm:$0xff]  }
  0x6d   : > { %v447_v63 = vpack.c.bf16 %v415_v51, %v415_v51  ;;  %v3652_v3 = vsel %vm1123_vm4, %v1242_v46, %v1246_v49  ;;  %v615_v5 = vor.u32 %v613_v16, %v612_v54  ;;  %v706_v62 = vsel %vm3382_vm3, %v612_v54, 0 }
  0x6e   : > { %5273 = vst [vmem:[#allocation14_spill] sm:$0xff] %v3652_v3  ;;  %1348 = vrot.lane.b32.xlu2 %v3652_v3, %s3270_s7  ;;  %v1250_v10 = vor.u32 %v1248_v40, %v1246_v49  ;;  %v617_v12 = vshrl.u32 %v528_v59, 16  ;;  %v778_v13 = vunpack.c.l.b16 %v706_v62  ;;  %v510_v18 = vunpack.c.l.b16 %v446_v45 }
  0x6f   : > { %v690_v20 = vsel %vm3382_vm3, 0, %v615_v5  ;;  %v620_v23 = vshll.u32 %v528_v59, 16  ;;  %v511_v25 = vunpack.c.l.b16 %v447_v63  ;;  %v384_v27 = vadd.f32 %v3340_v2, %v349_v56  ;;  %v317_v59 = vld [vmem:[%s3335_s28 + $0xf8] sm:$0xff] }
  0x70   : > { %v776_v28 = vunpack.c.l.b16 %v690_v20  ;;  %v777_v1 = vunpack.c.h.b16 %v690_v20  ;;  %v619_v35 = vrot.slane %v617_v12, 7  ;;  %v826_v36 = vpack.c.b16 %v778_v13, %v778_v13 }
  0x71   : > { %v3659_v15 = vld [vmem:[#allocation2 + $0x80] sm:$0xff]   ;;  %v385_v37 = vadd.f32 %v3340_v2, %v350_v0  ;;  %v529_v46 = vpack.c.b16 %v511_v25, %v510_v18  ;;  %v416_v49 = vmax.f32 %v384_v27, 0.0  ;;  %vm2548_vm11 = vcmask 1041408  }
  0x72   : > { %v1252_v14 = vshll.u32 %v3659_v15, 16  ;;  %v3665_v29 = vld [vmem:[#allocation2 + $0x88] sm:$0xff]   ;;  %v1256_v33 = vshrl.u32 %v3659_v15, 16  ;;  %v824_v42 = vpack.c.b16 %v776_v28, %v776_v28  ;;  %v825_v16 = vpack.c.b16 %v777_v1, %v777_v1  ;;  %922 = vst.msk [vmem:[#allocation2 + $0x98] sm:$0xf] %vm273_vm0, %v826_v36 }
  0x73   : > { %v1260_v34 = vshll.u32 %v3665_v29, 16  ;;  %v622_v51 = vor.u32 %v620_v23, %v619_v35  ;;  %v707_v53 = vsel %vm3382_vm3, %v619_v35, 0  ;;  %v624_v56 = vshrl.u32 %v529_v46, 16  ;;  %v3233_v27 = vld [vmem:[%s5197_s0] ss:$0 sm:$0xff] }
  0x74   : > { %v1254_v40 = vrot.slane %v1252_v14, 1  ;;  %920 = vst.msk [vmem:[#allocation2 + $0x90] sm:$0xf] %vm273_vm0, %v824_v42  ;;  %v627_v2 = vshll.u32 %v529_v46, 16  ;;  %v1264_v63 = vshrl.u32 %v3665_v29, 16  ;;  %v781_v5 = vunpack.c.l.b16 %v707_v53 }
  0x75   : > { %v1262_v48 = vrot.slane %v1260_v34, 1  ;;  %921 = vst.msk [vmem:[#allocation2 + $0x94] sm:$0xf] %vm273_vm0, %v825_v16  ;;  %v691_v0 = vsel %vm3382_vm3, 0, %v622_v51  ;;  %v417_v62 = vmax.f32 %v385_v37, 0.0  ;;  %v626_v13 = vrot.slane %v624_v56, 7 }
  0x76   : > { %v3674_v54 = vsel %vm1123_vm4, %v1250_v10, %v1254_v40  ;;  %v1258_v45 = vor.u32 %v1256_v33, %v1254_v40  ;;  %v779_v12 = vunpack.c.l.b16 %v691_v0  ;;  %v780_v18 = vunpack.c.h.b16 %v691_v0  ;;  %v3234_v40 = vld [vmem:[%s5198_s1] ss:$0 sm:$0xff] }
  0x77   : > { %1350 = vrot.lane.b32.xlu0 %v3674_v54, %s3270_s7  ;;  %v829_v20 = vpack.c.b16 %v781_v5, %v781_v5  ;;  %v448_v23 = vpack.c.bf16 %v416_v49, %v416_v49  ;;  %v449_v25 = vpack.c.bf16 %v417_v62, %v417_v62  ;;  %v352_v14 = vmul.f32 %v3233_v27, %v317_v59 }
  0x78   : > { %v3685_v10 = vsel %vm1123_vm4, %v1258_v45, %v1262_v48  ;;  %v827_v28 = vpack.c.b16 %v779_v12, %v779_v12  ;;  %v629_v1 = vor.u32 %v627_v2, %v626_v13  ;;  %v828_v33 = vpack.c.b16 %v780_v18, %v780_v18 }
  0x79   : > { %5274 = vst [vmem:[#allocation15_spill] sm:$0xff] %v3685_v10  ;;  %1352 = vrot.lane.b32.xlu1 %v3685_v10, %s3270_s7  ;;  %v708_v34 = vsel %vm3382_vm3, %v626_v13, 0  ;;  %v512_v35 = vunpack.c.l.b16 %v448_v23  ;;  %v513_v36 = vunpack.c.l.b16 %v449_v25  ;;  %v386_v42 = vadd.f32 %v3234_v40, %v351_v7 }
  0x7a   : > { %925 = vst.msk [vmem:[#allocation2 + $0xa4] sm:$0xf] %vm273_vm0, %v829_v20  ;;  %v784_v37 = vunpack.c.l.b16 %v708_v34  ;;  %v692_v16 = vsel %vm3382_vm3, 0, %v629_v1  ;;  %v387_v46 = vadd.f32 %v3234_v40, %v352_v14  ;;  %v1266_v2 = vor.u32 %v1264_v63, %v1262_v48 }
  0x7b   : > { %923 = vst.msk [vmem:[#allocation2 + $0x9c] sm:$0xf] %vm273_vm0, %v827_v28  ;;  %v782_v51 = vunpack.c.l.b16 %v692_v16  ;;  %v783_v53 = vunpack.c.h.b16 %v692_v16  ;;  %v530_v49 = vpack.c.b16 %v513_v36, %v512_v35  ;;  %v418_v59 = vmax.f32 %v386_v42, 0.0 }
  0x7c   : > { %924 = vst.msk [vmem:[#allocation2 + $0xa0] sm:$0xf] %vm273_vm0, %v828_v33  ;;  %v832_v45 = vpack.c.b16 %v784_v37, %v784_v37  ;;  %v3702_v56 = vld [vmem:[#allocation2 + $0x90] sm:$0xff]   ;;  %v419_v0 = vmax.f32 %v387_v46, 0.0  ;;  %vm2386_vm12 = vcmask 228352   ;;  %vm2337_vm13 = vcmask 195584  }
  0x7d   : > { %v1268_v5 = vshll.u32 %v3702_v56, 16  ;;  %v1272_v7 = vshrl.u32 %v3702_v56, 16  ;;  %v830_v62 = vpack.c.b16 %v782_v51, %v782_v51  ;;  %v831_v12 = vpack.c.b16 %v783_v53, %v783_v53 }
  0x7e   : > { %928 = vst.msk [vmem:[#allocation2 + $0xb0] sm:$0xf] %vm273_vm0, %v832_v45  ;;  %v631_v13 = vshrl.u32 %v530_v49, 16  ;;  %v634_v18 = vshll.u32 %v530_v49, 16  ;;  %v450_v20 = vpack.c.bf16 %v418_v59, %v418_v59  ;;  %v451_v23 = vpack.c.bf16 %v419_v0, %v419_v0 }
  0x7f   : > { %v1270_v25 = vrot.slane %v1268_v5, 1  ;;  %926 = vst.msk [vmem:[#allocation2 + $0xa8] sm:$0xf] %vm273_vm0, %v830_v62  ;;  %vm2435_vm14 = vcmask 261120   ;;  %vm2499_vm15 = vcmask 293888  }
  0x80   : > { %927 = vst.msk [vmem:[#allocation2 + $0xac] sm:$0xf] %vm273_vm0, %v831_v12  ;;  %v633_v48 = vrot.slane %v631_v13, 7  ;;  %v514_v63 = vunpack.c.l.b16 %v450_v20  ;;  %v515_v27 = vunpack.c.l.b16 %v451_v23 }
  0x81   : > { %v3710_v14 = vsel %vm1123_vm4, %v1266_v2, %v1270_v25  ;;  %v1274_v1 = vor.u32 %v1272_v7, %v1270_v25 }
  0x82   : > { %5275 = vst [vmem:[#allocation16_spill] sm:$0xff] %v3710_v14  ;;  %v3712_v28 = vld [vmem:[#allocation2 + $0x98] sm:$0xff]   ;;  %1354 = vrot.lane.b32.xlu2 %v3710_v14, %s3270_s7  ;;  %v636_v36 = vor.u32 %v634_v18, %v633_v48  ;;  %v531_v37 = vpack.c.b16 %v515_v27, %v514_v63  ;;  %v709_v16 = vsel %vm3382_vm3, %v633_v48, 0  ;;  %v4048_v14 = vld [vmem:[#allocation2 + $0x8c] sm:$0xff]  }
  0x83   : > { %v1276_v33 = vshll.u32 %v3712_v28, 16  ;;  %v3717_v34 = vld [vmem:[#allocation2 + $0xa0] sm:$0xff]   ;;  %v1280_v35 = vshrl.u32 %v3712_v28, 16  ;;  %v787_v0 = vunpack.c.l.b16 %v709_v16  ;;  %5319 = vst [vmem:[#allocation60_spill] sm:$0xff] %v4048_v14 }
  0x84   : > { %v1284_v40 = vshll.u32 %v3717_v34, 16  ;;  %v1288_v42 = vshrl.u32 %v3717_v34, 16  ;;  %v693_v51 = vsel %vm3382_vm3, 0, %v636_v36  ;;  %v638_v53 = vshrl.u32 %v531_v37, 16  ;;  %v3048_v16 = vld [vmem:[#allocation2] sm:$0xe] }
  0x85   : > { %v1278_v46 = vrot.slane %v1276_v33, 1  ;;  %v641_v49 = vshll.u32 %v531_v37, 16  ;;  %v785_v2 = vunpack.c.l.b16 %v693_v51  ;;  %v786_v59 = vunpack.c.h.b16 %v693_v51 }
  0x86   : > { %v1286_v45 = vrot.slane %v1284_v40, 1  ;;  %v3729_v62 = vrot.slane %v638_v53, 7  ;;  %v835_v20 = vpack.c.b16 %v787_v0, %v787_v0  ;;  %v4066_v52 = vld [vmem:[#allocation2 + $0xa4] sm:$0xff]  }
  0x87   : > { %v3727_v5 = vsel %vm1123_vm4, %v1274_v1, %v1278_v46  ;;  %v1282_v7 = vor.u32 %v1280_v35, %v1278_v46  ;;  %v3733_v12 = vld [vmem:[#allocation2 + $0xa8] sm:$0xff]   ;;  %v833_v13 = vpack.c.b16 %v785_v2, %v785_v2  ;;  %v834_v18 = vpack.c.b16 %v786_v59, %v786_v59 }
  0x88   : > { %5276 = vst [vmem:[#allocation17_spill] sm:$0xff] %v3727_v5  ;;  %1356 = vrot.lane.b32.xlu0 %v3727_v5, %s3270_s7  ;;  %v1290_v23 = vor.u32 %v1288_v42, %v1286_v45  ;;  %v1292_v25 = vshll.u32 %v3733_v12, 16  ;;  %v643_v63 = vor.u32 %v641_v49, %v3729_v62  ;;  %v1296_v36 = vshrl.u32 %v3733_v12, 16  ;;  %v3047_v42 = vld [vmem:[#allocation2] sm:$0xf0]  ;;  %v4008_v5 = vld [vmem:[#allocation2 + $0x4c] sm:$0xff]  }
  0x89   : > { %v3737_v48 = vsel %vm1123_vm4, %v1282_v7, %v1286_v45  ;;  %929 = vst.msk [vmem:[#allocation2 + $0xb4] sm:$0xf] %vm273_vm0, %v833_v13  ;;  %v3049_v59 = vor.u32 %v3048_v16, %v3047_v42  ;;  %v710_v6 = vsel %vm3382_vm3, %v3729_v62, 0  ;;  %v4030_v62 = vld [vmem:[#allocation2 + $0x74] sm:$0xff]  }
  0x8a   : > { %5277 = vst [vmem:[#allocation18_spill] sm:$0xff] %v3737_v48  ;;  %1358 = vrot.lane.b32.xlu1 %v3737_v48, %s3270_s7  ;;  %v1294_v27 = vrot.slane %v1292_v25, 1  ;;  %v3745_v1 = vsel %vm3382_vm3, 0, %v643_v63  ;;  %v3988_v48 = vld [vmem:[#allocation2 + $0x34] sm:$0xff]  }
  0x8b   : > { %930 = vst.msk [vmem:[#allocation2 + $0xb8] sm:$0xf] %vm273_vm0, %v834_v18  ;;  %v788_v33 = vunpack.c.l.b16 %v3745_v1  ;;  %v789_v30 = vunpack.c.h.b16 %v3745_v1 }
  0x8c   : > { %931 = vst.msk [vmem:[#allocation2 + $0xbc] sm:$0xf] %vm273_vm0, %v835_v20  ;;  %v3751_v35 = vsel %vm1123_vm4, %v1290_v23, %v1294_v27  ;;  %v1298_v46 = vor.u32 %v1296_v36, %v1294_v27  ;;  %v1373_v20 = vrot.slane %v3431_v17, 1  ;;  %v1372_v27 = vrot.slane %v3049_v59, 1 }
  0x8d   : > { %5278 = vst [vmem:[#allocation19_spill] sm:$0xff] %v3751_v35  ;;  %1360 = vrot.lane.b32.xlu2 %v3751_v35, %s3270_s7  ;;  %v836_v37 = vpack.c.b16 %v788_v33, %v788_v33  ;;  %v1375_v36 = vrot.slane %v3448_v43, 1  ;;  %v1377_v43 = vrot.slane %v3458_v50, 1  ;;  %v1387_v50 = vrot.slane %v3512_v57, 1  ;;  %v3959_v35 = vld [vmem:[#allocation2 + $0x20] sm:$0xff]  }
  0x8e   : > { %v1374_v17 = vsel %vm1371_vm5, %v1372_v27, %v1373_v20  ;;  %v1393_v57 = vrot.slane %v3561_v19, 1  ;;  %v1399_v19 = vrot.slane %v3625_v60, 1  ;;  %v1405_v60 = vrot.slane %v3665_v29, 1  ;;  %5306 = vst [vmem:[#allocation47_spill] sm:$0xff] %v3959_v35 }
  0x8f   : > { %932 = vst.msk [vmem:[#allocation2 + $0xc0] sm:$0xf] %vm273_vm0, %v836_v37  ;;  %v1378_v59 = vsel %vm1371_vm5, %v1375_v36, %v1377_v43  ;;  %v837_v39 = vpack.c.b16 %v789_v30, %v789_v30  ;;  %v4028_v30 = vld [vmem:[#allocation2 + $0x64] sm:$0xff]  }
  0x90   : > { %v3757_v40 = vld [vmem:[#allocation2 + $0xb0] sm:$0xff]  }
  0x91   : > { %v1300_v51 = vshll.u32 %v3757_v40, 16  ;;  %v1304_v53 = vshrl.u32 %v3757_v40, 16  ;;  %933 = vst.msk [vmem:[#allocation2 + $0xc4] sm:$0xf] %vm273_vm0, %v837_v39 }
  0x93   : > { %v3761_v49 = vld [vmem:[#allocation2 + $0xb8] sm:$0xff]   ;;  %v1302_v45 = vrot.slane %v1300_v51, 1 }
  0x94   : > { %v1308_v2 = vshll.u32 %v3761_v49, 16  ;;  %v1312_v25 = vshrl.u32 %v3761_v49, 16 }
  0x95   : > { %v3765_v0 = vsel %vm1123_vm4, %v1298_v46, %v1302_v45  ;;  %v1306_v13 = vor.u32 %v1304_v53, %v1302_v45  ;;  %v1376_v46 = vsel %vm1371_vm5, %v1373_v20, %v1375_v36  ;;  %v3788_v53 = vrot.slane %v3436_v26, 1 }
  0x96   : > { %v1310_v7 = vrot.slane %v1308_v2, 1  ;;  %1362 = vrot.lane.b32.xlu0 %v3765_v0, %s3270_s7  ;;  %v988_v18 = vld [vmem:[#allocation2 + $0xc0] sm:$0x1]  ;;  %v1381_v45 = vrot.slane %v3438_v32, 1  ;;  %v1385_v26 = vrot.slane %v3498_v61, 1  ;;  %v1383_v32 = vrot.slane %v3470_v11, 1 }
  0x97   : > { %v1121_v23 = vunpack.c.l.b16 %v988_v18  ;;  %5281 = vst [vmem:[#allocation22_spill] sm:$0xff] %v3788_v53  ;;  %v1380_v2 = vsel %vm1371_vm5, %v1377_v43, %v3788_v53  ;;  %v1391_v61 = vrot.slane %v3556_v9, 1  ;;  %v1389_v11 = vrot.slane %v3527_v21, 1 }
  0x98   : > { %v3772_v63 = vsel %vm1123_vm4, %v1306_v13, %v1310_v7  ;;  %v3779_v37 = vor.u32 %v1312_v25, %v1310_v7  ;;  %v3799_v7 = vsel %vm1371_vm5, %v3788_v53, %v1381_v45  ;;  %v3809_v13 = vsel %vm1371_vm5, %v1383_v32, %v1385_v26  ;;  %v3829_v25 = vpop.permute.xlu2 %1328 }
  0x99   : > { %5279 = vst [vmem:[#allocation20_spill] sm:$0xff] %v3772_v63  ;;  %1364 = vrot.lane.b32.xlu1 %v3772_v63, %s3270_s7  ;;  %v3776_v33 = vpack.c.b16 %v1121_v23, %v1121_v23  ;;  %v3812_v18 = vsel %vm1371_vm5, %v1381_v45, %v1383_v32  ;;  %v3815_v20 = vsel %vm1371_vm5, %v1385_v26, %v1387_v50  ;;  %v1397_v36 = vrot.slane %v3617_v55, 1  ;;  %v4085_v63 = vld [vmem:[#allocation2 + $0xac] sm:$0xff]  }
  0x9a   : > { %5280 = vst [vmem:[#allocation21_spill] sm:$0xff] %v3779_v37  ;;  %v3827_v23 = vsel %vm1371_vm5, %v1389_v11, %v1391_v61  ;;  %v3832_v27 = vsel %vm1371_vm5, %v1387_v50, %v1389_v11  ;;  %v3835_v9 = vsel %vm1371_vm5, %v1391_v61, %v1393_v57  ;;  %v1395_v21 = vrot.slane %v3591_v8, 1 }
  0x9b   : > { %v1316_v42 = vshll.u32 %v3776_v33, 16  ;;  %5282 = vst [vmem:[#allocation23_spill] sm:$0xff] %v3799_v7  ;;  %v1401_v8 = vrot.slane %v3634_v31, 1  ;;  %v1409_v31 = vrot.slane %v3712_v28, 1  ;;  %v1411_v26 = vrot.slane %v3717_v34, 1 }
  0x9c   : > { %5283 = vst [vmem:[#allocation24_spill] sm:$0xff] %v3809_v13  ;;  %v1413_v34 = vrot.slane %v3733_v12, 1 }
  0x9d   : > { %v1318_v16 = vrot.slane %v1316_v42, 1  ;;  %5284 = vst [vmem:[#allocation25_spill] sm:$0xff] %v3812_v18  ;;  %v3847_v42 = vsel %vm1371_vm5, %v1395_v21, %v1397_v36  ;;  %v3899_v28 = vsel %vm1371_vm5, %v1409_v31, %v1411_v26 }
  0x9e   : > { %1421 = vrot.lane.b32.xlu0 %v1374_v17, %s3271_s12  ;;  %5285 = vst [vmem:[#allocation26_spill] sm:$0xff] %v3815_v20  ;;  %v3850_v17 = vsel %vm1371_vm5, %v1393_v57, %v1395_v21  ;;  %v3912_v57 = vrot.slane %v3761_v49, 1 }
  0x9f   : > { %v1319_v51 = vsel %vm1123_vm4, %v3779_v37, %v1318_v16  ;;  %5286 = vst [vmem:[#allocation27_spill] sm:$0xff] %v3827_v23  ;;  %v3853_v16 = vsel %vm1371_vm5, %v1397_v36, %v1399_v19 }
  0xa0   : > { %1366 = vrot.lane.b32.xlu2 %v1319_v51, %s3270_s7  ;;  %5287 = vst [vmem:[#allocation28_spill] sm:$0xff] %v3829_v25  ;;  %v3857_v55 = vpop.permute.xlu2 %1330 }
  0xa1   : > { %1423 = vrot.lane.b32.xlu1 %v1376_v46, %s3271_s12  ;;  %5288 = vst [vmem:[#allocation29_spill] sm:$0xff] %v3832_v27  ;;  %v1403_v46 = vrot.slane %v3659_v15, 1 }
  0xa2   : > { %5289 = vst [vmem:[#allocation30_spill] sm:$0xff] %v3835_v9 }
  0xa3   : > { %5290 = vst [vmem:[#allocation31_spill] sm:$0xff] %v3847_v42  ;;  %v3869_v43 = vsel %vm1371_vm5, %v1401_v8, %v1403_v46  ;;  %v3877_v15 = vsel %vm1371_vm5, %v1403_v46, %v1405_v60 }
  0xa4   : > { %5291 = vst [vmem:[#allocation32_spill] sm:$0xff] %v3850_v17 }
  0xa5   : > { %5292 = vst [vmem:[#allocation33_spill] sm:$0xff] %v3853_v16 }
  0xa6   : > { %1427 = vrot.lane.b32.xlu0 %v1380_v2, %s3271_s12  ;;  %v3874_v2 = vsel %vm1371_vm5, %v1399_v19, %v1401_v8  ;;  %5294 = vst [vmem:[#allocation35_spill] sm:$0xff] %v3877_v15  ;;  %v3920_v19 = vsel %vm1371_vm5, %v1411_v26, %v1413_v34  ;;  %v3928_v8 = vld [vmem:[#allocation2 + $0x8] sm:$0xff]  }
  0xa7   : > { %v3866_v51 = vpop.permute.xlu0 %1320  ;;  %5293 = vst [vmem:[#allocation34_spill] sm:$0xff] %v3874_v2 }
  0xa8   : > { %1425 = vrot.lane.b32.xlu2 %v1378_v59, %s3271_s12  ;;  %v1407_v59 = vrot.slane %v3702_v56, 1  ;;  %5297 = vst [vmem:[#allocation38_spill] sm:$0xff] %v3899_v28  ;;  %v1415_v56 = vrot.slane %v3757_v40, 1 }
  0xa9   : > { %1429 = vrot.lane.b32.xlu1 %v3799_v7, %s3271_s12  ;;  %5299 = vst [vmem:[#allocation40_spill] sm:$0xff] %v3912_v57 }
  0xaa   : > { %v3886_v29 = vpop.permute.xlu2 %1336  ;;  %v3891_v32 = vsel %vm1371_vm5, %v1407_v59, %v1409_v31  ;;  %v3896_v61 = vsel %vm1371_vm5, %v1405_v60, %v1407_v59  ;;  %v3917_v21 = vsel %vm1371_vm5, %v1413_v34, %v1415_v56  ;;  %5301 = vst [vmem:[#allocation42_spill] sm:$0xff] %v3920_v19  ;;  %v3924_v46 = vsel %vm1371_vm5, %v1415_v56, %v3912_v57  ;;  %v3931_v31 = vld [vmem:[#allocation2 + $0x10] sm:$0xff]  }
  0xab   : > { %5295 = vst [vmem:[#allocation36_spill] sm:$0xff] %v3891_v32  ;;  %v2925_v60 = vunpack.c.h.b16 %v3928_v8  ;;  %v5210_v59 = vunpack.c.l.b16 %v3931_v31  ;;  %v1419_v56 = vrot.slane %v3776_v33, 1 }
  0xac   : > { %5296 = vst [vmem:[#allocation37_spill] sm:$0xff] %v3896_v61 }
  0xad   : > { %5302 = vst [vmem:[#allocation43_spill] sm:$0xff] %v3924_v46  ;;  %v3945_v34 = vpack.c.b16 %v5210_v59, %v2925_v60  ;;  %v1420_v3 = vsel %vm1371_vm5, %v3912_v57, %v1419_v56  ;;  %v2936_v60 = vunpack.c.l.b16 %v3959_v35  ;;  %v3966_v56 = vld [vmem:[#allocation2 + $0x24] sm:$0xff]  }
  0xae   : > { %1433 = vrot.lane.b32.xlu0 %v3809_v13, %s3271_s12  ;;  %v3871_v45 = vpop.permute.xlu1 %1324  ;;  %v4002_v13 = vld [vmem:[#allocation2 + $0x54] sm:$0xff]   ;;  %v1578_v41 = vshrl.u32 %v3966_v56, 16 }
  0xaf   : > { %v3893_v50 = vpop.permute.xlu0 %1322 }
  0xb0   : > { %1431 = vrot.lane.b32.xlu2 %v3812_v18, %s3271_s12 }
  0xb1   : > { %1435 = vrot.lane.b32.xlu1 %v3815_v20, %s3271_s12  ;;  %v3974_v20 = vld [vmem:[#allocation2 + $0x2c] sm:$0xff]  }
  0xb6   : > { %1439 = vrot.lane.b32.xlu0 %v3827_v23, %s3271_s12  ;;  %v3903_v11 = vpop.permute.xlu1 %1326 }
  0xb7   : > { %5298 = vst [vmem:[#allocation39_spill] sm:$0xff] %v3903_v11 }
  0xb8   : > { %1437 = vrot.lane.b32.xlu2 %v3832_v27, %s3271_s12  ;;  %v3949_v27 = vld [vmem:[#allocation2 + $0x14] sm:$0xff]  }
  0xb9   : > { %1441 = vrot.lane.b32.xlu1 %v3835_v9, %s3271_s12  ;;  %v4064_v9 = vld [vmem:[#allocation2 + $0x94] sm:$0xff]   ;;  %v1562_v10 = vshrl.u32 %v3949_v27, 16 }
  0xbc   : > { %v3914_v36 = vpop.permute.xlu2 %1342 }
  0xbd   : > { %5300 = vst [vmem:[#allocation41_spill] sm:$0xff] %v3914_v36 }
  0xbe   : > { %1445 = vrot.lane.b32.xlu0 %v3847_v42, %s3271_s12  ;;  %v3940_v26 = vpop.permute.xlu1 %1334 }
  0xbf   : > { %5304 = vst [vmem:[#allocation45_spill] sm:$0xff] %v3940_v26 }
  0xc0   : > { %1443 = vrot.lane.b32.xlu2 %v3850_v17, %s3271_s12  ;;  %v4010_v17 = vld [vmem:[#allocation2 + $0x5c] sm:$0xff]  }
  0xc1   : > { %1447 = vrot.lane.b32.xlu1 %v3853_v16, %s3271_s12 }
  0xc6   : > { %1451 = vrot.lane.b32.xlu0 %v3869_v43, %s3271_s12 }
  0xc8   : > { %1449 = vrot.lane.b32.xlu2 %v3874_v2, %s3271_s12  ;;  %v3934_v2 = vpop.permute.xlu0 %1332  ;;  %v3947_v38 = vpop.permute.xlu2 %1348 }
  0xc9   : > { %1453 = vrot.lane.b32.xlu1 %v3877_v15, %s3271_s12  ;;  %5303 = vst [vmem:[#allocation44_spill] sm:$0xff] %v3934_v2 }
  0xca   : > { %5305 = vst [vmem:[#allocation46_spill] sm:$0xff] %v3947_v38 }
  0xcd   : > { %v3968_v16 = vpop.permute.xlu1 %1340 }
  0xce   : > { %1457 = vrot.lane.b32.xlu0 %v3891_v32, %s3271_s12  ;;  %5308 = vst [vmem:[#allocation49_spill] sm:$0xff] %v3968_v16  ;;  %v790_v32 = vunpack.c.l.b16 %v710_v6  ;;  %v4026_v6 = vld [vmem:[#allocation2 + $0x6c] sm:$0xff]   ;;  %v4087_v16 = vld [vmem:[#allocation2 + $0xbc] sm:$0xff]  }
  0xcf   : > { %5322 = vst [vmem:[#allocation63_spill] sm:$0xff] %v4087_v16 }
  0xd0   : > { %1455 = vrot.lane.b32.xlu2 %v3896_v61, %s3271_s12  ;;  %v3964_v59 = vpop.permute.xlu0 %1338  ;;  %v838_v44 = vpack.c.b16 %v790_v32, %v790_v32  ;;  %v4044_v32 = vld [vmem:[#allocation2 + $0x84] sm:$0xff]   ;;  %v4046_v61 = vld [vmem:[#allocation2 + $0x7c] sm:$0xff]  }
  0xd1   : > { %1459 = vrot.lane.b32.xlu1 %v3899_v28, %s3271_s12  ;;  %5307 = vst [vmem:[#allocation48_spill] sm:$0xff] %v3964_v59 }
  0xd2   : > { %934 = vst.msk [vmem:[#allocation2 + $0xc8] sm:$0xf] %vm273_vm0, %v838_v44 }
  0xd3   : > { %5317 = vst [vmem:[#allocation58_spill] sm:$0xff] %v4044_v32 }
  0xd4   : > { %5318 = vst [vmem:[#allocation59_spill] sm:$0xff] %v4046_v61 }
  0xd6   : > { %1463 = vrot.lane.b32.xlu0 %v3917_v21, %s3271_s12 }
  0xd8   : > { %1461 = vrot.lane.b32.xlu2 %v3920_v19, %s3271_s12  ;;  %v3956_v19 = vld [vmem:[#allocation2 + $0x18] sm:$0xff]  }
  0xd9   : > { %1465 = vrot.lane.b32.xlu1 %v3924_v46, %s3271_s12  ;;  %v5217_v33 = vunpack.c.h.b16 %v3956_v19  ;;  %v1551_v46 = vshrl.u32 %v3945_v34, 16  ;;  %v4107_v36 = vld [vmem:[#allocation2 + $0xc4] sm:$0xff]  }
  0xdb   : > { %v3986_v28 = vpop.permute.xlu0 %1344 }
  0xdc   : > { %v3976_v24 = vpop.permute.xlu2 %1354  ;;  %5310 = vst [vmem:[#allocation51_spill] sm:$0xff] %v3986_v28 }
  0xdd   : > { %5309 = vst [vmem:[#allocation50_spill] sm:$0xff] %v3976_v24 }
  0xde   : > { %1499 = vrot.lane.b32.xlu0 %v3945_v34, %s3272_s13 }
  0xe0   : > { %1467 = vrot.lane.b32.xlu2 %v1420_v3, %s3271_s12  ;;  %v3972_v3 = vpack.c.b16 %v2936_v60, %v5217_v33  ;;  %v3990_v60 = vld [vmem:[#allocation2 + $0x44] sm:$0xff]   ;;  %v3992_v33 = vpop.permute.xlu1 %1346 }
  0xe1   : > { %1501 = vrot.lane.b32.xlu1 %v3949_v27, %s3272_s13  ;;  %5311 = vst [vmem:[#allocation52_spill] sm:$0xff] %v3992_v33 }
  0xe2   : > { %v1566_v26 = vshll.u32 %v3972_v3, 16  ;;  %v1570_v35 = vshrl.u32 %v3972_v3, 16 }
  0xe6   : > { %1505 = vrot.lane.b32.xlu0 %v3966_v56, %s3272_s13 }
  0xe7   : > { %v3998_v42 = vpop.permute.xlu2 %1360 }
  0xe8   : > { %1503 = vrot.lane.b32.xlu2 %v3972_v3, %s3272_s13  ;;  %5312 = vst [vmem:[#allocation53_spill] sm:$0xff] %v3998_v42  ;;  %v4082_v42 = vld [vmem:[#allocation2 + $0xb4] sm:$0xff]  }
  0xe9   : > { %1507 = vrot.lane.b32.xlu1 %v3974_v20, %s3272_s13  ;;  %v4012_v18 = vpop.permute.xlu0 %1350 }
  0xea   : > { %5313 = vst [vmem:[#allocation54_spill] sm:$0xff] %v4012_v18  ;;  %v1558_v18 = vshll.u32 %v3949_v27, 16 }
  0xeb   : > { %v4016_v57 = vpop.permute.xlu1 %1352 }
  0xec   : > { %5314 = vst [vmem:[#allocation55_spill] sm:$0xff] %v4016_v57  ;;  %v1553_v57 = vshll.u32 %v3945_v34, 16  ;;  %v1560_v24 = vrot.slane %v1558_v18, 1  ;;  %v1574_v34 = vshll.u32 %v3966_v56, 16  ;;  %v1582_v18 = vshll.u32 %v3974_v20, 16 }
  0xee   : > { %1511 = vrot.lane.b32.xlu0 %v3984_v47, %s3272_s13  ;;  %v1555_v28 = vrot.slane %v1553_v57, 1  ;;  %v1564_v38 = vor.u32 %v1562_v10, %v1560_v24  ;;  %v1576_v25 = vrot.slane %v1574_v34, 1  ;;  %v1584_v11 = vrot.slane %v1582_v18, 1 }
  0xef   : > { %v1586_v10 = vshrl.u32 %v3974_v20, 16  ;;  %v1606_v34 = vshll.u32 %v3990_v60, 16 }
  0xf0   : > { %1509 = vrot.lane.b32.xlu2 %v3988_v48, %s3272_s13  ;;  %v1556_v59 = vor.u32 %v1555_v28, %v1551_v46  ;;  %v1568_v46 = vrot.slane %v1566_v26, 1  ;;  %v1598_v26 = vshll.u32 %v3984_v47, 16 }
  0xf1   : > { %1513 = vrot.lane.b32.xlu1 %v3990_v60, %s3272_s13 }
  0xf2   : > { %v1561_v28 = vsel %vm1123_vm4, %v1556_v59, %v1560_v24  ;;  %v1572_v24 = vor.u32 %v1570_v35, %v1568_v46 }
  0xf4   : > { %v1577_v35 = vsel %vm1123_vm4, %v1572_v24, %v1576_v25  ;;  %v1630_v24 = vshll.u32 %v4010_v17, 16 }
  0xf6   : > { %1517 = vrot.lane.b32.xlu0 %v4002_v13, %s3272_s13 }
  0xf8   : > { %1515 = vrot.lane.b32.xlu2 %v4008_v5, %s3272_s13 }
  0xf9   : > { %1519 = vrot.lane.b32.xlu1 %v4010_v17, %s3272_s13 }
  0xfa   : > { %v4024_v4 = vpop.permute.xlu2 %1366  ;;  %v4034_v39 = vpop.permute.xlu0 %1356 }
  0xfb   : > { %5315 = vst [vmem:[#allocation56_spill] sm:$0xff] %v4034_v39 }
  0xfc   : > { %v4040_v44 = vpop.permute.xlu1 %1358 }
  0xfd   : > { %5316 = vst [vmem:[#allocation57_spill] sm:$0xff] %v4040_v44  ;;  %v4062_v44 = vld [vmem:[#allocation2 + $0x9c] sm:$0xff]  }
  0xfe   : > { %1523 = vrot.lane.b32.xlu0 %v4026_v6, %s3272_s13 }
 0x100   : > { %1521 = vrot.lane.b32.xlu2 %v4028_v30, %s3272_s13 }
 0x101   : > { %1525 = vrot.lane.b32.xlu1 %v4030_v62, %s3272_s13 }
 0x102   : > { %v4042_v1 = vpop.permute.xlu2 %1425 }
 0x106   : > { %1529 = vrot.lane.b32.xlu0 %v4044_v32, %s3272_s13 }
 0x108   : > { %1527 = vrot.lane.b32.xlu2 %v4046_v61, %s3272_s13  ;;  %v4056_v39 = vpop.permute.xlu0 %1362 }
 0x109   : > { %1531 = vrot.lane.b32.xlu1 %v4048_v14, %s3272_s13 }
 0x10a   : > { %v4058_v37 = vpop.permute.xlu2 %1431 }
 0x10b   : > { %v4060_v7 = vpop.permute.xlu1 %1364 }
 0x10e   : > { %1535 = vrot.lane.b32.xlu0 %v4062_v44, %s3272_s13 }
 0x110   : > { %1533 = vrot.lane.b32.xlu2 %v4064_v9, %s3272_s13  ;;  %v4075_v58 = vpop.permute.xlu0 %1421 }
 0x111   : > { %1537 = vrot.lane.b32.xlu1 %v4066_v52, %s3272_s13 }
 0x112   : > { %v4078_v15 = vpop.permute.xlu2 %1437 }
 0x113   : > { %5320 = vst [vmem:[#allocation61_spill] sm:$0xff] %v4078_v15  ;;  %v4080_v33 = vpop.permute.xlu1 %1423  ;;  %v1608_v15 = vrot.slane %v1606_v34, 1 }
 0x114   : > { %5321 = vst [vmem:[#allocation62_spill] sm:$0xff] %v4080_v33  ;;  %v1602_v33 = vshrl.u32 %v3984_v47, 16 }
 0x116   : > { %1541 = vrot.lane.b32.xlu0 %v4082_v42, %s3272_s13 }
 0x118   : > { %1539 = vrot.lane.b32.xlu2 %v4085_v63, %s3272_s13  ;;  %v4097_v57 = vpop.permute.xlu0 %1427 }
 0x119   : > { %1543 = vrot.lane.b32.xlu1 %v4087_v16, %s3272_s13  ;;  %5323 = vst [vmem:[#allocation64_spill] sm:$0xff] %v4097_v57  ;;  %v1569_v57 = vsel %vm1123_vm4, %v1564_v38, %v1568_v46  ;;  %v1588_v38 = vor.u32 %v1586_v10, %v1584_v11  ;;  %v1600_v46 = vrot.slane %v1598_v26, 1  ;;  %v1610_v10 = vshrl.u32 %v3990_v60, 16 }
 0x11a   : > { %v4101_v2 = vpop.permute.xlu2 %1443 }
 0x11b   : > { %5324 = vst [vmem:[#allocation65_spill] sm:$0xff] %v4101_v2  ;;  %v4103_v23 = vpop.permute.xlu1 %1429  ;;  %v1580_v2 = vor.u32 %v1578_v41, %v1576_v25  ;;  %v1622_v25 = vshll.u32 %v4002_v13, 16 }
 0x11c   : > { %5325 = vst [vmem:[#allocation66_spill] sm:$0xff] %v4103_v23  ;;  %v1590_v23 = vshll.u32 %v3988_v48, 16 }
 0x11d   : > { %v1585_v41 = vsel %vm1123_vm4, %v1580_v2, %v1584_v11  ;;  %v1612_v11 = vor.u32 %v1610_v10, %v1608_v15  ;;  %v1634_v10 = vshrl.u32 %v4010_v17, 16 }
 0x11e   : > { %1746 = vrot.lane.b32.xlu0 %v1561_v28, %s3273_s14  ;;  %v1592_v28 = vrot.slane %v1590_v23, 1 }
 0x120   : > { %1545 = vrot.lane.b32.xlu2 %v4107_v36, %s3272_s13  ;;  %v4117_v59 = vpop.permute.xlu0 %1433 }
 0x121   : > { %1748 = vrot.lane.b32.xlu1 %v1569_v57, %s3273_s14  ;;  %5326 = vst [vmem:[#allocation67_spill] sm:$0xff] %v4117_v59  ;;  %v1594_v57 = vshrl.u32 %v3988_v48, 16  ;;  %v1593_v59 = vsel %vm1123_vm4, %v1588_v38, %v1592_v28 }
 0x122   : > { %v4121_v18 = vpop.permute.xlu2 %1449 }
 0x123   : > { %5327 = vst [vmem:[#allocation68_spill] sm:$0xff] %v4121_v18  ;;  %v4123_v53 = vpop.permute.xlu1 %1435  ;;  %v1604_v18 = vor.u32 %v1602_v33, %v1600_v46  ;;  %v1596_v23 = vor.u32 %v1594_v57, %v1592_v28 }
 0x124   : > { %5328 = vst [vmem:[#allocation69_spill] sm:$0xff] %v4123_v53  ;;  %v1614_v53 = vshll.u32 %v4008_v5, 16 }
 0x125   : > { %v1609_v33 = vsel %vm1123_vm4, %v1604_v18, %v1608_v15  ;;  %v1601_v28 = vsel %vm1123_vm4, %v1596_v23, %v1600_v46  ;;  %v1646_v18 = vshll.u32 %v4026_v6, 16  ;;  %v1654_v23 = vshll.u32 %v4030_v62, 16 }
 0x126   : > { %1752 = vrot.lane.b32.xlu0 %v1585_v41, %s3273_s14  ;;  %v1616_v34 = vrot.slane %v1614_v53, 1  ;;  %v1626_v41 = vshrl.u32 %v4002_v13, 16 }
 0x128   : > { %1750 = vrot.lane.b32.xlu2 %v1577_v35, %s3273_s14  ;;  %v4135_v2 = vpop.permute.xlu0 %1439  ;;  %v1624_v35 = vrot.slane %v1622_v25, 1  ;;  %v1617_v57 = vsel %vm1123_vm4, %v1612_v11, %v1616_v34 }
 0x129   : > { %1754 = vrot.lane.b32.xlu1 %v1593_v59, %s3273_s14  ;;  %5329 = vst [vmem:[#allocation70_spill] sm:$0xff] %v4135_v2  ;;  %v1618_v59 = vshrl.u32 %v4008_v5, 16  ;;  %v1632_v2 = vrot.slane %v1630_v24, 1 }
 0x12a   : > { %v4139_v26 = vpop.permute.xlu2 %1455 }
 0x12b   : > { %5330 = vst [vmem:[#allocation71_spill] sm:$0xff] %v4139_v26  ;;  %v4141_v38 = vpop.permute.xlu1 %1441  ;;  %v1628_v26 = vor.u32 %v1626_v41, %v1624_v35  ;;  %v1620_v53 = vor.u32 %v1618_v59, %v1616_v34  ;;  %v1636_v46 = vor.u32 %v1634_v10, %v1632_v2  ;;  %v1642_v41 = vshrl.u32 %v4028_v30, 16 }
 0x12c   : > { %5331 = vst [vmem:[#allocation72_spill] sm:$0xff] %v4141_v38  ;;  %v1638_v38 = vshll.u32 %v4028_v30, 16  ;;  %v1658_v10 = vshrl.u32 %v4030_v62, 16  ;;  %v1670_v30 = vshll.u32 %v4044_v32, 16 }
 0x12d   : > { %v1633_v11 = vsel %vm1123_vm4, %v1628_v26, %v1632_v2  ;;  %v1625_v34 = vsel %vm1123_vm4, %v1620_v53, %v1624_v35  ;;  %v1678_v35 = vshll.u32 %v4048_v14, 16 }
 0x12e   : > { %1758 = vrot.lane.b32.xlu0 %v1609_v33, %s3273_s14  ;;  %v1640_v24 = vrot.slane %v1638_v38, 1  ;;  %v1650_v33 = vshrl.u32 %v4026_v6, 16 }
 0x130   : > { %1756 = vrot.lane.b32.xlu2 %v1601_v28, %s3273_s14  ;;  %v4153_v15 = vpop.permute.xlu0 %1445  ;;  %v1648_v28 = vrot.slane %v1646_v18, 1  ;;  %v1641_v59 = vsel %vm1123_vm4, %v1636_v46, %v1640_v24  ;;  %v1644_v2 = vor.u32 %v1642_v41, %v1640_v24 }
 0x131   : > { %1760 = vrot.lane.b32.xlu1 %v1617_v57, %s3273_s14  ;;  %5332 = vst [vmem:[#allocation73_spill] sm:$0xff] %v4153_v15  ;;  %v1656_v57 = vrot.slane %v1654_v23, 1 }
 0x132   : > { %v4157_v25 = vpop.permute.xlu2 %1461  ;;  %v1649_v24 = vsel %vm1123_vm4, %v1644_v2, %v1648_v28  ;;  %v1702_v2 = vshll.u32 %v4066_v52, 16 }
 0x133   : > { %5333 = vst [vmem:[#allocation74_spill] sm:$0xff] %v4157_v25  ;;  %v4159_v17 = vpop.permute.xlu1 %1447  ;;  %v1652_v25 = vor.u32 %v1650_v33, %v1648_v28  ;;  %v1660_v38 = vor.u32 %v1658_v10, %v1656_v57  ;;  %v1666_v33 = vshrl.u32 %v4046_v61, 16  ;;  %v1682_v10 = vshrl.u32 %v4048_v14, 16 }
 0x134   : > { %5334 = vst [vmem:[#allocation75_spill] sm:$0xff] %v4159_v17  ;;  %v1662_v17 = vshll.u32 %v4046_v61, 16  ;;  %v1694_v28 = vshll.u32 %v4062_v44, 16  ;;  %v1730_v61 = vshrl.u32 %v4087_v16, 16 }
 0x135   : > { %v1657_v46 = vsel %vm1123_vm4, %v1652_v25, %v1656_v57 }
 0x136   : > { %1764 = vrot.lane.b32.xlu0 %v1633_v11, %s3273_s14  ;;  %v1664_v23 = vrot.slane %v1662_v17, 1  ;;  %v1674_v11 = vshrl.u32 %v4044_v32, 16 }
 0x138   : > { %1762 = vrot.lane.b32.xlu2 %v1625_v34, %s3273_s14  ;;  %v4171_v26 = vpop.permute.xlu0 %1451  ;;  %v1672_v34 = vrot.slane %v1670_v30, 1  ;;  %v1665_v41 = vsel %vm1123_vm4, %v1660_v38, %v1664_v23  ;;  %v1668_v25 = vor.u32 %v1666_v33, %v1664_v23  ;;  %v1696_v33 = vrot.slane %v1694_v28, 1 }
 0x139   : > { %1766 = vrot.lane.b32.xlu1 %v1641_v59, %s3273_s14  ;;  %5335 = vst [vmem:[#allocation76_spill] sm:$0xff] %v4171_v26  ;;  %v1680_v59 = vrot.slane %v1678_v35, 1 }
 0x13a   : > { %v4175_v53 = vpop.permute.xlu2 %1467  ;;  %v1676_v26 = vor.u32 %v1674_v11, %v1672_v34  ;;  %v1698_v11 = vshrl.u32 %v4062_v44, 16  ;;  %v1673_v23 = vsel %vm1123_vm4, %v1668_v25, %v1672_v34 }
 0x13b   : > { %v4177_v18 = vpop.permute.xlu1 %1453  ;;  %v1684_v57 = vor.u32 %v1682_v10, %v1680_v59  ;;  %v1706_v10 = vshrl.u32 %v4066_v52, 16 }
 0x13c   : > { %5336 = vst [vmem:[#allocation77_spill] sm:$0xff] %v4177_v18  ;;  %v1686_v18 = vshll.u32 %v4064_v9, 16  ;;  %v1681_v35 = vsel %vm1123_vm4, %v1676_v26, %v1680_v59  ;;  %v1700_v14 = vor.u32 %v1698_v11, %v1696_v33  ;;  %v1726_v59 = vshll.u32 %v4087_v16, 16 }
 0x13d   : > { %v1722_v11 = vshrl.u32 %v4082_v42, 16 }
 0x13e   : > { %1770 = vrot.lane.b32.xlu0 %v1657_v46, %s3273_s14  ;;  %v1688_v46 = vrot.slane %v1686_v18, 1  ;;  %v1728_v32 = vrot.slane %v1726_v59, 1 }
 0x140   : > { %1768 = vrot.lane.b32.xlu2 %v1649_v24, %s3273_s14  ;;  %v4189_v17 = vpop.permute.xlu0 %1457  ;;  %v1690_v24 = vshrl.u32 %v4064_v9, 16  ;;  %v1718_v9 = vshll.u32 %v4082_v42, 16 }
 0x141   : > { %1772 = vrot.lane.b32.xlu1 %v1665_v41, %s3273_s14  ;;  %5337 = vst [vmem:[#allocation78_spill] sm:$0xff] %v4189_v17  ;;  %v1689_v41 = vsel %vm1123_vm4, %v1684_v57, %v1688_v46  ;;  %v1704_v17 = vrot.slane %v1702_v2, 1  ;;  %v993_v57 = vld [vmem:[#allocation2 + $0xcc] sm:$0x1] }
 0x142   : > { %v4193_v30 = vpop.permute.xlu2 %1503  ;;  %v1692_v26 = vor.u32 %v1690_v24, %v1688_v46  ;;  %v1720_v24 = vrot.slane %v1718_v9, 1  ;;  %v1548_v15 = vunpack.c.l.b16 %v993_v57  ;;  %v1732_v9 = vor.u32 %v1730_v61, %v1728_v32 }
 0x143   : > { %v4195_v38 = vpop.permute.xlu1 %1459  ;;  %v1708_v34 = vor.u32 %v1706_v10, %v1704_v17  ;;  %v1705_v2 = vsel %vm1123_vm4, %v1700_v14, %v1704_v17  ;;  %v1734_v14 = vshll.u32 %v4107_v36, 16 }
 0x144   : > { %5338 = vst [vmem:[#allocation79_spill] sm:$0xff] %v4195_v38  ;;  %v1710_v38 = vshll.u32 %v4085_v63, 16  ;;  %v1697_v46 = vsel %vm1123_vm4, %v1692_v26, %v1696_v33  ;;  %v1724_v22 = vor.u32 %v1722_v11, %v1720_v24  ;;  %v4227_v26 = vpack.c.b16 %v1548_v15, %v1548_v15 }
 0x145   : > { %v5339_v11 = vunpack.c.l.b16 %v3931_v31 }
 0x146   : > { %1776 = vrot.lane.b32.xlu0 %v1681_v35, %s3273_s14  ;;  %v1712_v35 = vrot.slane %v1710_v38, 1  ;;  %v1729_v57 = vsel %vm1123_vm4, %v1724_v22, %v1728_v32  ;;  %v1742_v16 = vshll.u32 %v4227_v26, 16 }
 0x148   : > { %1774 = vrot.lane.b32.xlu2 %v1673_v23, %s3273_s14  ;;  %v4207_v18 = vpop.permute.xlu0 %1463  ;;  %v1714_v23 = vshrl.u32 %v4085_v63, 16  ;;  %v1713_v10 = vsel %vm1123_vm4, %v1708_v34, %v1712_v35 }
 0x149   : > { %1778 = vrot.lane.b32.xlu1 %v1689_v41, %s3273_s14  ;;  %v994_v41 = vld [vmem:[#allocation2 + $0xc] sm:$0xe] }
 0x14a   : > { %v4211_v25 = vpop.permute.xlu2 %1509  ;;  %v1795_v17 = vunpack.c.l.b16 %v994_v41  ;;  %v1716_v33 = vor.u32 %v1714_v23, %v1712_v35  ;;  %v1798_v35 = vrot.slane %v3949_v27, 1  ;;  %v1744_v23 = vrot.slane %v1742_v16, 1 }
 0x14b   : > { %v4213_v28 = vpop.permute.xlu1 %1465 }
 0x14c   : > { %v1796_v41 = vpack.c.b16 %v5339_v11, %v1795_v17 }
 0x14e   : > { %1782 = vrot.lane.b32.xlu0 %v1705_v2, %s3273_s14  ;;  %v1736_v2 = vrot.slane %v1734_v14, 1  ;;  %v1797_v61 = vrot.slane %v1796_v41, 1 }
 0x150   : > { %1780 = vrot.lane.b32.xlu2 %v1697_v46, %s3273_s14  ;;  %v4225_v38 = vpop.permute.xlu0 %1499  ;;  %v1721_v46 = vsel %vm1123_vm4, %v1716_v33, %v1720_v24  ;;  %v1737_v15 = vsel %vm1123_vm4, %v1732_v9, %v1736_v2  ;;  %v1800_v24 = vrot.slane %v3972_v3, 1  ;;  %v1799_v33 = vsel %vm1371_vm5, %v1797_v61, %v1798_v35 }
 0x151   : > { %1784 = vrot.lane.b32.xlu1 %v1713_v10, %s3273_s14  ;;  %v1738_v10 = vshrl.u32 %v4107_v36, 16  ;;  %v1802_v3 = vrot.slane %v3966_v56, 1  ;;  %v1812_v61 = vrot.slane %v4008_v5, 1  ;;  %v5258_v5 = vrot.slane %v4002_v13, 1 }
 0x152   : > { %v4229_v34 = vpop.permute.xlu2 %1515  ;;  %v1801_v27 = vsel %vm1371_vm5, %v1798_v35, %v1800_v24 }
 0x153   : > { %v4231_v59 = vpop.permute.xlu1 %1501  ;;  %v1740_v32 = vor.u32 %v1738_v10, %v1736_v2  ;;  %v1806_v2 = vrot.slane %v3988_v48, 1  ;;  %v1803_v10 = vsel %vm1371_vm5, %v1800_v24, %v1802_v3  ;;  %v1808_v48 = vrot.slane %v3984_v47, 1 }
 0x155   : > { %v1745_v9 = vsel %vm1123_vm4, %v1740_v32, %v1744_v23  ;;  %v1809_v24 = vsel %vm1371_vm5, %v1806_v2, %v1808_v48 }
 0x156   : > { %1788 = vrot.lane.b32.xlu0 %v1729_v57, %s3273_s14  ;;  %v1804_v57 = vrot.slane %v3974_v20, 1 }
 0x158   : > { %1786 = vrot.lane.b32.xlu2 %v1721_v46, %s3273_s14  ;;  %v4244_v22 = vpop.permute.xlu0 %1505  ;;  %v1805_v46 = vsel %vm1371_vm5, %v1802_v3, %v1804_v57  ;;  %v1807_v20 = vsel %vm1371_vm5, %v1804_v57, %v1806_v2  ;;  %v1834_v57 = vrot.slane %v4066_v52, 1  ;;  %v4482_v52 = vld [vmem:[#allocation2 + $0x70] sm:$0xff]  }
 0x159   : > { %1790 = vrot.lane.b32.xlu1 %v1737_v15, %s3273_s14  ;;  %v1810_v15 = vrot.slane %v3990_v60, 1 }
 0x15a   : > { %v4247_v14 = vpop.permute.xlu2 %1521 }
 0x15b   : > { %v4249_v17 = vpop.permute.xlu1 %1507  ;;  %v1811_v23 = vsel %vm1371_vm5, %v1808_v48, %v1810_v15  ;;  %v1813_v60 = vsel %vm1371_vm5, %v1810_v15, %v1812_v61  ;;  %v2140_v48 = vsel %vm2092_vm6, %v3761_v49, %v4024_v4  ;;  %v4331_v49 = vld [vmem:[#allocation2 + $0x78] sm:$0xff]  }
 0x15e   : > { %1846 = vrot.lane.b32.xlu0 %v1799_v33, %s3274_s15  ;;  %v5254_v33 = vrot.slane %v4026_v6, 1 }
 0x160   : > { %1792 = vrot.lane.b32.xlu2 %v1745_v9, %s3273_s14  ;;  %v4258_v16 = vpop.permute.xlu0 %1511  ;;  %v1822_v9 = vrot.slane %v4030_v62, 1  ;;  %v4487_v62 = vld [vmem:[#allocation2 + $0x38] sm:$0xff]  }
 0x161   : > { %1848 = vrot.lane.b32.xlu1 %v1801_v27, %s3274_s15  ;;  %v5255_v27 = vrot.slane %v4062_v44, 1 }
 0x162   : > { %v4262_v11 = vpop.permute.xlu2 %1527 }
 0x163   : > { %v4264_v41 = vpop.permute.xlu1 %1513 }
 0x166   : > { %1852 = vrot.lane.b32.xlu0 %v1805_v46, %s3274_s15  ;;  %v1823_v46 = vsel %vm1371_vm5, %v5254_v33, %v1822_v9  ;;  %v5400_v33 = vld [vmem:[#allocation56_spill] sm:$0xff] }
 0x168   : > { %1850 = vrot.lane.b32.xlu2 %v1803_v10, %s3274_s15  ;;  %v4273_v56 = vpop.permute.xlu0 %1517  ;;  %v1815_v10 = vsel %vm1371_vm5, %v1812_v61, %v5258_v5  ;;  %v2189_v61 = vsel %vm2141_vm7, %v2140_v48, %v4175_v53  ;;  %v999_v48 = vld [vmem:[#allocation2 + $0x18] sm:$0xe]  ;;  %v5401_v5 = vld [vmem:[#allocation78_spill] sm:$0xff] }
 0x169   : > { %1854 = vrot.lane.b32.xlu1 %v1807_v20, %s3274_s15  ;;  %v1835_v20 = vsel %vm1371_vm5, %v5255_v27, %v1834_v57 }
 0x16a   : > { %v4277_v35 = vpop.permute.xlu2 %1533 }
 0x16b   : > { %v4279_v32 = vpop.permute.xlu1 %1519 }
 0x16e   : > { %1858 = vrot.lane.b32.xlu0 %v1811_v23, %s3274_s15 }
 0x170   : > { %1856 = vrot.lane.b32.xlu2 %v1809_v24, %s3274_s15  ;;  %v4289_v47 = vpop.permute.xlu0 %1523 }
 0x171   : > { %1860 = vrot.lane.b32.xlu1 %v1813_v60, %s3274_s15 }
 0x172   : > { %v4294_v3 = vpop.permute.xlu2 %1539 }
 0x173   : > { %v4296_v2 = vpop.permute.xlu1 %1525 }
 0x176   : > { %1870 = vrot.lane.b32.xlu0 %v1823_v46, %s3274_s15  ;;  %v2098_v46 = vsel %vm2092_vm6, %v3931_v31, %v3871_v45 }
 0x177   : > { %v2147_v53 = vsel %vm2141_vm7, %v2098_v46, %v4042_v1  ;;  %v4353_v1 = vld [vmem:[#allocation2 + $0x28] sm:$0xff]  }
 0x178   : > { %1862 = vrot.lane.b32.xlu2 %v1815_v10, %s3274_s15  ;;  %v4314_v15 = vpop.permute.xlu0 %1529  ;;  %v2196_v10 = vsel %vm2190_vm8, %v2147_v53, %v4193_v30  ;;  %v2104_v30 = vsel %vm2092_vm6, %v4353_v1, %v3857_v55 }
 0x179   : > { %1882 = vrot.lane.b32.xlu1 %v1835_v20, %s3274_s15 }
 0x17a   : > { %v1546_v23 = vpop.permute.xlu2 %1545 }
 0x17b   : > { %v4321_v24 = vpop.permute.xlu1 %1531  ;;  %v4324_v60 = vsel %vm2190_vm8, %v2189_v61, %v1546_v23  ;;  %v2032_v61 = vunpack.c.l.b16 %v999_v48  ;;  %v4386_v48 = vld [vmem:[#allocation2 + $0x48] sm:$0xff]  }
 0x17e   : > { %1939 = vrot.lane.b32.xlu0 %v3733_v12, %s3275_s16 }
 0x180   : > { %1927 = vrot.lane.b32.xlu2 %v4331_v49, %s3275_s16  ;;  %v4337_v4 = vpop.permute.xlu0 %1535 }
 0x181   : > { %2007 = vrot.lane.b32.xlu1 %v3674_v54, %s3276_s17  ;;  %v2136_v54 = vsel %vm2092_vm6, %v3733_v12, %v4056_v39  ;;  %v2153_v12 = vsel %vm2141_vm7, %v2104_v30, %v4058_v37  ;;  %v2138_v39 = vsel %vm2092_vm6, %v3757_v40, %v4060_v7  ;;  %v3241_v7 = vld [vmem:[#allocation2] sm:$0xff]  }
 0x182   : > { %v1751_v20 = vpop.permute.xlu2 %1750  ;;  %v2185_v23 = vsel %vm2141_vm7, %v2136_v54, %v4207_v18  ;;  %v2202_v55 = vsel %vm2190_vm8, %v2153_v12, %v4211_v25  ;;  %v4392_v54 = vld [vmem:[#allocation2 + $0x40] sm:$0xff]  }
 0x183   : > { %v4343_v45 = vpop.permute.xlu1 %1537  ;;  %v4346_v31 = vsel %vm2239_vm9, %v2196_v10, %v1751_v20  ;;  %v5340_v10 = vunpack.c.h.b16 %v3956_v19  ;;  %v2094_v20 = vsel %vm2092_vm6, %v3241_v7, %v3866_v51  ;;  %v2110_v30 = vsel %vm2092_vm6, %v4392_v54, %v3886_v29  ;;  %v5345_v7 = vld [vmem:[#allocation39_spill] sm:$0xff] }
 0x184   : > { %v2143_v25 = vsel %vm2141_vm7, %v2094_v20, %v4075_v58  ;;  %v2100_v20 = vsel %vm2092_vm6, %v3956_v19, %v5345_v7 }
 0x185   : > { %v2033_v40 = vpack.c.b16 %v5340_v10, %v2032_v61  ;;  %v2096_v61 = vsel %vm2092_vm6, %v3928_v8, %v3893_v50  ;;  %v2192_v51 = vsel %vm2190_vm8, %v2143_v25, %v4225_v38  ;;  %v5344_v10 = vld [vmem:[#allocation22_spill] sm:$0xff]  ;;  %v1836_v25 = vrot.slane %v4085_v63, 1 }
 0x186   : > { %2068 = vrot.lane.b32.xlu0 %v3869_v43, %s3277_s18 }
 0x188   : > { %2019 = vrot.lane.b32.xlu2 %v3765_v0, %s3276_s17  ;;  %v1542_v43 = vpop.permute.xlu0 %1541  ;;  %v2187_v0 = vsel %vm2141_vm7, %v2138_v39, %v4213_v28  ;;  %v2034_v28 = vrot.slane %v2033_v40, 1  ;;  %v5343_v39 = vld [vmem:[#allocation62_spill] sm:$0xff] }
 0x189   : > { %2080 = vrot.lane.b32.xlu1 %v3917_v21, %s3277_s18  ;;  %v4370_v46 = vsel %vm2190_vm8, %v2185_v23, %v1542_v43  ;;  %v5341_v23 = vld [vmem:[#allocation4_spill] sm:$0xff]  ;;  %v5342_v43 = vld [vmem:[#allocation61_spill] sm:$0xff]  ;;  %v2145_v29 = vsel %vm2141_vm7, %v2096_v61, %v5343_v39  ;;  %v5348_v61 = vld [vmem:[#allocation47_spill] sm:$0xff] }
 0x18a   : > { %v1757_v18 = vpop.permute.xlu2 %1756  ;;  %v2159_v12 = vsel %vm2141_vm7, %v2110_v30, %v5342_v43  ;;  %v2194_v8 = vsel %vm2190_vm8, %v2145_v29, %v4231_v59  ;;  %v2035_v40 = vsel %vm1371_vm5, %v2034_v28, %v5344_v10  ;;  %v5347_v30 = vld [vmem:[#allocation28_spill] sm:$0xff]  ;;  %v5350_v43 = vld [vmem:[#allocation9_spill] sm:$0xff] }
 0x18b   : > { %v1544_v53 = vpop.permute.xlu1 %1543  ;;  %v4377_v21 = vsel %vm2239_vm9, %v2202_v55, %v1757_v18  ;;  %v2208_v50 = vsel %vm2190_vm8, %v2159_v12, %v4229_v34  ;;  %v5346_v34 = vld [vmem:[#allocation64_spill] sm:$0xff]  ;;  %v5351_v12 = vld [vmem:[#allocation27_spill] sm:$0xff]  ;;  %v5352_v29 = vld [vmem:[#allocation65_spill] sm:$0xff] }
 0x18c   : > { %v4380_v37 = vsel %vm2190_vm8, %v2187_v0, %v1544_v53  ;;  %v2149_v59 = vsel %vm2141_vm7, %v2100_v20, %v5346_v34 }
 0x18e   : > { %1915 = vrot.lane.b32.xlu0 %v4386_v48, %s3275_s16 }
 0x190   : > { %1903 = vrot.lane.b32.xlu2 %v3956_v19, %s3275_s16  ;;  %v1747_v58 = vpop.permute.xlu0 %1746  ;;  %v2198_v19 = vsel %vm2190_vm8, %v2149_v59, %v4244_v22 }
 0x191   : > { %1983 = vrot.lane.b32.xlu1 %v5341_v23, %s3276_s17  ;;  %v4411_v55 = vsel %vm2239_vm9, %v2192_v51, %v1747_v58  ;;  %v2102_v51 = vsel %vm2092_vm6, %v5348_v61, %v5347_v30  ;;  %v4435_v23 = vld [vmem:[#allocation2 + $0x58] sm:$0xff]  }
 0x192   : > { %v1763_v38 = vpop.permute.xlu2 %1762  ;;  %v5349_v58 = vld [vmem:[#allocation41_spill] sm:$0xff] }
 0x193   : > { %v1749_v0 = vpop.permute.xlu1 %1748  ;;  %v4418_v18 = vsel %vm2239_vm9, %v2208_v50, %v1763_v38  ;;  %v2116_v28 = vsel %vm2092_vm6, %v4435_v23, %v5349_v58  ;;  %v5355_v58 = vld [vmem:[#allocation44_spill] sm:$0xff] }
 0x194   : > { %v4421_v53 = vsel %vm2239_vm9, %v2194_v8, %v1749_v0  ;;  %v2165_v50 = vsel %vm2141_vm7, %v2116_v28, %v5352_v29  ;;  %v5353_v8 = vld [vmem:[#allocation66_spill] sm:$0xff]  ;;  %v5354_v0 = vld [vmem:[#allocation59_spill] sm:$0xff] }
 0x195   : > { %v2151_v38 = vsel %vm2141_vm7, %v2102_v51, %v5353_v8  ;;  %v1824_v10 = vrot.slane %v5354_v0, 1  ;;  %v2214_v22 = vsel %vm2190_vm8, %v2165_v50, %v4247_v14  ;;  %v1837_v51 = vsel %vm1371_vm5, %v1834_v57, %v1836_v25  ;;  %v5357_v57 = vld [vmem:[#allocation46_spill] sm:$0xff] }
 0x196   : > { %2044 = vrot.lane.b32.xlu0 %v2035_v40, %s3277_s18  ;;  %v2200_v7 = vsel %vm2190_vm8, %v2151_v38, %v4249_v17  ;;  %v4474_v17 = vld [vmem:[#allocation2 + $0x30] sm:$0xff]   ;;  %v3248_v50 = vld [vmem:[#allocation2 + $0x80] sm:$0xff]  }
 0x197   : > { %v1825_v14 = vsel %vm1371_vm5, %v1822_v9, %v1824_v10  ;;  %v2106_v28 = vsel %vm2092_vm6, %v4474_v17, %v5355_v58  ;;  %v5358_v9 = vld [vmem:[#allocation45_spill] sm:$0xff]  ;;  %v5359_v38 = vld [vmem:[#allocation68_spill] sm:$0xff]  ;;  %v4637_v0 = vld [vmem:[#allocation2 + $0xc0] sm:$0xff]  }
 0x198   : > { %1995 = vrot.lane.b32.xlu2 %v5350_v43, %s3276_s17  ;;  %v1753_v39 = vpop.permute.xlu0 %1752 }
 0x199   : > { %2056 = vrot.lane.b32.xlu1 %v5351_v12, %s3277_s18  ;;  %v4452_v40 = vsel %vm2239_vm9, %v2198_v19, %v1753_v39  ;;  %v5356_v19 = vld [vmem:[#allocation67_spill] sm:$0xff]  ;;  %v2122_v12 = vsel %vm2092_vm6, %v4482_v52, %v5357_v57  ;;  %v2108_v39 = vsel %vm2092_vm6, %v4487_v62, %v5358_v9  ;;  %v5363_v9 = vld [vmem:[#allocation70_spill] sm:$0xff] }
 0x19a   : > { %v1769_v20 = vpop.permute.xlu2 %1768  ;;  %v2155_v43 = vsel %vm2141_vm7, %v2106_v28, %v5356_v19 }
 0x19b   : > { %v1755_v34 = vpop.permute.xlu1 %1754  ;;  %v4459_v59 = vsel %vm2239_vm9, %v2214_v22, %v1769_v20  ;;  %v2204_v29 = vsel %vm2190_vm8, %v2155_v43, %v4258_v16  ;;  %v2171_v22 = vsel %vm2141_vm7, %v2122_v12, %v5359_v38  ;;  %v5361_v43 = vld [vmem:[#allocation48_spill] sm:$0xff]  ;;  %v5362_v12 = vld [vmem:[#allocation15_spill] sm:$0xff]  ;;  %v5365_v38 = vld [vmem:[#allocation49_spill] sm:$0xff] }
 0x19c   : > { %v4462_v30 = vsel %vm2239_vm9, %v2200_v7, %v1755_v34  ;;  %v5360_v7 = vld [vmem:[#allocation69_spill] sm:$0xff]  ;;  %v2112_v57 = vsel %vm2092_vm6, %v4386_v48, %v5361_v43 }
 0x19d   : > { %v2157_v20 = vsel %vm2141_vm7, %v2108_v39, %v5360_v7  ;;  %v4520_v39 = vld [vmem:[#allocation2 + $0x88] sm:$0xff]   ;;  %v3251_v48 = vld [vmem:[#allocation2 + $0xb0] sm:$0xff]  }
 0x19e   : > { %1884 = vrot.lane.b32.xlu0 %v1837_v51, %s3274_s15  ;;  %v2220_v51 = vsel %vm2190_vm8, %v2171_v22, %v4262_v11  ;;  %v2206_v16 = vsel %vm2190_vm8, %v2157_v20, %v4264_v41  ;;  %v2161_v11 = vsel %vm2141_vm7, %v2112_v57, %v5363_v9  ;;  %v5364_v41 = vld [vmem:[#allocation50_spill] sm:$0xff]  ;;  %v5366_v20 = vld [vmem:[#allocation20_spill] sm:$0xff] }
 0x19f   : > { %v2210_v7 = vsel %vm2190_vm8, %v2161_v11, %v4273_v56 }
 0x1a0   : > { %1872 = vrot.lane.b32.xlu2 %v1825_v14, %s3274_s15  ;;  %v1759_v8 = vpop.permute.xlu0 %1758 }
 0x1a1   : > { %1929 = vrot.lane.b32.xlu1 %v3248_v50, %s3275_s16  ;;  %v4501_v34 = vsel %vm2239_vm9, %v2204_v29, %v1759_v8  ;;  %v2128_v29 = vsel %vm2092_vm6, %v4520_v39, %v5364_v41  ;;  %v3250_v8 = vld [vmem:[#allocation2 + $0x50] sm:$0xff]  }
 0x1a2   : > { %v1775_v14 = vpop.permute.xlu2 %1774  ;;  %v2114_v22 = vsel %vm2092_vm6, %v3250_v8, %v5365_v38 }
 0x1a3   : > { %v1761_v58 = vpop.permute.xlu1 %1760  ;;  %v4508_v28 = vsel %vm2239_vm9, %v2220_v51, %v1775_v14 }
 0x1a4   : > { %v4511_v19 = vsel %vm2239_vm9, %v2206_v16, %v1761_v58  ;;  %v5367_v16 = vld [vmem:[#allocation71_spill] sm:$0xff]  ;;  %v5368_v58 = vld [vmem:[#allocation72_spill] sm:$0xff] }
 0x1a5   : > { %v2177_v14 = vsel %vm2141_vm7, %v2128_v29, %v5367_v16  ;;  %v2163_v43 = vsel %vm2141_vm7, %v2114_v22, %v5368_v58  ;;  %v4549_v29 = vld [vmem:[#allocation2 + $0x60] sm:$0xff]   ;;  %v5373_v58 = vld [vmem:[#allocation52_spill] sm:$0xff] }
 0x1a6   : > { %2009 = vrot.lane.b32.xlu0 %v5362_v12, %s3276_s17  ;;  %v2226_v12 = vsel %vm2190_vm8, %v2177_v14, %v4277_v35  ;;  %v2212_v56 = vsel %vm2190_vm8, %v2163_v43, %v4279_v32  ;;  %v5369_v22 = vld [vmem:[#allocation51_spill] sm:$0xff]  ;;  %v5371_v35 = vld [vmem:[#allocation73_spill] sm:$0xff] }
 0x1a7   : > { %v4563_v14 = vld [vmem:[#allocation2 + $0x68] sm:$0xff]  }
 0x1a8   : > { %1941 = vrot.lane.b32.xlu2 %v3251_v48, %s3275_s16  ;;  %v1765_v51 = vpop.permute.xlu0 %1764  ;;  %v5370_v48 = vld [vmem:[#allocation43_spill] sm:$0xff]  ;;  %v2120_v43 = vsel %vm2092_vm6, %v4563_v14, %v5373_v58 }
 0x1a9   : > { %2021 = vrot.lane.b32.xlu1 %v5366_v20, %s3276_s17  ;;  %v4537_v57 = vsel %vm2239_vm9, %v2210_v7, %v1765_v51  ;;  %v2118_v7 = vsel %vm2092_vm6, %v4549_v29, %v5369_v22  ;;  %v4558_v20 = vld [vmem:[#allocation2 + $0xa0] sm:$0xff]   ;;  %v5372_v51 = vld [vmem:[#allocation53_spill] sm:$0xff] }
 0x1aa   : > { %v1781_v9 = vpop.permute.xlu2 %1780  ;;  %v2167_v32 = vsel %vm2141_vm7, %v2118_v7, %v5371_v35  ;;  %v2134_v16 = vsel %vm2092_vm6, %v4558_v20, %v5372_v51  ;;  %v5376_v7 = vld [vmem:[#allocation75_spill] sm:$0xff] }
 0x1ab   : > { %v1767_v11 = vpop.permute.xlu1 %1766  ;;  %v4544_v41 = vsel %vm2239_vm9, %v2226_v12, %v1781_v9  ;;  %v2216_v12 = vsel %vm2190_vm8, %v2167_v32, %v4289_v47 }
 0x1ac   : > { %v4547_v38 = vsel %vm2239_vm9, %v2212_v56, %v1767_v11  ;;  %v5374_v56 = vld [vmem:[#allocation35_spill] sm:$0xff]  ;;  %v5375_v11 = vld [vmem:[#allocation74_spill] sm:$0xff] }
 0x1ad   : > { %v2183_v22 = vsel %vm2141_vm7, %v2134_v16, %v5375_v11  ;;  %v5377_v16 = vld [vmem:[#allocation54_spill] sm:$0xff]  ;;  %v5380_v11 = vld [vmem:[#allocation55_spill] sm:$0xff] }
 0x1ae   : > { %2082 = vrot.lane.b32.xlu0 %v5370_v48, %s3277_s18  ;;  %v2169_v48 = vsel %vm2141_vm7, %v2120_v43, %v5376_v7  ;;  %v2232_v51 = vsel %vm2190_vm8, %v2183_v22, %v4294_v3  ;;  %v2124_v43 = vsel %vm2092_vm6, %v4331_v49, %v5377_v16  ;;  %v5381_v7 = vld [vmem:[#allocation10_spill] sm:$0xff] }
 0x1af   : > { %v2218_v47 = vsel %vm2190_vm8, %v2169_v48, %v4296_v2  ;;  %v2126_v2 = vsel %vm2092_vm6, %v3248_v50, %v5380_v11 }
 0x1b0   : > { %2070 = vrot.lane.b32.xlu2 %v5374_v56, %s3277_s18  ;;  %v1771_v9 = vpop.permute.xlu0 %1770 }
 0x1b1   : > { %1905 = vrot.lane.b32.xlu1 %v5348_v61, %s3275_s16  ;;  %v4579_v35 = vsel %vm2239_vm9, %v2216_v12, %v1771_v9  ;;  %v5378_v12 = vld [vmem:[#allocation3_spill] sm:$0xff]  ;;  %v5379_v9 = vld [vmem:[#allocation76_spill] sm:$0xff] }
 0x1b2   : > { %v1787_v32 = vpop.permute.xlu2 %1786  ;;  %v2173_v3 = vsel %vm2141_vm7, %v2124_v43, %v5379_v9  ;;  %v5384_v9 = vld [vmem:[#allocation30_spill] sm:$0xff] }
 0x1b3   : > { %v1773_v58 = vpop.permute.xlu1 %1772  ;;  %v4586_v61 = vsel %vm2239_vm9, %v2232_v51, %v1787_v32  ;;  %v2222_v22 = vsel %vm2190_vm8, %v2173_v3, %v4314_v15  ;;  %v5382_v51 = vld [vmem:[#allocation77_spill] sm:$0xff]  ;;  %v5383_v32 = vld [vmem:[#allocation58_spill] sm:$0xff] }
 0x1b4   : > { %v4589_v56 = vsel %vm2239_vm9, %v2218_v47, %v1773_v58  ;;  %v2175_v49 = vsel %vm2141_vm7, %v2126_v2, %v5382_v51  ;;  %v1826_v58 = vrot.slane %v5383_v32, 1  ;;  %v4627_v3 = vld [vmem:[#allocation2 + $0x98] sm:$0xff]   ;;  %v1959_v32 = vshrl.u32 %v4637_v0, 16 }
 0x1b5   : > { %v2224_v50 = vsel %vm2190_vm8, %v2175_v49, %v4321_v24  ;;  %v5385_v24 = vld [vmem:[#allocation57_spill] sm:$0xff] }
 0x1b6   : > { %1985 = vrot.lane.b32.xlu0 %v5378_v12, %s3276_s17  ;;  %v1827_v12 = vsel %vm1371_vm5, %v1824_v10, %v1826_v58  ;;  %v2132_v11 = vsel %vm2092_vm6, %v4627_v3, %v5385_v24  ;;  %v5387_v10 = vld [vmem:[#allocation79_spill] sm:$0xff] }
 0x1b8   : > { %1917 = vrot.lane.b32.xlu2 %v3250_v8, %s3275_s16  ;;  %v1777_v48 = vpop.permute.xlu0 %1776 }
 0x1b9   : > { %1997 = vrot.lane.b32.xlu1 %v5381_v7, %s3276_s17  ;;  %v4608_v47 = vsel %vm2239_vm9, %v2222_v22, %v1777_v48  ;;  %v2181_v22 = vsel %vm2141_vm7, %v2132_v11, %v5387_v10  ;;  %v1838_v7 = vrot.slane %v4082_v42, 1  ;;  %v3257_v42 = vld [vmem:[#allocation2 + $0x90] sm:$0xff]  }
 0x1ba   : > { %v1793_v16 = vpop.permute.xlu2 %1792  ;;  %v2230_v48 = vsel %vm2190_vm8, %v2181_v22, %v4343_v45  ;;  %v5390_v22 = vld [vmem:[#allocation16_spill] sm:$0xff]  ;;  %v2130_v27 = vsel %vm2092_vm6, %v3257_v42, %v5400_v33  ;;  %v5402_v33 = vrot.slane %v4637_v0, 1 }
 0x1bb   : > { %v1779_v43 = vpop.permute.xlu1 %1778  ;;  %v4615_v15 = vsel %vm2239_vm9, %v4324_v60, %v1793_v16  ;;  %v5386_v60 = vld [vmem:[#allocation23_spill] sm:$0xff] }
 0x1bc   : > { %v4618_v8 = vsel %vm2239_vm9, %v2224_v50, %v1779_v43  ;;  %v1955_v43 = vshll.u32 %v4637_v0, 16 }
 0x1be   : > { %2058 = vrot.lane.b32.xlu0 %v5384_v9, %s3277_s18  ;;  %v4659_v45 = vrot.slane %v1955_v43, 1 }
 0x1c0   : > { %2046 = vrot.lane.b32.xlu2 %v5386_v60, %s3277_s18  ;;  %v4635_v2 = vpop.permute.xlu0 %1782 }
 0x1c1   : > { %1874 = vrot.lane.b32.xlu1 %v1827_v12, %s3274_s15  ;;  %v1839_v12 = vsel %vm1371_vm5, %v1836_v25, %v1838_v7 }
 0x1c2   : > { %v1851_v51 = vpop.permute.xlu2 %1850 }
 0x1c3   : > { %v1785_v49 = vpop.permute.xlu1 %1784  ;;  %v4646_v50 = vsel %vm2288_vm10, %v4346_v31, %v1851_v51  ;;  %v3256_v31 = vld [vmem:[#allocation2 + $0xb8] sm:$0xff]  }
 0x1c4   : > { %v4649_v16 = vsel %vm2239_vm9, %v2230_v48, %v1785_v49 }
 0x1c6   : > { %1931 = vrot.lane.b32.xlu0 %v4520_v39, %s3275_s16  ;;  %v5389_v39 = vld [vmem:[#allocation21_spill] sm:$0xff] }
 0x1c7   : > { %v1958_v10 = vsel %vm1123_vm4, %v5389_v39, %v4659_v45 }
 0x1c8   : > { %1886 = vrot.lane.b32.xlu2 %v1839_v12, %s3274_s15  ;;  %v1789_v9 = vpop.permute.xlu0 %1788 }
 0x1c9   : > { %1943 = vrot.lane.b32.xlu1 %v3256_v31, %s3275_s16  ;;  %v4665_v24 = vsel %vm2239_vm9, %v4370_v46, %v1789_v9  ;;  %v5391_v46 = vld [vmem:[#allocation37_spill] sm:$0xff] }
 0x1ca   : > { %v1857_v11 = vpop.permute.xlu2 %1856 }
 0x1cb   : > { %v1791_v60 = vpop.permute.xlu1 %1790  ;;  %v4669_v63 = vsel %vm2288_vm10, %v4377_v21, %v1857_v11  ;;  %v5259_v21 = vrot.slane %v4637_v0, 1  ;;  %v5392_v11 = vld [vmem:[#allocation40_spill] sm:$0xff] }
 0x1cc   : > { %5388 = vst [vmem:[#allocation4_spill] sm:$0xff] %v4669_v63  ;;  %v4673_v25 = vsel %vm2239_vm9, %v4380_v37, %v1791_v60  ;;  %v939_v37 = vld [vmem:[%s5200_s3 + $0x10] sm:$0x3] }
 0x1cd   : > { %v2493_v43 = vunpack.c.l.b16 %v939_v37  ;;  %v2037_v60 = vsel %vm1371_vm5, %v5392_v11, %v5259_v21  ;;  %v5394_v37 = vld [vmem:[#allocation60_spill] sm:$0xff]  ;;  %v2179_v21 = vsel %vm2141_vm7, %v2130_v27, %v5401_v5 }
 0x1ce   : > { %2023 = vrot.lane.b32.xlu0 %v1958_v10, %s3276_s17  ;;  %v2916_v10 = vld [vmem:[%s5200_s3 + $0x8] sm:$0xff]  ;;  %v2228_v63 = vsel %vm2190_vm8, %v2179_v21, %v4337_v4 }
 0x1cf   : > { %v2496_v9 = vpack.c.b16 %v2493_v43, %v2493_v43  ;;  %v5403_v27 = vld [vmem:[#allocation36_spill] sm:$0xff] }
 0x1d0   : > { %2011 = vrot.lane.b32.xlu2 %v5390_v22, %s3276_s17  ;;  %v4683_v48 = vpop.permute.xlu0 %1846 }
 0x1d1   : > { %2072 = vrot.lane.b32.xlu1 %v5391_v46, %s3277_s18  ;;  %v2550_v39 = vsel %vm2548_vm11, %v2496_v9, 0  ;;  %v5397_v9 = vld [vmem:[#allocation63_spill] sm:$0xff] }
 0x1d2   : > { %v1863_v51 = vpop.permute.xlu2 %1862  ;;  %3201 = vmatpush.bf16.msra.mxu2 %v2550_v39  ;;  %3202 = vmatpush.bf16.msra.mxu3 %v2550_v39  ;;  %v5256_v11 = vrot.slane %v5397_v9, 1 }
 0x1d3   : > { %v1849_v49 = vpop.permute.xlu1 %1848  ;;  %v4691_v12 = vsel %vm2288_vm10, %v4418_v18, %v1863_v51  ;;  %2557 = vmatpush.bf16.msra.mxu0 %v2550_v39  ;;  %3200 = vmatpush.bf16.msra.mxu1 %v2550_v39  ;;  %v5257_v51 = vrot.slane %v5394_v37, 1 }
 0x1d4   : > { %v4695_v31 = vsel %vm2288_vm10, %v4421_v53, %v1849_v49  ;;  %v5395_v49 = vld [vmem:[#allocation5_spill] sm:$0xff] }
 0x1d6   : > { %1907 = vrot.lane.b32.xlu0 %v4353_v1, %s3275_s16  ;;  %3204 = vmatpush.bf16.msra.mxu2 %v2916_v10 }
 0x1d7   : > { %3205 = vmatpush.bf16.msra.mxu3 %v2916_v10  ;;  %2558 = vmatpush.bf16.msra.mxu0 %v2916_v10 }
 0x1d8   : > { %2084 = vrot.lane.b32.xlu2 %v2037_v60, %s3277_s18  ;;  %v1853_v18 = vpop.permute.xlu0 %1852  ;;  %3203 = vmatpush.bf16.msra.mxu1 %v2916_v10  ;;  %v1829_v10 = vsel %vm1371_vm5, %v1826_v58, %v5257_v51 }
 0x1d9   : > { %1919 = vrot.lane.b32.xlu1 %v4435_v23, %s3275_s16  ;;  %v4708_v53 = vsel %vm2288_vm10, %v4452_v40, %v1853_v18  ;;  %v2915_v23 = vld [vmem:[%s5200_s3] sm:$0xff] }
 0x1da   : > { %v1928_v1 = vpop.permute.xlu2 %1927  ;;  %v5393_v40 = vld [vmem:[#allocation11_spill] sm:$0xff]  ;;  %3207 = vmatpush.bf16.msra.mxu2 %v2915_v23 }
 0x1db   : > { %v1855_v22 = vpop.permute.xlu1 %1854  ;;  %3208 = vmatpush.bf16.msra.mxu3 %v2915_v23  ;;  %2559 = vmatpush.bf16.msra.mxu0 %v2915_v23 }
 0x1dc   : > { %v4715_v46 = vsel %vm2288_vm10, %v4462_v30, %v1855_v22  ;;  %v5396_v30 = vld [vmem:[#allocation25_spill] sm:$0xff]  ;;  %3206 = vmatpush.bf16.msra.mxu1 %v2915_v23  ;;  %v1841_v22 = vsel %vm1371_vm5, %v1838_v7, %v5256_v11  ;;  %v5398_v23 = vld [vmem:[#allocation32_spill] sm:$0xff] }
 0x1dd   : > { %v5399_v7 = vld [vmem:[#allocation17_spill] sm:$0xff] }
 0x1de   : > { %1999 = vrot.lane.b32.xlu0 %v5393_v40, %s3276_s17 }
 0x1e0   : > { %1987 = vrot.lane.b32.xlu2 %v5395_v49, %s3276_s17  ;;  %v4727_v43 = vpop.permute.xlu0 %1858 }
 0x1e1   : > { %2048 = vrot.lane.b32.xlu1 %v5396_v30, %s3277_s18  ;;  %v4748_v30 = vld [vmem:[#allocation2 + $0xc8] sm:$0xff]  }
 0x1e2   : > { %v2020_v60 = vpop.permute.xlu2 %2019  ;;  %v1963_v58 = vshll.u32 %v4748_v30, 16 }
 0x1e3   : > { %v1861_v39 = vpop.permute.xlu1 %1860 }
 0x1e4   : > { %v4732_v18 = vsel %vm2288_vm10, %v4511_v19, %v1861_v39 }
 0x1e6   : > { %1876 = vrot.lane.b32.xlu0 %v1829_v10, %s3274_s15  ;;  %v1961_v10 = vor.u32 %v1959_v32, %v4659_v45  ;;  %v2277_v45 = vsel %vm2239_vm9, %v2228_v63, %v4635_v2  ;;  %v4786_v63 = vld [vmem:[#allocation2 + $0x5c] sm:$0xff]  }
 0x1e7   : > { %v1816_v21 = vrot.slane %v4786_v63, 1 }
 0x1e8   : > { %2060 = vrot.lane.b32.xlu2 %v5398_v23, %s3277_s18  ;;  %v1871_v19 = vpop.permute.xlu0 %1870  ;;  %v2038_v23 = vrot.slane %v4748_v30, 1 }
 0x1e9   : > { %1888 = vrot.lane.b32.xlu1 %v1841_v22, %s3274_s15  ;;  %v4758_v22 = vrot.slane %v1963_v58, 1 }
 0x1ea   : > { %v1904_v40 = vpop.permute.xlu2 %1903  ;;  %v2039_v58 = vsel %vm1371_vm5, %v5402_v33, %v2038_v23  ;;  %v5405_v33 = vld [vmem:[#allocation12_spill] sm:$0xff] }
 0x1eb   : > { %v1883_v49 = vpop.permute.xlu1 %1882  ;;  %v1966_v32 = vsel %vm1123_vm4, %v1961_v10, %v4758_v22 }
 0x1ec   : > { %v2326_v5 = vsel %vm2288_vm10, %v2277_v45, %v1883_v49 }
 0x1ee   : > { %1945 = vrot.lane.b32.xlu0 %v4637_v0, %s3275_s16 }
 0x1f0   : > { %1933 = vrot.lane.b32.xlu2 %v3257_v42, %s3275_s16  ;;  %v1940_v39 = vpop.permute.xlu0 %1939 }
 0x1f1   : > { %2013 = vrot.lane.b32.xlu1 %v5399_v7, %s3276_s17  ;;  %v2314_v7 = vsel %vm2288_vm10, %v4579_v35, %v1871_v19  ;;  %v2375_v4 = vsel %vm2337_vm13, %v2326_v5, %v1940_v39  ;;  %v4814_v5 = vld [vmem:[#allocation2 + $0x94] sm:$0xff]  }
 0x1f2   : > { %v1996_v11 = vpop.permute.xlu2 %1995  ;;  %v2363_v35 = vsel %vm2337_vm13, %v2314_v7, %v1928_v1  ;;  %v2424_v1 = vsel %vm2386_vm12, %v2375_v4, %v2020_v60  ;;  %v1842_v4 = vrot.slane %v4107_v36, 1 }
 0x1f3   : > { %v2008_v51 = vpop.permute.xlu1 %2007 }
 0x1f4   : > { %v2412_v2 = vsel %vm2386_vm12, %v2363_v35, %v2008_v51  ;;  %v5404_v51 = vrot.slane %v4002_v13, 1  ;;  %v2302_v13 = vsel %vm2288_vm10, %v4501_v34, %v4727_v43 }
 0x1f6   : > { %2074 = vrot.lane.b32.xlu0 %v5403_v27, %s3277_s18  ;;  %v1817_v10 = vsel %vm1371_vm5, %v5404_v51, %v1816_v21  ;;  %v5406_v27 = vld [vmem:[#allocation6_spill] sm:$0xff] }
 0x1f8   : > { %2025 = vrot.lane.b32.xlu2 %v1966_v32, %s3276_s17  ;;  %v2069_v0 = vpop.permute.xlu0 %2068  ;;  %v2290_v32 = vsel %vm2288_vm10, %v4411_v55, %v4683_v48  ;;  %v5407_v48 = vld [vmem:[#allocation24_spill] sm:$0xff] }
 0x1f9   : > { %2086 = vrot.lane.b32.xlu1 %v2039_v58, %s3277_s18  ;;  %v2461_v19 = vsel %vm2435_vm14, %v2412_v2, %v2069_v0 }
 0x1fa   : > { %v1873_v49 = vpop.permute.xlu2 %1872  ;;  %2898 = vmatmul.msk.bf16.vlgmr.msra.gmra.mxu2 %vm2499_vm15, %v2461_v19  ;;  %v5408_v19 = vrot.slane %v5394_v37, 1 }
 0x1fb   : > { %v2081_v42 = vpop.permute.xlu1 %2080 }
 0x1fc   : > { %v2473_v39 = vsel %vm2435_vm14, %v2424_v1, %v2081_v42  ;;  %v5409_v1 = vrot.slane %v5397_v9, 1  ;;  %v2316_v9 = vsel %vm2288_vm10, %v4589_v56, %v1873_v49 }
 0x1fd   : > { %2904 = vmatmul.msk.bf16.vlgmr.msra.gmra.mxu3 %vm2499_vm15, %v2473_v39 }
 0x1fe   : > { %1909 = vrot.lane.b32.xlu0 %v4474_v17, %s3275_s16  ;;  %v2339_v17 = vsel %vm2337_vm13, %v2290_v32, %v1904_v40  ;;  %v1843_v39 = vsel %vm1371_vm5, %v5409_v1, %v1842_v4 }
 0x200   : > { %1864 = vrot.lane.b32.xlu2 %v1817_v10, %s3274_s15  ;;  %v1916_v7 = vpop.permute.xlu0 %1915  ;;  %v4842_v10 = vld [vmem:[#allocation2 + $0xd0] sm:$0xff] }
 0x201   : > { %1921 = vrot.lane.b32.xlu1 %v4549_v29, %s3275_s16  ;;  %v2351_v58 = vsel %vm2337_vm13, %v2302_v13, %v1916_v7  ;;  %v1830_v29 = vrot.slane %v4814_v5, 1  ;;  %v1971_v32 = vshll.u32 %v4842_v10, 16  ;;  %v1975_v5 = vshrl.u32 %v4842_v10, 16 }
 0x202   : > { %v1942_v60 = vpop.permute.xlu2 %1941  ;;  %v2400_v2 = vsel %vm2386_vm12, %v2351_v58, %v1996_v11  ;;  %v5410_v11 = vld [vmem:[#allocation31_spill] sm:$0xff] }
 0x203   : > { %v1984_v45 = vpop.permute.xlu1 %1983  ;;  %v1831_v42 = vsel %vm1371_vm5, %v5408_v19, %v1830_v29 }
 0x204   : > { %v2388_v55 = vsel %vm2386_vm12, %v2339_v17, %v1984_v45  ;;  %v1967_v45 = vshrl.u32 %v4748_v30, 16 }
 0x206   : > { %2001 = vrot.lane.b32.xlu0 %v5405_v33, %s3276_s17  ;;  %v5411_v33 = vld [vmem:[#allocation18_spill] sm:$0xff]  ;;  %v1969_v58 = vor.u32 %v1967_v45, %v4758_v22 }
 0x207   : > { %v5415_v45 = vld [vmem:[#allocation26_spill] sm:$0xff] }
 0x208   : > { %1989 = vrot.lane.b32.xlu2 %v5406_v27, %s3276_s17  ;;  %v2045_v34 = vpop.permute.xlu0 %2044  ;;  %v4856_v27 = vrot.slane %v1971_v32, 1 }
 0x209   : > { %2050 = vrot.lane.b32.xlu1 %v5407_v48, %s3277_s18  ;;  %v2437_v43 = vsel %vm2435_vm14, %v2388_v55, %v2045_v34  ;;  %v2040_v48 = vrot.slane %v4842_v10, 1 }
 0x20a   : > { %v2071_v40 = vpop.permute.xlu2 %2070  ;;  %2886 = vmatmul.msk.bf16.vlgmr.msra.gmra.mxu0 %vm2499_vm15, %v2437_v43  ;;  %v1974_v49 = vsel %vm1123_vm4, %v1969_v58, %v4856_v27  ;;  %v998_v58 = vld [vmem:[#allocation2 + $0xd8] sm:$0x1] }
 0x20b   : > { %v2057_v35 = vpop.permute.xlu1 %2056  ;;  %v2041_v22 = vsel %vm1371_vm5, %v2038_v23, %v2040_v48 }
 0x20c   : > { %v2449_v0 = vsel %vm2435_vm14, %v2400_v2, %v2057_v35  ;;  %v5412_v35 = vld [vmem:[#allocation38_spill] sm:$0xff] }
 0x20d   : > { %2892 = vmatmul.msk.bf16.vlgmr.msra.gmra.mxu1 %vm2499_vm15, %v2449_v0  ;;  %v4877_v0 = vld [vmem:[#allocation2 + $0x64] sm:$0xff]  }
 0x20e   : > { %1878 = vrot.lane.b32.xlu0 %v1831_v42, %s3274_s15  ;;  %v1818_v19 = vrot.slane %v4877_v0, 1 }
 0x210   : > { %2062 = vrot.lane.b32.xlu2 %v5410_v11, %s3277_s18  ;;  %v1885_v51 = vpop.permute.xlu0 %1884 }
 0x211   : > { %1890 = vrot.lane.b32.xlu1 %v1843_v39, %s3274_s15 }
 0x212   : > { %v1918_v37 = vpop.permute.xlu2 %1917 }
 0x213   : > { %v1930_v7 = vpop.permute.xlu1 %1929 }
 0x214   : > { %v2365_v13 = vsel %vm2337_vm13, %v2316_v9, %v1930_v7 }
 0x216   : > { %1947 = vrot.lane.b32.xlu0 %v4748_v30, %s3275_s16 }
 0x218   : > { %1935 = vrot.lane.b32.xlu2 %v4627_v3, %s3275_s16  ;;  %v2010_v17 = vpop.permute.xlu0 %2009  ;;  %v2328_v3 = vsel %vm2288_vm10, %v4649_v16, %v1885_v51 }
 0x219   : > { %2015 = vrot.lane.b32.xlu1 %v5411_v33, %s3276_s17  ;;  %v2414_v55 = vsel %vm2386_vm12, %v2365_v13, %v2010_v17  ;;  %v2377_v2 = vsel %vm2337_vm13, %v2328_v3, %v1942_v60  ;;  %v1819_v60 = vsel %vm1371_vm5, %v1816_v21, %v1818_v19  ;;  %v5413_v21 = vld [vmem:[#allocation13_spill] sm:$0xff]  ;;  %v1844_v13 = vrot.slane %v4227_v26, 1 }
 0x21a   : > { %v2047_v34 = vpop.permute.xlu2 %2046  ;;  %v2463_v56 = vsel %vm2435_vm14, %v2414_v55, %v2071_v40  ;;  %v5417_v26 = vld [vmem:[#allocation33_spill] sm:$0xff] }
 0x21b   : > { %v2022_v43 = vpop.permute.xlu1 %2021  ;;  %2899 = vmatmul.msk.bf16.gmra.mxu2 %vm2499_vm15, %v2463_v56  ;;  %v1845_v55 = vsel %vm1371_vm5, %v1842_v4, %v1844_v13 }
 0x21c   : > { %v2426_v40 = vsel %vm2386_vm12, %v2377_v2, %v2022_v43 }
 0x21e   : > { %2076 = vrot.lane.b32.xlu0 %v5412_v35, %s3277_s18  ;;  %v5418_v35 = vld [vmem:[#allocation19_spill] sm:$0xff] }
 0x220   : > { %2027 = vrot.lane.b32.xlu2 %v1974_v49, %s3276_s17  ;;  %v2083_v16 = vpop.permute.xlu0 %2082 }
 0x221   : > { %2088 = vrot.lane.b32.xlu1 %v2041_v22, %s3277_s18  ;;  %v2475_v30 = vsel %vm2435_vm14, %v2426_v40, %v2083_v16  ;;  %v1977_v40 = vor.u32 %v1975_v5, %v4856_v27 }
 0x222   : > { %v1887_v42 = vpop.permute.xlu2 %1886  ;;  %2905 = vmatmul.msk.bf16.gmra.mxu3 %vm2499_vm15, %v2475_v30 }
 0x223   : > { %v1906_v23 = vpop.permute.xlu1 %1905 }
 0x224   : > { %v2341_v1 = vsel %vm2337_vm13, %v4695_v31, %v1906_v23  ;;  %v5414_v31 = vld [vmem:[#allocation7_spill] sm:$0xff] }
 0x226   : > { %1911 = vrot.lane.b32.xlu0 %v4487_v62, %s3275_s16  ;;  %v2353_v62 = vsel %vm2337_vm13, %v4732_v18, %v1918_v37  ;;  %v5416_v18 = vrot.slane %v4062_v44, 1 }
 0x228   : > { %1866 = vrot.lane.b32.xlu2 %v1819_v60, %s3274_s15  ;;  %v1986_v39 = vpop.permute.xlu0 %1985  ;;  %v1833_v37 = vsel %vm1371_vm5, %v1830_v29, %v5416_v18  ;;  %v2330_v29 = vsel %vm2288_vm10, %v4586_v61, %v1887_v42 }
 0x229   : > { %1923 = vrot.lane.b32.xlu1 %v4563_v14, %s3275_s16  ;;  %v2390_v11 = vsel %vm2386_vm12, %v2341_v1, %v1986_v39  ;;  %v5419_v39 = vld [vmem:[#allocation42_spill] sm:$0xff] }
 0x22a   : > { %v2012_v51 = vpop.permute.xlu2 %2011  ;;  %v2439_v63 = vsel %vm2435_vm14, %v2390_v11, %v2047_v34  ;;  %v1952_v34 = vunpack.c.l.b16 %v998_v58 }
 0x22b   : > { %v1998_v7 = vpop.permute.xlu1 %1997  ;;  %2887 = vmatmul.msk.bf16.gmra.mxu0 %vm2499_vm15, %v2439_v63  ;;  %v5420_v63 = vrot.slane %v4026_v6, 1 }
 0x22c   : > { %v2402_v14 = vsel %vm2386_vm12, %v2353_v62, %v1998_v7  ;;  %v1953_v56 = vpack.c.b16 %v1952_v34, %v1952_v34 }
 0x22e   : > { %2003 = vrot.lane.b32.xlu0 %v5413_v21, %s3276_s17  ;;  %v1979_v49 = vshll.u32 %v1953_v56, 16  ;;  %v2042_v30 = vrot.slane %v1953_v56, 1  ;;  %v1821_v21 = vsel %vm1371_vm5, %v1818_v19, %v5420_v63 }
 0x230   : > { %1991 = vrot.lane.b32.xlu2 %v5414_v31, %s3276_s17  ;;  %v2059_v32 = vpop.permute.xlu0 %2058  ;;  %v2043_v27 = vsel %vm1371_vm5, %v2040_v48, %v2042_v30 }
 0x231   : > { %2052 = vrot.lane.b32.xlu1 %v5415_v45, %s3277_s18  ;;  %v2451_v9 = vsel %vm2435_vm14, %v2402_v14, %v2059_v32  ;;  %v5423_v45 = vld [vmem:[#allocation8_spill] sm:$0xff] }
 0x232   : > { %v2085_v33 = vpop.permute.xlu2 %2084  ;;  %2893 = vmatmul.msk.bf16.gmra.mxu1 %vm2499_vm15, %v2451_v9 }
 0x233   : > { %v1875_v17 = vpop.permute.xlu1 %1874 }
 0x234   : > { %v2318_v36 = vsel %vm2288_vm10, %v4508_v28, %v1875_v17  ;;  %v1981_v28 = vrot.slane %v1979_v49, 1 }
 0x236   : > { %1880 = vrot.lane.b32.xlu0 %v1833_v37, %s3274_s15  ;;  %v1982_v1 = vsel %vm1123_vm4, %v1977_v40, %v1981_v28 }
 0x238   : > { %2064 = vrot.lane.b32.xlu2 %v5417_v26, %s3277_s18  ;;  %v1932_v43 = vpop.permute.xlu0 %1931 }
 0x239   : > { %1892 = vrot.lane.b32.xlu1 %v1845_v55, %s3274_s15  ;;  %v2367_v4 = vsel %vm2337_vm13, %v2318_v36, %v1932_v43 }
 0x23a   : > { %v1988_v3 = vpop.permute.xlu2 %1987  ;;  %v2416_v42 = vsel %vm2386_vm12, %v2367_v4, %v2012_v51 }
 0x23b   : > { %v1944_v44 = vpop.permute.xlu1 %1943 }
 0x23c   : > { %v2379_v22 = vsel %vm2337_vm13, %v2330_v29, %v1944_v44 }
 0x23e   : > { %1949 = vrot.lane.b32.xlu0 %v4842_v10, %s3275_s16 }
 0x240   : > { %1937 = vrot.lane.b32.xlu2 %v4558_v20, %s3275_s16  ;;  %v2024_v2 = vpop.permute.xlu0 %2023 }
 0x241   : > { %2017 = vrot.lane.b32.xlu1 %v5418_v35, %s3276_s17  ;;  %v2428_v16 = vsel %vm2386_vm12, %v2379_v22, %v2024_v2 }
 0x242   : > { %v2061_v23 = vpop.permute.xlu2 %2060  ;;  %v2477_v61 = vsel %vm2435_vm14, %v2428_v16, %v2085_v33  ;;  %v5424_v33 = vld [vmem:[#allocation34_spill] sm:$0xff] }
 0x243   : > { %v2073_v60 = vpop.permute.xlu1 %2072  ;;  %2906 = vmatmul.msk.bf16.gmra.mxu3 %vm2499_vm15, %v2477_v61 }
 0x244   : > { %v2465_v20 = vsel %vm2435_vm14, %v2416_v42, %v2073_v60  ;;  %v2716_v60 = vld [vmem:[%s5003_s29 + $0x80] sm:$0xff] }
 0x245   : > { %2900 = vmatmul.msk.bf16.gmra.mxu2 %vm2499_vm15, %v2465_v20  ;;  %v2724_v20 = vld [vmem:[%s5003_s29 + $0xc0] sm:$0xff] }
 0x246   : > { %2078 = vrot.lane.b32.xlu0 %v5419_v39, %s3277_s18 }
 0x248   : > { %2029 = vrot.lane.b32.xlu2 %v1982_v1, %s3276_s17  ;;  %v1908_v11 = vpop.permute.xlu0 %1907 }
 0x249   : > { %2090 = vrot.lane.b32.xlu1 %v2043_v27, %s3277_s18  ;;  %v2343_v10 = vsel %vm2337_vm13, %v4646_v50, %v1908_v11 }
 0x24a   : > { %v1934_v51 = vpop.permute.xlu2 %1933 }
 0x24b   : > { %v1920_v7 = vpop.permute.xlu1 %1919 }
 0x24c   : > { %v2355_v48 = vsel %vm2337_vm13, %v4691_v12, %v1920_v7  ;;  %v5421_v12 = vld [vmem:[#allocation14_spill] sm:$0xff] }
 0x24e   : > { %1913 = vrot.lane.b32.xlu0 %v4392_v54, %s3275_s16  ;;  %v2392_v54 = vsel %vm2386_vm12, %v2343_v10, %v1988_v3 }
 0x250   : > { %1868 = vrot.lane.b32.xlu2 %v1821_v21, %s3274_s15  ;;  %v2000_v62 = vpop.permute.xlu0 %1999  ;;  %v2717_v21 = vld [vmem:[%s5003_s29 + $0x88] sm:$0xff] }
 0x251   : > { %1925 = vrot.lane.b32.xlu1 %v4482_v52, %s3275_s16  ;;  %v2404_v6 = vsel %vm2386_vm12, %v2355_v48, %v2000_v62  ;;  %v5422_v52 = vld [vmem:[#allocation29_spill] sm:$0xff]  ;;  %v2700_v62 = vld [vmem:[%s5003_s29] sm:$0xff] }
 0x252   : > { %v2026_v0 = vpop.permute.xlu2 %2025  ;;  %v2453_v19 = vsel %vm2435_vm14, %v2404_v6, %v2061_v23 }
 0x253   : > { %v2049_v31 = vpop.permute.xlu1 %2048  ;;  %2894 = vmatmul.msk.bf16.gmra.mxu1 %vm2499_vm15, %v2453_v19 }
 0x254   : > { %v2441_v50 = vsel %vm2435_vm14, %v2392_v54, %v2049_v31 }
 0x255   : > { %2888 = vmatmul.msk.bf16.gmra.mxu0 %vm2499_vm15, %v2441_v50 }
 0x256   : > { %2005 = vrot.lane.b32.xlu0 %v5421_v12, %s3276_s17 }
 0x258   : > { %v1877_v14 = vpop.permute.xlu0 %1876  ;;  %1993 = vrot.lane.b32.xlu2 %v5423_v45, %s3276_s17 }
 0x259   : > { %2054 = vrot.lane.b32.xlu1 %v5422_v52, %s3277_s18  ;;  %v2320_v18 = vsel %vm2288_vm10, %v4608_v47, %v1877_v14  ;;  %v2708_v52 = vld [vmem:[%s5003_s29 + $0x40] sm:$0xff] }
 0x25a   : > { %v1865_v32 = vpop.permute.xlu2 %1864  ;;  %v2369_v34 = vsel %vm2337_vm13, %v2320_v18, %v1934_v51 }
 0x25b   : > { %v1889_v9 = vpop.permute.xlu1 %1888  ;;  %v2308_v29 = vsel %vm2288_vm10, %v4537_v57, %v1865_v32  ;;  %v5008_v57 = vld [vmem:[%s5201_s4] ss:$0 sm:$0xff] }
 0x25c   : > { %v2332_v37 = vsel %vm2288_vm10, %v4665_v24, %v1889_v9 }
 0x260   : > { %v1946_v13 = vpop.permute.xlu0 %1945  ;;  %2066 = vrot.lane.b32.xlu2 %v5424_v33, %s3277_s18 }
 0x261   : > { %v2381_v55 = vsel %vm2337_vm13, %v2332_v37, %v1946_v13 }
 0x262   : > { %v1990_v17 = vpop.permute.xlu2 %1989  ;;  %v2430_v5 = vsel %vm2386_vm12, %v2381_v55, %v2026_v0  ;;  %v2725_v0 = vld [vmem:[%s5003_s29 + $0xc8] sm:$0xff] }
 0x263   : > { %v2014_v58 = vpop.permute.xlu1 %2013 }
 0x264   : > { %v2418_v26 = vsel %vm2386_vm12, %v2369_v34, %v2014_v58  ;;  %v2701_v34 = vld [vmem:[%s5003_s29 + $0x8] sm:$0xff] }
 0x268   : > { %v2075_v43 = vpop.permute.xlu0 %2074 }
 0x269   : > { %v2467_v56 = vsel %vm2435_vm14, %v2418_v26, %v2075_v43 }
 0x26a   : > { %v2063_v3 = vpop.permute.xlu2 %2062  ;;  %2901 = vmatmul.msk.bf16.gmra.mxu2 %vm2499_vm15, %v2467_v56 }
 0x26b   : > { %v2087_v44 = vpop.permute.xlu1 %2086 }
 0x26c   : > { %v2479_v47 = vsel %vm2435_vm14, %v2430_v5, %v2087_v44 }
 0x26d   : > { %2907 = vmatmul.msk.bf16.gmra.mxu3 %vm2499_vm15, %v2479_v47 }
 0x270   : > { %v1910_v24 = vpop.permute.xlu0 %1909 }
 0x271   : > { %v2345_v4 = vsel %vm2337_vm13, %v4708_v53, %v1910_v24 }
 0x272   : > { %v1936_v49 = vpop.permute.xlu2 %1935  ;;  %v2394_v30 = vsel %vm2386_vm12, %v2345_v4, %v1990_v17 }
 0x273   : > { %v1922_v36 = vpop.permute.xlu1 %1921 }
 0x274   : > { %v2357_v22 = vsel %vm2337_vm13, %v2308_v29, %v1922_v36 }
 0x278   : > { %v2002_v35 = vpop.permute.xlu0 %2001 }
 0x279   : > { %v2406_v2 = vsel %vm2386_vm12, %v2357_v22, %v2002_v35 }
 0x27a   : > { %v4995_v40 = vpop.permute.xlu2 %2027  ;;  %v2455_v16 = vsel %vm2435_vm14, %v2406_v2, %v2063_v3  ;;  %v2709_v3 = vld [vmem:[%s5003_s29 + $0x48] sm:$0xff] }
 0x27b   : > { %v2051_v28 = vpop.permute.xlu1 %2050  ;;  %2895 = vmatmul.msk.bf16.gmra.mxu1 %vm2499_vm15, %v2455_v16 }
 0x27c   : > { %v2443_v53 = vsel %vm2435_vm14, %v2394_v30, %v2051_v28 }
 0x27d   : > { %2889 = vmatmul.msk.bf16.gmra.mxu0 %vm2499_vm15, %v2443_v53  ;;  %v2613_v23 = vpop.f32.mrf.mxu2 }
 0x27e   : > { %v2684_v61 = vadd.f32 %v5008_v57, %v2613_v23 }
 0x280   : > { %v2639_v42 = vpop.f32.mrf.mxu3  ;;  %v2748_v1 = vadd.f32 %v2716_v60, %v2684_v61  ;;  %v1879_v39 = vpop.permute.xlu0 %1878 }
 0x281   : > { %v2692_v27 = vadd.f32 %v5008_v57, %v2639_v42  ;;  %v2322_v13 = vsel %vm2288_vm10, %v4618_v8, %v1879_v39 }
 0x282   : > { %2780 = vst.msk [vmem:[%s5019_s10 + $0x80] sm:$0xff] %vm2092_vm6, %v2748_v1  ;;  %v1867_v7 = vpop.permute.xlu2 %1866  ;;  %v2371_v37 = vsel %vm2337_vm13, %v2322_v13, %v1936_v49  ;;  %v2710_v13 = vld [vmem:[%s5003_s29 + $0x50] sm:$0xff] }
 0x283   : > { %v2756_v11 = vadd.f32 %v2724_v20, %v2692_v27  ;;  %v1891_v51 = vpop.permute.xlu1 %1890  ;;  %v2310_v2 = vsel %vm2288_vm10, %v4547_v38, %v1867_v7  ;;  %v2718_v20 = vld [vmem:[%s5003_s29 + $0x90] sm:$0xff] }
 0x284   : > { %v2334_v58 = vsel %vm2288_vm10, %v4673_v25, %v1891_v51 }
 0x285   : > { %2788 = vst.msk [vmem:[%s5019_s10 + $0xc0] sm:$0xff] %vm2092_vm6, %v2756_v11  ;;  %v2615_v63 = vpop.f32.mrf.mxu2 }
 0x286   : > { %v2685_v10 = vadd.f32 %v5008_v57, %v2615_v63 }
 0x287   : > { %v2561_v48 = vpop.f32.mrf.mxu0 }
 0x288   : > { %v2641_v6 = vpop.f32.mrf.mxu3  ;;  %v2749_v31 = vadd.f32 %v2717_v21, %v2685_v10  ;;  %v2668_v19 = vadd.f32 %v5008_v57, %v2561_v48  ;;  %v1948_v50 = vpop.permute.xlu0 %1947  ;;  %v2726_v21 = vld [vmem:[%s5003_s29 + $0xd0] sm:$0xff] }
 0x289   : > { %v2693_v54 = vadd.f32 %v5008_v57, %v2641_v6  ;;  %v2383_v18 = vsel %vm2337_vm13, %v2334_v58, %v1948_v50 }
 0x28a   : > { %v2587_v12 = vpop.f32.mrf.mxu1  ;;  %2781 = vst.msk [vmem:[%s5019_s10 + $0x88] sm:$0xff] %vm2092_vm6, %v2749_v31  ;;  %v2732_v14 = vadd.f32 %v2700_v62, %v2668_v19  ;;  %v1992_v17 = vpop.permute.xlu2 %1991  ;;  %v2432_v24 = vsel %vm2386_vm12, %v2383_v18, %v4995_v40 }
 0x28b   : > { %v2757_v45 = vadd.f32 %v2725_v0, %v2693_v54  ;;  %v2676_v32 = vadd.f32 %v5008_v57, %v2587_v12  ;;  %v2016_v9 = vpop.permute.xlu1 %2015  ;;  %v2702_v0 = vld [vmem:[%s5003_s29 + $0x10] sm:$0xff] }
 0x28c   : > { %2764 = vst.msk [vmem:[%s5019_s10] sm:$0xff] %vm2092_vm6, %v2732_v14  ;;  %v2420_v8 = vsel %vm2386_vm12, %v2371_v37, %v2016_v9 }
 0x28d   : > { %v2740_v33 = vadd.f32 %v2708_v52, %v2676_v32  ;;  %2789 = vst.msk [vmem:[%s5019_s10 + $0xc8] sm:$0xff] %vm2092_vm6, %v2757_v45 }
 0x28f   : > { %2772 = vst.msk [vmem:[%s5019_s10 + $0x40] sm:$0xff] %vm2092_vm6, %v2740_v33  ;;  %v2563_v55 = vpop.f32.mrf.mxu0 }
 0x290   : > { %v2669_v26 = vadd.f32 %v5008_v57, %v2563_v55  ;;  %v2077_v43 = vpop.permute.xlu0 %2076 }
 0x291   : > { %v2469_v44 = vsel %vm2435_vm14, %v2420_v8, %v2077_v43 }
 0x292   : > { %v2589_v56 = vpop.f32.mrf.mxu1  ;;  %v2733_v25 = vadd.f32 %v2701_v34, %v2669_v26  ;;  %2902 = vmatmul.msk.bf16.gmra.mxu2 %vm2499_vm15, %v2469_v44  ;;  %v2065_v29 = vpop.permute.xlu2 %2064  ;;  %v5425_v44 = vld [vmem:[#allocation4_spill] sm:$0xff] }
 0x293   : > { %v2677_v5 = vadd.f32 %v5008_v57, %v2589_v56  ;;  %v2089_v47 = vpop.permute.xlu1 %2088  ;;  %v2727_v56 = vld [vmem:[%s5003_s29 + $0xd8] sm:$0xff] }
 0x294   : > { %v2481_v49 = vsel %vm2435_vm14, %v2432_v24, %v2089_v47  ;;  %2765 = vst.msk [vmem:[%s5019_s10 + $0x8] sm:$0xff] %vm2092_vm6, %v2733_v25  ;;  %v2719_v24 = vld [vmem:[%s5003_s29 + $0x98] sm:$0xff] }
 0x295   : > { %v2741_v36 = vadd.f32 %v2709_v3, %v2677_v5  ;;  %2908 = vmatmul.msk.bf16.gmra.mxu3 %vm2499_vm15, %v2481_v49 }
 0x297   : > { %2773 = vst.msk [vmem:[%s5019_s10 + $0x48] sm:$0xff] %vm2092_vm6, %v2741_v36 }
 0x298   : > { %v1912_v4 = vpop.permute.xlu0 %1911 }
 0x299   : > { %v2347_v40 = vsel %vm2337_vm13, %v4715_v46, %v1912_v4 }
 0x29a   : > { %v1938_v30 = vpop.permute.xlu2 %1937  ;;  %v2396_v61 = vsel %vm2386_vm12, %v2347_v40, %v1992_v17 }
 0x29b   : > { %v1924_v22 = vpop.permute.xlu1 %1923 }
 0x29c   : > { %v2359_v28 = vsel %vm2337_vm13, %v2310_v2, %v1924_v22 }
 0x29e   : > { %v2618_v35 = vpop.f32.mrf.mxu2 }
 0x2a0   : > { %v2004_v16 = vpop.permute.xlu0 %2003 }
 0x2a1   : > { %v2408_v53 = vsel %vm2386_vm12, %v2359_v28, %v2004_v16 }
 0x2a2   : > { %v2457_v60 = vsel %vm2435_vm14, %v2408_v53, %v2065_v29  ;;  %v2030_v7 = vpop.permute.xlu2 %2029 }
 0x2a3   : > { %v2053_v23 = vpop.permute.xlu1 %2052  ;;  %2896 = vmatmul.msk.bf16.gmra.mxu1 %vm2499_vm15, %v2457_v60  ;;  %v2711_v60 = vld [vmem:[%s5003_s29 + $0x58] sm:$0xff] }
 0x2a4   : > { %v2445_v38 = vsel %vm2435_vm14, %v2396_v61, %v2053_v23 }
 0x2a5   : > { %2890 = vmatmul.msk.bf16.gmra.mxu0 %vm2499_vm15, %v2445_v38  ;;  %v2644_v46 = vpop.f32.mrf.mxu3 }
 0x2a6   : > { %v2619_v42 = vpop.f32.mrf.mxu2  ;;  %v2703_v46 = vld [vmem:[%s5003_s29 + $0x18] sm:$0xff] }
 0x2a7   : > { %v2686_v1 = vadd.f32 %v5008_v57, %v2619_v42 }
 0x2a8   : > { %v2566_v27 = vpop.f32.mrf.mxu0  ;;  %v1881_v39 = vpop.permute.xlu0 %1880 }
 0x2a9   : > { %v2750_v11 = vadd.f32 %v2718_v20, %v2686_v1  ;;  %v2324_v12 = vsel %vm2288_vm10, %v4544_v41, %v1881_v39 }
 0x2aa   : > { %v1869_v52 = vpop.permute.xlu2 %1868  ;;  %v2373_v32 = vsel %vm2337_vm13, %v2324_v12, %v1938_v30 }
 0x2ab   : > { %v1893_v51 = vpop.permute.xlu1 %1892  ;;  %2782 = vst.msk [vmem:[%s5019_s10 + $0x90] sm:$0xff] %vm2092_vm6, %v2750_v11  ;;  %v2312_v3 = vsel %vm2288_vm10, %v4459_v59, %v1869_v52 }
 0x2ac   : > { %v2336_v14 = vsel %vm2288_vm10, %v4615_v15, %v1893_v51  ;;  %v2720_v51 = vld [vmem:[%s5003_s29 + $0xa0] sm:$0xff] }
 0x2ad   : > { %v2645_v63 = vpop.f32.mrf.mxu3 }
 0x2ae   : > { %v2694_v10 = vadd.f32 %v5008_v57, %v2645_v63 }
 0x2af   : > { %v2592_v48 = vpop.f32.mrf.mxu1 }
 0x2b0   : > { %v2758_v62 = vadd.f32 %v2726_v21, %v2694_v10  ;;  %v2567_v6 = vpop.f32.mrf.mxu0  ;;  %v1950_v31 = vpop.permute.xlu0 %1949  ;;  %v2728_v21 = vld [vmem:[%s5003_s29 + $0xe0] sm:$0xff] }
 0x2b1   : > { %v2670_v19 = vadd.f32 %v5008_v57, %v2567_v6  ;;  %v2385_v45 = vsel %vm2337_vm13, %v2336_v14, %v1950_v31  ;;  %v2712_v14 = vld [vmem:[%s5003_s29 + $0x60] sm:$0xff] }
 0x2b2   : > { %2790 = vst.msk [vmem:[%s5019_s10 + $0xd0] sm:$0xff] %vm2092_vm6, %v2758_v62  ;;  %v2434_v15 = vsel %vm2386_vm12, %v2385_v45, %v2030_v7  ;;  %v1994_v34 = vpop.permute.xlu2 %1993 }
 0x2b3   : > { %v2018_v54 = vpop.permute.xlu1 %2017  ;;  %v2734_v50 = vadd.f32 %v2702_v0, %v2670_v19  ;;  %v2721_v0 = vld [vmem:[%s5003_s29 + $0xa8] sm:$0xff] }
 0x2b4   : > { %v2422_v33 = vsel %vm2386_vm12, %v2373_v32, %v2018_v54  ;;  %v2729_v54 = vld [vmem:[%s5003_s29 + $0xe8] sm:$0xff] }
 0x2b5   : > { %2766 = vst.msk [vmem:[%s5019_s10 + $0x10] sm:$0xff] %vm2092_vm6, %v2734_v50 }
 0x2b7   : > { %v2593_v9 = vpop.f32.mrf.mxu1 }
 0x2b8   : > { %v2678_v17 = vadd.f32 %v5008_v57, %v2593_v9  ;;  %v2079_v58 = vpop.permute.xlu0 %2078  ;;  %v2704_v9 = vld [vmem:[%s5003_s29 + $0x20] sm:$0xff] }
 0x2b9   : > { %v2471_v41 = vsel %vm2435_vm14, %v2422_v33, %v2079_v58 }
 0x2ba   : > { %v2742_v18 = vadd.f32 %v2710_v13, %v2678_v17  ;;  %2903 = vmatmul.msk.bf16.gmra.mxu2 %vm2499_vm15, %v2471_v41  ;;  %v2067_v49 = vpop.permute.xlu2 %2066 }
 0x2bb   : > { %v2091_v37 = vpop.permute.xlu1 %2090 }
 0x2bc   : > { %v2483_v55 = vsel %vm2435_vm14, %v2434_v15, %v2091_v37  ;;  %2774 = vst.msk [vmem:[%s5019_s10 + $0x50] sm:$0xff] %vm2092_vm6, %v2742_v18  ;;  %v2713_v18 = vld [vmem:[%s5003_s29 + $0x68] sm:$0xff] }
 0x2bd   : > { %2909 = vmatmul.msk.bf16.gmra.mxu3 %vm2499_vm15, %v2483_v55  ;;  %v2705_v55 = vld [vmem:[%s5003_s29 + $0x28] sm:$0xff] }
 0x2c0   : > { %v1914_v8 = vpop.permute.xlu0 %1913 }
 0x2c1   : > { %v2349_v25 = vsel %vm2337_vm13, %v5425_v44, %v1914_v8  ;;  %v2722_v44 = vld [vmem:[%s5003_s29 + $0xb0] sm:$0xff] }
 0x2c2   : > { %v2398_v59 = vsel %vm2386_vm12, %v2349_v25, %v1994_v34 }
 0x2c3   : > { %v1926_v26 = vpop.permute.xlu1 %1925 }
 0x2c4   : > { %v2361_v36 = vsel %vm2337_vm13, %v2312_v3, %v1926_v26 }
 0x2c6   : > { %v2648_v43 = vpop.f32.mrf.mxu3 }
 0x2c7   : > { %v2695_v5 = vadd.f32 %v5008_v57, %v2648_v43 }
 0x2c8   : > { %v2622_v47 = vpop.f32.mrf.mxu2  ;;  %v2006_v4 = vpop.permute.xlu0 %2005 }
 0x2c9   : > { %v2687_v29 = vadd.f32 %v5008_v57, %v2622_v47  ;;  %v2759_v22 = vadd.f32 %v2727_v56, %v2695_v5  ;;  %v2410_v35 = vsel %vm2386_vm12, %v2361_v36, %v2006_v4  ;;  %v2730_v47 = vld [vmem:[%s5003_s29 + $0xf0] sm:$0xff] }
 0x2ca   : > { %v2459_v28 = vsel %vm2435_vm14, %v2410_v35, %v2067_v49  ;;  %v2714_v35 = vld [vmem:[%s5003_s29 + $0x70] sm:$0xff] }
 0x2cb   : > { %v2751_v2 = vadd.f32 %v2719_v24, %v2687_v29  ;;  %v2055_v40 = vpop.permute.xlu1 %2054  ;;  %2791 = vst.msk [vmem:[%s5019_s10 + $0xd8] sm:$0xff] %vm2092_vm6, %v2759_v22  ;;  %2897 = vmatmul.msk.bf16.gmra.mxu1 %vm2499_vm15, %v2459_v28 }
 0x2cc   : > { %v2447_v16 = vsel %vm2435_vm14, %v2398_v59, %v2055_v40  ;;  %v2706_v40 = vld [vmem:[%s5003_s29 + $0x30] sm:$0xff] }
 0x2cd   : > { %2783 = vst.msk [vmem:[%s5019_s10 + $0x98] sm:$0xff] %vm2092_vm6, %v2751_v2  ;;  %2891 = vmatmul.msk.bf16.gmra.mxu0 %vm2499_vm15, %v2447_v16 }
 0x2ce   : > { %v2650_v30 = vpop.f32.mrf.mxu3 }
 0x2d0   : > { %v2624_v53 = vpop.f32.mrf.mxu2  ;;  %v2596_v23 = vpop.f32.mrf.mxu1 }
 0x2d1   : > { %v2679_v61 = vadd.f32 %v5008_v57, %v2596_v23  ;;  %v2723_v23 = vld [vmem:[%s5003_s29 + $0xb8] sm:$0xff] }
 0x2d2   : > { %v2570_v38 = vpop.f32.mrf.mxu0 }
 0x2d3   : > { %v2671_v42 = vadd.f32 %v5008_v57, %v2570_v38  ;;  %v2743_v20 = vadd.f32 %v2711_v60, %v2679_v61  ;;  %v2731_v38 = vld [vmem:[%s5003_s29 + $0xf8] sm:$0xff] }
 0x2d5   : > { %v2735_v1 = vadd.f32 %v2703_v46, %v2671_v42  ;;  %2775 = vst.msk [vmem:[%s5019_s10 + $0x58] sm:$0xff] %vm2092_vm6, %v2743_v20 }
 0x2d7   : > { %2767 = vst.msk [vmem:[%s5019_s10 + $0x18] sm:$0xff] %vm2092_vm6, %v2735_v1 }
 0x2d8   : > { %v2598_v27 = vpop.f32.mrf.mxu1 }
 0x2da   : > { %v2572_v39 = vpop.f32.mrf.mxu0 }
 0x2ed   : > { %v2626_v11 = vpop.f32.mrf.mxu2 }
 0x2ee   : > { %v2688_v7 = vadd.f32 %v5008_v57, %v2626_v11  ;;  %v2715_v11 = vld [vmem:[%s5003_s29 + $0x78] sm:$0xff] }
 0x2f0   : > { %v2652_v63 = vpop.f32.mrf.mxu3  ;;  %v2752_v10 = vadd.f32 %v2720_v51, %v2688_v7 }
 0x2f1   : > { %v2696_v48 = vadd.f32 %v5008_v57, %v2652_v63  ;;  %v2707_v63 = vld [vmem:[%s5003_s29 + $0x38] sm:$0xff] }
 0x2f2   : > { %2784 = vst.msk [vmem:[%s5019_s10 + $0xa0] sm:$0xff] %vm2092_vm6, %v2752_v10 }
 0x2f3   : > { %v2760_v62 = vadd.f32 %v2728_v21, %v2696_v48 }
 0x2f5   : > { %2792 = vst.msk [vmem:[%s5019_s10 + $0xe0] sm:$0xff] %vm2092_vm6, %v2760_v62  ;;  %v2628_v6 = vpop.f32.mrf.mxu2 }
 0x2f6   : > { %v2689_v31 = vadd.f32 %v5008_v57, %v2628_v6 }
 0x2f8   : > { %v2654_v19 = vpop.f32.mrf.mxu3  ;;  %v2753_v50 = vadd.f32 %v2721_v0, %v2689_v31  ;;  %v2600_v52 = vpop.f32.mrf.mxu1 }
 0x2f9   : > { %v2697_v12 = vadd.f32 %v5008_v57, %v2654_v19  ;;  %v2680_v45 = vadd.f32 %v5008_v57, %v2600_v52 }
 0x2fa   : > { %v2574_v32 = vpop.f32.mrf.mxu0  ;;  %2785 = vst.msk [vmem:[%s5019_s10 + $0xa8] sm:$0xff] %vm2092_vm6, %v2753_v50 }
 0x2fb   : > { %v2761_v13 = vadd.f32 %v2729_v54, %v2697_v12  ;;  %v2672_v33 = vadd.f32 %v5008_v57, %v2574_v32  ;;  %v2744_v17 = vadd.f32 %v2712_v14, %v2680_v45 }
 0x2fd   : > { %2793 = vst.msk [vmem:[%s5019_s10 + $0xe8] sm:$0xff] %vm2092_vm6, %v2761_v13  ;;  %v2736_v58 = vadd.f32 %v2704_v9, %v2672_v33 }
 0x2fe   : > { %2776 = vst.msk [vmem:[%s5019_s10 + $0x60] sm:$0xff] %vm2092_vm6, %v2744_v17 }
 0x2ff   : > { %2768 = vst.msk [vmem:[%s5019_s10 + $0x20] sm:$0xff] %vm2092_vm6, %v2736_v58 }
 0x300   : > { %v2602_v41 = vpop.f32.mrf.mxu1 }
 0x301   : > { %v2681_v37 = vadd.f32 %v5008_v57, %v2602_v41 }
 0x302   : > { %v2576_v15 = vpop.f32.mrf.mxu0 }
 0x303   : > { %v2673_v34 = vadd.f32 %v5008_v57, %v2576_v15  ;;  %v2745_v8 = vadd.f32 %v2713_v18, %v2681_v37 }
 0x305   : > { %v2737_v26 = vadd.f32 %v2705_v55, %v2673_v34  ;;  %2777 = vst.msk [vmem:[%s5019_s10 + $0x68] sm:$0xff] %vm2092_vm6, %v2745_v8 }
 0x307   : > { %2769 = vst.msk [vmem:[%s5019_s10 + $0x28] sm:$0xff] %vm2092_vm6, %v2737_v26 }
 0x315   : > { %v2631_v43 = vpop.f32.mrf.mxu2 }
 0x318   : > { %v2657_v56 = vpop.f32.mrf.mxu3 }
 0x31d   : > { %v2632_v3 = vpop.f32.mrf.mxu2 }
 0x31e   : > { %v2690_v25 = vadd.f32 %v5008_v57, %v2632_v3 }
 0x320   : > { %v2658_v5 = vpop.f32.mrf.mxu3  ;;  %v2754_v24 = vadd.f32 %v2722_v44, %v2690_v25  ;;  %v2605_v36 = vpop.f32.mrf.mxu1 }
 0x321   : > { %v2698_v49 = vadd.f32 %v5008_v57, %v2658_v5 }
 0x322   : > { %v2579_v29 = vpop.f32.mrf.mxu0  ;;  %2786 = vst.msk [vmem:[%s5019_s10 + $0xb0] sm:$0xff] %vm2092_vm6, %v2754_v24 }
 0x323   : > { %v2762_v4 = vadd.f32 %v2730_v47, %v2698_v49 }
 0x325   : > { %2794 = vst.msk [vmem:[%s5019_s10 + $0xf0] sm:$0xff] %vm2092_vm6, %v2762_v4 }
 0x328   : > { %v2606_v22 = vpop.f32.mrf.mxu1 }
 0x329   : > { %v2682_v59 = vadd.f32 %v5008_v57, %v2606_v22 }
 0x32a   : > { %v2580_v2 = vpop.f32.mrf.mxu0 }
 0x32b   : > { %v2674_v28 = vadd.f32 %v5008_v57, %v2580_v2  ;;  %v2746_v16 = vadd.f32 %v2714_v35, %v2682_v59 }
 0x32d   : > { %v2738_v30 = vadd.f32 %v2706_v40, %v2674_v28  ;;  %2778 = vst.msk [vmem:[%s5019_s10 + $0x70] sm:$0xff] %vm2092_vm6, %v2746_v16 }
 0x32f   : > { %2770 = vst.msk [vmem:[%s5019_s10 + $0x30] sm:$0xff] %vm2092_vm6, %v2738_v30 }
 0x33d   : > { %v2635_v53 = vpop.f32.mrf.mxu2 }
 0x33e   : > { %v2691_v60 = vadd.f32 %v5008_v57, %v2635_v53 }
 0x340   : > { %v2661_v61 = vpop.f32.mrf.mxu3  ;;  %v2755_v46 = vadd.f32 %v2723_v23, %v2691_v60 }
 0x341   : > { %v2699_v42 = vadd.f32 %v5008_v57, %v2661_v61 }
 0x342   : > { %2787 = vst.msk [vmem:[%s5019_s10 + $0xb8] sm:$0xff] %vm2092_vm6, %v2755_v46 }
 0x343   : > { %v2763_v20 = vadd.f32 %v2731_v38, %v2699_v42 }
 0x345   : > { %2795 = vst.msk [vmem:[%s5019_s10 + $0xf8] sm:$0xff] %vm2092_vm6, %v2763_v20  ;;  %v2637_v1 = vpop.f32.mrf.mxu2 }
 0x348   : > { %v2663_v27 = vpop.f32.mrf.mxu3  ;;  %v2609_v39 = vpop.f32.mrf.mxu1 }
 0x349   : > { %v2683_v51 = vadd.f32 %v5008_v57, %v2609_v39 }
 0x34a   : > { %v2583_v7 = vpop.f32.mrf.mxu0 }
 0x34b   : > { %v2675_v21 = vadd.f32 %v5008_v57, %v2583_v7  ;;  %v2747_v10 = vadd.f32 %v2715_v11, %v2683_v51 }
 0x34d   : > { %v2739_v48 = vadd.f32 %v2707_v63, %v2675_v21  ;;  %2779 = vst.msk [vmem:[%s5019_s10 + $0x78] sm:$0xff] %vm2092_vm6, %v2747_v10 }
 0x34f   : > { %2771 = vst.msk [vmem:[%s5019_s10 + $0x38] sm:$0xff] %vm2092_vm6, %v2739_v48 }
 0x350   : > { %v2611_v62 = vpop.f32.mrf.mxu1 }
 0x352   : > { %v2585_v6 = vpop.f32.mrf.mxu0 }
 0x353 PF: > { %s16_s21 = sadd.s32 1, %s3267_s21  }
 0x354   : > { %p13_p4 = scmp.ge.s32.totalorder %s16_s21, 4  }
 0x356   :  { %15 = sbr.rel (!%p13_p4) target bundleno = 1 (0x1), region = 77 }

// kernel: resblock2d.4
= control target key start
LH: loop header
LB: loop body
LE: loop exit
PB: predicated region body
PF: predicated region fallthrough
CT: control target
= control target key end

     0   :  { %s3433_s21 = smov 0   ;;  %s5430_s0 = inlined_call_operand.vmem [shape: f32[1,4], index: 0, kind: input, shape index: {}]   ;;  %s5431_s1 = inlined_call_operand.vmem [shape: f32[1,4], index: 1, kind: input, shape index: {}]   ;;  %s5432_s2 = inlined_call_operand.vmem [shape: f32[2,16,16,4], index: 2, kind: input, shape index: {}]   ;;  %s5433_s3 = inlined_call_operand.vmem [shape: bf16[36,4], index: 3, kind: input, shape index: {}]   ;;  %s5434_s4 = inlined_call_operand.vmem [shape: f32[1,4], index: 4, kind: input, shape index: {}]   ;;  %s5435_s5 = inlined_call_operand.vmem [shape: f32[2,16,16,4], index: 5, kind: output, shape index: {0}]   ;;  %s5436_s6 = inlined_call_operand.vmem [shape: f32[2,2,4], index: 6, kind: output, shape index: {1}]  }
   0x1 LB: > { %s2985_s22 = sadd.s32 4294967295, %s3387_s21   ;;  %p2989_p0 = scmp.ge.s32.totalorder %s3387_s21, 1  ;;  %s3387_s21 = sphi %s3433_s21, %s17_s21  }
   0x2   : > { %p215_p1 = scmp.lt.s32.totalorder %s3387_s21, 3 }
   0x4   : > { %p216_p2 = pnand %p2989_p0, %p215_p1 }
   0x6   : > { %219 = sbr.rel (%p216_p2) target bundleno = 876 (0x36c), region = 40 }
   0xb   : > { %p249_p3 = scmp.lt.s32.totalorder %s2985_s22, 1  ;;  %vm264_vm0 = vcmask 27648   ;;  %v3389_v0 = vmov 0   ;;  %v3449_v1 = vld [vmem:[%s5430_s0] ss:$0 sm:$0xff]  ;;  %vm667_vm1 = vcmask 1040384  }
   0xc   : > { %265 = vst.msk [vmem:[#allocation2] sm:$0xf] %vm264_vm0, %v3389_v0  ;;  %v3462_v2 = vld [vmem:[%s5431_s1] ss:$0 sm:$0xff]  ;;  %vm668_vm2 = vsmask.f32 256 }
   0xd   : > { %s5653_s22 = smov (!%p249_p3, %s2985_s22), 1  ;;  %266 = vst.msk [vmem:[#allocation2 + $0x4] sm:$0xf] %vm264_vm0, %v3389_v0  ;;  %vm3504_vm3 = vmand %vm667_vm1, %vm668_vm2  ;;  %vm1114_vm4 = vsmask.f32 7424  ;;  %s3390_s7 = smov 4  }
   0xe   : > { %267 = vst.msk [vmem:[#allocation2 + $0x8] sm:$0xf] %vm264_vm0, %v3389_v0  ;;  %s3033_s25 = sshll.u32 %s5653_s22, 8  ;;  %vm1362_vm5 = vcmask 1046528   ;;  %s3391_s12 = smov 8   ;;  %vm2083_vm6 = vcmask 31744  }
   0xf   : > { %s3457_s28 = scalar_lea.vmem %s5432_s2, %s3033_s25  ;;  %268 = vst.msk [vmem:[#allocation2 + $0xcc] sm:$0xf] %vm264_vm0, %v3389_v0  ;;  %s3392_s13 = smov 12   ;;  %vm2132_vm7 = vcmask 64512   ;;  %vm2181_vm8 = vcmask 97280   ;;  %vm2230_vm9 = vcmask 130048  }
  0x10   : > { %v277_v3 = vld [vmem:[%s3457_s28] sm:$0xff]  ;;  %v278_v4 = vld [vmem:[%s3457_s28 + $0x8] sm:$0xff]  ;;  %v279_v5 = vld [vmem:[%s3457_s28 + $0x10] sm:$0xff]  ;;  %269 = vst.msk [vmem:[#allocation2 + $0xd0] sm:$0xf] %vm264_vm0, %v3389_v0  ;;  %s3393_s14 = smov 16   ;;  %s5017_s8 = scalar_lea.vmem %s5435_s5, %s3033_s25 }
  0x11   : > { %v312_v6 = vmul.f32 %v3449_v1, %v277_v3  ;;  %v313_v7 = vmul.f32 %v3449_v1, %v278_v4  ;;  %v280_v8 = vld [vmem:[%s3457_s28 + $0x18] sm:$0xff]  ;;  %v281_v9 = vld [vmem:[%s3457_s28 + $0x20] sm:$0xff]  ;;  %v282_v10 = vld [vmem:[%s3457_s28 + $0x28] sm:$0xff]  ;;  %v314_v11 = vmul.f32 %v3449_v1, %v279_v5  ;;  %270 = vst.msk [vmem:[#allocation2 + $0xd4] sm:$0xf] %vm264_vm0, %v3389_v0  ;;  %s3394_s15 = smov 20  }
  0x12   : > { %v315_v12 = vmul.f32 %v3449_v1, %v280_v8  ;;  %v316_v13 = vmul.f32 %v3449_v1, %v281_v9  ;;  %v317_v14 = vmul.f32 %v3449_v1, %v282_v10  ;;  %v283_v15 = vld [vmem:[%s3457_s28 + $0x30] sm:$0xff]  ;;  %271 = vst.msk [vmem:[#allocation2 + $0xd8] sm:$0xf] %vm264_vm0, %v3389_v0  ;;  %v284_v20 = vld [vmem:[%s3457_s28 + $0x38] sm:$0xff]  ;;  %v285_v42 = vld [vmem:[%s3457_s28 + $0x40] sm:$0xff]  ;;  %s3395_s16 = smov 24  }
  0x13   : > { %v347_v16 = vadd.f32 %v3462_v2, %v312_v6  ;;  %v348_v17 = vadd.f32 %v3462_v2, %v313_v7  ;;  %v349_v19 = vadd.f32 %v3462_v2, %v314_v11  ;;  %v318_v21 = vmul.f32 %v3449_v1, %v283_v15  ;;  %v286_v43 = vld [vmem:[%s3457_s28 + $0x48] sm:$0xff]  ;;  %v287_v48 = vld [vmem:[%s3457_s28 + $0x50] sm:$0xff]  ;;  %v288_v3 = vld [vmem:[%s3457_s28 + $0x58] sm:$0xff]  ;;  %s3396_s17 = smov 32   ;;  %s3397_s18 = smov 28  }
  0x14   : > { %v3039_v18 = vld [vmem:[#allocation2] sm:$0xff]   ;;  %v350_v24 = vadd.f32 %v3462_v2, %v315_v12  ;;  %v351_v25 = vadd.f32 %v3462_v2, %v316_v13  ;;  %v352_v28 = vadd.f32 %v3462_v2, %v317_v14  ;;  %v319_v33 = vmul.f32 %v3449_v1, %v284_v20  ;;  %s2994_s25 = sshll.u32 %s5653_s22, 1 }
  0x15   : > { %v1116_v22 = vshrl.u32 %v3039_v18, 16  ;;  %v1118_v23 = vshll.u32 %v3039_v18, 16  ;;  %v379_v26 = vmax.f32 %v347_v16, 0.0  ;;  %v380_v27 = vmax.f32 %v348_v17, 0.0  ;;  %s262_s11 = scalar_lea.vmem %s5436_s6, %s2994_s25 }
  0x16   : > { %v381_v29 = vmax.f32 %v349_v19, 0.0  ;;  %v382_v31 = vmax.f32 %v350_v24, 0.0  ;;  %v383_v32 = vmax.f32 %v351_v25, 0.0  ;;  %v384_v36 = vmax.f32 %v352_v28, 0.0 }
  0x17   : > { %v1120_v30 = vrot.slane %v1118_v23, 1  ;;  %v411_v34 = vpack.c.bf16 %v379_v26, %v379_v26  ;;  %v412_v35 = vpack.c.bf16 %v380_v27, %v380_v27  ;;  %v353_v41 = vadd.f32 %v3462_v2, %v318_v21 }
  0x18   : > { %v413_v37 = vpack.c.bf16 %v381_v29, %v381_v29  ;;  %v414_v39 = vpack.c.bf16 %v382_v31, %v382_v31  ;;  %v415_v40 = vpack.c.bf16 %v383_v32, %v383_v32  ;;  %v416_v46 = vpack.c.bf16 %v384_v36, %v384_v36 }
  0x19   : > { %v3490_v38 = vor.u32 %v1120_v30, %v1116_v22  ;;  %v475_v44 = vunpack.c.l.b16 %v411_v34  ;;  %v476_v45 = vunpack.c.l.b16 %v412_v35  ;;  %v354_v51 = vadd.f32 %v3462_v2, %v319_v33 }
  0x1a   : > { %v477_v47 = vunpack.c.l.b16 %v413_v37  ;;  %v478_v49 = vunpack.c.l.b16 %v414_v39  ;;  %v479_v50 = vunpack.c.l.b16 %v415_v40  ;;  %v385_v52 = vmax.f32 %v353_v41, 0.0 }
  0x1b   : > { %v507_v53 = vpack.c.b16 %v476_v45, %v475_v44  ;;  %v480_v54 = vunpack.c.l.b16 %v416_v46  ;;  %v320_v55 = vmul.f32 %v3449_v1, %v285_v42  ;;  %v321_v56 = vmul.f32 %v3449_v1, %v286_v43  ;;  %v289_v46 = vld [vmem:[%s3457_s28 + $0x60] sm:$0xff] }
  0x1c   : > { %v508_v57 = vpack.c.b16 %v478_v49, %v477_v47  ;;  %v386_v58 = vmax.f32 %v354_v51, 0.0  ;;  %v417_v59 = vpack.c.bf16 %v385_v52, %v385_v52  ;;  %v322_v60 = vmul.f32 %v3449_v1, %v287_v48  ;;  %v290_v47 = vld [vmem:[%s3457_s28 + $0x68] sm:$0xff]  ;;  %v291_v48 = vld [vmem:[%s3457_s28 + $0x70] sm:$0xff] }
  0x1d   : > { %v524_v61 = vshrl.u32 %v507_v53, 16  ;;  %v527_v62 = vshll.u32 %v507_v53, 16  ;;  %v509_v63 = vpack.c.b16 %v480_v54, %v479_v50  ;;  %v355_v0 = vadd.f32 %v3462_v2, %v320_v55 }
  0x1e   : > { %v531_v5 = vshrl.u32 %v508_v57, 16  ;;  %v534_v6 = vshll.u32 %v508_v57, 16  ;;  %v418_v7 = vpack.c.bf16 %v386_v58, %v386_v58  ;;  %v481_v8 = vunpack.c.l.b16 %v417_v59 }
  0x1f   : > { %v526_v9 = vrot.slane %v524_v61, 7  ;;  %v538_v10 = vshrl.u32 %v509_v63, 16  ;;  %v541_v11 = vshll.u32 %v509_v63, 16  ;;  %v356_v12 = vadd.f32 %v3462_v2, %v321_v56 }
  0x20   : > { %v533_v13 = vrot.slane %v531_v5, 7  ;;  %v482_v14 = vunpack.c.l.b16 %v418_v7  ;;  %v387_v15 = vmax.f32 %v355_v0, 0.0  ;;  %v323_v16 = vmul.f32 %v3449_v1, %v288_v3  ;;  %v292_v5 = vld [vmem:[%s3457_s28 + $0x78] sm:$0xff] }
  0x21   : > { %v529_v17 = vor.u32 %v527_v62, %v526_v9  ;;  %v540_v18 = vrot.slane %v538_v10, 7  ;;  %v686_v19 = vsel %vm3504_vm3, %v526_v9, 0  ;;  %v388_v20 = vmax.f32 %v356_v12, 0.0 }
  0x22   : > { %v687_v21 = vsel %vm3504_vm3, %v533_v13, 0  ;;  %v536_v22 = vor.u32 %v534_v6, %v533_v13  ;;  %v736_v23 = vunpack.c.l.b16 %v686_v19  ;;  %v510_v24 = vpack.c.b16 %v482_v14, %v481_v8 }
  0x23   : > { %v670_v25 = vsel %vm3504_vm3, 0, %v529_v17  ;;  %v543_v26 = vor.u32 %v541_v11, %v540_v18  ;;  %v688_v27 = vsel %vm3504_vm3, %v540_v18, 0  ;;  %v739_v28 = vunpack.c.l.b16 %v687_v21 }
  0x24   : > { %v734_v29 = vunpack.c.l.b16 %v670_v25  ;;  %v742_v30 = vunpack.c.l.b16 %v688_v27  ;;  %v671_v31 = vsel %vm3504_vm3, 0, %v536_v22  ;;  %v735_v32 = vunpack.c.h.b16 %v670_v25 }
  0x25   : > { %v672_v33 = vsel %vm3504_vm3, 0, %v543_v26  ;;  %v787_v34 = vpack.c.b16 %v739_v28, %v739_v28  ;;  %v737_v35 = vunpack.c.l.b16 %v671_v31  ;;  %v738_v36 = vunpack.c.h.b16 %v671_v31 }
  0x26   : > { %v782_v37 = vpack.c.b16 %v734_v29, %v734_v29  ;;  %v740_v39 = vunpack.c.l.b16 %v672_v33  ;;  %v741_v40 = vunpack.c.h.b16 %v672_v33  ;;  %v790_v41 = vpack.c.b16 %v742_v30, %v742_v30 }
  0x27   : > { %883 = vst.msk [vmem:[#allocation2 + $0x20] sm:$0xf] %vm264_vm0, %v787_v34  ;;  %v783_v42 = vpack.c.b16 %v735_v32, %v735_v32  ;;  %v784_v43 = vpack.c.b16 %v736_v23, %v736_v23  ;;  %v785_v44 = vpack.c.b16 %v737_v35, %v737_v35  ;;  %v786_v45 = vpack.c.b16 %v738_v36, %v738_v36 }
  0x28   : > { %878 = vst.msk [vmem:[#allocation2 + $0xc] sm:$0xf] %vm264_vm0, %v782_v37  ;;  %v788_v49 = vpack.c.b16 %v740_v39, %v740_v39  ;;  %v789_v50 = vpack.c.b16 %v741_v40, %v741_v40  ;;  %v545_v51 = vshrl.u32 %v510_v24, 16  ;;  %v548_v52 = vshll.u32 %v510_v24, 16 }
  0x29   : > { %886 = vst.msk [vmem:[#allocation2 + $0x2c] sm:$0xf] %vm264_vm0, %v790_v41  ;;  %v419_v53 = vpack.c.bf16 %v387_v15, %v387_v15  ;;  %v420_v54 = vpack.c.bf16 %v388_v20, %v388_v20  ;;  %v357_v55 = vadd.f32 %v3462_v2, %v322_v60  ;;  %v358_v56 = vadd.f32 %v3462_v2, %v323_v16 }
  0x2a   : > { %884 = vst.msk [vmem:[#allocation2 + $0x24] sm:$0xf] %vm264_vm0, %v788_v49  ;;  %v547_v57 = vrot.slane %v545_v51, 7  ;;  %v324_v58 = vmul.f32 %v3449_v1, %v289_v46  ;;  %v325_v59 = vmul.f32 %v3449_v1, %v290_v47  ;;  %v3534_v61 = vmul.f32 %v3449_v1, %v291_v48 }
  0x2b   : > { %885 = vst.msk [vmem:[#allocation2 + $0x28] sm:$0xf] %vm264_vm0, %v789_v50  ;;  %v483_v62 = vunpack.c.l.b16 %v419_v53  ;;  %v484_v63 = vunpack.c.l.b16 %v420_v54  ;;  %v389_v0 = vmax.f32 %v357_v55, 0.0  ;;  %v390_v3 = vmax.f32 %v358_v56, 0.0 }
  0x2c   : > { %879 = vst.msk [vmem:[#allocation2 + $0x10] sm:$0xf] %vm264_vm0, %v783_v42  ;;  %v550_v60 = vor.u32 %v548_v52, %v547_v57  ;;  %v689_v6 = vsel %vm3504_vm3, %v547_v57, 0  ;;  %v359_v7 = vadd.f32 %v3462_v2, %v324_v58  ;;  %v3543_v8 = vadd.f32 %v3462_v2, %v325_v59 }
  0x2d   : > { %880 = vst.msk [vmem:[#allocation2 + $0x14] sm:$0xf] %vm264_vm0, %v784_v43  ;;  %v511_v9 = vpack.c.b16 %v484_v63, %v483_v62  ;;  %v745_v10 = vunpack.c.l.b16 %v689_v6  ;;  %v421_v11 = vpack.c.bf16 %v389_v0, %v389_v0  ;;  %v422_v12 = vpack.c.bf16 %v390_v3, %v390_v3 }
  0x2e   : > { %881 = vst.msk [vmem:[#allocation2 + $0x18] sm:$0xf] %vm264_vm0, %v785_v44  ;;  %v673_v13 = vsel %vm3504_vm3, 0, %v550_v60  ;;  %v391_v14 = vmax.f32 %v359_v7, 0.0  ;;  %v392_v15 = vmax.f32 %v3543_v8, 0.0  ;;  %v3551_v16 = vmul.f32 %v3449_v1, %v292_v5 }
  0x2f   : > { %v3553_v17 = vld [vmem:[#allocation2 + $0x8] sm:$0xff]   ;;  %882 = vst.msk [vmem:[#allocation2 + $0x1c] sm:$0xf] %vm264_vm0, %v786_v45  ;;  %v743_v18 = vunpack.c.l.b16 %v673_v13  ;;  %v744_v19 = vunpack.c.h.b16 %v673_v13  ;;  %v552_v20 = vshrl.u32 %v511_v9, 16  ;;  %v555_v21 = vshll.u32 %v511_v9, 16 }
  0x30   : > { %v1123_v22 = vshll.u32 %v3553_v17, 16  ;;  %v1127_v23 = vshrl.u32 %v3553_v17, 16  ;;  %v793_v24 = vpack.c.b16 %v745_v10, %v745_v10  ;;  %v485_v25 = vunpack.c.l.b16 %v421_v11 }
  0x31   : > { %v3558_v26 = vld [vmem:[#allocation2 + $0x20] sm:$0xff]   ;;  %v791_v27 = vpack.c.b16 %v743_v18, %v743_v18  ;;  %v792_v28 = vpack.c.b16 %v744_v19, %v744_v19  ;;  %v554_v29 = vrot.slane %v552_v20, 7  ;;  %v486_v30 = vunpack.c.l.b16 %v422_v12 }
  0x32   : > { %v1125_v31 = vrot.slane %v1123_v22, 1  ;;  %v3560_v32 = vld [vmem:[#allocation2 + $0x28] sm:$0xff]   ;;  %v1147_v33 = vshll.u32 %v3558_v26, 16  ;;  %v1151_v34 = vshrl.u32 %v3558_v26, 16  ;;  %889 = vst.msk [vmem:[#allocation2 + $0x38] sm:$0xf] %vm264_vm0, %v793_v24  ;;  %v423_v35 = vpack.c.bf16 %v391_v14, %v391_v14 }
  0x33   : > { %v1155_v36 = vshll.u32 %v3560_v32, 16  ;;  %887 = vst.msk [vmem:[#allocation2 + $0x30] sm:$0xf] %vm264_vm0, %v791_v27  ;;  %v1159_v37 = vshrl.u32 %v3560_v32, 16  ;;  %v557_v39 = vor.u32 %v555_v21, %v554_v29  ;;  %v512_v40 = vpack.c.b16 %v486_v30, %v485_v25  ;;  %v293_v21 = vld [vmem:[%s3457_s28 + $0x80] sm:$0xff] }
  0x34   : > { %v1126_v41 = vsel %vm1114_vm4, %v3490_v38, %v1125_v31  ;;  %v1149_v42 = vrot.slane %v1147_v33, 1  ;;  %v3570_v43 = vld [vmem:[#allocation2 + $0x10] sm:$0xff]   ;;  %v1129_v44 = vor.u32 %v1127_v23, %v1125_v31  ;;  %888 = vst.msk [vmem:[#allocation2 + $0x34] sm:$0xf] %vm264_vm0, %v792_v28  ;;  %v690_v45 = vsel %vm3504_vm3, %v554_v29, 0  ;;  %v294_v31 = vld [vmem:[%s3457_s28 + $0x88] sm:$0xff] }
  0x35   : > { %1311 = vrot.lane.b32.xlu0 %v1126_v41, %s3390_s7  ;;  %v1157_v46 = vrot.slane %v1155_v36, 1  ;;  %v1131_v47 = vshll.u32 %v3570_v43, 16  ;;  %v1135_v48 = vshrl.u32 %v3570_v43, 16  ;;  %v674_v38 = vsel %vm3504_vm3, 0, %v557_v39 }
  0x36   : > { %v1153_v49 = vor.u32 %v1151_v34, %v1149_v42  ;;  %v3580_v50 = vld [vmem:[#allocation2 + $0x18] sm:$0xff]   ;;  %v746_v51 = vunpack.c.l.b16 %v674_v38  ;;  %v559_v52 = vshrl.u32 %v512_v40, 16  ;;  %v562_v53 = vshll.u32 %v512_v40, 16 }
  0x37   : > { %v1133_v54 = vrot.slane %v1131_v47, 1  ;;  %v1139_v55 = vshll.u32 %v3580_v50, 16  ;;  %v1161_v56 = vor.u32 %v1159_v37, %v1157_v46  ;;  %v1143_v57 = vshrl.u32 %v3580_v50, 16  ;;  %v295_v37 = vld [vmem:[%s3457_s28 + $0x90] sm:$0xff]  ;;  %v296_v47 = vld [vmem:[%s3457_s28 + $0x98] sm:$0xff] }
  0x38   : > { %v3585_v58 = vsel %vm1114_vm4, %v1153_v49, %v1157_v46  ;;  %v794_v59 = vpack.c.b16 %v746_v51, %v746_v51  ;;  %v561_v62 = vrot.slane %v559_v52, 7  ;;  %v747_v63 = vunpack.c.h.b16 %v674_v38 }
  0x39   : > { %1319 = vrot.lane.b32.xlu2 %v3585_v58, %s3390_s7  ;;  %v1137_v0 = vor.u32 %v1135_v48, %v1133_v54  ;;  %v1141_v3 = vrot.slane %v1139_v55, 1  ;;  %v1134_v5 = vsel %vm1114_vm4, %v1129_v44, %v1133_v54  ;;  %v748_v60 = vunpack.c.l.b16 %v690_v45 }
  0x3a   : > { %890 = vst.msk [vmem:[#allocation2 + $0x3c] sm:$0xf] %vm264_vm0, %v794_v59  ;;  %v564_v6 = vor.u32 %v562_v53, %v561_v62  ;;  %v795_v7 = vpack.c.b16 %v747_v63, %v747_v63  ;;  %v424_v8 = vpack.c.bf16 %v392_v15, %v392_v15  ;;  %v487_v9 = vunpack.c.l.b16 %v423_v35 }
  0x3b   : > { %v1142_v10 = vsel %vm1114_vm4, %v1137_v0, %v1141_v3  ;;  %v3592_v11 = vld [vmem:[#allocation2 + $0x30] sm:$0xff]   ;;  %v1145_v12 = vor.u32 %v1143_v57, %v1141_v3  ;;  %v796_v13 = vpack.c.b16 %v748_v60, %v748_v60  ;;  %v691_v14 = vsel %vm3504_vm3, %v561_v62, 0 }
  0x3c   : > { %1315 = vrot.lane.b32.xlu1 %v1142_v10, %s3390_s7  ;;  %v1163_v18 = vshll.u32 %v3592_v11, 16  ;;  %v1167_v19 = vshrl.u32 %v3592_v11, 16  ;;  %v675_v15 = vsel %vm3504_vm3, 0, %v564_v6  ;;  %891 = vst.msk [vmem:[#allocation2 + $0x40] sm:$0xf] %vm264_vm0, %v795_v7  ;;  %v488_v20 = vunpack.c.l.b16 %v424_v8 }
  0x3d   : > { %1313 = vrot.lane.b32.xlu0 %v1134_v5, %s3390_s7  ;;  %v3605_v22 = vsel %vm1114_vm4, %v1145_v12, %v1149_v42  ;;  %v749_v23 = vunpack.c.l.b16 %v675_v15  ;;  %v750_v24 = vunpack.c.h.b16 %v675_v15  ;;  %892 = vst.msk [vmem:[#allocation2 + $0x44] sm:$0xf] %vm264_vm0, %v796_v13  ;;  %v751_v25 = vunpack.c.l.b16 %v691_v14 }
  0x3e   : > { %v1165_v27 = vrot.slane %v1163_v18, 1  ;;  %v513_v28 = vpack.c.b16 %v488_v20, %v487_v9  ;;  %v361_v29 = vadd.f32 %v3462_v2, %v3534_v61  ;;  %v362_v30 = vadd.f32 %v3462_v2, %v3551_v16 }
  0x3f   : > { %v797_v33 = vpack.c.b16 %v749_v23, %v749_v23  ;;  %v798_v34 = vpack.c.b16 %v750_v24, %v750_v24  ;;  %v799_v35 = vpack.c.b16 %v751_v25, %v751_v25  ;;  %v328_v36 = vmul.f32 %v3449_v1, %v293_v21 }
  0x40   : > { %v3616_v39 = vsel %vm1114_vm4, %v1161_v56, %v1165_v27  ;;  %v1169_v40 = vor.u32 %v1167_v19, %v1165_v27  ;;  %v566_v41 = vshrl.u32 %v513_v28, 16  ;;  %v569_v42 = vshll.u32 %v513_v28, 16  ;;  %v297_v28 = vld [vmem:[%s3457_s28 + $0xa0] sm:$0xff] }
  0x41   : > { %1321 = vrot.lane.b32.xlu2 %v3616_v39, %s3390_s7  ;;  %v3620_v61 = vld [vmem:[#allocation2 + $0x38] sm:$0xff]   ;;  %893 = vst.msk [vmem:[#allocation2 + $0x48] sm:$0xf] %vm264_vm0, %v797_v33  ;;  %v393_v16 = vmax.f32 %v361_v29, 0.0  ;;  %v394_v44 = vmax.f32 %v362_v30, 0.0  ;;  %v329_v45 = vmul.f32 %v3449_v1, %v294_v31  ;;  %v363_v46 = vadd.f32 %v3462_v2, %v328_v36  ;;  %v298_v29 = vld [vmem:[%s3457_s28 + $0xa8] sm:$0xff] }
  0x42   : > { %v1171_v48 = vshll.u32 %v3620_v61, 16  ;;  %894 = vst.msk [vmem:[#allocation2 + $0x4c] sm:$0xf] %vm264_vm0, %v798_v34  ;;  %v1175_v38 = vshrl.u32 %v3620_v61, 16  ;;  %v568_v49 = vrot.slane %v566_v41, 7  ;;  %v330_v51 = vmul.f32 %v3449_v1, %v295_v37 }
  0x43   : > { %895 = vst.msk [vmem:[#allocation2 + $0x50] sm:$0xf] %vm264_vm0, %v799_v35  ;;  %v425_v52 = vpack.c.bf16 %v393_v16, %v393_v16  ;;  %v426_v53 = vpack.c.bf16 %v394_v44, %v394_v44  ;;  %v364_v54 = vadd.f32 %v3462_v2, %v329_v45  ;;  %v395_v55 = vmax.f32 %v363_v46, 0.0 }
  0x44   : > { %1317 = vrot.lane.b32.xlu1 %v3605_v22, %s3390_s7  ;;  %v1173_v56 = vrot.slane %v1171_v48, 1  ;;  %v3634_v57 = vld [vmem:[#allocation2 + $0x40] sm:$0xff]   ;;  %v571_v59 = vor.u32 %v569_v42, %v568_v49  ;;  %v692_v62 = vsel %vm3504_vm3, %v568_v49, 0  ;;  %v331_v63 = vmul.f32 %v3449_v1, %v296_v47 }
  0x45   : > { %v1179_v0 = vshll.u32 %v3634_v57, 16  ;;  %v1183_v3 = vshrl.u32 %v3634_v57, 16  ;;  %v489_v5 = vunpack.c.l.b16 %v425_v52  ;;  %v490_v60 = vunpack.c.l.b16 %v426_v53 }
  0x46   : > { %v3642_v6 = vsel %vm1114_vm4, %v1169_v40, %v1173_v56  ;;  %v1177_v7 = vor.u32 %v1175_v38, %v1173_v56  ;;  %v676_v8 = vsel %vm3504_vm3, 0, %v571_v59  ;;  %v754_v9 = vunpack.c.l.b16 %v692_v62  ;;  %v299_v59 = vld [vmem:[%s3457_s28 + $0xb0] sm:$0xff] }
  0x47   : > { %5495 = vst [vmem:[#allocation3_spill] sm:$0xff] %v3642_v6  ;;  %1323 = vrot.lane.b32.xlu0 %v3642_v6, %s3390_s7  ;;  %v1181_v10 = vrot.slane %v1179_v0, 1  ;;  %v752_v12 = vunpack.c.l.b16 %v676_v8  ;;  %v514_v13 = vpack.c.b16 %v490_v60, %v489_v5  ;;  %v753_v14 = vunpack.c.h.b16 %v676_v8 }
  0x48   : > { %v802_v18 = vpack.c.b16 %v754_v9, %v754_v9  ;;  %v396_v19 = vmax.f32 %v364_v54, 0.0  ;;  %v427_v15 = vpack.c.bf16 %v395_v55, %v395_v55  ;;  %v365_v20 = vadd.f32 %v3462_v2, %v330_v51 }
  0x49   : > { %v3649_v21 = vld [vmem:[#allocation2 + $0x48] sm:$0xff]   ;;  %v1185_v23 = vor.u32 %v1183_v3, %v1181_v10  ;;  %v3652_v24 = vsel %vm1114_vm4, %v1177_v7, %v1181_v10  ;;  %v800_v25 = vpack.c.b16 %v752_v12, %v752_v12  ;;  %v573_v27 = vshrl.u32 %v514_v13, 16 }
  0x4a   : > { %5496 = vst [vmem:[#allocation4_spill] sm:$0xff] %v3652_v24  ;;  %v1187_v30 = vshll.u32 %v3649_v21, 16  ;;  %v1191_v31 = vshrl.u32 %v3649_v21, 16  ;;  %v576_v33 = vshll.u32 %v514_v13, 16  ;;  %v801_v34 = vpack.c.b16 %v753_v14, %v753_v14 }
  0x4b   : > { %898 = vst.msk [vmem:[#allocation2 + $0x5c] sm:$0xf] %vm264_vm0, %v802_v18  ;;  %v575_v35 = vrot.slane %v573_v27, 7  ;;  %v428_v36 = vpack.c.bf16 %v396_v19, %v396_v19  ;;  %v491_v37 = vunpack.c.l.b16 %v427_v15  ;;  %v366_v40 = vadd.f32 %v3462_v2, %v331_v63 }
  0x4c   : > { %896 = vst.msk [vmem:[#allocation2 + $0x54] sm:$0xf] %vm264_vm0, %v800_v25  ;;  %v1189_v41 = vrot.slane %v1187_v30, 1  ;;  %1325 = vrot.lane.b32.xlu1 %v3652_v24, %s3390_s7  ;;  %v397_v42 = vmax.f32 %v365_v20, 0.0  ;;  %v332_v16 = vmul.f32 %v3449_v1, %v297_v28  ;;  %v333_v44 = vmul.f32 %v3449_v1, %v298_v29 }
  0x4d   : > { %897 = vst.msk [vmem:[#allocation2 + $0x58] sm:$0xf] %vm264_vm0, %v801_v34  ;;  %v578_v45 = vor.u32 %v576_v33, %v575_v35  ;;  %v492_v46 = vunpack.c.l.b16 %v428_v36  ;;  %v693_v47 = vsel %vm3504_vm3, %v575_v35, 0  ;;  %v398_v48 = vmax.f32 %v366_v40, 0.0 }
  0x4e   : > { %v3669_v38 = vsel %vm1114_vm4, %v1185_v23, %v1189_v41  ;;  %v1193_v49 = vor.u32 %v1191_v31, %v1189_v41  ;;  %v757_v51 = vunpack.c.l.b16 %v693_v47  ;;  %v429_v52 = vpack.c.bf16 %v397_v42, %v397_v42 }
  0x4f   : > { %5497 = vst [vmem:[#allocation5_spill] sm:$0xff] %v3669_v38  ;;  %1327 = vrot.lane.b32.xlu2 %v3669_v38, %s3390_s7  ;;  %v677_v53 = vsel %vm3504_vm3, 0, %v578_v45  ;;  %v515_v54 = vpack.c.b16 %v492_v46, %v491_v37  ;;  %v430_v55 = vpack.c.bf16 %v398_v48, %v398_v48  ;;  %v367_v56 = vadd.f32 %v3462_v2, %v332_v16  ;;  %v4106_v38 = vld [vmem:[#allocation2 + $0x3c] sm:$0xff]  }
  0x50   : > { %v755_v62 = vunpack.c.l.b16 %v677_v53  ;;  %v756_v63 = vunpack.c.h.b16 %v677_v53  ;;  %v805_v0 = vpack.c.b16 %v757_v51, %v757_v51  ;;  %v493_v3 = vunpack.c.l.b16 %v429_v52  ;;  %v300_v51 = vld [vmem:[%s3457_s28 + $0xb8] sm:$0xff] }
  0x51   : > { %v580_v5 = vshrl.u32 %v515_v54, 16  ;;  %v583_v60 = vshll.u32 %v515_v54, 16  ;;  %v494_v7 = vunpack.c.l.b16 %v430_v55  ;;  %v368_v8 = vadd.f32 %v3462_v2, %v333_v44  ;;  %v301_v55 = vld [vmem:[%s3457_s28 + $0xc0] sm:$0xff] }
  0x52   : > { %v803_v10 = vpack.c.b16 %v755_v62, %v755_v62  ;;  %v804_v12 = vpack.c.b16 %v756_v63, %v756_v63  ;;  %901 = vst.msk [vmem:[#allocation2 + $0x68] sm:$0xf] %vm264_vm0, %v805_v0  ;;  %v399_v13 = vmax.f32 %v367_v56, 0.0  ;;  %v334_v14 = vmul.f32 %v3449_v1, %v299_v59 }
  0x53   : > { %v3678_v9 = vld [vmem:[#allocation2 + $0x50] sm:$0xff]   ;;  %v582_v20 = vrot.slane %v580_v5, 7  ;;  %v516_v23 = vpack.c.b16 %v494_v7, %v493_v3  ;;  %v400_v28 = vmax.f32 %v368_v8, 0.0  ;;  %v335_v5 = vmul.f32 %v3449_v1, %v300_v51  ;;  %v302_v7 = vld [vmem:[%s3457_s28 + $0xc8] sm:$0xff] }
  0x54   : > { %v1195_v18 = vshll.u32 %v3678_v9, 16  ;;  %v3683_v19 = vld [vmem:[#allocation2 + $0x58] sm:$0xff]   ;;  %v1199_v15 = vshrl.u32 %v3678_v9, 16  ;;  %899 = vst.msk [vmem:[#allocation2 + $0x60] sm:$0xf] %vm264_vm0, %v803_v10  ;;  %v431_v29 = vpack.c.bf16 %v399_v13, %v399_v13  ;;  %vm2539_vm10 = vcmask 1041408  }
  0x55   : > { %v1203_v25 = vshll.u32 %v3683_v19, 16  ;;  %v1207_v27 = vshrl.u32 %v3683_v19, 16  ;;  %900 = vst.msk [vmem:[#allocation2 + $0x64] sm:$0xf] %vm264_vm0, %v804_v12  ;;  %v585_v31 = vor.u32 %v583_v60, %v582_v20  ;;  %v587_v33 = vshrl.u32 %v516_v23, 16 }
  0x56   : > { %v1197_v30 = vrot.slane %v1195_v18, 1  ;;  %v590_v34 = vshll.u32 %v516_v23, 16  ;;  %v694_v36 = vsel %vm3504_vm3, %v582_v20, 0  ;;  %v432_v37 = vpack.c.bf16 %v400_v28, %v400_v28  ;;  %v304_v20 = vld [vmem:[%s3457_s28 + $0xd8] sm:$0xff] }
  0x57   : > { %v1205_v35 = vrot.slane %v1203_v25, 1  ;;  %v495_v40 = vunpack.c.l.b16 %v431_v29  ;;  %v678_v16 = vsel %vm3504_vm3, 0, %v585_v31  ;;  %v589_v44 = vrot.slane %v587_v33, 7 }
  0x58   : > { %v3693_v41 = vsel %vm1114_vm4, %v1193_v49, %v1197_v30  ;;  %v1201_v42 = vor.u32 %v1199_v15, %v1197_v30  ;;  %v758_v46 = vunpack.c.l.b16 %v678_v16  ;;  %v759_v47 = vunpack.c.h.b16 %v678_v16  ;;  %v303_v15 = vld [vmem:[%s3457_s28 + $0xd0] sm:$0xff] }
  0x59   : > { %1329 = vrot.lane.b32.xlu0 %v3693_v41, %s3390_s7  ;;  %v1209_v45 = vor.u32 %v1207_v27, %v1205_v35  ;;  %v760_v48 = vunpack.c.l.b16 %v694_v36  ;;  %v592_v53 = vor.u32 %v590_v34, %v589_v44  ;;  %v496_v49 = vunpack.c.l.b16 %v432_v37 }
  0x5a   : > { %v3701_v52 = vsel %vm1114_vm4, %v1201_v42, %v1205_v35  ;;  %v695_v54 = vsel %vm3504_vm3, %v589_v44, 0  ;;  %v806_v56 = vpack.c.b16 %v758_v46, %v758_v46  ;;  %v807_v59 = vpack.c.b16 %v759_v47, %v759_v47 }
  0x5b   : > { %1331 = vrot.lane.b32.xlu1 %v3701_v52, %s3390_s7  ;;  %v808_v62 = vpack.c.b16 %v760_v48, %v760_v48  ;;  %v763_v63 = vunpack.c.l.b16 %v695_v54  ;;  %v679_v0 = vsel %vm3504_vm3, 0, %v592_v53  ;;  %v517_v3 = vpack.c.b16 %v496_v49, %v495_v40 }
  0x5c   : > { %v369_v60 = vadd.f32 %v3462_v2, %v334_v14  ;;  %v3713_v8 = vld [vmem:[#allocation2 + $0x60] sm:$0xff]   ;;  %902 = vst.msk [vmem:[#allocation2 + $0x6c] sm:$0xf] %vm264_vm0, %v806_v56  ;;  %v761_v10 = vunpack.c.l.b16 %v679_v0  ;;  %v762_v12 = vunpack.c.h.b16 %v679_v0  ;;  %v336_v18 = vmul.f32 %v3449_v1, %v301_v55 }
  0x5d   : > { %v811_v13 = vpack.c.b16 %v763_v63, %v763_v63  ;;  %v1211_v23 = vshll.u32 %v3713_v8, 16  ;;  %v1215_v25 = vshrl.u32 %v3713_v8, 16  ;;  %903 = vst.msk [vmem:[#allocation2 + $0x70] sm:$0xf] %vm264_vm0, %v807_v59  ;;  %v594_v27 = vshrl.u32 %v517_v3, 16 }
  0x5e   : > { %v597_v14 = vshll.u32 %v517_v3, 16  ;;  %v809_v28 = vpack.c.b16 %v761_v10, %v761_v10  ;;  %v810_v29 = vpack.c.b16 %v762_v12, %v762_v12  ;;  %904 = vst.msk [vmem:[#allocation2 + $0x74] sm:$0xf] %vm264_vm0, %v808_v62  ;;  %v370_v30 = vadd.f32 %v3462_v2, %v335_v5 }
  0x5f   : > { %v401_v31 = vmax.f32 %v369_v60, 0.0  ;;  %v1213_v33 = vrot.slane %v1211_v23, 1  ;;  %v596_v34 = vrot.slane %v594_v27, 7  ;;  %907 = vst.msk [vmem:[#allocation2 + $0x80] sm:$0xf] %vm264_vm0, %v811_v13  ;;  %v337_v35 = vmul.f32 %v3449_v1, %v302_v7 }
  0x60   : > { %v371_v36 = vadd.f32 %v3462_v2, %v336_v18  ;;  %905 = vst.msk [vmem:[#allocation2 + $0x78] sm:$0xf] %vm264_vm0, %v809_v28  ;;  %v402_v37 = vmax.f32 %v370_v30, 0.0  ;;  %v338_v42 = vmul.f32 %v3449_v1, %v303_v15  ;;  %v339_v16 = vmul.f32 %v3449_v1, %v304_v20 }
  0x61   : > { %v433_v40 = vpack.c.bf16 %v401_v31, %v401_v31  ;;  %v3731_v44 = vsel %vm1114_vm4, %v1209_v45, %v1213_v33  ;;  %v1217_v46 = vor.u32 %v1215_v25, %v1213_v33  ;;  %906 = vst.msk [vmem:[#allocation2 + $0x7c] sm:$0xf] %vm264_vm0, %v810_v29  ;;  %v599_v47 = vor.u32 %v597_v14, %v596_v34  ;;  %v305_v29 = vld [vmem:[%s3457_s28 + $0xe0] sm:$0xff] }
  0x62   : > { %5498 = vst [vmem:[#allocation6_spill] sm:$0xff] %v3731_v44  ;;  %v696_v48 = vsel %vm3504_vm3, %v596_v34, 0  ;;  %1333 = vrot.lane.b32.xlu2 %v3731_v44, %s3390_s7  ;;  %v434_v51 = vpack.c.bf16 %v402_v37, %v402_v37  ;;  %v372_v54 = vadd.f32 %v3462_v2, %v337_v35  ;;  %v403_v56 = vmax.f32 %v371_v36, 0.0  ;;  %v306_v36 = vld [vmem:[%s3457_s28 + $0xe8] sm:$0xff] }
  0x63   : > { %v497_v53 = vunpack.c.l.b16 %v433_v40  ;;  %v766_v49 = vunpack.c.l.b16 %v696_v48  ;;  %v3739_v55 = vld [vmem:[#allocation2 + $0x68] sm:$0xff]   ;;  %v680_v45 = vsel %vm3504_vm3, 0, %v599_v47  ;;  %v373_v59 = vadd.f32 %v3462_v2, %v338_v42 }
  0x64   : > { %v374_v62 = vadd.f32 %v3462_v2, %v339_v16  ;;  %v1219_v63 = vshll.u32 %v3739_v55, 16  ;;  %v1223_v0 = vshrl.u32 %v3739_v55, 16  ;;  %v764_v3 = vunpack.c.l.b16 %v680_v45 }
  0x65   : > { %v498_v5 = vunpack.c.l.b16 %v434_v51  ;;  %v3747_v60 = vld [vmem:[#allocation2 + $0x70] sm:$0xff]   ;;  %v765_v7 = vunpack.c.h.b16 %v680_v45  ;;  %v814_v10 = vpack.c.b16 %v766_v49, %v766_v49  ;;  %v404_v12 = vmax.f32 %v372_v54, 0.0 }
  0x66   : > { %v435_v13 = vpack.c.bf16 %v403_v56, %v403_v56  ;;  %v1221_v18 = vrot.slane %v1219_v63, 1  ;;  %v1227_v15 = vshll.u32 %v3747_v60, 16  ;;  %v1231_v20 = vshrl.u32 %v3747_v60, 16 }
  0x67   : > { %v812_v23 = vpack.c.b16 %v764_v3, %v764_v3  ;;  %v518_v25 = vpack.c.b16 %v498_v5, %v497_v53  ;;  %v813_v27 = vpack.c.b16 %v765_v7, %v765_v7  ;;  %910 = vst.msk [vmem:[#allocation2 + $0x8c] sm:$0xf] %vm264_vm0, %v814_v10  ;;  %v436_v14 = vpack.c.bf16 %v404_v12, %v404_v12  ;;  %v307_v53 = vld [vmem:[%s3457_s28 + $0xf0] sm:$0xff] }
  0x68   : > { %v499_v28 = vunpack.c.l.b16 %v435_v13  ;;  %v3754_v30 = vsel %vm1114_vm4, %v1217_v46, %v1221_v18  ;;  %v3756_v31 = vld [vmem:[#allocation2 + $0x78] sm:$0xff]   ;;  %v1229_v33 = vrot.slane %v1227_v15, 1  ;;  %v1225_v34 = vor.u32 %v1223_v0, %v1221_v18 }
  0x69   : > { %5499 = vst [vmem:[#allocation7_spill] sm:$0xff] %v3754_v30  ;;  %v405_v35 = vmax.f32 %v373_v59, 0.0  ;;  %1335 = vrot.lane.b32.xlu0 %v3754_v30, %s3390_s7  ;;  %v1235_v37 = vshll.u32 %v3756_v31, 16  ;;  %v1239_v40 = vshrl.u32 %v3756_v31, 16  ;;  %v601_v42 = vshrl.u32 %v518_v25, 16 }
  0x6a   : > { %908 = vst.msk [vmem:[#allocation2 + $0x84] sm:$0xf] %vm264_vm0, %v812_v23  ;;  %v604_v16 = vshll.u32 %v518_v25, 16  ;;  %v1233_v46 = vor.u32 %v1231_v20, %v1229_v33  ;;  %v3766_v47 = vsel %vm1114_vm4, %v1225_v34, %v1229_v33  ;;  %v500_v48 = vunpack.c.l.b16 %v436_v14 }
  0x6b   : > { %909 = vst.msk [vmem:[#allocation2 + $0x88] sm:$0xf] %vm264_vm0, %v813_v27  ;;  %v406_v51 = vmax.f32 %v374_v62, 0.0  ;;  %v1237_v49 = vrot.slane %v1235_v37, 1  ;;  %1337 = vrot.lane.b32.xlu1 %v3766_v47, %s3390_s7  ;;  %v603_v54 = vrot.slane %v601_v42, 7  ;;  %v437_v45 = vpack.c.bf16 %v405_v35, %v405_v35 }
  0x6c   : > { %5500 = vst [vmem:[#allocation8_spill] sm:$0xff] %v3766_v47  ;;  %v340_v56 = vmul.f32 %v3449_v1, %v305_v29  ;;  %v519_v59 = vpack.c.b16 %v500_v48, %v499_v28  ;;  %v341_v0 = vmul.f32 %v3449_v1, %v306_v36  ;;  %v342_v7 = vmul.f32 %v3449_v1, %v307_v53 }
  0x6d   : > { %v438_v63 = vpack.c.bf16 %v406_v51, %v406_v51  ;;  %v3774_v3 = vsel %vm1114_vm4, %v1233_v46, %v1237_v49  ;;  %v606_v5 = vor.u32 %v604_v16, %v603_v54  ;;  %v697_v62 = vsel %vm3504_vm3, %v603_v54, 0 }
  0x6e   : > { %5501 = vst [vmem:[#allocation9_spill] sm:$0xff] %v3774_v3  ;;  %1339 = vrot.lane.b32.xlu2 %v3774_v3, %s3390_s7  ;;  %v1241_v10 = vor.u32 %v1239_v40, %v1237_v49  ;;  %v608_v12 = vshrl.u32 %v519_v59, 16  ;;  %v769_v13 = vunpack.c.l.b16 %v697_v62  ;;  %v501_v18 = vunpack.c.l.b16 %v437_v45  ;;  %v4071_v3 = vld [vmem:[#allocation2 + $0x14] sm:$0xff]  }
  0x6f   : > { %v681_v20 = vsel %vm3504_vm3, 0, %v606_v5  ;;  %v611_v23 = vshll.u32 %v519_v59, 16  ;;  %v502_v25 = vunpack.c.l.b16 %v438_v63  ;;  %v375_v27 = vadd.f32 %v3462_v2, %v340_v56  ;;  %v308_v59 = vld [vmem:[%s3457_s28 + $0xf8] sm:$0xff] }
  0x70   : > { %v767_v28 = vunpack.c.l.b16 %v681_v20  ;;  %v768_v1 = vunpack.c.h.b16 %v681_v20  ;;  %v610_v35 = vrot.slane %v608_v12, 7  ;;  %v817_v36 = vpack.c.b16 %v769_v13, %v769_v13 }
  0x71   : > { %v3781_v15 = vld [vmem:[#allocation2 + $0x80] sm:$0xff]   ;;  %v376_v37 = vadd.f32 %v3462_v2, %v341_v0  ;;  %v520_v46 = vpack.c.b16 %v502_v25, %v501_v18  ;;  %v407_v49 = vmax.f32 %v375_v27, 0.0  ;;  %vm2279_vm11 = vcmask 162816  }
  0x72   : > { %v1243_v14 = vshll.u32 %v3781_v15, 16  ;;  %v3787_v29 = vld [vmem:[#allocation2 + $0x88] sm:$0xff]   ;;  %v1247_v33 = vshrl.u32 %v3781_v15, 16  ;;  %v815_v42 = vpack.c.b16 %v767_v28, %v767_v28  ;;  %v816_v16 = vpack.c.b16 %v768_v1, %v768_v1  ;;  %913 = vst.msk [vmem:[#allocation2 + $0x98] sm:$0xf] %vm264_vm0, %v817_v36 }
  0x73   : > { %v1251_v34 = vshll.u32 %v3787_v29, 16  ;;  %v613_v51 = vor.u32 %v611_v23, %v610_v35  ;;  %v698_v53 = vsel %vm3504_vm3, %v610_v35, 0  ;;  %v615_v56 = vshrl.u32 %v520_v46, 16  ;;  %v3353_v27 = vld [vmem:[%s5430_s0] ss:$0 sm:$0xff] }
  0x74   : > { %v1245_v40 = vrot.slane %v1243_v14, 1  ;;  %911 = vst.msk [vmem:[#allocation2 + $0x90] sm:$0xf] %vm264_vm0, %v815_v42  ;;  %v618_v2 = vshll.u32 %v520_v46, 16  ;;  %v1255_v63 = vshrl.u32 %v3787_v29, 16  ;;  %v772_v5 = vunpack.c.l.b16 %v698_v53 }
  0x75   : > { %v1253_v48 = vrot.slane %v1251_v34, 1  ;;  %912 = vst.msk [vmem:[#allocation2 + $0x94] sm:$0xf] %vm264_vm0, %v816_v16  ;;  %v682_v0 = vsel %vm3504_vm3, 0, %v613_v51  ;;  %v408_v62 = vmax.f32 %v376_v37, 0.0  ;;  %v617_v13 = vrot.slane %v615_v56, 7 }
  0x76   : > { %v3796_v54 = vsel %vm1114_vm4, %v1241_v10, %v1245_v40  ;;  %v1249_v45 = vor.u32 %v1247_v33, %v1245_v40  ;;  %v770_v12 = vunpack.c.l.b16 %v682_v0  ;;  %v771_v18 = vunpack.c.h.b16 %v682_v0  ;;  %v3354_v40 = vld [vmem:[%s5431_s1] ss:$0 sm:$0xff] }
  0x77   : > { %1341 = vrot.lane.b32.xlu0 %v3796_v54, %s3390_s7  ;;  %v820_v20 = vpack.c.b16 %v772_v5, %v772_v5  ;;  %v439_v23 = vpack.c.bf16 %v407_v49, %v407_v49  ;;  %v440_v25 = vpack.c.bf16 %v408_v62, %v408_v62  ;;  %v343_v14 = vmul.f32 %v3353_v27, %v308_v59 }
  0x78   : > { %v3807_v10 = vsel %vm1114_vm4, %v1249_v45, %v1253_v48  ;;  %v818_v28 = vpack.c.b16 %v770_v12, %v770_v12  ;;  %v620_v1 = vor.u32 %v618_v2, %v617_v13  ;;  %v819_v33 = vpack.c.b16 %v771_v18, %v771_v18 }
  0x79   : > { %5502 = vst [vmem:[#allocation10_spill] sm:$0xff] %v3807_v10  ;;  %1343 = vrot.lane.b32.xlu1 %v3807_v10, %s3390_s7  ;;  %v699_v34 = vsel %vm3504_vm3, %v617_v13, 0  ;;  %v503_v35 = vunpack.c.l.b16 %v439_v23  ;;  %v504_v36 = vunpack.c.l.b16 %v440_v25  ;;  %v377_v42 = vadd.f32 %v3354_v40, %v342_v7 }
  0x7a   : > { %916 = vst.msk [vmem:[#allocation2 + $0xa4] sm:$0xf] %vm264_vm0, %v820_v20  ;;  %v775_v37 = vunpack.c.l.b16 %v699_v34  ;;  %v683_v16 = vsel %vm3504_vm3, 0, %v620_v1  ;;  %v378_v46 = vadd.f32 %v3354_v40, %v343_v14  ;;  %v1257_v2 = vor.u32 %v1255_v63, %v1253_v48 }
  0x7b   : > { %914 = vst.msk [vmem:[#allocation2 + $0x9c] sm:$0xf] %vm264_vm0, %v818_v28  ;;  %v773_v51 = vunpack.c.l.b16 %v683_v16  ;;  %v774_v53 = vunpack.c.h.b16 %v683_v16  ;;  %v521_v49 = vpack.c.b16 %v504_v36, %v503_v35  ;;  %v409_v59 = vmax.f32 %v377_v42, 0.0 }
  0x7c   : > { %915 = vst.msk [vmem:[#allocation2 + $0xa0] sm:$0xf] %vm264_vm0, %v819_v33  ;;  %v823_v45 = vpack.c.b16 %v775_v37, %v775_v37  ;;  %v3824_v56 = vld [vmem:[#allocation2 + $0x90] sm:$0xff]   ;;  %v410_v0 = vmax.f32 %v378_v46, 0.0  ;;  %v1593_v10 = vshrl.u32 %v4106_v38, 16  ;;  %vm2328_vm12 = vcmask 195584  }
  0x7d   : > { %v1259_v5 = vshll.u32 %v3824_v56, 16  ;;  %v1263_v7 = vshrl.u32 %v3824_v56, 16  ;;  %v821_v62 = vpack.c.b16 %v773_v51, %v773_v51  ;;  %v822_v12 = vpack.c.b16 %v774_v53, %v774_v53 }
  0x7e   : > { %919 = vst.msk [vmem:[#allocation2 + $0xb0] sm:$0xf] %vm264_vm0, %v823_v45  ;;  %v622_v13 = vshrl.u32 %v521_v49, 16  ;;  %v625_v18 = vshll.u32 %v521_v49, 16  ;;  %v441_v20 = vpack.c.bf16 %v409_v59, %v409_v59  ;;  %v442_v23 = vpack.c.bf16 %v410_v0, %v410_v0 }
  0x7f   : > { %v1261_v25 = vrot.slane %v1259_v5, 1  ;;  %917 = vst.msk [vmem:[#allocation2 + $0xa8] sm:$0xf] %vm264_vm0, %v821_v62  ;;  %vm2377_vm13 = vcmask 228352   ;;  %vm2426_vm14 = vcmask 261120   ;;  %vm2490_vm15 = vcmask 293888  }
  0x80   : > { %918 = vst.msk [vmem:[#allocation2 + $0xac] sm:$0xf] %vm264_vm0, %v822_v12  ;;  %v624_v48 = vrot.slane %v622_v13, 7  ;;  %v505_v63 = vunpack.c.l.b16 %v441_v20  ;;  %v506_v27 = vunpack.c.l.b16 %v442_v23 }
  0x81   : > { %v3832_v14 = vsel %vm1114_vm4, %v1257_v2, %v1261_v25  ;;  %v1265_v1 = vor.u32 %v1263_v7, %v1261_v25 }
  0x82   : > { %5503 = vst [vmem:[#allocation11_spill] sm:$0xff] %v3832_v14  ;;  %v3834_v28 = vld [vmem:[#allocation2 + $0x98] sm:$0xff]   ;;  %1345 = vrot.lane.b32.xlu2 %v3832_v14, %s3390_s7  ;;  %v627_v36 = vor.u32 %v625_v18, %v624_v48  ;;  %v522_v37 = vpack.c.b16 %v506_v27, %v505_v63  ;;  %v700_v16 = vsel %vm3504_vm3, %v624_v48, 0 }
  0x83   : > { %v1267_v33 = vshll.u32 %v3834_v28, 16  ;;  %v3839_v34 = vld [vmem:[#allocation2 + $0xa0] sm:$0xff]   ;;  %v1271_v35 = vshrl.u32 %v3834_v28, 16  ;;  %v778_v0 = vunpack.c.l.b16 %v700_v16  ;;  %v4186_v14 = vld [vmem:[#allocation2 + $0x94] sm:$0xff]  }
  0x84   : > { %v1275_v40 = vshll.u32 %v3839_v34, 16  ;;  %v1279_v42 = vshrl.u32 %v3839_v34, 16  ;;  %v684_v51 = vsel %vm3504_vm3, 0, %v627_v36  ;;  %v629_v53 = vshrl.u32 %v522_v37, 16  ;;  %v3168_v16 = vld [vmem:[#allocation2] sm:$0xe] }
  0x85   : > { %v1269_v46 = vrot.slane %v1267_v33, 1  ;;  %v632_v49 = vshll.u32 %v522_v37, 16  ;;  %v776_v2 = vunpack.c.l.b16 %v684_v51  ;;  %v777_v59 = vunpack.c.h.b16 %v684_v51  ;;  %5548 = vst [vmem:[#allocation56_spill] sm:$0xff] %v4186_v14 }
  0x86   : > { %v1277_v45 = vrot.slane %v1275_v40, 1  ;;  %v3851_v62 = vrot.slane %v629_v53, 7  ;;  %v826_v20 = vpack.c.b16 %v778_v0, %v778_v0 }
  0x87   : > { %v3849_v5 = vsel %vm1114_vm4, %v1265_v1, %v1269_v46  ;;  %v1273_v7 = vor.u32 %v1271_v35, %v1269_v46  ;;  %v3855_v12 = vld [vmem:[#allocation2 + $0xa8] sm:$0xff]   ;;  %v824_v13 = vpack.c.b16 %v776_v2, %v776_v2  ;;  %v825_v18 = vpack.c.b16 %v777_v59, %v777_v59 }
  0x88   : > { %5504 = vst [vmem:[#allocation12_spill] sm:$0xff] %v3849_v5  ;;  %1347 = vrot.lane.b32.xlu0 %v3849_v5, %s3390_s7  ;;  %v1281_v23 = vor.u32 %v1279_v42, %v1277_v45  ;;  %v1283_v25 = vshll.u32 %v3855_v12, 16  ;;  %v634_v63 = vor.u32 %v632_v49, %v3851_v62  ;;  %v1287_v36 = vshrl.u32 %v3855_v12, 16  ;;  %v3167_v42 = vld [vmem:[#allocation2] sm:$0xf0] }
  0x89   : > { %v3859_v48 = vsel %vm1114_vm4, %v1273_v7, %v1277_v45  ;;  %920 = vst.msk [vmem:[#allocation2 + $0xb4] sm:$0xf] %vm264_vm0, %v824_v13  ;;  %v3169_v59 = vor.u32 %v3168_v16, %v3167_v42  ;;  %v701_v5 = vsel %vm3504_vm3, %v3851_v62, 0  ;;  %v4152_v62 = vld [vmem:[#allocation2 + $0x74] sm:$0xff]  }
  0x8a   : > { %5505 = vst [vmem:[#allocation13_spill] sm:$0xff] %v3859_v48  ;;  %1349 = vrot.lane.b32.xlu1 %v3859_v48, %s3390_s7  ;;  %v1285_v27 = vrot.slane %v1283_v25, 1  ;;  %v3867_v1 = vsel %vm3504_vm3, 0, %v634_v63  ;;  %v4081_v48 = vld [vmem:[#allocation2 + $0x20] sm:$0xff]   ;;  %v781_v30 = vunpack.c.l.b16 %v701_v5  ;;  %v4148_v5 = vld [vmem:[#allocation2 + $0x6c] sm:$0xff]  }
  0x8b   : > { %921 = vst.msk [vmem:[#allocation2 + $0xb8] sm:$0xf] %vm264_vm0, %v825_v18  ;;  %v779_v33 = vunpack.c.l.b16 %v3867_v1 }
  0x8c   : > { %922 = vst.msk [vmem:[#allocation2 + $0xbc] sm:$0xf] %vm264_vm0, %v826_v20  ;;  %v3873_v35 = vsel %vm1114_vm4, %v1281_v23, %v1285_v27  ;;  %v1289_v46 = vor.u32 %v1287_v36, %v1285_v27  ;;  %v1364_v20 = vrot.slane %v3553_v17, 1  ;;  %v1363_v27 = vrot.slane %v3169_v59, 1 }
  0x8d   : > { %5506 = vst [vmem:[#allocation14_spill] sm:$0xff] %v3873_v35  ;;  %1351 = vrot.lane.b32.xlu2 %v3873_v35, %s3390_s7  ;;  %v827_v37 = vpack.c.b16 %v779_v33, %v779_v33  ;;  %v1366_v36 = vrot.slane %v3570_v43, 1  ;;  %v1368_v43 = vrot.slane %v3580_v50, 1  ;;  %v1378_v50 = vrot.slane %v3634_v57, 1 }
  0x8e   : > { %v1365_v17 = vsel %vm1362_vm5, %v1363_v27, %v1364_v20  ;;  %v1384_v57 = vrot.slane %v3683_v19, 1  ;;  %v1390_v19 = vrot.slane %v3747_v60, 1  ;;  %v1396_v60 = vrot.slane %v3787_v29, 1  ;;  %5544 = vst [vmem:[#allocation52_spill] sm:$0xff] %v4148_v5 }
  0x8f   : > { %923 = vst.msk [vmem:[#allocation2 + $0xc0] sm:$0xf] %vm264_vm0, %v827_v37  ;;  %v1369_v59 = vsel %vm1362_vm5, %v1366_v36, %v1368_v43 }
  0x90   : > { %v3879_v40 = vld [vmem:[#allocation2 + $0xb0] sm:$0xff]  }
  0x91   : > { %v1291_v51 = vshll.u32 %v3879_v40, 16  ;;  %v1295_v53 = vshrl.u32 %v3879_v40, 16 }
  0x93   : > { %v3883_v49 = vld [vmem:[#allocation2 + $0xb8] sm:$0xff]   ;;  %v1293_v45 = vrot.slane %v1291_v51, 1 }
  0x94   : > { %v1299_v2 = vshll.u32 %v3883_v49, 16  ;;  %v1303_v25 = vshrl.u32 %v3883_v49, 16 }
  0x95   : > { %v3887_v0 = vsel %vm1114_vm4, %v1289_v46, %v1293_v45  ;;  %v1297_v13 = vor.u32 %v1295_v53, %v1293_v45  ;;  %v1367_v46 = vsel %vm1362_vm5, %v1364_v20, %v1366_v36  ;;  %v3910_v53 = vrot.slane %v3558_v26, 1 }
  0x96   : > { %5507 = vst [vmem:[#allocation15_spill] sm:$0xff] %v3887_v0  ;;  %v1301_v7 = vrot.slane %v1299_v2, 1  ;;  %1353 = vrot.lane.b32.xlu0 %v3887_v0, %s3390_s7  ;;  %v979_v18 = vld [vmem:[#allocation2 + $0xc0] sm:$0x1]  ;;  %v1372_v45 = vrot.slane %v3560_v32, 1  ;;  %v1376_v26 = vrot.slane %v3620_v61, 1 }
  0x97   : > { %v1112_v23 = vunpack.c.l.b16 %v979_v18  ;;  %v1371_v2 = vsel %vm1362_vm5, %v1368_v43, %v3910_v53  ;;  %v1374_v32 = vrot.slane %v3592_v11, 1  ;;  %v1382_v61 = vrot.slane %v3678_v9, 1 }
  0x98   : > { %v3894_v63 = vsel %vm1114_vm4, %v1297_v13, %v1301_v7  ;;  %v3901_v37 = vor.u32 %v1303_v25, %v1301_v7  ;;  %v3921_v7 = vsel %vm1362_vm5, %v3910_v53, %v1372_v45  ;;  %v3937_v20 = vsel %vm1362_vm5, %v1376_v26, %v1378_v50  ;;  %v3951_v25 = vpop.permute.xlu2 %1319 }
  0x99   : > { %5508 = vst [vmem:[#allocation16_spill] sm:$0xff] %v3894_v63  ;;  %1355 = vrot.lane.b32.xlu1 %v3894_v63, %s3390_s7  ;;  %v3898_v33 = vpack.c.b16 %v1112_v23, %v1112_v23  ;;  %v3931_v13 = vsel %vm1362_vm5, %v1374_v32, %v1376_v26  ;;  %v3934_v18 = vsel %vm1362_vm5, %v1372_v45, %v1374_v32  ;;  %v1380_v11 = vrot.slane %v3649_v21, 1  ;;  %v4188_v63 = vld [vmem:[#allocation2 + $0xa4] sm:$0xff]  }
  0x9a   : > { %5509 = vst [vmem:[#allocation17_spill] sm:$0xff] %v3901_v37  ;;  %v3957_v9 = vsel %vm1362_vm5, %v1382_v61, %v1384_v57  ;;  %v1388_v36 = vrot.slane %v3739_v55, 1  ;;  %v1386_v21 = vrot.slane %v3713_v8, 1  ;;  %v1392_v8 = vrot.slane %v3756_v31, 1 }
  0x9b   : > { %v1307_v42 = vshll.u32 %v3898_v33, 16  ;;  %5510 = vst [vmem:[#allocation18_spill] sm:$0xff] %v3931_v13  ;;  %v3949_v23 = vsel %vm1362_vm5, %v1380_v11, %v1382_v61  ;;  %v3954_v27 = vsel %vm1362_vm5, %v1378_v50, %v1380_v11  ;;  %v1400_v31 = vrot.slane %v3834_v28, 1 }
  0x9c   : > { %5511 = vst [vmem:[#allocation19_spill] sm:$0xff] %v3937_v20  ;;  %v1402_v26 = vrot.slane %v3839_v34, 1  ;;  %v1404_v34 = vrot.slane %v3855_v12, 1 }
  0x9d   : > { %v1309_v16 = vrot.slane %v1307_v42, 1  ;;  %5512 = vst [vmem:[#allocation20_spill] sm:$0xff] %v3951_v25  ;;  %v3969_v42 = vsel %vm1362_vm5, %v1386_v21, %v1388_v36 }
  0x9e   : > { %1412 = vrot.lane.b32.xlu0 %v1365_v17, %s3391_s12  ;;  %5513 = vst [vmem:[#allocation21_spill] sm:$0xff] %v3954_v27  ;;  %v3972_v17 = vsel %vm1362_vm5, %v1384_v57, %v1386_v21  ;;  %v4021_v28 = vsel %vm1362_vm5, %v1400_v31, %v1402_v26  ;;  %v4034_v57 = vrot.slane %v3883_v49, 1 }
  0x9f   : > { %v1310_v51 = vsel %vm1114_vm4, %v3901_v37, %v1309_v16  ;;  %5514 = vst [vmem:[#allocation22_spill] sm:$0xff] %v3969_v42  ;;  %v3975_v16 = vsel %vm1362_vm5, %v1388_v36, %v1390_v19  ;;  %v4124_v37 = vld [vmem:[#allocation2 + $0x54] sm:$0xff]  }
  0xa0   : > { %1357 = vrot.lane.b32.xlu2 %v1310_v51, %s3390_s7  ;;  %5515 = vst [vmem:[#allocation23_spill] sm:$0xff] %v3972_v17  ;;  %v3979_v55 = vpop.permute.xlu2 %1321 }
  0xa1   : > { %1414 = vrot.lane.b32.xlu1 %v1367_v46, %s3391_s12  ;;  %5516 = vst [vmem:[#allocation24_spill] sm:$0xff] %v3975_v16  ;;  %v1394_v46 = vrot.slane %v3781_v15, 1 }
  0xa2   : > { %5523 = vst [vmem:[#allocation31_spill] sm:$0xff] %v4021_v28 }
  0xa3   : > { %v3991_v43 = vsel %vm1362_vm5, %v1392_v8, %v1394_v46  ;;  %v3999_v15 = vsel %vm1362_vm5, %v1394_v46, %v1396_v60  ;;  %5524 = vst [vmem:[#allocation32_spill] sm:$0xff] %v4034_v57 }
  0xa4   : > { %5519 = vst [vmem:[#allocation27_spill] sm:$0xff] %v3999_v15 }
  0xa6   : > { %1418 = vrot.lane.b32.xlu0 %v1371_v2, %s3391_s12  ;;  %v3996_v2 = vsel %vm1362_vm5, %v1390_v19, %v1392_v8  ;;  %v4042_v19 = vsel %vm1362_vm5, %v1402_v26, %v1404_v34  ;;  %v4050_v8 = vld [vmem:[#allocation2 + $0x8] sm:$0xff]  }
  0xa7   : > { %v3988_v51 = vpop.permute.xlu0 %1311  ;;  %5518 = vst [vmem:[#allocation26_spill] sm:$0xff] %v3996_v2 }
  0xa8   : > { %1416 = vrot.lane.b32.xlu2 %v1369_v59, %s3391_s12  ;;  %5517 = vst [vmem:[#allocation25_spill] sm:$0xff] %v3988_v51  ;;  %v1398_v59 = vrot.slane %v3824_v56, 1  ;;  %v1406_v56 = vrot.slane %v3879_v40, 1  ;;  %v1549_v51 = vshll.u32 %v4071_v3, 16 }
  0xa9   : > { %1420 = vrot.lane.b32.xlu1 %v3921_v7, %s3391_s12  ;;  %v4008_v29 = vpop.permute.xlu2 %1327  ;;  %5527 = vst [vmem:[#allocation35_spill] sm:$0xff] %v4042_v19 }
  0xaa   : > { %v4013_v32 = vsel %vm1362_vm5, %v1398_v59, %v1400_v31  ;;  %v4018_v61 = vsel %vm1362_vm5, %v1396_v60, %v1398_v59  ;;  %v4039_v21 = vsel %vm1362_vm5, %v1404_v34, %v1406_v56  ;;  %v4046_v46 = vsel %vm1362_vm5, %v1406_v56, %v4034_v57  ;;  %5529 = vst [vmem:[#allocation37_spill] sm:$0xff] %v4050_v8  ;;  %v4053_v31 = vld [vmem:[#allocation2 + $0x10] sm:$0xff]  }
  0xab   : > { %5520 = vst [vmem:[#allocation28_spill] sm:$0xff] %v4013_v32  ;;  %v3045_v60 = vunpack.c.h.b16 %v4050_v8  ;;  %v5443_v59 = vunpack.c.l.b16 %v4053_v31  ;;  %v1410_v56 = vrot.slane %v3898_v33, 1  ;;  %v4170_v8 = vld [vmem:[#allocation2 + $0x8c] sm:$0xff]  }
  0xac   : > { %5522 = vst [vmem:[#allocation30_spill] sm:$0xff] %v4018_v61 }
  0xad   : > { %5526 = vst [vmem:[#allocation34_spill] sm:$0xff] %v4039_v21  ;;  %v4067_v34 = vpack.c.b16 %v5443_v59, %v3045_v60  ;;  %v3056_v60 = vunpack.c.l.b16 %v4081_v48 }
  0xae   : > { %1424 = vrot.lane.b32.xlu0 %v3931_v13, %s3391_s12  ;;  %v3993_v45 = vpop.permute.xlu1 %1315  ;;  %5528 = vst [vmem:[#allocation36_spill] sm:$0xff] %v4046_v46 }
  0xaf   : > { %v4015_v50 = vpop.permute.xlu0 %1313  ;;  %v1542_v44 = vshrl.u32 %v4067_v34, 16 }
  0xb0   : > { %1422 = vrot.lane.b32.xlu2 %v3934_v18, %s3391_s12  ;;  %5521 = vst [vmem:[#allocation29_spill] sm:$0xff] %v4015_v50 }
  0xb1   : > { %1426 = vrot.lane.b32.xlu1 %v3937_v20, %s3391_s12  ;;  %v4130_v20 = vld [vmem:[#allocation2 + $0x4c] sm:$0xff]  }
  0xb6   : > { %1430 = vrot.lane.b32.xlu0 %v3949_v23, %s3391_s12  ;;  %v4025_v11 = vpop.permute.xlu1 %1317 }
  0xb8   : > { %1428 = vrot.lane.b32.xlu2 %v3954_v27, %s3391_s12 }
  0xb9   : > { %1432 = vrot.lane.b32.xlu1 %v3957_v9, %s3391_s12  ;;  %v4056_v35 = vpop.permute.xlu0 %1323 }
  0xba   : > { %5530 = vst [vmem:[#allocation38_spill] sm:$0xff] %v4056_v35 }
  0xbc   : > { %v4036_v36 = vpop.permute.xlu2 %1333 }
  0xbd   : > { %5525 = vst [vmem:[#allocation33_spill] sm:$0xff] %v4036_v36 }
  0xbe   : > { %1436 = vrot.lane.b32.xlu0 %v3969_v42, %s3391_s12  ;;  %v4062_v26 = vpop.permute.xlu1 %1325  ;;  %v780_v42 = vunpack.c.h.b16 %v3867_v1 }
  0xbf   : > { %5531 = vst [vmem:[#allocation39_spill] sm:$0xff] %v4062_v26  ;;  %v1553_v26 = vshrl.u32 %v4071_v3, 16 }
  0xc0   : > { %1434 = vrot.lane.b32.xlu2 %v3972_v17, %s3391_s12 }
  0xc1   : > { %1438 = vrot.lane.b32.xlu1 %v3975_v16, %s3391_s12  ;;  %v4096_v16 = vld [vmem:[#allocation2 + $0x2c] sm:$0xff]  }
  0xc2   : > { %5535 = vst [vmem:[#allocation43_spill] sm:$0xff] %v4096_v16 }
  0xc6   : > { %1442 = vrot.lane.b32.xlu0 %v3991_v43, %s3391_s12 }
  0xc8   : > { %1440 = vrot.lane.b32.xlu2 %v3996_v2, %s3391_s12  ;;  %v4069_v2 = vpop.permute.xlu2 %1339 }
  0xc9   : > { %1444 = vrot.lane.b32.xlu1 %v3999_v15, %s3391_s12  ;;  %5532 = vst [vmem:[#allocation40_spill] sm:$0xff] %v4069_v2  ;;  %v4209_v15 = vld [vmem:[#allocation2 + $0xbc] sm:$0xff]  }
  0xca   : > { %5553 = vst [vmem:[#allocation61_spill] sm:$0xff] %v4209_v15 }
  0xcb   : > { %v4086_v59 = vpop.permute.xlu0 %1329 }
  0xcc   : > { %5533 = vst [vmem:[#allocation41_spill] sm:$0xff] %v4086_v59  ;;  %v4207_v59 = vld [vmem:[#allocation2 + $0xac] sm:$0xff]  }
  0xcd   : > { %v4090_v27 = vpop.permute.xlu1 %1331  ;;  %5552 = vst [vmem:[#allocation60_spill] sm:$0xff] %v4207_v59 }
  0xce   : > { %1448 = vrot.lane.b32.xlu0 %v4013_v32, %s3391_s12  ;;  %5534 = vst [vmem:[#allocation42_spill] sm:$0xff] %v4090_v27 }
  0xd0   : > { %1446 = vrot.lane.b32.xlu2 %v4018_v61, %s3391_s12  ;;  %v4184_v61 = vld [vmem:[#allocation2 + $0x9c] sm:$0xff]  }
  0xd1   : > { %1450 = vrot.lane.b32.xlu1 %v4021_v28, %s3391_s12  ;;  %v1411_v28 = vsel %vm1362_vm5, %v4034_v57, %v1410_v56  ;;  %v4088_v56 = vld [vmem:[#allocation2 + $0x24] sm:$0xff]   ;;  %v4110_v57 = vld [vmem:[#allocation2 + $0x34] sm:$0xff]  }
  0xd2   : > { %5538 = vst [vmem:[#allocation46_spill] sm:$0xff] %v4110_v57 }
  0xd6   : > { %1454 = vrot.lane.b32.xlu0 %v4039_v21, %s3391_s12 }
  0xd8   : > { %1452 = vrot.lane.b32.xlu2 %v4042_v19, %s3391_s12  ;;  %v4078_v19 = vld [vmem:[#allocation2 + $0x18] sm:$0xff]  }
  0xd9   : > { %1456 = vrot.lane.b32.xlu1 %v4046_v46, %s3391_s12  ;;  %v5450_v33 = vunpack.c.h.b16 %v4078_v19  ;;  %v828_v46 = vpack.c.b16 %v780_v42, %v780_v42 }
  0xdb   : > { %v4108_v32 = vpop.permute.xlu0 %1335  ;;  %924 = vst.msk [vmem:[#allocation2 + $0xc4] sm:$0xf] %vm264_vm0, %v828_v46  ;;  %v4166_v46 = vld [vmem:[#allocation2 + $0x84] sm:$0xff]  }
  0xdc   : > { %v4098_v47 = vpop.permute.xlu2 %1345  ;;  %5537 = vst [vmem:[#allocation45_spill] sm:$0xff] %v4108_v32  ;;  %v4132_v32 = vld [vmem:[#allocation2 + $0x5c] sm:$0xff]  }
  0xdd   : > { %5536 = vst [vmem:[#allocation44_spill] sm:$0xff] %v4098_v47 }
  0xde   : > { %1490 = vrot.lane.b32.xlu0 %v4067_v34, %s3392_s13  ;;  %5541 = vst [vmem:[#allocation49_spill] sm:$0xff] %v4132_v32 }
  0xe0   : > { %1458 = vrot.lane.b32.xlu2 %v1411_v28, %s3391_s12  ;;  %v4094_v28 = vpack.c.b16 %v3056_v60, %v5450_v33  ;;  %v4112_v60 = vld [vmem:[#allocation2 + $0x44] sm:$0xff]   ;;  %v4114_v33 = vpop.permute.xlu1 %1337 }
  0xe1   : > { %1492 = vrot.lane.b32.xlu1 %v4071_v3, %s3392_s13  ;;  %5539 = vst [vmem:[#allocation47_spill] sm:$0xff] %v4114_v33  ;;  %v4204_v33 = vld [vmem:[#allocation2 + $0xb4] sm:$0xff]  }
  0xe2   : > { %5551 = vst [vmem:[#allocation59_spill] sm:$0xff] %v4204_v33  ;;  %v1557_v2 = vshll.u32 %v4094_v28, 16  ;;  %v1561_v36 = vshrl.u32 %v4094_v28, 16 }
  0xe6   : > { %1496 = vrot.lane.b32.xlu0 %v4088_v56, %s3392_s13 }
  0xe7   : > { %v4120_v47 = vpop.permute.xlu2 %1351 }
  0xe8   : > { %1494 = vrot.lane.b32.xlu2 %v4094_v28, %s3392_s13  ;;  %5540 = vst [vmem:[#allocation48_spill] sm:$0xff] %v4120_v47  ;;  %v829_v47 = vpack.c.b16 %v781_v30, %v781_v30  ;;  %v4150_v30 = vld [vmem:[#allocation2 + $0x64] sm:$0xff]  }
  0xe9   : > { %1498 = vrot.lane.b32.xlu1 %v4096_v16, %s3392_s13  ;;  %v4134_v24 = vpop.permute.xlu0 %1341  ;;  %5545 = vst [vmem:[#allocation53_spill] sm:$0xff] %v4150_v30 }
  0xea   : > { %5542 = vst [vmem:[#allocation50_spill] sm:$0xff] %v4134_v24  ;;  %v1544_v24 = vshll.u32 %v4067_v34, 16  ;;  %v1565_v34 = vshll.u32 %v4088_v56, 16 }
  0xeb   : > { %v4138_v35 = vpop.permute.xlu1 %1343  ;;  %925 = vst.msk [vmem:[#allocation2 + $0xc8] sm:$0xf] %vm264_vm0, %v829_v47  ;;  %vm2897_vm0 = vcmask 25600  }
  0xec   : > { %5543 = vst [vmem:[#allocation51_spill] sm:$0xff] %v4138_v35  ;;  %v4168_v35 = vld [vmem:[#allocation2 + $0x7c] sm:$0xff]   ;;  %v1546_v27 = vrot.slane %v1544_v24, 1 }
  0xee   : > { %1502 = vrot.lane.b32.xlu0 %v4106_v38, %s3392_s13 }
  0xf0   : > { %1500 = vrot.lane.b32.xlu2 %v4110_v57, %s3392_s13 }
  0xf1   : > { %1504 = vrot.lane.b32.xlu1 %v4112_v60, %s3392_s13 }
  0xf6   : > { %1508 = vrot.lane.b32.xlu0 %v4124_v37, %s3392_s13 }
  0xf8   : > { %1506 = vrot.lane.b32.xlu2 %v4130_v20, %s3392_s13 }
  0xf9   : > { %1510 = vrot.lane.b32.xlu1 %v4132_v32, %s3392_s13 }
  0xfa   : > { %v4146_v4 = vpop.permute.xlu2 %1357  ;;  %v4156_v1 = vpop.permute.xlu0 %1347 }
  0xfb   : > { %5546 = vst [vmem:[#allocation54_spill] sm:$0xff] %v4156_v1 }
  0xfc   : > { %v4162_v47 = vpop.permute.xlu1 %1349 }
  0xfd   : > { %5547 = vst [vmem:[#allocation55_spill] sm:$0xff] %v4162_v47 }
  0xfe   : > { %1514 = vrot.lane.b32.xlu0 %v4148_v5, %s3392_s13 }
 0x100   : > { %1512 = vrot.lane.b32.xlu2 %v4150_v30, %s3392_s13 }
 0x101   : > { %1516 = vrot.lane.b32.xlu1 %v4152_v62, %s3392_s13 }
 0x102   : > { %v4164_v42 = vpop.permute.xlu2 %1416 }
 0x106   : > { %1520 = vrot.lane.b32.xlu0 %v4166_v46, %s3392_s13 }
 0x108   : > { %1518 = vrot.lane.b32.xlu2 %v4168_v35, %s3392_s13  ;;  %v4178_v1 = vpop.permute.xlu0 %1353 }
 0x109   : > { %1522 = vrot.lane.b32.xlu1 %v4170_v8, %s3392_s13 }
 0x10a   : > { %v4180_v47 = vpop.permute.xlu2 %1422 }
 0x10b   : > { %v4182_v50 = vpop.permute.xlu1 %1355 }
 0x10e   : > { %1526 = vrot.lane.b32.xlu0 %v4184_v61, %s3392_s13 }
 0x110   : > { %1524 = vrot.lane.b32.xlu2 %v4186_v14, %s3392_s13  ;;  %v4197_v17 = vpop.permute.xlu0 %1412  ;;  %v1551_v14 = vrot.slane %v1549_v51, 1  ;;  %v1573_v51 = vshll.u32 %v4096_v16, 16 }
 0x111   : > { %1528 = vrot.lane.b32.xlu1 %v4188_v63, %s3392_s13  ;;  %5549 = vst [vmem:[#allocation57_spill] sm:$0xff] %v4197_v17  ;;  %v1547_v17 = vor.u32 %v1546_v27, %v1542_v44  ;;  %v1559_v27 = vrot.slane %v1557_v2, 1  ;;  %v1589_v2 = vshll.u32 %v4106_v38, 16 }
 0x112   : > { %v4200_v13 = vpop.permute.xlu2 %1428 }
 0x113   : > { %v4202_v6 = vpop.permute.xlu1 %1414  ;;  %v1552_v44 = vsel %vm1114_vm4, %v1547_v17, %v1551_v14 }
 0x114   : > { %5550 = vst [vmem:[#allocation58_spill] sm:$0xff] %v4202_v6  ;;  %v1555_v6 = vor.u32 %v1553_v26, %v1551_v14  ;;  %v1577_v26 = vshrl.u32 %v4096_v16, 16  ;;  %v1563_v14 = vor.u32 %v1561_v36, %v1559_v27 }
 0x116   : > { %1532 = vrot.lane.b32.xlu0 %v4204_v33, %s3392_s13  ;;  %v1569_v33 = vshrl.u32 %v4088_v56, 16  ;;  %v1560_v25 = vsel %vm1114_vm4, %v1555_v6, %v1559_v27  ;;  %v1597_v6 = vshll.u32 %v4112_v60, 16 }
 0x118   : > { %1530 = vrot.lane.b32.xlu2 %v4207_v59, %s3392_s13  ;;  %v4219_v24 = vpop.permute.xlu0 %1418  ;;  %v3332_v59 = vld [vmem:[#allocation2 + $0xc4] sm:$0xff]  }
 0x119   : > { %1534 = vrot.lane.b32.xlu1 %v4209_v15, %s3392_s13  ;;  %5554 = vst [vmem:[#allocation62_spill] sm:$0xff] %v4219_v24  ;;  %v1567_v15 = vrot.slane %v1565_v34, 1  ;;  %v1575_v24 = vrot.slane %v1573_v51, 1 }
 0x11a   : > { %v4223_v21 = vpop.permute.xlu2 %1434 }
 0x11b   : > { %5555 = vst [vmem:[#allocation63_spill] sm:$0xff] %v4223_v21  ;;  %v4225_v0 = vpop.permute.xlu1 %1420  ;;  %v1571_v21 = vor.u32 %v1569_v33, %v1567_v15  ;;  %v1579_v34 = vor.u32 %v1577_v26, %v1575_v24  ;;  %v1568_v36 = vsel %vm1114_vm4, %v1563_v14, %v1567_v15  ;;  %v1601_v26 = vshrl.u32 %v4112_v60, 16 }
 0x11c   : > { %5556 = vst [vmem:[#allocation64_spill] sm:$0xff] %v4225_v0  ;;  %v1581_v0 = vshll.u32 %v4110_v57, 16  ;;  %v1613_v15 = vshll.u32 %v4124_v37, 16  ;;  %v1621_v14 = vshll.u32 %v4132_v32, 16 }
 0x11d   : > { %v1576_v33 = vsel %vm1114_vm4, %v1571_v21, %v1575_v24 }
 0x11e   : > { %1737 = vrot.lane.b32.xlu0 %v1552_v44, %s3393_s14  ;;  %v1583_v44 = vrot.slane %v1581_v0, 1 }
 0x120   : > { %1536 = vrot.lane.b32.xlu2 %v3332_v59, %s3392_s13  ;;  %v4236_v17 = vpop.permute.xlu0 %1424  ;;  %v1591_v59 = vrot.slane %v1589_v2, 1  ;;  %v1584_v27 = vsel %vm1114_vm4, %v1579_v34, %v1583_v44 }
 0x121   : > { %1739 = vrot.lane.b32.xlu1 %v1560_v25, %s3393_s14  ;;  %5557 = vst [vmem:[#allocation65_spill] sm:$0xff] %v4236_v17  ;;  %v1585_v25 = vshrl.u32 %v4110_v57, 16  ;;  %v1599_v17 = vrot.slane %v1597_v6, 1  ;;  %v1623_v57 = vrot.slane %v1621_v14, 1 }
 0x122   : > { %v4240_v51 = vpop.permute.xlu2 %1440 }
 0x123   : > { %5558 = vst [vmem:[#allocation66_spill] sm:$0xff] %v4240_v51  ;;  %v4242_v16 = vpop.permute.xlu1 %1426  ;;  %v1595_v51 = vor.u32 %v1593_v10, %v1591_v59  ;;  %v1587_v0 = vor.u32 %v1585_v25, %v1583_v44  ;;  %v1603_v24 = vor.u32 %v1601_v26, %v1599_v17  ;;  %v1615_v25 = vrot.slane %v1613_v15, 1 }
 0x124   : > { %5559 = vst [vmem:[#allocation67_spill] sm:$0xff] %v4242_v16  ;;  %v1605_v16 = vshll.u32 %v4130_v20, 16  ;;  %v1625_v26 = vshrl.u32 %v4132_v32, 16  ;;  %v1649_v32 = vshrl.u32 %v4152_v62, 16 }
 0x125   : > { %v1600_v10 = vsel %vm1114_vm4, %v1595_v51, %v1599_v17  ;;  %v1592_v44 = vsel %vm1114_vm4, %v1587_v0, %v1591_v59  ;;  %v1637_v51 = vshll.u32 %v4148_v5, 16  ;;  %v1645_v0 = vshll.u32 %v4152_v62, 16 }
 0x126   : > { %1743 = vrot.lane.b32.xlu0 %v1576_v33, %s3393_s14  ;;  %v1607_v6 = vrot.slane %v1605_v16, 1  ;;  %v1617_v33 = vshrl.u32 %v4124_v37, 16  ;;  %v1627_v59 = vor.u32 %v1625_v26, %v1623_v57 }
 0x127   : > { %v1647_v26 = vrot.slane %v1645_v0, 1 }
 0x128   : > { %1741 = vrot.lane.b32.xlu2 %v1568_v36, %s3393_s14  ;;  %v4254_v21 = vpop.permute.xlu0 %1430  ;;  %v1609_v36 = vshrl.u32 %v4130_v20, 16 }
 0x129   : > { %1745 = vrot.lane.b32.xlu1 %v1584_v27, %s3393_s14  ;;  %v1608_v27 = vsel %vm1114_vm4, %v1603_v24, %v1607_v6 }
 0x12a   : > { %v4258_v2 = vpop.permute.xlu2 %1446  ;;  %v1611_v16 = vor.u32 %v1609_v36, %v1607_v6  ;;  %v985_v36 = vld [vmem:[#allocation2 + $0xc] sm:$0xe] }
 0x12b   : > { %5560 = vst [vmem:[#allocation68_spill] sm:$0xff] %v4258_v2  ;;  %v4260_v34 = vpop.permute.xlu1 %1432  ;;  %v1619_v2 = vor.u32 %v1617_v33, %v1615_v25  ;;  %v1641_v33 = vshrl.u32 %v4148_v5, 16 }
 0x12c   : > { %5561 = vst [vmem:[#allocation69_spill] sm:$0xff] %v4260_v34  ;;  %v1629_v34 = vshll.u32 %v4150_v30, 16  ;;  %v1616_v6 = vsel %vm1114_vm4, %v1611_v16, %v1615_v25  ;;  %v1651_v25 = vor.u32 %v1649_v32, %v1647_v26 }
 0x12d   : > { %v1624_v14 = vsel %vm1114_vm4, %v1619_v2, %v1623_v57  ;;  %v1786_v57 = vunpack.c.l.b16 %v985_v36 }
 0x12e   : > { %1749 = vrot.lane.b32.xlu0 %v1600_v10, %s3393_s14  ;;  %v1631_v10 = vrot.slane %v1629_v34, 1 }
 0x130   : > { %1747 = vrot.lane.b32.xlu2 %v1592_v44, %s3393_s14  ;;  %v4272_v17 = vpop.permute.xlu0 %1436  ;;  %v1633_v44 = vshrl.u32 %v4150_v30, 16  ;;  %v990_v30 = vld [vmem:[#allocation2 + $0x18] sm:$0xe] }
 0x131   : > { %1751 = vrot.lane.b32.xlu1 %v1608_v27, %s3393_s14  ;;  %5562 = vst [vmem:[#allocation70_spill] sm:$0xff] %v4272_v17  ;;  %v1639_v27 = vrot.slane %v1637_v51, 1  ;;  %v1632_v17 = vsel %vm1114_vm4, %v1627_v59, %v1631_v10 }
 0x132   : > { %v4276_v15 = vpop.permute.xlu2 %1452  ;;  %v1635_v34 = vor.u32 %v1633_v44, %v1631_v10  ;;  %v1789_v44 = vrot.slane %v4071_v3, 1 }
 0x133   : > { %5563 = vst [vmem:[#allocation71_spill] sm:$0xff] %v4276_v15  ;;  %v4278_v24 = vpop.permute.xlu1 %1438  ;;  %v1643_v15 = vor.u32 %v1641_v33, %v1639_v27 }
 0x134   : > { %5564 = vst [vmem:[#allocation72_spill] sm:$0xff] %v4278_v24  ;;  %v1653_v24 = vshll.u32 %v4168_v35, 16  ;;  %v1640_v36 = vsel %vm1114_vm4, %v1635_v34, %v1639_v27 }
 0x135   : > { %v1648_v59 = vsel %vm1114_vm4, %v1643_v15, %v1647_v26 }
 0x136   : > { %1755 = vrot.lane.b32.xlu0 %v1624_v14, %s3393_s14  ;;  %v1655_v0 = vrot.slane %v1653_v24, 1  ;;  %v5566_v14 = vunpack.c.l.b16 %v4053_v31 }
 0x138   : > { %1753 = vrot.lane.b32.xlu2 %v1616_v6, %s3393_s14  ;;  %v4290_v2 = vpop.permute.xlu0 %1442  ;;  %v1787_v33 = vpack.c.b16 %v5566_v14, %v1786_v57  ;;  %v1657_v6 = vshrl.u32 %v4168_v35, 16  ;;  %v1656_v10 = vsel %vm1114_vm4, %v1651_v25, %v1655_v0  ;;  %v5568_v25 = vunpack.c.h.b16 %v4078_v19 }
 0x139   : > { %1757 = vrot.lane.b32.xlu1 %v1632_v17, %s3393_s14  ;;  %v1661_v17 = vshll.u32 %v4166_v46, 16  ;;  %v1669_v14 = vshll.u32 %v4170_v8, 16 }
 0x13a   : > { %v4292_v16 = vpop.permute.xlu2 %1458  ;;  %v1788_v32 = vrot.slane %v1787_v33, 1  ;;  %v1659_v24 = vor.u32 %v1657_v6, %v1655_v0 }
 0x13b   : > { %v4294_v51 = vpop.permute.xlu1 %1444  ;;  %v1663_v27 = vrot.slane %v1661_v17, 1 }
 0x13c   : > { %5565 = vst [vmem:[#allocation73_spill] sm:$0xff] %v4294_v51  ;;  %v2023_v51 = vunpack.c.l.b16 %v990_v30  ;;  %v1790_v34 = vsel %vm1362_vm5, %v1788_v32, %v1789_v44  ;;  %v1665_v30 = vshrl.u32 %v4166_v46, 16 }
 0x13d   : > { %v1664_v3 = vsel %vm1114_vm4, %v1659_v24, %v1663_v27  ;;  %v5486_v24 = vrot.slane %v4106_v38, 1 }
 0x13e   : > { %1761 = vrot.lane.b32.xlu0 %v1648_v59, %s3393_s14  ;;  %v2024_v59 = vpack.c.b16 %v5568_v25, %v2023_v51  ;;  %v4325_v51 = vrot.slane %v1669_v14, 1  ;;  %v4364_v14 = vld [vmem:[#allocation2 + $0x48] sm:$0xff]  }
 0x140   : > { %1759 = vrot.lane.b32.xlu2 %v1640_v36, %s3393_s14  ;;  %v4307_v15 = vpop.permute.xlu0 %1448  ;;  %v2025_v0 = vrot.slane %v2024_v59, 1  ;;  %v1667_v36 = vor.u32 %v1665_v30, %v1663_v27  ;;  %5569 = vst [vmem:[#allocation75_spill] sm:$0xff] %v4325_v51 }
 0x141   : > { %1763 = vrot.lane.b32.xlu1 %v1656_v10, %s3393_s14 }
 0x142   : > { %v4309_v26 = vpop.permute.xlu2 %1494  ;;  %v2026_v10 = vsel %vm1362_vm5, %v2025_v0, %v3910_v53  ;;  %v1672_v32 = vsel %vm1114_vm4, %v1667_v36, %v4325_v51  ;;  %v1791_v53 = vrot.slane %v4094_v28, 1  ;;  %v5487_v0 = vrot.slane %v4148_v5, 1 }
 0x143   : > { %v4311_v57 = vpop.permute.xlu1 %1450  ;;  %v5488_v36 = vrot.slane %v4152_v62, 1  ;;  %v1689_v5 = vshrl.u32 %v4184_v61, 16  ;;  %v1693_v51 = vshll.u32 %v4188_v63, 16 }
 0x144   : > { %5567 = vst [vmem:[#allocation74_spill] sm:$0xff] %v4311_v57 }
 0x146   : > { %1837 = vrot.lane.b32.xlu0 %v1790_v34, %s3394_s15  ;;  %v1801_v34 = vrot.slane %v4112_v60, 1  ;;  %v1792_v60 = vsel %vm1362_vm5, %v1789_v44, %v1791_v53 }
 0x148   : > { %1765 = vrot.lane.b32.xlu2 %v1664_v3, %s3393_s14  ;;  %v4323_v33 = vpop.permute.xlu0 %1454  ;;  %v1802_v3 = vsel %vm1362_vm5, %v5486_v24, %v1801_v34  ;;  %v5489_v24 = vrot.slane %v4130_v20, 1 }
 0x149   : > { %1894 = vrot.lane.b32.xlu1 %v4078_v19, %s3395_s16 }
 0x14a   : > { %v4327_v6 = vpop.permute.xlu2 %1500 }
 0x14b   : > { %v4329_v17 = vpop.permute.xlu1 %1456 }
 0x14e   : > { %2035 = vrot.lane.b32.xlu0 %v2026_v10, %s3396_s17 }
 0x150   : > { %1974 = vrot.lane.b32.xlu2 %v3605_v22, %s3397_s18  ;;  %v4341_v27 = vpop.permute.xlu0 %1490 }
 0x151   : > { %1767 = vrot.lane.b32.xlu1 %v1672_v32, %s3393_s14 }
 0x152   : > { %v4344_v25 = vpop.permute.xlu2 %1506 }
 0x153   : > { %v4346_v59 = vpop.permute.xlu1 %1492 }
 0x156   : > { %1849 = vrot.lane.b32.xlu0 %v1802_v3, %s3394_s15 }
 0x158   : > { %1839 = vrot.lane.b32.xlu2 %v1792_v60, %s3394_s15  ;;  %v4356_v22 = vpop.permute.xlu0 %1496 }
 0x159   : > { %1896 = vrot.lane.b32.xlu1 %v4081_v48, %s3395_s16 }
 0x15a   : > { %v4358_v28 = vpop.permute.xlu2 %1512 }
 0x15b   : > { %v4360_v30 = vpop.permute.xlu1 %1498 }
 0x15e   : > { %1976 = vrot.lane.b32.xlu0 %v3585_v58, %s3397_s18  ;;  %v1814_v58 = vsel %vm1362_vm5, %v5487_v0, %v5488_v36  ;;  %v4397_v0 = vld [vmem:[#allocation2 + $0x78] sm:$0xff]  }
 0x160   : > { %1906 = vrot.lane.b32.xlu2 %v4364_v14, %s3395_s16  ;;  %v4370_v44 = vpop.permute.xlu0 %1502 }
 0x161   : > { %1986 = vrot.lane.b32.xlu1 %v3693_v41, %s3397_s18 }
 0x162   : > { %v4374_v10 = vpop.permute.xlu2 %1518 }
 0x163   : > { %v4376_v32 = vpop.permute.xlu1 %1504 }
 0x166   : > { %2047 = vrot.lane.b32.xlu0 %v3949_v23, %s3396_s17  ;;  %v5490_v23 = vrot.slane %v4088_v56, 1 }
 0x168   : > { %2037 = vrot.lane.b32.xlu2 %v3921_v7, %s3396_s17  ;;  %v4388_v41 = vpop.permute.xlu0 %1508 }
 0x169   : > { %1861 = vrot.lane.b32.xlu1 %v1814_v58, %s3394_s15 }
 0x16a   : > { %v4390_v3 = vpop.permute.xlu2 %1524 }
 0x16b   : > { %5570 = vst [vmem:[#allocation76_spill] sm:$0xff] %v4390_v3  ;;  %v4392_v60 = vpop.permute.xlu1 %1510  ;;  %v1794_v3 = vsel %vm1362_vm5, %v1791_v53, %v5490_v23 }
 0x16e   : > { %1998 = vrot.lane.b32.xlu0 %v3796_v54, %s3397_s18  ;;  %v1804_v54 = vsel %vm1362_vm5, %v1801_v34, %v5489_v24  ;;  %v1685_v34 = vshll.u32 %v4184_v61, 16 }
 0x170   : > { %1918 = vrot.lane.b32.xlu2 %v4397_v0, %s3395_s16  ;;  %v4403_v7 = vpop.permute.xlu0 %1514  ;;  %v4432_v23 = vrot.slane %v1685_v34, 1  ;;  %v4452_v34 = vrot.slane %v1693_v51, 1 }
 0x171   : > { %2059 = vrot.lane.b32.xlu1 %v3991_v43, %s3396_s17  ;;  %v3361_v43 = vld [vmem:[#allocation2 + $0x28] sm:$0xff]  }
 0x172   : > { %v4406_v58 = vpop.permute.xlu2 %1530  ;;  %v2095_v51 = vsel %vm2083_vm6, %v3361_v43, %v3979_v55 }
 0x173   : > { %5571 = vst [vmem:[#allocation77_spill] sm:$0xff] %v4406_v58  ;;  %v4408_v36 = vpop.permute.xlu1 %1516  ;;  %v2131_v58 = vsel %vm2083_vm6, %v3883_v49, %v4146_v4  ;;  %v2089_v49 = vsel %vm2083_vm6, %v4053_v31, %v3993_v45  ;;  %v4441_v4 = vld [vmem:[#allocation2 + $0x50] sm:$0xff]  }
 0x174   : > { %v2180_v53 = vsel %vm2132_vm7, %v2131_v58, %v4292_v16  ;;  %v2138_v58 = vsel %vm2132_vm7, %v2089_v49, %v4164_v42  ;;  %v1823_v42 = vrot.slane %v4184_v61, 1 }
 0x175   : > { %v2187_v45 = vsel %vm2181_vm8, %v2138_v58, %v4309_v26  ;;  %v1825_v26 = vrot.slane %v4188_v63, 1  ;;  %v2144_v58 = vsel %vm2132_vm7, %v2095_v51, %v4180_v47 }
 0x176   : > { %1851 = vrot.lane.b32.xlu0 %v1804_v54, %s3394_s15 }
 0x178   : > { %1841 = vrot.lane.b32.xlu2 %v1794_v3, %s3394_s15  ;;  %v4419_v57 = vpop.permute.xlu0 %1520 }
 0x179   : > { %1898 = vrot.lane.b32.xlu1 %v3361_v43, %s3395_s16 }
 0x17a   : > { %v1537_v54 = vpop.permute.xlu2 %1536 }
 0x17b   : > { %v4427_v24 = vpop.permute.xlu1 %1522  ;;  %v4430_v3 = vsel %vm2181_vm8, %v2180_v53, %v1537_v54 }
 0x17e   : > { %1978 = vrot.lane.b32.xlu0 %v3616_v39, %s3397_s18  ;;  %v1691_v39 = vor.u32 %v1689_v5, %v4432_v23  ;;  %v2127_v5 = vsel %vm2083_vm6, %v3855_v12, %v4178_v1  ;;  %v2129_v1 = vsel %vm2083_vm6, %v3879_v40, %v4182_v50  ;;  %v1826_v40 = vsel %vm1362_vm5, %v1823_v42, %v1825_v26 }
 0x17f   : > { %v2176_v49 = vsel %vm2132_vm7, %v2127_v5, %v4323_v33  ;;  %v2193_v33 = vsel %vm2181_vm8, %v2144_v58, %v4327_v6  ;;  %v5572_v50 = vrot.slane %v4152_v62, 1  ;;  %v4513_v5 = vld [vmem:[#allocation2 + $0x80] sm:$0xff]  }
 0x180   : > { %1908 = vrot.lane.b32.xlu2 %v4441_v4, %s3395_s16  ;;  %v4447_v16 = vpop.permute.xlu0 %1526 }
 0x181   : > { %1988 = vrot.lane.b32.xlu1 %v3701_v52, %s3397_s18  ;;  %v1696_v52 = vsel %vm1114_vm4, %v1691_v39, %v4452_v34  ;;  %v1815_v39 = vrot.slane %v4168_v35, 1 }
 0x182   : > { %v1742_v31 = vpop.permute.xlu2 %1741 }
 0x183   : > { %v4456_v53 = vpop.permute.xlu1 %1528  ;;  %v4459_v54 = vsel %vm2230_vm9, %v2187_v45, %v1742_v31  ;;  %v1816_v6 = vsel %vm1362_vm5, %v5572_v50, %v1815_v39 }
 0x186   : > { %2049 = vrot.lane.b32.xlu0 %v3957_v9, %s3396_s17 }
 0x188   : > { %2039 = vrot.lane.b32.xlu2 %v3934_v18, %s3396_s17  ;;  %v1533_v9 = vpop.permute.xlu0 %1532  ;;  %v2178_v18 = vsel %vm2132_vm7, %v2129_v1, %v4329_v17  ;;  %v4507_v17 = vld [vmem:[#allocation2 + $0x40] sm:$0xff]   ;;  %v2091_v1 = vsel %vm2083_vm6, %v4078_v19, %v4025_v11 }
 0x189   : > { %1773 = vrot.lane.b32.xlu1 %v1696_v52, %s3393_s14  ;;  %v4484_v55 = vsel %vm2181_vm8, %v2176_v49, %v1533_v9  ;;  %v2101_v52 = vsel %vm2083_vm6, %v4507_v17, %v4008_v29  ;;  %v5577_v11 = vld [vmem:[#allocation15_spill] sm:$0xff] }
 0x18a   : > { %v1748_v43 = vpop.permute.xlu2 %1747  ;;  %v2150_v62 = vsel %vm2132_vm7, %v2101_v52, %v4200_v13  ;;  %v5575_v13 = vld [vmem:[#allocation20_spill] sm:$0xff]  ;;  %v5578_v52 = vld [vmem:[#allocation63_spill] sm:$0xff] }
 0x18b   : > { %v1535_v45 = vpop.permute.xlu1 %1534  ;;  %v4491_v31 = vsel %vm2230_vm9, %v2193_v33, %v1748_v43  ;;  %v2199_v49 = vsel %vm2181_vm8, %v2150_v62, %v4344_v25  ;;  %v5573_v33 = vld [vmem:[#allocation10_spill] sm:$0xff]  ;;  %v2093_v25 = vsel %vm2083_vm6, %v4081_v48, %v5575_v13 }
 0x18c   : > { %v4494_v47 = vsel %vm2181_vm8, %v2178_v18, %v1535_v45  ;;  %v5574_v18 = vld [vmem:[#allocation62_spill] sm:$0xff] }
 0x18d   : > { %v2140_v43 = vsel %vm2132_vm7, %v2091_v1, %v5574_v18  ;;  %v3365_v45 = vld [vmem:[#allocation2 + $0x58] sm:$0xff]   ;;  %v5580_v1 = vld [vmem:[#allocation43_spill] sm:$0xff] }
 0x18e   : > { %1873 = vrot.lane.b32.xlu0 %v1826_v40, %s3394_s15  ;;  %v5576_v40 = vld [vmem:[#allocation33_spill] sm:$0xff] }
 0x18f   : > { %v2107_v50 = vsel %vm2083_vm6, %v3365_v45, %v5576_v40 }
 0x190   : > { %1863 = vrot.lane.b32.xlu2 %v1816_v6, %s3394_s15  ;;  %v4517_v51 = vpop.permute.xlu0 %1737  ;;  %v2189_v6 = vsel %vm2181_vm8, %v2140_v43, %v4356_v22  ;;  %v2156_v62 = vsel %vm2132_vm7, %v2107_v50, %v5578_v52  ;;  %v930_v22 = vld [vmem:[%s5433_s3 + $0x10] sm:$0x3] }
 0x191   : > { %1920 = vrot.lane.b32.xlu1 %v4513_v5, %s3395_s16  ;;  %v2484_v40 = vunpack.c.l.b16 %v930_v22  ;;  %v4574_v52 = vld [vmem:[#allocation2 + $0x70] sm:$0xff]   ;;  %v5584_v22 = vld [vmem:[#allocation39_spill] sm:$0xff] }
 0x192   : > { %v1754_v9 = vpop.permute.xlu2 %1753 }
 0x193   : > { %v4523_v58 = vpop.permute.xlu1 %1739  ;;  %v4526_v29 = vsel %vm2230_vm9, %v2199_v49, %v1754_v9  ;;  %v5579_v49 = vld [vmem:[#allocation64_spill] sm:$0xff] }
 0x194   : > { %v2142_v48 = vsel %vm2132_vm7, %v2093_v25, %v5579_v49 }
 0x195   : > { %v2191_v18 = vsel %vm2181_vm8, %v2142_v48, %v4360_v30  ;;  %v4579_v48 = vld [vmem:[#allocation2 + $0x38] sm:$0xff]  }
 0x196   : > { %2000 = vrot.lane.b32.xlu0 %v5573_v33, %s3397_s18  ;;  %v1795_v33 = vrot.slane %v5580_v1, 1 }
 0x198   : > { %1930 = vrot.lane.b32.xlu2 %v3855_v12, %s3395_s16  ;;  %v1744_v19 = vpop.permute.xlu0 %1743  ;;  %v2205_v12 = vsel %vm2181_vm8, %v2156_v62, %v4358_v28  ;;  %v5583_v62 = vld [vmem:[#allocation40_spill] sm:$0xff] }
 0x199   : > { %2010 = vrot.lane.b32.xlu1 %v5577_v11, %s3397_s18  ;;  %v4551_v9 = vsel %vm2230_vm9, %v2189_v6, %v1744_v19  ;;  %v2487_v6 = vpack.c.b16 %v2484_v40, %v2484_v40  ;;  %v5581_v11 = vrot.slane %v4088_v56, 1  ;;  %v5582_v19 = vld [vmem:[#allocation34_spill] sm:$0xff]  ;;  %v2113_v49 = vsel %vm2083_vm6, %v4574_v52, %v5583_v62  ;;  %v5587_v40 = vld [vmem:[#allocation67_spill] sm:$0xff] }
 0x19a   : > { %v1760_v43 = vpop.permute.xlu2 %1759  ;;  %v2099_v56 = vsel %vm2083_vm6, %v4579_v48, %v5584_v22 }
 0x19b   : > { %v1746_v13 = vpop.permute.xlu1 %1745  ;;  %v4562_v25 = vsel %vm2230_vm9, %v2205_v12, %v1760_v43  ;;  %v1796_v28 = vsel %vm1362_vm5, %v5581_v11, %v1795_v33  ;;  %v2541_v30 = vsel %vm2539_vm10, %v2487_v6, 0  ;;  %v5585_v12 = vld [vmem:[#allocation27_spill] sm:$0xff]  ;;  %v5586_v43 = vld [vmem:[#allocation66_spill] sm:$0xff]  ;;  %v2148_v6 = vsel %vm2132_vm7, %v2099_v56, %v5587_v40  ;;  %v4618_v40 = vld [vmem:[#allocation2 + $0x30] sm:$0xff]  }
 0x19c   : > { %v4565_v50 = vsel %vm2230_vm9, %v2191_v18, %v1746_v13  ;;  %2548 = vmatpush.bf16.msra.mxu0 %v2541_v30  ;;  %3320 = vmatpush.bf16.msra.mxu1 %v2541_v30  ;;  %v2162_v13 = vsel %vm2132_vm7, %v2113_v49, %v5586_v43  ;;  %v1805_v11 = vrot.slane %v4124_v37, 1  ;;  %v3035_v43 = vld [vmem:[%s5433_s3] sm:$0xff] }
 0x19d   : > { %3321 = vmatpush.bf16.msra.mxu2 %v2541_v30  ;;  %3322 = vmatpush.bf16.msra.mxu3 %v2541_v30  ;;  %v2211_v62 = vsel %vm2181_vm8, %v2162_v13, %v4374_v10  ;;  %v5588_v10 = vrot.slane %v4130_v20, 1  ;;  %v5589_v30 = vld [vmem:[#allocation41_spill] sm:$0xff] }
 0x19e   : > { %2071 = vrot.lane.b32.xlu0 %v5582_v19, %s3396_s17  ;;  %v3036_v19 = vld [vmem:[%s5433_s3 + $0x8] sm:$0xff]  ;;  %v2103_v13 = vsel %vm2083_vm6, %v4364_v14, %v5589_v30 }
 0x1a0   : > { %2061 = vrot.lane.b32.xlu2 %v5585_v12, %s3396_s17  ;;  %v4587_v18 = vpop.permute.xlu0 %1749  ;;  %2549 = vmatpush.bf16.msra.mxu0 %v3036_v19 }
 0x1a1   : > { %1843 = vrot.lane.b32.xlu1 %v1796_v28, %s3394_s15  ;;  %v2197_v28 = vsel %vm2181_vm8, %v2148_v6, %v4376_v32  ;;  %3323 = vmatpush.bf16.msra.mxu1 %v3036_v19  ;;  %v1806_v32 = vsel %vm1362_vm5, %v5588_v10, %v1805_v11  ;;  %v2152_v6 = vsel %vm2132_vm7, %v2103_v13, %v4254_v21  ;;  %v5593_v13 = vld [vmem:[#allocation6_spill] sm:$0xff] }
 0x1a2   : > { %v1766_v22 = vpop.permute.xlu2 %1765  ;;  %3324 = vmatpush.bf16.msra.mxu2 %v3036_v19  ;;  %3325 = vmatpush.bf16.msra.mxu3 %v3036_v19  ;;  %v2201_v19 = vsel %vm2181_vm8, %v2152_v6, %v4388_v41 }
 0x1a3   : > { %v1752_v12 = vpop.permute.xlu1 %1751  ;;  %v4602_v49 = vsel %vm2230_vm9, %v2211_v62, %v1766_v22  ;;  %v5590_v62 = vld [vmem:[#allocation42_spill] sm:$0xff] }
 0x1a4   : > { %v4605_v56 = vsel %vm2230_vm9, %v2197_v28, %v1752_v12  ;;  %2550 = vmatpush.bf16.msra.mxu0 %v3035_v43  ;;  %v2105_v20 = vsel %vm2083_vm6, %v4441_v4, %v5590_v62  ;;  %v5591_v28 = vld [vmem:[#allocation69_spill] sm:$0xff] }
 0x1a5   : > { %3326 = vmatpush.bf16.msra.mxu1 %v3035_v43  ;;  %v2154_v22 = vsel %vm2132_vm7, %v2105_v20, %v5591_v28  ;;  %v5594_v20 = vld [vmem:[#allocation47_spill] sm:$0xff] }
 0x1a6   : > { %1900 = vrot.lane.b32.xlu0 %v4618_v40, %s3395_s16  ;;  %3327 = vmatpush.bf16.msra.mxu2 %v3035_v43  ;;  %v2203_v21 = vsel %vm2181_vm8, %v2154_v22, %v4392_v60  ;;  %v5597_v22 = vld [vmem:[#allocation72_spill] sm:$0xff] }
 0x1a7   : > { %3328 = vmatpush.bf16.msra.mxu3 %v3035_v43  ;;  %v4648_v43 = vld [vmem:[#allocation2 + $0x68] sm:$0xff]  }
 0x1a8   : > { %1853 = vrot.lane.b32.xlu2 %v1806_v32, %s3394_s15  ;;  %v1756_v14 = vpop.permute.xlu0 %1755  ;;  %v1697_v32 = vshrl.u32 %v4188_v63, 16  ;;  %v2111_v60 = vsel %vm2083_vm6, %v4648_v43, %v5594_v20 }
 0x1a9   : > { %1910 = vrot.lane.b32.xlu1 %v3365_v45, %s3395_s16  ;;  %v4634_v12 = vsel %vm2230_vm9, %v2201_v19, %v1756_v14  ;;  %v5592_v45 = vld [vmem:[#allocation60_spill] sm:$0xff]  ;;  %v5595_v19 = vld [vmem:[#allocation3_spill] sm:$0xff]  ;;  %v5596_v14 = vld [vmem:[#allocation18_spill] sm:$0xff] }
 0x1aa   : > { %v1975_v4 = vpop.permute.xlu2 %1974  ;;  %v1701_v30 = vshll.u32 %v5592_v45, 16  ;;  %v1699_v6 = vor.u32 %v1697_v32, %v4452_v34  ;;  %v1817_v34 = vrot.slane %v4166_v46, 1 }
 0x1ab   : > { %v1758_v10 = vpop.permute.xlu1 %1757 }
 0x1ac   : > { %v4639_v41 = vsel %vm2230_vm9, %v2203_v21, %v1758_v10  ;;  %v4646_v62 = vrot.slane %v1701_v30, 1  ;;  %v2160_v21 = vsel %vm2132_vm7, %v2111_v60, %v5597_v22  ;;  %v3370_v60 = vld [vmem:[#allocation2] sm:$0xff]  }
 0x1ad   : > { %v2209_v10 = vsel %vm2181_vm8, %v2160_v21, %v4408_v36  ;;  %v5599_v36 = vld [vmem:[#allocation57_spill] sm:$0xff] }
 0x1ae   : > { %1990 = vrot.lane.b32.xlu0 %v5593_v13, %s3397_s18  ;;  %v1704_v20 = vsel %vm1114_vm4, %v1699_v6, %v4646_v62  ;;  %v5600_v6 = vld [vmem:[#allocation23_spill] sm:$0xff] }
 0x1b0   : > { %1980 = vrot.lane.b32.xlu2 %v5595_v19, %s3397_s18  ;;  %v4657_v28 = vpop.permute.xlu0 %1761  ;;  %v1818_v19 = vsel %vm1362_vm5, %v1815_v39, %v1817_v34 }
 0x1b1   : > { %2041 = vrot.lane.b32.xlu1 %v5596_v14, %s3396_s17  ;;  %v5598_v14 = vld [vmem:[#allocation25_spill] sm:$0xff] }
 0x1b2   : > { %v1840_v32 = vpop.permute.xlu2 %1839  ;;  %v2085_v22 = vsel %vm2083_vm6, %v3370_v60, %v5598_v14 }
 0x1b3   : > { %v1764_v30 = vpop.permute.xlu1 %1763  ;;  %v2134_v21 = vsel %vm2132_vm7, %v2085_v22, %v5599_v36  ;;  %v4694_v22 = vld [vmem:[#allocation2 + $0x88] sm:$0xff]  }
 0x1b4   : > { %v4665_v13 = vsel %vm2230_vm9, %v2209_v10, %v1764_v30  ;;  %v2183_v10 = vsel %vm2181_vm8, %v2134_v21, %v4341_v27  ;;  %v1827_v30 = vrot.slane %v5592_v45, 1  ;;  %v3372_v21 = vld [vmem:[#allocation2 + $0xb0] sm:$0xff]  }
 0x1b5   : > { %v2232_v39 = vsel %vm2230_vm9, %v2183_v10, %v4517_v51  ;;  %v5601_v51 = vld [vmem:[#allocation50_spill] sm:$0xff] }
 0x1b6   : > { %1775 = vrot.lane.b32.xlu0 %v1704_v20, %s3393_s14  ;;  %v1828_v27 = vsel %vm1362_vm5, %v1825_v26, %v1827_v30  ;;  %v2115_v36 = vsel %vm2083_vm6, %v4397_v0, %v5601_v51 }
 0x1b7   : > { %v2164_v10 = vsel %vm2132_vm7, %v2115_v36, %v4290_v2  ;;  %v5605_v2 = vld [vmem:[#allocation30_spill] sm:$0xff] }
 0x1b8   : > { %2051 = vrot.lane.b32.xlu2 %v5600_v6, %s3396_s17  ;;  %v1838_v35 = vpop.permute.xlu0 %1837 }
 0x1b9   : > { %1865 = vrot.lane.b32.xlu1 %v1818_v19, %s3394_s15  ;;  %v2281_v20 = vsel %vm2279_vm11, %v2232_v39, %v1838_v35  ;;  %v2213_v35 = vsel %vm2181_vm8, %v2164_v10, %v4419_v57  ;;  %v5606_v57 = vld [vmem:[#allocation49_spill] sm:$0xff] }
 0x1ba   : > { %v1907_v60 = vpop.permute.xlu2 %1906  ;;  %v1807_v36 = vrot.slane %v5606_v57, 1  ;;  %v5608_v10 = vld [vmem:[#allocation37_spill] sm:$0xff]  ;;  %v1673_v57 = vshrl.u32 %v4170_v8, 16 }
 0x1bb   : > { %v1895_v14 = vpop.permute.xlu1 %1894 }
 0x1bc   : > { %v2330_v19 = vsel %vm2328_vm12, %v2281_v20, %v1895_v14  ;;  %v5602_v14 = vld [vmem:[#allocation16_spill] sm:$0xff] }
 0x1bd   : > { %v2379_v26 = vsel %vm2377_vm13, %v2330_v19, %v1975_v4  ;;  %v5604_v19 = vld [vmem:[#allocation11_spill] sm:$0xff] }
 0x1be   : > { %1922 = vrot.lane.b32.xlu0 %v4694_v22, %s3395_s16 }
 0x1c0   : > { %1875 = vrot.lane.b32.xlu2 %v1828_v27, %s3394_s15  ;;  %v2036_v63 = vpop.permute.xlu0 %2035  ;;  %v5603_v27 = vld [vmem:[#allocation46_spill] sm:$0xff] }
 0x1c1   : > { %1932 = vrot.lane.b32.xlu1 %v3372_v21, %s3395_s16  ;;  %v2428_v6 = vsel %vm2426_vm14, %v2379_v26, %v2036_v63  ;;  %v1797_v4 = vrot.slane %v5603_v27, 1  ;;  %v5607_v26 = vld [vmem:[#allocation29_spill] sm:$0xff] }
 0x1c2   : > { %v2038_v39 = vpop.permute.xlu2 %2037  ;;  %3007 = vmatmul.msk.bf16.vlgmr.msra.gmra.mxu0 %vm2490_vm15, %v2428_v6  ;;  %v2087_v6 = vsel %vm2083_vm6, %v5608_v10, %v5607_v26 }
 0x1c3   : > { %v1768_v20 = vpop.permute.xlu1 %1767 }
 0x1c4   : > { %v4711_v0 = vsel %vm2230_vm9, %v2213_v35, %v1768_v20  ;;  %v1798_v35 = vsel %vm1362_vm5, %v1795_v33, %v1797_v4  ;;  %v5609_v20 = vld [vmem:[#allocation58_spill] sm:$0xff] }
 0x1c5   : > { %v5610_v33 = vld [vmem:[#allocation38_spill] sm:$0xff] }
 0x1c6   : > { %2012 = vrot.lane.b32.xlu0 %v5602_v14, %s3397_s18  ;;  %v2136_v14 = vsel %vm2132_vm7, %v2087_v6, %v5609_v20  ;;  %v2097_v10 = vsel %vm2083_vm6, %v4618_v40, %v5610_v33  ;;  %v5611_v6 = vld [vmem:[#allocation36_spill] sm:$0xff]  ;;  %v5614_v33 = vld [vmem:[#allocation45_spill] sm:$0xff] }
 0x1c8   : > { %2002 = vrot.lane.b32.xlu2 %v5604_v19, %s3397_s18  ;;  %v1850_v51 = vpop.permute.xlu0 %1849  ;;  %v2185_v19 = vsel %vm2181_vm8, %v2136_v14, %v4346_v59 }
 0x1c9   : > { %2063 = vrot.lane.b32.xlu1 %v5605_v2, %s3396_s17  ;;  %v1808_v2 = vsel %vm1362_vm5, %v1805_v11, %v1807_v36  ;;  %v2234_v26 = vsel %vm2230_vm9, %v2185_v19, %v4523_v58  ;;  %v5612_v11 = vld [vmem:[#allocation65_spill] sm:$0xff] }
 0x1ca   : > { %v1919_v21 = vpop.permute.xlu2 %1918  ;;  %v2283_v1 = vsel %vm2279_vm11, %v2234_v26, %v1840_v32  ;;  %v2146_v20 = vsel %vm2132_vm7, %v2097_v10, %v5612_v11 }
 0x1cb   : > { %v1897_v63 = vpop.permute.xlu1 %1896  ;;  %v2195_v32 = vsel %vm2181_vm8, %v2146_v20, %v4370_v44  ;;  %v1705_v20 = vshrl.u32 %v5592_v45, 16 }
 0x1cc   : > { %v2332_v59 = vsel %vm2328_vm12, %v2283_v1, %v1897_v63  ;;  %v2244_v19 = vsel %vm2230_vm9, %v2195_v32, %v4587_v18  ;;  %v5613_v1 = vld [vmem:[#allocation4_spill] sm:$0xff] }
 0x1cd   : > { %v2293_v63 = vsel %vm2279_vm11, %v2244_v19, %v1850_v51  ;;  %v5615_v51 = vld [vmem:[#allocation70_spill] sm:$0xff]  ;;  %v5618_v19 = vld [vmem:[#allocation7_spill] sm:$0xff] }
 0x1ce   : > { %1845 = vrot.lane.b32.xlu0 %v1798_v35, %s3394_s15  ;;  %v2342_v26 = vsel %vm2328_vm12, %v2293_v63, %v1907_v60  ;;  %v5619_v63 = vld [vmem:[#allocation22_spill] sm:$0xff] }
 0x1d0   : > { %2073 = vrot.lane.b32.xlu2 %v5611_v6, %s3396_s17  ;;  %v1977_v37 = vpop.permute.xlu0 %1976 }
 0x1d1   : > { %1855 = vrot.lane.b32.xlu1 %v1808_v2, %s3394_s15  ;;  %v2381_v58 = vsel %vm2377_vm13, %v2332_v59, %v1977_v37  ;;  %v3373_v2 = vld [vmem:[#allocation2 + $0x60] sm:$0xff]  }
 0x1d2   : > { %v1842_v35 = vpop.permute.xlu2 %1841  ;;  %v2430_v40 = vsel %vm2426_vm14, %v2381_v58, %v2038_v39  ;;  %v2109_v18 = vsel %vm2083_vm6, %v3373_v2, %v5614_v33  ;;  %v5616_v58 = vld [vmem:[#allocation59_spill] sm:$0xff] }
 0x1d3   : > { %v1987_v14 = vpop.permute.xlu1 %1986  ;;  %3008 = vmatmul.msk.bf16.gmra.mxu0 %vm2490_vm15, %v2430_v40  ;;  %v2158_v6 = vsel %vm2132_vm7, %v2109_v18, %v5615_v51  ;;  %v1709_v32 = vshll.u32 %v5616_v58, 16  ;;  %v1819_v40 = vrot.slane %v4170_v8, 1  ;;  %v2285_v45 = vsel %vm2279_vm11, %v4459_v54, %v1842_v35  ;;  %v5621_v35 = vld [vmem:[#allocation17_spill] sm:$0xff]  ;;  %v4912_v8 = vld [vmem:[#allocation2 + $0xc8] sm:$0xff]  }
 0x1d4   : > { %v2391_v44 = vsel %vm2377_vm13, %v2342_v26, %v1987_v14  ;;  %v5617_v14 = vld [vmem:[#allocation19_spill] sm:$0xff] }
 0x1d5   : > { %v4788_v26 = vrot.slane %v1709_v32, 1 }
 0x1d6   : > { %1912 = vrot.lane.b32.xlu0 %v3373_v2, %s3395_s16  ;;  %v1707_v2 = vor.u32 %v1705_v20, %v4646_v62 }
 0x1d8   : > { %1902 = vrot.lane.b32.xlu2 %v4579_v48, %s3395_s16  ;;  %v2048_v39 = vpop.permute.xlu0 %2047  ;;  %v2207_v48 = vsel %vm2181_vm8, %v2158_v6, %v4403_v7  ;;  %v1712_v62 = vsel %vm1114_vm4, %v1707_v2, %v4788_v26  ;;  %v4809_v6 = vld [vmem:[#allocation2 + $0xc0] sm:$0xff]  }
 0x1d9   : > { %1982 = vrot.lane.b32.xlu1 %v5613_v1, %s3397_s18  ;;  %v2440_v10 = vsel %vm2426_vm14, %v2391_v44, %v2048_v39  ;;  %v2256_v60 = vsel %vm2230_vm9, %v2207_v48, %v4657_v28  ;;  %v1829_v1 = vrot.slane %v5616_v58, 1  ;;  %v3374_v48 = vld [vmem:[#allocation2 + $0xb8] sm:$0xff]  }
 0x1da   : > { %v1909_v59 = vpop.permute.xlu2 %1908  ;;  %3013 = vmatmul.msk.bf16.vlgmr.msra.gmra.mxu1 %vm2490_vm15, %v2440_v10  ;;  %v1820_v10 = vsel %vm1362_vm5, %v1817_v34, %v1819_v40 }
 0x1db   : > { %v1862_v37 = vpop.permute.xlu1 %1861 }
 0x1dc   : > { %v2305_v11 = vsel %vm2279_vm11, %v2256_v60, %v1862_v37  ;;  %v1946_v37 = vshll.u32 %v4809_v6, 16 }
 0x1dd   : > { %v2354_v7 = vsel %vm2328_vm12, %v2305_v11, %v1919_v21  ;;  %v1830_v21 = vsel %vm1362_vm5, %v1827_v30, %v1829_v1  ;;  %v3375_v30 = vld [vmem:[#allocation2 + $0x90] sm:$0xff]  }
 0x1de   : > { %2043 = vrot.lane.b32.xlu0 %v5617_v14, %s3396_s17  ;;  %v5620_v11 = vld [vmem:[#allocation12_spill] sm:$0xff]  ;;  %v4819_v32 = vrot.slane %v1946_v37, 1 }
 0x1e0   : > { %1992 = vrot.lane.b32.xlu2 %v5618_v19, %s3397_s18  ;;  %v1999_v28 = vpop.permute.xlu0 %1998  ;;  %v2027_v19 = vrot.slane %v4809_v6, 1  ;;  %v1949_v2 = vsel %vm1114_vm4, %v5621_v35, %v4819_v32 }
 0x1e1   : > { %2053 = vrot.lane.b32.xlu1 %v5619_v63, %s3396_s17  ;;  %v2403_v44 = vsel %vm2377_vm13, %v2354_v7, %v1999_v28 }
 0x1e2   : > { %v2040_v39 = vpop.permute.xlu2 %2039 }
 0x1e3   : > { %v2060_v33 = vpop.permute.xlu1 %2059 }
 0x1e4   : > { %v2452_v18 = vsel %vm2426_vm14, %v2403_v44, %v2060_v33  ;;  %v5622_v44 = vld [vmem:[#allocation32_spill] sm:$0xff] }
 0x1e5   : > { %3019 = vmatmul.msk.bf16.vlgmr.msra.gmra.mxu2 %vm2490_vm15, %v2452_v18  ;;  %v2028_v33 = vsel %vm1362_vm5, %v5622_v44, %v2027_v19  ;;  %v5623_v18 = vld [vmem:[#allocation28_spill] sm:$0xff]  ;;  %v5630_v44 = vld [vmem:[#allocation75_spill] sm:$0xff] }
 0x1e6   : > { %1867 = vrot.lane.b32.xlu0 %v1820_v10, %s3394_s15 }
 0x1e8   : > { %1777 = vrot.lane.b32.xlu2 %v1712_v62, %s3393_s14  ;;  %v1852_v46 = vpop.permute.xlu0 %1851 }
 0x1e9   : > { %1877 = vrot.lane.b32.xlu1 %v1830_v21, %s3394_s15  ;;  %v2295_v54 = vsel %vm2279_vm11, %v4605_v56, %v1852_v46 }
 0x1ea   : > { %v1864_v51 = vpop.permute.xlu2 %1863  ;;  %v2344_v10 = vsel %vm2328_vm12, %v2295_v54, %v1909_v59 }
 0x1eb   : > { %v1899_v34 = vpop.permute.xlu1 %1898  ;;  %v2307_v27 = vsel %vm2279_vm11, %v4665_v13, %v1864_v51 }
 0x1ec   : > { %v2334_v60 = vsel %vm2328_vm12, %v2285_v45, %v1899_v34 }
 0x1ee   : > { %1934 = vrot.lane.b32.xlu0 %v3374_v48, %s3395_s16  ;;  %v5625_v48 = vrot.slane %v4106_v38, 1  ;;  %v5627_v38 = vld [vmem:[#allocation5_spill] sm:$0xff] }
 0x1f0   : > { %1924 = vrot.lane.b32.xlu2 %v3375_v30, %s3395_s16  ;;  %v1979_v20 = vpop.permute.xlu0 %1978  ;;  %v1800_v45 = vsel %vm1362_vm5, %v1797_v4, %v5625_v48  ;;  %v5628_v4 = vld [vmem:[#allocation54_spill] sm:$0xff]  ;;  %v5632_v48 = vld [vmem:[#allocation24_spill] sm:$0xff] }
 0x1f1   : > { %2004 = vrot.lane.b32.xlu1 %v5620_v11, %s3397_s18  ;;  %v2383_v14 = vsel %vm2377_vm13, %v2334_v60, %v1979_v20 }
 0x1f2   : > { %v1931_v63 = vpop.permute.xlu2 %1930  ;;  %v2432_v28 = vsel %vm2426_vm14, %v2383_v14, %v2040_v39  ;;  %v5624_v39 = vld [vmem:[#allocation53_spill] sm:$0xff]  ;;  %v5626_v14 = vld [vmem:[#allocation56_spill] sm:$0xff] }
 0x1f3   : > { %v1989_v7 = vpop.permute.xlu1 %1988  ;;  %3009 = vmatmul.msk.bf16.gmra.mxu0 %vm2490_vm15, %v2432_v28  ;;  %v1809_v62 = vrot.slane %v5624_v39, 1  ;;  %v5629_v28 = vld [vmem:[#allocation8_spill] sm:$0xff]  ;;  %v5639_v39 = vld [vmem:[#allocation55_spill] sm:$0xff] }
 0x1f4   : > { %v2393_v56 = vsel %vm2377_vm13, %v2344_v10, %v1989_v7  ;;  %v2121_v7 = vsel %vm2083_vm6, %v3375_v30, %v5628_v4 }
 0x1f5   : > { %v1810_v59 = vsel %vm1362_vm5, %v1807_v36, %v1809_v62  ;;  %v1677_v36 = vshll.u32 %v5626_v14, 16  ;;  %v2170_v35 = vsel %vm2132_vm7, %v2121_v7, %v4307_v15  ;;  %v1713_v15 = vshrl.u32 %v5616_v58, 16 }
 0x1f6   : > { %2065 = vrot.lane.b32.xlu0 %v5623_v18, %s3396_s17  ;;  %v2219_v51 = vsel %vm2181_vm8, %v2170_v35, %v4447_v16  ;;  %v1954_v35 = vshll.u32 %v4912_v8, 16 }
 0x1f7   : > { %v4874_v13 = vrot.slane %v1677_v36, 1 }
 0x1f8   : > { %2014 = vrot.lane.b32.xlu2 %v1949_v2, %s3397_s18  ;;  %v2050_v21 = vpop.permute.xlu0 %2049 }
 0x1f9   : > { %2075 = vrot.lane.b32.xlu1 %v2028_v33, %s3396_s17  ;;  %v2442_v46 = vsel %vm2426_vm14, %v2393_v56, %v2050_v21  ;;  %v1675_v33 = vor.u32 %v1673_v57, %v5630_v44  ;;  %v5631_v21 = vld [vmem:[#allocation61_spill] sm:$0xff] }
 0x1fa   : > { %v2062_v34 = vpop.permute.xlu2 %2061  ;;  %3014 = vmatmul.msk.bf16.gmra.mxu1 %vm2490_vm15, %v2442_v46  ;;  %v1717_v46 = vshll.u32 %v5631_v21, 16  ;;  %v3376_v44 = vld [vmem:[#allocation2 + $0x98] sm:$0xff]  }
 0x1fb   : > { %v1774_v37 = vpop.permute.xlu1 %1773 }
 0x1fc   : > { %v2268_v10 = vsel %vm2230_vm9, %v2219_v51, %v1774_v37  ;;  %v5633_v37 = vld [vmem:[#allocation21_spill] sm:$0xff]  ;;  %v1719_v57 = vrot.slane %v1717_v46, 1 }
 0x1fd   : > { %v5634_v51 = vld [vmem:[#allocation13_spill] sm:$0xff] }
 0x1fe   : > { %1857 = vrot.lane.b32.xlu0 %v1810_v59, %s3394_s15  ;;  %v1680_v59 = vsel %vm1114_vm4, %v1675_v33, %v4874_v13 }
 0x200   : > { %1847 = vrot.lane.b32.xlu2 %v1800_v45, %s3394_s15  ;;  %v1874_v60 = vpop.permute.xlu0 %1873 }
 0x201   : > { %1904 = vrot.lane.b32.xlu1 %v4507_v17, %s3395_s16  ;;  %v2317_v56 = vsel %vm2279_vm11, %v2268_v10, %v1874_v60 }
 0x202   : > { %v1854_v11 = vpop.permute.xlu2 %1853  ;;  %v2366_v16 = vsel %vm2328_vm12, %v2317_v56, %v1931_v63  ;;  %v2029_v56 = vrot.slane %v4912_v8, 1 }
 0x203   : > { %v1921_v20 = vpop.permute.xlu1 %1920 }
 0x204   : > { %v2356_v17 = vsel %vm2328_vm12, %v2307_v27, %v1921_v20  ;;  %v1715_v20 = vor.u32 %v1713_v15, %v4788_v26 }
 0x206   : > { %1984 = vrot.lane.b32.xlu0 %v5627_v38, %s3397_s18  ;;  %v1831_v38 = vrot.slane %v5631_v21, 1  ;;  %v1720_v7 = vsel %vm1114_vm4, %v1715_v20, %v1719_v57 }
 0x208   : > { %1914 = vrot.lane.b32.xlu2 %v4648_v43, %s3395_s16  ;;  %v2001_v54 = vpop.permute.xlu0 %2000  ;;  %v1832_v26 = vsel %vm1362_vm5, %v1829_v1, %v1831_v38  ;;  %v2297_v1 = vsel %vm2279_vm11, %v4526_v29, %v1854_v11 }
 0x209   : > { %1994 = vrot.lane.b32.xlu1 %v5629_v28, %s3397_s18  ;;  %v2405_v2 = vsel %vm2377_vm13, %v2356_v17, %v2001_v54 }
 0x20a   : > { %v1981_v30 = vpop.permute.xlu2 %1980  ;;  %v2454_v18 = vsel %vm2426_vm14, %v2405_v2, %v2062_v34  ;;  %v1821_v34 = vrot.slane %v5626_v14, 1 }
 0x20b   : > { %v2011_v43 = vpop.permute.xlu1 %2010  ;;  %3020 = vmatmul.msk.bf16.gmra.mxu2 %vm2490_vm15, %v2454_v18 }
 0x20c   : > { %v2415_v45 = vsel %vm2377_vm13, %v2366_v16, %v2011_v43  ;;  %v1822_v63 = vsel %vm1362_vm5, %v1819_v40, %v1821_v34  ;;  %v1950_v40 = vshrl.u32 %v4809_v6, 16  ;;  %v5635_v16 = vld [vmem:[#allocation31_spill] sm:$0xff] }
 0x20e   : > { %2055 = vrot.lane.b32.xlu0 %v5632_v48, %s3396_s17  ;;  %v1952_v18 = vor.u32 %v1950_v40, %v4819_v32  ;;  %v2030_v48 = vsel %vm1362_vm5, %v2027_v19, %v2029_v56 }
 0x210   : > { %2045 = vrot.lane.b32.xlu2 %v5633_v37, %s3396_s17  ;;  %v2072_v60 = vpop.permute.xlu0 %2071 }
 0x211   : > { %1769 = vrot.lane.b32.xlu1 %v1680_v59, %s3393_s14  ;;  %v2464_v36 = vsel %vm2426_vm14, %v2415_v45, %v2072_v60  ;;  %v3377_v60 = vld [vmem:[#allocation2 + $0x94] sm:$0xff]  }
 0x212   : > { %v2052_v27 = vpop.permute.xlu2 %2051  ;;  %3025 = vmatmul.msk.bf16.vlgmr.msra.gmra.mxu3 %vm2490_vm15, %v2464_v36  ;;  %v1681_v20 = vshrl.u32 %v3377_v60, 16  ;;  %v5636_v36 = vld [vmem:[#allocation52_spill] sm:$0xff]  ;;  %v1824_v60 = vsel %vm1362_vm5, %v1821_v34, %v1823_v42 }
 0x213   : > { %v1844_v4 = vpop.permute.xlu1 %1843 }
 0x214   : > { %v2287_v58 = vsel %vm2279_vm11, %v4551_v9, %v1844_v4  ;;  %v4928_v9 = vrot.slane %v1954_v35, 1  ;;  %v3378_v4 = vld [vmem:[#allocation2 + $0xbc] sm:$0xff]  }
 0x215   : > { %v1721_v19 = vshrl.u32 %v3378_v4, 16  ;;  %v989_v4 = vld [vmem:[#allocation2 + $0xd8] sm:$0x1] }
 0x216   : > { %1869 = vrot.lane.b32.xlu0 %v1822_v63, %s3394_s15  ;;  %v1957_v32 = vsel %vm1114_vm4, %v1952_v18, %v4928_v9  ;;  %v4953_v63 = vld [vmem:[#allocation2 + $0xc4] sm:$0xff]  }
 0x217   : > { %v1723_v40 = vor.u32 %v1721_v19, %v1719_v57 }
 0x218   : > { %1779 = vrot.lane.b32.xlu2 %v1720_v7, %s3393_s14  ;;  %v1901_v17 = vpop.permute.xlu0 %1900  ;;  %v1725_v7 = vshll.u32 %v4953_v63, 16 }
 0x219   : > { %1879 = vrot.lane.b32.xlu1 %v1832_v26, %s3394_s15  ;;  %v2336_v2 = vsel %vm2328_vm12, %v2287_v58, %v1901_v17  ;;  %v1683_v26 = vor.u32 %v1681_v20, %v4874_v13  ;;  %v5638_v17 = vld [vmem:[#allocation9_spill] sm:$0xff]  ;;  %v5640_v58 = vld [vmem:[#allocation74_spill] sm:$0xff] }
 0x21a   : > { %v1876_v28 = vpop.permute.xlu2 %1875  ;;  %v2385_v46 = vsel %vm2377_vm13, %v2336_v2, %v1981_v30  ;;  %v1727_v35 = vrot.slane %v1725_v7, 1  ;;  %v1729_v7 = vshrl.u32 %v4953_v63, 16 }
 0x21b   : > { %v1911_v54 = vpop.permute.xlu1 %1910  ;;  %v1688_v13 = vsel %vm1114_vm4, %v1683_v26, %v4432_v23 }
 0x21c   : > { %v2346_v33 = vsel %vm2328_vm12, %v2297_v1, %v1911_v54 }
 0x21e   : > { %1936 = vrot.lane.b32.xlu0 %v4809_v6, %s3395_s16 }
 0x220   : > { %1926 = vrot.lane.b32.xlu2 %v3376_v44, %s3395_s16  ;;  %v1991_v43 = vpop.permute.xlu0 %1990 }
 0x221   : > { %2006 = vrot.lane.b32.xlu1 %v5634_v51, %s3397_s18  ;;  %v2395_v10 = vsel %vm2377_vm13, %v2346_v33, %v1991_v43  ;;  %v1728_v43 = vsel %vm1114_vm4, %v1723_v40, %v1727_v35 }
 0x222   : > { %v2003_v29 = vpop.permute.xlu2 %2002  ;;  %v2444_v15 = vsel %vm2426_vm14, %v2395_v10, %v2052_v27  ;;  %v5637_v27 = vrot.slane %v5636_v36, 1  ;;  %v1833_v10 = vrot.slane %v4953_v63, 1  ;;  %v5020_v36 = vld [vmem:[#allocation2 + $0xa0] sm:$0xff]  }
 0x223   : > { %v2042_v11 = vpop.permute.xlu1 %2041  ;;  %3015 = vmatmul.msk.bf16.gmra.mxu1 %vm2490_vm15, %v2444_v15 }
 0x224   : > { %v2434_v59 = vsel %vm2426_vm14, %v2385_v46, %v2042_v11  ;;  %v1812_v6 = vsel %vm1362_vm5, %v1809_v62, %v5637_v27  ;;  %v2123_v62 = vsel %vm2083_vm6, %v3376_v44, %v5639_v39  ;;  %v5641_v11 = vld [vmem:[#allocation26_spill] sm:$0xff]  ;;  %v4985_v46 = vld [vmem:[#allocation2 + $0xd0] sm:$0xff] }
 0x225   : > { %3010 = vmatmul.msk.bf16.gmra.mxu0 %vm2490_vm15, %v2434_v59  ;;  %v2172_v1 = vsel %vm2132_vm7, %v2123_v62, %v5640_v58 }
 0x226   : > { %2067 = vrot.lane.b32.xlu0 %v5635_v16, %s3396_s17 }
 0x228   : > { %2016 = vrot.lane.b32.xlu2 %v1957_v32, %s3397_s18  ;;  %v1776_v30 = vpop.permute.xlu0 %1775 }
 0x229   : > { %2077 = vrot.lane.b32.xlu1 %v2030_v48, %s3396_s17  ;;  %v984_v48 = vld [vmem:[#allocation2 + $0xcc] sm:$0x1] }
 0x22a   : > { %v2074_v37 = vpop.permute.xlu2 %2073  ;;  %v1539_v21 = vunpack.c.l.b16 %v984_v48 }
 0x22b   : > { %v1866_v45 = vpop.permute.xlu1 %1865 }
 0x22c   : > { %v2309_v57 = vsel %vm2279_vm11, %v4602_v49, %v1866_v45  ;;  %v5002_v45 = vld [vmem:[%s5434_s4] ss:$0 sm:$0xff]  ;;  %v1540_v34 = vpack.c.b16 %v1539_v21, %v1539_v21 }
 0x22e   : > { %1916 = vrot.lane.b32.xlu0 %v4574_v52, %s3395_s16  ;;  %v2221_v52 = vsel %vm2181_vm8, %v2172_v1, %v4456_v53  ;;  %v1733_v26 = vshll.u32 %v1540_v34, 16  ;;  %v1731_v1 = vor.u32 %v1729_v7, %v1727_v35  ;;  %v1835_v21 = vrot.slane %v1540_v34, 1 }
 0x22f   : > { %v2270_v51 = vsel %vm2230_vm9, %v2221_v52, %v1776_v30  ;;  %v1834_v30 = vsel %vm1362_vm5, %v1831_v38, %v1833_v10 }
 0x230   : > { %1859 = vrot.lane.b32.xlu2 %v1812_v6, %s3394_s15  ;;  %v1923_v54 = vpop.permute.xlu0 %1922  ;;  %v2319_v18 = vsel %vm2279_vm11, %v2270_v51, %v1876_v28 }
 0x231   : > { %1996 = vrot.lane.b32.xlu1 %v5638_v17, %s3397_s18  ;;  %v2358_v44 = vsel %vm2328_vm12, %v2309_v57, %v1923_v54  ;;  %v1943_v17 = vunpack.c.l.b16 %v989_v4  ;;  %v5642_v54 = vld [vmem:[#allocation14_spill] sm:$0xff] }
 0x232   : > { %v4966_v2 = vpop.permute.xlu2 %1902  ;;  %v2407_v32 = vsel %vm2377_vm13, %v2358_v44, %v2003_v29  ;;  %v1958_v29 = vshrl.u32 %v4912_v8, 16 }
 0x233   : > { %v1933_v33 = vpop.permute.xlu1 %1932  ;;  %v1944_v52 = vpack.c.b16 %v1943_v17, %v1943_v17 }
 0x234   : > { %v2368_v53 = vsel %vm2328_vm12, %v2319_v18, %v1933_v33  ;;  %v1960_v42 = vor.u32 %v1958_v29, %v4928_v9  ;;  %v2031_v9 = vrot.slane %v4985_v46, 1  ;;  %v1735_v33 = vrot.slane %v1733_v26, 1  ;;  %v5643_v29 = vld [vmem:[#allocation35_spill] sm:$0xff] }
 0x235   : > { %v2033_v7 = vrot.slane %v1944_v52, 1 }
 0x236   : > { %1771 = vrot.lane.b32.xlu0 %v1688_v13, %s3393_s14 }
 0x238   : > { %v2013_v23 = vpop.permute.xlu0 %2012  ;;  %2057 = vrot.lane.b32.xlu2 %v5641_v11, %s3396_s17 }
 0x239   : > { %1781 = vrot.lane.b32.xlu1 %v1728_v43, %s3393_s14  ;;  %v2417_v15 = vsel %vm2377_vm13, %v2368_v53, %v2013_v23  ;;  %v2032_v53 = vsel %vm1362_vm5, %v2029_v56, %v2031_v9 }
 0x23a   : > { %v4987_v49 = vpop.permute.xlu2 %1992  ;;  %v2466_v28 = vsel %vm2426_vm14, %v2417_v15, %v2074_v37  ;;  %v1962_v37 = vshll.u32 %v4985_v46, 16 }
 0x23b   : > { %v2064_v59 = vpop.permute.xlu1 %2063  ;;  %3026 = vmatmul.msk.bf16.gmra.mxu3 %vm2490_vm15, %v2466_v28  ;;  %v1966_v28 = vshrl.u32 %v4985_v46, 16 }
 0x23c   : > { %v2456_v16 = vsel %vm2426_vm14, %v2407_v32, %v2064_v59  ;;  %v1964_v14 = vrot.slane %v1962_v37, 1  ;;  %v1736_v59 = vsel %vm1114_vm4, %v1731_v1, %v1735_v33  ;;  %v1970_v32 = vshll.u32 %v1944_v52, 16  ;;  %v5644_v52 = vld [vmem:[#allocation48_spill] sm:$0xff] }
 0x23d   : > { %3021 = vmatmul.msk.bf16.gmra.mxu2 %vm2490_vm15, %v2456_v16 }
 0x23e   : > { %1881 = vrot.lane.b32.xlu0 %v1834_v30, %s3394_s15  ;;  %v1965_v19 = vsel %vm1114_vm4, %v1960_v42, %v1964_v14 }
 0x23f   : > { %v2552_v38 = vpop.f32.mrf.mxu0 }
 0x240   : > { %v2659_v20 = vadd.f32 %v5002_v45, %v2552_v38  ;;  %v1846_v61 = vpop.permute.xlu0 %1845  ;;  %1871 = vrot.lane.b32.xlu2 %v1824_v60, %s3394_s15  ;;  %v1968_v60 = vor.u32 %v1966_v28, %v1964_v14  ;;  %v1836_v14 = vsel %vm1362_vm5, %v1833_v10, %v1835_v21 }
 0x241   : > { %1928 = vrot.lane.b32.xlu1 %v5020_v36, %s3395_s16  ;;  %v2289_v23 = vsel %vm2279_vm11, %v4565_v50, %v1846_v61 }
 0x242   : > { %v5026_v27 = vpop.permute.xlu2 %1777  ;;  %2863 = vst.msk [vmem:[%s5017_s8] sm:$0xff] %vm2083_vm6, %v2659_v20  ;;  %v2761_v62 = vmul.f32 %v2659_v20, %v2659_v20  ;;  %v2691_v13 = vsel %vm2083_vm6, %v2659_v20, 0.0  ;;  %v2338_v56 = vsel %vm2328_vm12, %v2289_v23, %v4966_v2 }
 0x243   : > { %v1856_v6 = vpop.permute.xlu1 %1855 }
 0x244   : > { %v2793_v35 = vsel %vm2083_vm6, %v2761_v62, 0.0  ;;  %v2299_v48 = vsel %vm2279_vm11, %v4634_v12, %v1856_v6  ;;  %v1972_v12 = vrot.slane %v1970_v32, 1  ;;  %v2034_v62 = vsel %vm1362_vm5, %v2031_v9, %v2033_v7 }
 0x246   : > { %2008 = vrot.lane.b32.xlu0 %v5642_v54, %s3397_s18  ;;  %v1973_v42 = vsel %vm1114_vm4, %v1968_v60, %v1972_v12 }
 0x247   : > { %v2554_v39 = vpop.f32.mrf.mxu0 }
 0x248   : > { %v2660_v40 = vadd.f32 %v5002_v45, %v2554_v39  ;;  %v1913_v58 = vpop.permute.xlu0 %1912  ;;  %1938 = vrot.lane.b32.xlu2 %v4912_v8, %s3395_s16 }
 0x249   : > { %2018 = vrot.lane.b32.xlu1 %v1965_v19, %s3397_s18  ;;  %v2348_v8 = vsel %vm2328_vm12, %v2299_v48, %v1913_v58 }
 0x24a   : > { %v5040_v51 = vpop.permute.xlu2 %1924  ;;  %v2692_v43 = vsel %vm2083_vm6, %v2660_v40, 0.0  ;;  %v2762_v57 = vmul.f32 %v2660_v40, %v2660_v40  ;;  %2864 = vst.msk [vmem:[%s5017_s8 + $0x8] sm:$0xff] %vm2083_vm6, %v2660_v40  ;;  %v2397_v2 = vsel %vm2377_vm13, %v2348_v8, %v4987_v49 }
 0x24b   : > { %v1983_v44 = vpop.permute.xlu1 %1982  ;;  %v2693_v18 = vadd.f32 %v2692_v43, %v2691_v13  ;;  %v2125_v13 = vsel %vm2083_vm6, %v5020_v36, %v5644_v52 }
 0x24c   : > { %v2794_v11 = vsel %vm2083_vm6, %v2762_v57, 0.0  ;;  %v2387_v50 = vsel %vm2377_vm13, %v2338_v56, %v1983_v44  ;;  %v5645_v57 = vld [vmem:[#allocation71_spill] sm:$0xff]  ;;  %v5646_v44 = vld [vmem:[#allocation77_spill] sm:$0xff] }
 0x24d   : > { %v2795_v15 = vadd.f32 %v2794_v11, %v2793_v35  ;;  %v2174_v9 = vsel %vm2132_vm7, %v2125_v13, %v5645_v57  ;;  %v5647_v13 = vld [vmem:[#allocation51_spill] sm:$0xff]  ;;  %v5648_v57 = vld [vmem:[#allocation73_spill] sm:$0xff] }
 0x24e   : > { %2079 = vrot.lane.b32.xlu0 %v2032_v53, %s3396_s17 }
 0x250   : > { %v2557_v16 = vpop.f32.mrf.mxu0  ;;  %v2044_v30 = vpop.permute.xlu0 %2043  ;;  %2069 = vrot.lane.b32.xlu2 %v5643_v29, %s3396_s17 }
 0x251   : > { %1783 = vrot.lane.b32.xlu1 %v1736_v59, %s3393_s14  ;;  %v2436_v37 = vsel %vm2426_vm14, %v2387_v50, %v2044_v30 }
 0x252   : > { %v2015_v38 = vpop.permute.xlu2 %2014  ;;  %3011 = vmatmul.msk.bf16.gmra.mxu0 %vm2490_vm15, %v2436_v37 }
 0x253   : > { %v2054_v20 = vpop.permute.xlu1 %2053 }
 0x254   : > { %v2446_v61 = vsel %vm2426_vm14, %v2397_v2, %v2054_v20 }
 0x255   : > { %3016 = vmatmul.msk.bf16.gmra.mxu1 %vm2490_vm15, %v2446_v61 }
 0x256   : > { %1940 = vrot.lane.b32.xlu0 %v4985_v46, %s3395_s16 }
 0x257   : > { %v2578_v34 = vpop.f32.mrf.mxu1 }
 0x258   : > { %v5079_v6 = vadd.f32 %v5002_v45, %v2578_v34  ;;  %v2558_v49 = vpop.f32.mrf.mxu0  ;;  %v1868_v4 = vpop.permute.xlu0 %1867  ;;  %1883 = vrot.lane.b32.xlu2 %v1836_v14, %s3394_s15 }
 0x259   : > { %2020 = vrot.lane.b32.xlu1 %v1973_v42, %s3397_s18  ;;  %v2661_v19 = vadd.f32 %v5002_v45, %v2558_v49  ;;  %v2311_v53 = vsel %vm2279_vm11, %v4711_v0, %v1868_v4 }
 0x25a   : > { %v1848_v63 = vpop.permute.xlu2 %1847  ;;  %2871 = vst.msk [vmem:[%s5017_s8 + $0x40] sm:$0xff] %vm2083_vm6, %v5079_v6  ;;  %v2360_v11 = vsel %vm2328_vm12, %v2311_v53, %v5040_v51 }
 0x25b   : > { %v1878_v10 = vpop.permute.xlu1 %1877  ;;  %v2694_v26 = vsel %vm2083_vm6, %v2661_v19, 0.0  ;;  %v2763_v17 = vmul.f32 %v2661_v19, %v2661_v19  ;;  %2865 = vst.msk [vmem:[%s5017_s8 + $0x10] sm:$0xff] %vm2083_vm6, %v2661_v19  ;;  %v2291_v61 = vsel %vm2279_vm11, %v4491_v31, %v1848_v63 }
 0x25c   : > { %v2695_v54 = vadd.f32 %v2694_v26, %v2693_v18  ;;  %v2223_v18 = vsel %vm2181_vm8, %v2174_v9, %v5646_v44 }
 0x25d   : > { %v2796_v39 = vsel %vm2083_vm6, %v2763_v17, 0.0  ;;  %v2272_v35 = vsel %vm2230_vm9, %v2223_v18, %v5026_v27 }
 0x25e   : > { %v2797_v40 = vadd.f32 %v2796_v39, %v2795_v15  ;;  %v2321_v36 = vsel %vm2279_vm11, %v2272_v35, %v1878_v10 }
 0x25f   : > { %v2580_v58 = vpop.f32.mrf.mxu1 }
 0x260   : > { %v5095_v1 = vadd.f32 %v5002_v45, %v2580_v58  ;;  %v1935_v33 = vpop.permute.xlu0 %1934  ;;  %2081 = vrot.lane.b32.xlu2 %v2034_v62, %s3396_s17 }
 0x261   : > { %v2370_v23 = vsel %vm2328_vm12, %v2321_v36, %v1935_v33 }
 0x262   : > { %v1915_v43 = vpop.permute.xlu2 %1914  ;;  %2872 = vst.msk [vmem:[%s5017_s8 + $0x48] sm:$0xff] %vm2083_vm6, %v5095_v1  ;;  %v2419_v51 = vsel %vm2377_vm13, %v2370_v23, %v2015_v38 }
 0x263   : > { %v2005_v46 = vpop.permute.xlu1 %2004 }
 0x264   : > { %v2409_v59 = vsel %vm2377_vm13, %v2360_v11, %v2005_v46 }
 0x268   : > { %v2604_v15 = vpop.f32.mrf.mxu2  ;;  %v2066_v32 = vpop.permute.xlu0 %2065 }
 0x269   : > { %v5118_v28 = vadd.f32 %v5002_v45, %v2604_v15  ;;  %v2458_v0 = vsel %vm2426_vm14, %v2409_v59, %v2066_v32 }
 0x26a   : > { %v2046_v48 = vpop.permute.xlu2 %2045  ;;  %3022 = vmatmul.msk.bf16.gmra.mxu2 %vm2490_vm15, %v2458_v0 }
 0x26b   : > { %2879 = vst.msk [vmem:[%s5017_s8 + $0x80] sm:$0xff] %vm2083_vm6, %v5118_v28  ;;  %v2076_v27 = vpop.permute.xlu1 %2075 }
 0x26c   : > { %v2468_v8 = vsel %vm2426_vm14, %v2419_v51, %v2076_v27 }
 0x26d   : > { %3027 = vmatmul.msk.bf16.gmra.mxu3 %vm2490_vm15, %v2468_v8 }
 0x270   : > { %v2606_v56 = vpop.f32.mrf.mxu2  ;;  %v2561_v16 = vpop.f32.mrf.mxu0 }
 0x271   : > { %v5129_v50 = vadd.f32 %v5002_v45, %v2606_v56  ;;  %v1858_v30 = vpop.permute.xlu0 %1857  ;;  %v2662_v29 = vadd.f32 %v5002_v45, %v2561_v16 }
 0x272   : > { %v1780_v60 = vpop.permute.xlu2 %1779  ;;  %v2301_v10 = vsel %vm2279_vm11, %v4639_v41, %v1858_v30 }
 0x273   : > { %2880 = vst.msk [vmem:[%s5017_s8 + $0x88] sm:$0xff] %vm2083_vm6, %v5129_v50  ;;  %v1905_v37 = vpop.permute.xlu1 %1904  ;;  %v2696_v12 = vsel %vm2083_vm6, %v2662_v29, 0.0  ;;  %v2764_v21 = vmul.f32 %v2662_v29, %v2662_v29  ;;  %v2350_v17 = vsel %vm2328_vm12, %v2301_v10, %v1915_v43  ;;  %v2117_v43 = vsel %vm2083_vm6, %v4513_v5, %v5647_v13 }
 0x274   : > { %2866 = vst.msk [vmem:[%s5017_s8 + $0x18] sm:$0xff] %vm2083_vm6, %v2662_v29  ;;  %v5138_v38 = vadd.f32 %v2696_v12, %v2695_v54  ;;  %v2340_v14 = vsel %vm2328_vm12, %v2291_v61, %v1905_v37  ;;  %v2166_v9 = vsel %vm2132_vm7, %v2117_v43, %v5648_v57  ;;  %v2274_v23 = vsel %vm2230_vm9, %v4484_v55, %v1780_v60  ;;  %v5649_v43 = vld [vmem:[#allocation44_spill] sm:$0xff] }
 0x275   : > { %v2798_v20 = vsel %vm2083_vm6, %v2764_v21, 0.0  ;;  %v2215_v18 = vsel %vm2181_vm8, %v2166_v9, %v4427_v24 }
 0x276   : > { %v5141_v2 = vadd.f32 %v2798_v20, %v2797_v40 }
 0x277   : > { %v2583_v42 = vpop.f32.mrf.mxu1 }
 0x278   : > { %v2563_v34 = vpop.f32.mrf.mxu0 }
 0x279   : > { %v1985_v49 = vpop.permute.xlu0 %1984 }
 0x27a   : > { %v2389_v4 = vsel %vm2377_vm13, %v2340_v14, %v1985_v49  ;;  %v1927_v26 = vpop.permute.xlu2 %1926 }
 0x27b   : > { %v1995_v19 = vpop.permute.xlu1 %1994  ;;  %v2438_v7 = vsel %vm2426_vm14, %v2389_v4, %v2046_v48 }
 0x27c   : > { %3012 = vmatmul.msk.bf16.gmra.mxu0 %vm2490_vm15, %v2438_v7  ;;  %v2399_v63 = vsel %vm2377_vm13, %v2350_v17, %v1995_v19 }
 0x27f   : > { %v2584_v31 = vpop.f32.mrf.mxu1 }
 0x280   : > { %v5154_v54 = vadd.f32 %v5002_v45, %v2584_v31 }
 0x281   : > { %v2056_v39 = vpop.permute.xlu0 %2055 }
 0x282   : > { %v2448_v62 = vsel %vm2426_vm14, %v2399_v63, %v2056_v39  ;;  %2873 = vst.msk [vmem:[%s5017_s8 + $0x50] sm:$0xff] %vm2083_vm6, %v5154_v54  ;;  %v2017_v58 = vpop.permute.xlu2 %2016 }
 0x283   : > { %v1770_v40 = vpop.permute.xlu1 %1769  ;;  %3017 = vmatmul.msk.bf16.gmra.mxu1 %vm2490_vm15, %v2448_v62 }
 0x284   : > { %v2264_v35 = vsel %vm2230_vm9, %v2215_v18, %v1770_v40 }
 0x289   : > { %v1870_v41 = vpop.permute.xlu0 %1869 }
 0x28a   : > { %v1860_v44 = vpop.permute.xlu2 %1859  ;;  %v2313_v36 = vsel %vm2279_vm11, %v2264_v35, %v1870_v41 }
 0x28b   : > { %v1880_v33 = vpop.permute.xlu1 %1879  ;;  %v2362_v0 = vsel %vm2328_vm12, %v2313_v36, %v1927_v26  ;;  %v2303_v37 = vsel %vm2279_vm11, %v4562_v25, %v1860_v44  ;;  %v5651_v44 = vld [vmem:[#allocation76_spill] sm:$0xff] }
 0x28c   : > { %v2323_v5 = vsel %vm2279_vm11, %v2274_v23, %v1880_v33 }
 0x28e   : > { %v2609_v52 = vpop.f32.mrf.mxu2 }
 0x291   : > { %v1937_v46 = vpop.permute.xlu0 %1936 }
 0x292   : > { %v2372_v32 = vsel %vm2328_vm12, %v2323_v5, %v1937_v46  ;;  %v2058_v51 = vpop.permute.xlu2 %2057  ;;  %v5650_v46 = vld [vmem:[#allocation68_spill] sm:$0xff] }
 0x293   : > { %v2007_v53 = vpop.permute.xlu1 %2006  ;;  %v2421_v56 = vsel %vm2377_vm13, %v2372_v32, %v2017_v58 }
 0x294   : > { %v2411_v48 = vsel %vm2377_vm13, %v2362_v0, %v2007_v53 }
 0x295   : > { %v2630_v11 = vpop.f32.mrf.mxu3 }
 0x296   : > { %v5174_v15 = vadd.f32 %v5002_v45, %v2630_v11  ;;  %v2610_v59 = vpop.f32.mrf.mxu2 }
 0x297   : > { %v5179_v24 = vadd.f32 %v5002_v45, %v2610_v59 }
 0x298   : > { %2887 = vst.msk [vmem:[%s5017_s8 + $0xc0] sm:$0xff] %vm2083_vm6, %v5174_v15 }
 0x299   : > { %v2068_v55 = vpop.permute.xlu0 %2067  ;;  %2881 = vst.msk [vmem:[%s5017_s8 + $0x90] sm:$0xff] %vm2083_vm6, %v5179_v24 }
 0x29a   : > { %v2460_v27 = vsel %vm2426_vm14, %v2411_v48, %v2068_v55  ;;  %v1872_v25 = vpop.permute.xlu2 %1871 }
 0x29b   : > { %v2078_v8 = vpop.permute.xlu1 %2077  ;;  %3023 = vmatmul.msk.bf16.gmra.mxu2 %vm2490_vm15, %v2460_v27 }
 0x29c   : > { %v2470_v16 = vsel %vm2426_vm14, %v2421_v56, %v2078_v8 }
 0x29d   : > { %3028 = vmatmul.msk.bf16.gmra.mxu3 %vm2490_vm15, %v2470_v16  ;;  %v2632_v30 = vpop.f32.mrf.mxu3 }
 0x29e   : > { %v5194_v29 = vadd.f32 %v5002_v45, %v2632_v30 }
 0x2a0   : > { %2888 = vst.msk [vmem:[%s5017_s8 + $0xc8] sm:$0xff] %vm2083_vm6, %v5194_v29  ;;  %v2587_v60 = vpop.f32.mrf.mxu1 }
 0x2a1   : > { %v1917_v12 = vpop.permute.xlu0 %1916  ;;  %v5202_v21 = vadd.f32 %v5002_v45, %v2587_v60 }
 0x2a2   : > { %v2352_v20 = vsel %vm2328_vm12, %v2303_v37, %v1917_v12  ;;  %v2565_v61 = vpop.f32.mrf.mxu0  ;;  %v1939_v33 = vpop.permute.xlu2 %1938 }
 0x2a3   : > { %v2663_v42 = vadd.f32 %v5002_v45, %v2565_v61  ;;  %v1997_v14 = vpop.permute.xlu1 %1996  ;;  %2874 = vst.msk [vmem:[%s5017_s8 + $0x58] sm:$0xff] %vm2083_vm6, %v5202_v21 }
 0x2a4   : > { %v2401_v34 = vsel %vm2377_vm13, %v2352_v20, %v1997_v14 }
 0x2a5   : > { %v2698_v49 = vsel %vm2083_vm6, %v2663_v42, 0.0  ;;  %v2765_v4 = vmul.f32 %v2663_v42, %v2663_v42  ;;  %2867 = vst.msk [vmem:[%s5017_s8 + $0x20] sm:$0xff] %vm2083_vm6, %v2663_v42  ;;  %v2450_v19 = vsel %vm2426_vm14, %v2401_v34, %v2058_v51 }
 0x2a6   : > { %v2699_v7 = vadd.f32 %v2698_v49, %v5138_v38  ;;  %3018 = vmatmul.msk.bf16.gmra.mxu1 %vm2490_vm15, %v2450_v19 }
 0x2a7   : > { %v2800_v10 = vsel %vm2083_vm6, %v2765_v4, 0.0 }
 0x2a8   : > { %v2801_v26 = vadd.f32 %v2800_v10, %v5141_v2  ;;  %v2589_v17 = vpop.f32.mrf.mxu1  ;;  %v2119_v2 = vsel %vm2083_vm6, %v4694_v22, %v5649_v43 }
 0x2a9   : > { %v1772_v31 = vpop.permute.xlu0 %1771  ;;  %v2168_v57 = vsel %vm2132_vm7, %v2119_v2, %v5650_v46 }
 0x2aa   : > { %v2567_v63 = vpop.f32.mrf.mxu0  ;;  %v2217_v18 = vsel %vm2181_vm8, %v2168_v57, %v5651_v44  ;;  %v2070_v36 = vpop.permute.xlu2 %2069 }
 0x2ab   : > { %v2664_v39 = vadd.f32 %v5002_v45, %v2567_v63  ;;  %v1782_v62 = vpop.permute.xlu1 %1781  ;;  %v2266_v53 = vsel %vm2230_vm9, %v2217_v18, %v1772_v31 }
 0x2ac   : > { %v2315_v35 = vsel %vm2279_vm11, %v2266_v53, %v1872_v25  ;;  %v2276_v32 = vsel %vm2230_vm9, %v4494_v47, %v1782_v62 }
 0x2ad   : > { %v2700_v40 = vsel %vm2083_vm6, %v2664_v39, 0.0  ;;  %v2766_v58 = vmul.f32 %v2664_v39, %v2664_v39  ;;  %2868 = vst.msk [vmem:[%s5017_s8 + $0x28] sm:$0xff] %vm2083_vm6, %v2664_v39 }
 0x2ae   : > { %v2701_v41 = vadd.f32 %v2700_v40, %v2699_v7 }
 0x2af   : > { %v2802_v38 = vsel %vm2083_vm6, %v2766_v58, 0.0 }
 0x2b0   : > { %v2803_v52 = vadd.f32 %v2802_v38, %v2801_v26 }
 0x2b1   : > { %v1882_v13 = vpop.permute.xlu0 %1881 }
 0x2b2   : > { %v2325_v0 = vsel %vm2279_vm11, %v2276_v32, %v1882_v13  ;;  %v1884_v30 = vpop.permute.xlu2 %1883  ;;  %v2771_v32 = vmul.f32 %v5154_v54, %v5154_v54 }
 0x2b3   : > { %v1929_v9 = vpop.permute.xlu1 %1928  ;;  %v2374_v55 = vsel %vm2328_vm12, %v2325_v0, %v1939_v33 }
 0x2b4   : > { %v2364_v23 = vsel %vm2328_vm12, %v2315_v35, %v1929_v9  ;;  %v2769_v9 = vmul.f32 %v5079_v6, %v5079_v6  ;;  %v2706_v35 = vsel %vm2083_vm6, %v5079_v6, 0.0 }
 0x2b9   : > { %v2009_v11 = vpop.permute.xlu0 %2008 }
 0x2ba   : > { %v2413_v5 = vsel %vm2377_vm13, %v2364_v23, %v2009_v11  ;;  %v2082_v49 = vpop.permute.xlu2 %2081 }
 0x2bb   : > { %v2019_v59 = vpop.permute.xlu1 %2018  ;;  %v2462_v22 = vsel %vm2426_vm14, %v2413_v5, %v2070_v36  ;;  %v2770_v36 = vmul.f32 %v5095_v1, %v5095_v1 }
 0x2bc   : > { %3024 = vmatmul.msk.bf16.gmra.mxu2 %vm2490_vm15, %v2462_v22  ;;  %v2423_v51 = vsel %vm2377_vm13, %v2374_v55, %v2019_v59  ;;  %v2808_v59 = vsel %vm2083_vm6, %v2769_v9, 0.0  ;;  %v2708_v22 = vsel %vm2083_vm6, %v5095_v1, 0.0  ;;  %v2712_v1 = vsel %vm2083_vm6, %v5202_v21, 0.0 }
 0x2bd   : > { %v2810_v6 = vsel %vm2083_vm6, %v2770_v36, 0.0 }
 0x2be   : > { %v2635_v48 = vpop.f32.mrf.mxu3 }
 0x2c0   : > { %v2613_v27 = vpop.f32.mrf.mxu2 }
 0x2c1   : > { %v5242_v8 = vadd.f32 %v5002_v45, %v2613_v27  ;;  %v2080_v56 = vpop.permute.xlu0 %2079 }
 0x2c2   : > { %v2472_v16 = vsel %vm2426_vm14, %v2423_v51, %v2080_v56  ;;  %v2710_v51 = vsel %vm2083_vm6, %v5154_v54, 0.0  ;;  %v2772_v56 = vmul.f32 %v5202_v21, %v5202_v21 }
 0x2c3   : > { %2882 = vst.msk [vmem:[%s5017_s8 + $0x98] sm:$0xff] %vm2083_vm6, %v5242_v8  ;;  %v1784_v47 = vpop.permute.xlu1 %1783  ;;  %3029 = vmatmul.msk.bf16.gmra.mxu3 %vm2490_vm15, %v2472_v16 }
 0x2c4   : > { %v2278_v60 = vsel %vm2230_vm9, %v4430_v3, %v1784_v47 }
 0x2c5   : > { %v2327_v42 = vsel %vm2279_vm11, %v2278_v60, %v1884_v30  ;;  %v2812_v30 = vsel %vm2083_vm6, %v2771_v32, 0.0 }
 0x2c6   : > { %v2636_v37 = vpop.f32.mrf.mxu3 }
 0x2c7   : > { %v5252_v12 = vadd.f32 %v5002_v45, %v2636_v37 }
 0x2c8   : > { %v2615_v20 = vpop.f32.mrf.mxu2 }
 0x2c9   : > { %v1941_v61 = vpop.permute.xlu0 %1940  ;;  %2889 = vst.msk [vmem:[%s5017_s8 + $0xd0] sm:$0xff] %vm2083_vm6, %v5252_v12 }
 0x2ca   : > { %v2376_v14 = vsel %vm2328_vm12, %v2327_v42, %v1941_v61  ;;  %v2814_v61 = vsel %vm2083_vm6, %v2772_v56, 0.0 }
 0x2cb   : > { %v2021_v34 = vpop.permute.xlu1 %2020 }
 0x2cc   : > { %v2425_v25 = vsel %vm2377_vm13, %v2376_v14, %v2021_v34 }
 0x2cd   : > { %v2474_v19 = vsel %vm2426_vm14, %v2425_v25, %v2082_v49 }
 0x2cf   : > { %v2570_v4 = vpop.f32.mrf.mxu0 }
 0x2d2   : > { %v2591_v3 = vpop.f32.mrf.mxu1 }
 0x2d3   : > { %v2671_v7 = vadd.f32 %v5002_v45, %v2591_v3  ;;  %3030 = vmatmul.msk.bf16.gmra.mxu3 %vm2490_vm15, %v2474_v19 }
 0x2d5   : > { %2875 = vst.msk [vmem:[%s5017_s8 + $0x60] sm:$0xff] %vm2083_vm6, %v2671_v7  ;;  %v2773_v37 = vmul.f32 %v2671_v7, %v2671_v7  ;;  %v2714_v42 = vsel %vm2083_vm6, %v2671_v7, 0.0 }
 0x2d7   : > { %v2571_v10 = vpop.f32.mrf.mxu0  ;;  %v2816_v25 = vsel %vm2083_vm6, %v2773_v37, 0.0 }
 0x2d8   : > { %v2665_v26 = vadd.f32 %v5002_v45, %v2571_v10 }
 0x2da   : > { %v2593_v17 = vpop.f32.mrf.mxu1  ;;  %v2702_v31 = vsel %vm2083_vm6, %v2665_v26, 0.0  ;;  %v2767_v63 = vmul.f32 %v2665_v26, %v2665_v26  ;;  %2869 = vst.msk [vmem:[%s5017_s8 + $0x30] sm:$0xff] %vm2083_vm6, %v2665_v26 }
 0x2db   : > { %v2672_v39 = vadd.f32 %v5002_v45, %v2593_v17  ;;  %v2703_v62 = vadd.f32 %v2702_v31, %v2701_v41 }
 0x2dc   : > { %v2804_v40 = vsel %vm2083_vm6, %v2767_v63, 0.0 }
 0x2dd   : > { %2876 = vst.msk [vmem:[%s5017_s8 + $0x68] sm:$0xff] %vm2083_vm6, %v2672_v39  ;;  %v2805_v58 = vadd.f32 %v2804_v40, %v2803_v52  ;;  %v2774_v14 = vmul.f32 %v2672_v39, %v2672_v39  ;;  %v2716_v49 = vsel %vm2083_vm6, %v2672_v39, 0.0 }
 0x2df   : > { %v2818_v10 = vsel %vm2083_vm6, %v2774_v14, 0.0 }
 0x2ed   : > { %v2617_v33 = vpop.f32.mrf.mxu2 }
 0x2ee   : > { %v5274_v38 = vadd.f32 %v5002_v45, %v2617_v33 }
 0x2f0   : > { %v2639_v13 = vpop.f32.mrf.mxu3  ;;  %2883 = vst.msk [vmem:[%s5017_s8 + $0xa0] sm:$0xff] %vm2083_vm6, %v5274_v38  ;;  %v2730_v37 = vsel %vm2083_vm6, %v5274_v38, 0.0 }
 0x2f1   : > { %v5280_v43 = vadd.f32 %v5002_v45, %v2639_v13  ;;  %v2777_v13 = vmul.f32 %v5118_v28, %v5118_v28 }
 0x2f3   : > { %2890 = vst.msk [vmem:[%s5017_s8 + $0xd8] sm:$0xff] %vm2083_vm6, %v5280_v43 }
 0x2f5   : > { %v2619_v41 = vpop.f32.mrf.mxu2 }
 0x2f6   : > { %v5286_v2 = vadd.f32 %v5002_v45, %v2619_v41 }
 0x2f8   : > { %v2641_v52 = vpop.f32.mrf.mxu3  ;;  %2884 = vst.msk [vmem:[%s5017_s8 + $0xa8] sm:$0xff] %vm2083_vm6, %v5286_v2 }
 0x2f9   : > { %v2574_v46 = vpop.f32.mrf.mxu0 }
 0x2fa   : > { %v2666_v57 = vadd.f32 %v5002_v45, %v2574_v46 }
 0x2fc   : > { %v2704_v44 = vsel %vm2083_vm6, %v2666_v57, 0.0  ;;  %v2768_v18 = vmul.f32 %v2666_v57, %v2666_v57  ;;  %2870 = vst.msk [vmem:[%s5017_s8 + $0x38] sm:$0xff] %vm2083_vm6, %v2666_v57 }
 0x2fd   : > { %v2705_v53 = vadd.f32 %v2704_v44, %v2703_v62 }
 0x2fe   : > { %v2806_v23 = vsel %vm2083_vm6, %v2768_v18, 0.0  ;;  %v2722_v18 = vsel %vm2083_vm6, %v5118_v28, 0.0 }
 0x2ff   : > { %v2707_v11 = vadd.f32 %v2706_v35, %v2705_v53  ;;  %v2807_v5 = vadd.f32 %v2806_v23, %v2805_v58  ;;  %v2778_v53 = vmul.f32 %v5129_v50, %v5129_v50 }
 0x300   : > { %v2596_v0 = vpop.f32.mrf.mxu1 }
 0x301   : > { %v2709_v48 = vadd.f32 %v2708_v22, %v2707_v11  ;;  %v2809_v55 = vadd.f32 %v2808_v59, %v2807_v5  ;;  %v2576_v27 = vpop.f32.mrf.mxu0  ;;  %v2824_v5 = vsel %vm2083_vm6, %v2777_v13, 0.0  ;;  %v2724_v59 = vsel %vm2083_vm6, %v5129_v50, 0.0 }
 0x302   : > { %v2779_v22 = vmul.f32 %v5179_v24, %v5179_v24  ;;  %v2726_v27 = vsel %vm2083_vm6, %v5179_v24, 0.0  ;;  %v2740_v13 = vsel %vm2083_vm6, %v5194_v29, 0.0 }
 0x303   : > { %v2711_v16 = vadd.f32 %v2710_v51, %v2709_v48  ;;  %v2811_v47 = vadd.f32 %v2810_v6, %v2809_v55  ;;  %v2826_v55 = vsel %vm2083_vm6, %v2778_v53, 0.0  ;;  %v2780_v6 = vmul.f32 %v5242_v8, %v5242_v8 }
 0x304   : > { %v2828_v56 = vsel %vm2083_vm6, %v2779_v22, 0.0 }
 0x305   : > { %v2813_v60 = vadd.f32 %v2812_v30, %v2811_v47  ;;  %v2713_v20 = vadd.f32 %v2712_v1, %v2711_v16  ;;  %v2728_v16 = vsel %vm2083_vm6, %v5242_v8, 0.0  ;;  %v2781_v47 = vmul.f32 %v5274_v38, %v5274_v38 }
 0x306   : > { %v2830_v24 = vsel %vm2083_vm6, %v2780_v6, 0.0  ;;  %v2732_v8 = vsel %vm2083_vm6, %v5286_v2, 0.0 }
 0x307   : > { %v2715_v54 = vadd.f32 %v2714_v42, %v2713_v20  ;;  %v2815_v34 = vadd.f32 %v2814_v61, %v2813_v60  ;;  %v2782_v60 = vmul.f32 %v5286_v2, %v5286_v2  ;;  %v2832_v42 = vsel %vm2083_vm6, %v2781_v47, 0.0 }
 0x308   : > { %v2597_v4 = vpop.f32.mrf.mxu1 }
 0x309   : > { %v2673_v3 = vadd.f32 %v5002_v45, %v2597_v4  ;;  %v2717_v21 = vadd.f32 %v2716_v49, %v2715_v54  ;;  %v2817_v19 = vadd.f32 %v2816_v25, %v2815_v34  ;;  %v2834_v34 = vsel %vm2083_vm6, %v2782_v60, 0.0 }
 0x30b   : > { %v2819_v26 = vadd.f32 %v2818_v10, %v2817_v19  ;;  %2877 = vst.msk [vmem:[%s5017_s8 + $0x70] sm:$0xff] %vm2083_vm6, %v2673_v3  ;;  %v2775_v17 = vmul.f32 %v2673_v3, %v2673_v3  ;;  %v2718_v62 = vsel %vm2083_vm6, %v2673_v3, 0.0  ;;  %v2785_v19 = vmul.f32 %v5174_v15, %v5174_v15 }
 0x30c   : > { %v2719_v33 = vadd.f32 %v2718_v62, %v2717_v21  ;;  %v2786_v62 = vmul.f32 %v5194_v29, %v5194_v29 }
 0x30d   : > { %v2820_v40 = vsel %vm2083_vm6, %v2775_v17, 0.0 }
 0x30e   : > { %v2821_v57 = vadd.f32 %v2820_v40, %v2819_v26 }
 0x31e   : > { %v2622_v7 = vpop.f32.mrf.mxu2 }
 0x320   : > { %v2643_v31 = vpop.f32.mrf.mxu3 }
 0x321   : > { %v5324_v63 = vadd.f32 %v5002_v45, %v2643_v31  ;;  %v2738_v31 = vsel %vm2083_vm6, %v5174_v15, 0.0  ;;  %v2842_v15 = vsel %vm2083_vm6, %v2786_v62, 0.0 }
 0x323   : > { %2891 = vst.msk [vmem:[%s5017_s8 + $0xe0] sm:$0xff] %vm2083_vm6, %v5324_v63  ;;  %v2600_v39 = vpop.f32.mrf.mxu1 }
 0x324   : > { %v2674_v58 = vadd.f32 %v5002_v45, %v2600_v39 }
 0x326   : > { %v2720_v41 = vsel %vm2083_vm6, %v2674_v58, 0.0  ;;  %v2776_v52 = vmul.f32 %v2674_v58, %v2674_v58  ;;  %2878 = vst.msk [vmem:[%s5017_s8 + $0x78] sm:$0xff] %vm2083_vm6, %v2674_v58  ;;  %v2623_v46 = vpop.f32.mrf.mxu2 }
 0x327   : > { %v2721_v9 = vadd.f32 %v2720_v41, %v2719_v33  ;;  %v2681_v44 = vadd.f32 %v5002_v45, %v2623_v46  ;;  %v2840_v33 = vsel %vm2083_vm6, %v2785_v19, 0.0  ;;  %v2787_v41 = vmul.f32 %v5252_v12, %v5252_v12 }
 0x328   : > { %v2822_v35 = vsel %vm2083_vm6, %v2776_v52, 0.0  ;;  %v2645_v36 = vpop.f32.mrf.mxu3 }
 0x329   : > { %v2723_v23 = vadd.f32 %v2722_v18, %v2721_v9  ;;  %v2823_v11 = vadd.f32 %v2822_v35, %v2821_v57  ;;  %2885 = vst.msk [vmem:[%s5017_s8 + $0xb0] sm:$0xff] %vm2083_vm6, %v2681_v44  ;;  %v5351_v28 = vadd.f32 %v5002_v45, %v2645_v36  ;;  %v2783_v49 = vmul.f32 %v2681_v44, %v2681_v44 }
 0x32a   : > { %v2734_v38 = vsel %vm2083_vm6, %v2681_v44, 0.0  ;;  %v2742_v44 = vsel %vm2083_vm6, %v5252_v12, 0.0  ;;  %v2788_v18 = vmul.f32 %v5280_v43, %v5280_v43  ;;  %v2844_v29 = vsel %vm2083_vm6, %v2787_v41, 0.0 }
 0x32b   : > { %v2725_v32 = vadd.f32 %v2724_v59, %v2723_v23  ;;  %v2825_v0 = vadd.f32 %v2824_v5, %v2823_v11  ;;  %v2602_v48 = vpop.f32.mrf.mxu1  ;;  %2892 = vst.msk [vmem:[%s5017_s8 + $0xe8] sm:$0xff] %vm2083_vm6, %v5351_v28  ;;  %v2836_v10 = vsel %vm2083_vm6, %v2783_v49, 0.0  ;;  %v2744_v36 = vsel %vm2083_vm6, %v5280_v43, 0.0 }
 0x32c   : > { %v2846_v5 = vsel %vm2083_vm6, %v2788_v18, 0.0  ;;  %v2789_v59 = vmul.f32 %v5324_v63, %v5324_v63  ;;  %v2790_v43 = vmul.f32 %v5351_v28, %v5351_v28  ;;  %v2748_v6 = vsel %vm2083_vm6, %v5351_v28, 0.0 }
 0x32d   : > { %v2727_v50 = vadd.f32 %v2726_v27, %v2725_v32  ;;  %v2827_v51 = vadd.f32 %v2826_v55, %v2825_v0  ;;  %v2746_v32 = vsel %vm2083_vm6, %v5324_v63, 0.0 }
 0x32e   : > { %v2848_v55 = vsel %vm2083_vm6, %v2789_v59, 0.0 }
 0x32f   : > { %v2829_v30 = vadd.f32 %v2828_v56, %v2827_v51  ;;  %v2729_v1 = vadd.f32 %v2728_v16, %v2727_v50  ;;  %v2850_v56 = vsel %vm2083_vm6, %v2790_v43, 0.0 }
 0x331   : > { %v2731_v20 = vadd.f32 %v2730_v37, %v2729_v1  ;;  %v2831_v61 = vadd.f32 %v2830_v24, %v2829_v30 }
 0x333   : > { %v2733_v14 = vadd.f32 %v2732_v8, %v2731_v20  ;;  %v2833_v54 = vadd.f32 %v2832_v42, %v2831_v61 }
 0x335   : > { %v2835_v25 = vadd.f32 %v2834_v34, %v2833_v54  ;;  %v2735_v21 = vadd.f32 %v2734_v38, %v2733_v14 }
 0x337   : > { %v2837_v7 = vadd.f32 %v2836_v10, %v2835_v25 }
 0x33f   : > { %v2626_v4 = vpop.f32.mrf.mxu2 }
 0x340   : > { %v2682_v3 = vadd.f32 %v5002_v45, %v2626_v4 }
 0x342   : > { %v2736_v26 = vsel %vm2083_vm6, %v2682_v3, 0.0  ;;  %v2784_v2 = vmul.f32 %v2682_v3, %v2682_v3  ;;  %2886 = vst.msk [vmem:[%s5017_s8 + $0xb8] sm:$0xff] %vm2083_vm6, %v2682_v3 }
 0x343   : > { %v2737_v17 = vadd.f32 %v2736_v26, %v2735_v21 }
 0x344   : > { %v2838_v39 = vsel %vm2083_vm6, %v2784_v2, 0.0 }
 0x345   : > { %v2739_v40 = vadd.f32 %v2738_v31, %v2737_v17  ;;  %v2839_v58 = vadd.f32 %v2838_v39, %v2837_v7 }
 0x346   : > { %v2648_v52 = vpop.f32.mrf.mxu3 }
 0x347   : > { %v2741_v46 = vadd.f32 %v2740_v13, %v2739_v40  ;;  %v2841_v57 = vadd.f32 %v2840_v33, %v2839_v58  ;;  %v2628_v9 = vpop.f32.mrf.mxu2 }
 0x349   : > { %v2743_v53 = vadd.f32 %v2742_v44, %v2741_v46  ;;  %v2843_v35 = vadd.f32 %v2842_v15, %v2841_v57 }
 0x34b   : > { %v2845_v23 = vadd.f32 %v2844_v29, %v2843_v35  ;;  %v2745_v11 = vadd.f32 %v2744_v36, %v2743_v53 }
 0x34d   : > { %v2847_v22 = vadd.f32 %v2846_v5, %v2845_v23  ;;  %v2747_v48 = vadd.f32 %v2746_v32, %v2745_v11 }
 0x34e   : > { %v2649_v12 = vpop.f32.mrf.mxu3 }
 0x34f   : > { %v2689_v0 = vadd.f32 %v5002_v45, %v2649_v12  ;;  %v2849_v27 = vadd.f32 %v2848_v55, %v2847_v22  ;;  %v2749_v51 = vadd.f32 %v2748_v6, %v2747_v48 }
 0x351   : > { %2893 = vst.msk [vmem:[%s5017_s8 + $0xf0] sm:$0xff] %vm2083_vm6, %v2689_v0  ;;  %v2791_v50 = vmul.f32 %v2689_v0, %v2689_v0  ;;  %v2750_v63 = vsel %vm2083_vm6, %v2689_v0, 0.0  ;;  %v2851_v16 = vadd.f32 %v2850_v56, %v2849_v27 }
 0x352   : > { %v2751_v24 = vadd.f32 %v2750_v63, %v2749_v51 }
 0x353   : > { %v2852_v30 = vsel %vm2083_vm6, %v2791_v50, 0.0 }
 0x354   : > { %v2853_v28 = vadd.f32 %v2852_v30, %v2851_v16 }
 0x356   : > { %v2652_v47 = vpop.f32.mrf.mxu3 }
 0x357   : > { %v2690_v1 = vadd.f32 %v5002_v45, %v2652_v47 }
 0x359   : > { %v2752_v37 = vsel %vm2083_vm6, %v2690_v1, 0.0  ;;  %v2792_v60 = vmul.f32 %v2690_v1, %v2690_v1  ;;  %2894 = vst.msk [vmem:[%s5017_s8 + $0xf8] sm:$0xff] %vm2083_vm6, %v2690_v1 }
 0x35a   : > { %v2753_v20 = vadd.f32 %v2752_v37, %v2751_v24 }
 0x35b   : > { %v2854_v61 = vsel %vm2083_vm6, %v2792_v60, 0.0 }
 0x35c   : > { %v2754_v42 = vrot.slane %v2753_v20, 4  ;;  %v2855_v8 = vadd.f32 %v2854_v61, %v2853_v28 }
 0x35e   : > { %v2755_v14 = vadd.f32 %v2754_v42, %v2753_v20  ;;  %v2856_v54 = vrot.slane %v2855_v8, 4  ;;  %v2654_v34 = vpop.f32.mrf.mxu3 }
 0x360   : > { %v2756_v25 = vrot.slane %v2755_v14, 2  ;;  %v2857_v49 = vadd.f32 %v2856_v54, %v2855_v8 }
 0x362   : > { %v2757_v4 = vadd.f32 %v2756_v25, %v2755_v14  ;;  %v2858_v45 = vrot.slane %v2857_v49, 2 }
 0x364   : > { %v2758_v38 = vrot.slane %v2757_v4, 1  ;;  %v2859_v3 = vadd.f32 %v2858_v45, %v2857_v49 }
 0x366   : > { %v2860_v21 = vrot.slane %v2859_v3, 1  ;;  %v2759_v19 = vadd.f32 %v2758_v38, %v2757_v4 }
 0x368   : > { %v2861_v10 = vadd.f32 %v2860_v21, %v2859_v3 }
 0x36a   : > { %v2896_v26 = vsel %vm667_vm1, %v2759_v19, %v2861_v10 }
 0x36b   : > { %2898 = vst.msk [vmem:[%s262_s11] sm:$0x3] %vm2897_vm0, %v2896_v26 }
 0x36c PF: > { %s17_s21 = sadd.s32 1, %s3387_s21  }
 0x36d   : > { %p14_p4 = scmp.ge.s32.totalorder %s17_s21, 4  }
 0x36f   :  { %16 = sbr.rel (!%p14_p4) target bundleno = 1 (0x1), region = 82 }

</bundles_post_ra>
